<compile_context>
chip_gen: v5e
topology: v5e:2x2
jax: 0.10.0
libtpu: 0.0.40
codegen_flags: <defaults>
</compile_context>

<pallas_src>
import functools

import jax
import jax.numpy as jnp
from jax.experimental import pallas as pl
from jax.experimental.pallas import tpu as pltpu

LEAKY_SLOPE = 0.01   # nn.LeakyReLU default
BN_EPS = 1e-5        # nn.BatchNorm default
LANES = 128
VMEM_LIMIT = 32 * 1024 * 1024


def _round_up(x, m):
    return (x + m - 1) // m * m


def _leaky(y):
    # 2 VPU ops (mul + max) instead of cmp + mul + select; valid for 0<slope<1.
    return jnp.maximum(y, LEAKY_SLOPE * y)


def _sigmoid(y):
    # Numerically stable sigmoid via tanh (single EUP op, result in [0, 1]).
    return 0.5 * jnp.tanh(0.5 * y) + 0.5


def _num_conv_tiles(rows):
    """Use a 2-way parallel M grid only on dual-TensorCore chips (v7x)."""
    try:
        kind = jax.devices()[0].device_kind.lower()
    except Exception:  # pragma: no cover - defensive
        kind = ""
    dual_tc = ("v7" in kind) or ("7x" in kind)
    return 2 if (dual_tc and rows >= 256) else 1


def _fold_bn(gamma, beta, mean, var, bias):
    """Eval-mode BatchNorm folded into (scale, shift); shift absorbs the bias."""
    s = gamma / jnp.sqrt(var + BN_EPS)
    t = (bias - mean) * s + beta
    return s, t


# --------------------------------------------------------------------------
# Pallas kernels
# --------------------------------------------------------------------------
def _conv_pool_kernel(p_ref, w_ref, shift_ref, o_ref):
    """Fused conv(im2col matmul, BN scale pre-folded into W) + 2x2 maxpool
    + BN shift + LeakyReLU.

    p_ref:     (4, TM, Kp) bf16 patches, axis 0 = pooling quadrant (di*2+dj).
    w_ref:     (Kp, 128)   bf16 scale-folded weights (C_out padded to 128).
    shift_ref: (1, 128)    f32 folded BatchNorm shift (incl. conv bias).
    o_ref:     (TM, 128)   bf16 pooled activations, rows ordered (n, ph, pw).
    """
    _, tm, kp = p_ref.shape
    p = p_ref[...].reshape(4 * tm, kp)                 # one long MXU push
    y = jnp.dot(p, w_ref[...], preferred_element_type=jnp.float32)
    # Max over quadrants on the raw dots; shift + leaky applied once (exact).
    m = jnp.maximum(jnp.maximum(y[0 * tm:1 * tm], y[1 * tm:2 * tm]),
                    jnp.maximum(y[2 * tm:3 * tm], y[3 * tm:4 * tm]))
    o_ref[...] = _leaky(m + shift_ref[...]).astype(o_ref.dtype)


def _conv3_fc_kernel(p_ref, wc_ref, shiftc_ref, w1_ref, t1_ref,
                     w2_ref, t2_ref, w3_ref, b3_ref, o_ref):
    """conv3+BN+LeakyReLU+MaxPool fused with fc1+BN+leaky, fc2+BN+leaky,
    fc3+Sigmoid — everything stays in VMEM.

    p_ref:      (4, 16*NB, Kp) bf16 conv3 patches, rows ordered (ph, pw, n).
    wc_ref:     (Kp, 128)      bf16 conv3 weight (BN scale folded).
    shiftc_ref: (1, 128)       f32 conv3 folded BN shift.
    w1_ref:     (16, 128, 128) bf16 fc1 weight, one (C,D1) slab per spatial
                               position (BN scale folded, torch NCHW-flatten
                               column order absorbed).
    t1/t2/b3:   (1, 128)       f32 shifts / bias.
    w2/w3:      (128, 128)     bf16 (fc2 BN scale folded / plain fc3).
    o_ref:      (NB, 128)      f32 sigmoid outputs (lanes >= d3 are padding).
    """
    _, m, kp = p_ref.shape
    n_pos = w1_ref.shape[0]                            # 16 pooled positions
    nb = m // n_pos                                    # padded batch rows

    # --- conv3 + pool + BN shift + leaky -----------------------------------
    p = p_ref[...].reshape(4 * m, kp)
    y = jnp.dot(p, wc_ref[...], preferred_element_type=jnp.float32)
    a = jnp.maximum(jnp.maximum(y[0 * m:1 * m], y[1 * m:2 * m]),
                    jnp.maximum(y[2 * m:3 * m], y[3 * m:4 * m]))
    a = _leaky(a + shiftc_ref[...]).astype(w1_ref.dtype)   # (16*NB, 128) bf16

    # --- fc1 as a sum over the 16 spatial positions -------------------------
    h = jnp.zeros((nb, w1_ref.shape[2]), jnp.float32)
    for hw in range(n_pos):                            # unrolled, 16 MXU dots
        h = h + jnp.dot(a[hw * nb:(hw + 1) * nb], w1_ref[hw],
                        preferred_element_type=jnp.float32)
    h = _leaky(h + t1_ref[...])

    # --- fc2 + BN + leaky ----------------------------------------------------
    h = jnp.dot(h.astype(w2_ref.dtype), w2_ref[...],
                preferred_element_type=jnp.float32)
    h = _leaky(h + t2_ref[...])

    # --- fc3 + sigmoid -------------------------------------------------------
    h = jnp.dot(h.astype(w3_ref.dtype), w3_ref[...],
                preferred_element_type=jnp.float32)
    o_ref[...] = _sigmoid(h + b3_ref[...])


# --------------------------------------------------------------------------
# XLA glue: quadrant-grouped im2col (NHWC, bf16)
# --------------------------------------------------------------------------
def _im2col_pooled_nhwc(x, kh, kw):
    """2x2-maxpool-quadrant-grouped im2col of an NHWC input.

    Returns (patches, ph, pw) with patches shape (4, N, PH, PW, K):
      patches[di*2+dj, n, i, j, (u*KW + v)*C + ci]
        = x[n, 2*i + di + u, 2*j + dj + v, ci]
    K is ordered (kh, kw, ci) to match a (cout, kh, kw, cin)-reshaped weight.
    """
    n, h, w, c = x.shape
    oh, ow = h - kh + 1, w - kw + 1
    ph, pw = oh // 2, ow // 2
    cols = [x[:, i:i + oh, j:j + ow, :] for i in range(kh) for j in range(kw)]
    p = jnp.stack(cols, axis=3)                       # (N, OH, OW, KH*KW, C)
    p = p.reshape(n, oh, ow, kh * kw * c)
    p = p[:, :2 * ph, :2 * pw, :]
    p = p.reshape(n, ph, 2, pw, 2, kh * kw * c)
    p = p.transpose(2, 4, 0, 1, 3, 5)                 # (di, dj, N, PH, PW, K)
    return p.reshape(4, n, ph, pw, kh * kw * c), ph, pw


def _conv_weight_matrix(w, scale, kp):
    """(C_out,C_in,KH,KW) torch weight -> (Kp, 128) bf16 with K=(kh,kw,cin)
    ordering and the BN scale folded in."""
    cout, cin, kh, kw = w.shape
    k = cin * kh * kw
    wm = (w * scale[:, None, None, None]).transpose(0, 2, 3, 1).reshape(cout, k)
    wm = jnp.pad(wm.T, ((0, kp - k), (0, LANES - cout)))
    return wm.astype(jnp.bfloat16)


def _row(v, width=LANES):
    return jnp.pad(v, (0, width - v.shape[0])).reshape(1, width).astype(jnp.float32)


# --------------------------------------------------------------------------
# Kernel wrappers
# --------------------------------------------------------------------------
def conv_bn_leaky_pool(x_nhwc, w, b, gamma, beta, mean, var):
    """One conv stage (NHWC in / NHWC out, bf16):
    Conv2d(5x5) + BatchNorm(eval) + LeakyReLU + MaxPool2d(2,2)."""
    cout, cin, kh, kw = w.shape
    n = x_nhwc.shape[0]
    k = cin * kh * kw
    kp = _round_up(k, LANES)

    patches, ph, pw = _im2col_pooled_nhwc(x_nhwc, kh, kw)     # (4,N,PH,PW,K)
    mq = n * ph * pw
    num_tiles = _num_conv_tiles(mq)
    tile_m = _round_up(-(-mq // num_tiles), 8)
    mp = tile_m * num_tiles

    patches = patches.reshape(4, mq, k).astype(jnp.bfloat16)
    patches = jnp.pad(patches, ((0, 0), (0, mp - mq), (0, kp - k)))

    s, t = _fold_bn(gamma, beta, mean, var, b)
    w_mat = _conv_weight_matrix(w, s, kp)
    t_row = _row(t)

    out = pl.pallas_call(
        _conv_pool_kernel,
        out_shape=jax.ShapeDtypeStruct((mp, LANES), jnp.bfloat16),
        grid=(num_tiles,),
        in_specs=[
            pl.BlockSpec((4, tile_m, kp), lambda i: (0, i, 0)),
            pl.BlockSpec((kp, LANES), lambda i: (0, 0)),
            pl.BlockSpec((1, LANES), lambda i: (0, 0)),
        ],
        out_specs=pl.BlockSpec((tile_m, LANES), lambda i: (i, 0)),
        compiler_params=pltpu.CompilerParams(
            dimension_semantics=("parallel",),
            vmem_limit_bytes=VMEM_LIMIT),
    )(patches, w_mat, t_row)

    # Stay NHWC between stages: rows are (n, ph, pw), lanes are C_out.
    return out[:mq, :cout].reshape(n, ph, pw, cout)


def conv3_fc_head(x_nhwc, conv3, fc1, fc2, fc3):
    """Fused conv3+BN+leaky+pool and the whole FC head in one pallas_call."""
    w_c, b_c, g_c, be_c, m_c, v_c = conv3
    w1, b1, g1, be1, m1, v1 = fc1
    w2, b2, g2, be2, m2, v2 = fc2
    w3, b3 = fc3

    cout, cin, kh, kw = w_c.shape
    n = x_nhwc.shape[0]
    d1, d2, d3 = w1.shape[0], w2.shape[0], w3.shape[0]
    k = cin * kh * kw
    kp = _round_up(k, LANES)
    nb = _round_up(n, 8)

    patches, ph, pw = _im2col_pooled_nhwc(x_nhwc, kh, kw)     # (4,N,PH,PW,K)
    n_pos = ph * pw
    assert n_pos * cout == w1.shape[1], "conv3 output does not match fc1 width"

    # Rows ordered (ph, pw, n) so fc1 can run as a sum of per-position dots;
    # batch padded to a sublane multiple.
    p = patches.transpose(0, 2, 3, 1, 4).astype(jnp.bfloat16)  # (4,PH,PW,N,K)
    p = jnp.pad(p, ((0, 0), (0, 0), (0, 0), (0, nb - n), (0, kp - k)))
    p = p.reshape(4, n_pos * nb, kp)

    # conv3 weight + BN fold.
    s_c, t_c = _fold_bn(g_c, be_c, m_c, v_c, b_c)
    wc = _conv_weight_matrix(w_c, s_c, kp)
    tc_row = _row(t_c)

    # fc1: torch flattens NCHW, so column = c*(PH*PW) + hw.  Build one (C,D1)
    # slab per pooled spatial position hw, with the BN scale folded in.
    s1, t1 = _fold_bn(g1, be1, m1, v1, b1)
    w1f = (w1 * s1[:, None]).reshape(d1, cout, n_pos).transpose(2, 1, 0)
    w1f = jnp.pad(w1f, ((0, 0), (0, LANES - cout), (0, LANES - d1)))
    w1f = w1f.astype(jnp.bfloat16)
    t1_row = _row(t1)

    s2, t2 = _fold_bn(g2, be2, m2, v2, b2)
    w2f = jnp.pad((w2 * s2[:, None]).T,
                  ((0, LANES - d1), (0, LANES - d2))).astype(jnp.bfloat16)
    t2_row = _row(t2)

    w3f = jnp.pad(w3.T, ((0, LANES - d2), (0, LANES - d3))).astype(jnp.bfloat16)
    b3_row = _row(b3)

    out = pl.pallas_call(
        _conv3_fc_kernel,
        out_shape=jax.ShapeDtypeStruct((nb, LANES), jnp.float32),
        grid=(1,),
        in_specs=[
            pl.BlockSpec((4, n_pos * nb, kp), lambda i: (0, 0, 0)),
            pl.BlockSpec((kp, LANES), lambda i: (0, 0)),
            pl.BlockSpec((1, LANES), lambda i: (0, 0)),
            pl.BlockSpec((n_pos, LANES, LANES), lambda i: (0, 0, 0)),
            pl.BlockSpec((1, LANES), lambda i: (0, 0)),
            pl.BlockSpec((LANES, LANES), lambda i: (0, 0)),
            pl.BlockSpec((1, LANES), lambda i: (0, 0)),
            pl.BlockSpec((LANES, LANES), lambda i: (0, 0)),
            pl.BlockSpec((1, LANES), lambda i: (0, 0)),
        ],
        out_specs=pl.BlockSpec((nb, LANES), lambda i: (0, 0)),
        compiler_params=pltpu.CompilerParams(
            dimension_semantics=("arbitrary",),
            vmem_limit_bytes=VMEM_LIMIT),
    )(p, wc, tc_row, w1f, t1_row, w2f, t2_row, w3f, b3_row)
    return out[:n, :d3]


def celeb_net_forward(params, x):
    # One-time NCHW -> NHWC + bf16 cast of the raw input; everything after
    # stays NHWC/bf16 (no activation transposes between pallas_calls).
    h = x.transpose(0, 2, 3, 1).astype(jnp.bfloat16)
    h = conv_bn_leaky_pool(h, *params["conv1"])   # (N, 28, 28, 6)  bf16 NHWC
    h = conv_bn_leaky_pool(h, *params["conv2"])   # (N, 12, 12, 16) bf16 NHWC
    return conv3_fc_head(h, params["conv3"], params["fc1"], params["fc2"],
                         params["fc3"])           # (N, 2) f32


# --------------------------------------------------------------------------
# Deterministic parameter init (synthetic; matches nn.Module shapes)
# --------------------------------------------------------------------------
def init_params(key):
    def conv_block(k, cout, cin, ksz):
        k1, k2, k3, k4, k5, k6 = jax.random.split(k, 6)
        fan_in = cin * ksz * ksz
        w = jax.random.normal(k1, (cout, cin, ksz, ksz), jnp.float32) / jnp.sqrt(fan_in)
        b = 0.1 * jax.random.normal(k2, (cout,), jnp.float32)
        gamma = jax.random.uniform(k3, (cout,), jnp.float32, 0.5, 1.5)
        beta = 0.1 * jax.random.normal(k4, (cout,), jnp.float32)
        mean = 0.1 * jax.random.normal(k5, (cout,), jnp.float32)
        var = jax.random.uniform(k6, (cout,), jnp.float32, 0.5, 1.5)
        return (w, b, gamma, beta, mean, var)

    def fc_block(k, dout, din, bn=True):
        k1, k2, k3, k4, k5, k6 = jax.random.split(k, 6)
        w = jax.random.normal(k1, (dout, din), jnp.float32) / jnp.sqrt(din)
        b = 0.1 * jax.random.normal(k2, (dout,), jnp.float32)
        if not bn:
            return (w, b)
        gamma = jax.random.uniform(k3, (dout,), jnp.float32, 0.5, 1.5)
        beta = 0.1 * jax.random.normal(k4, (dout,), jnp.float32)
        mean = 0.1 * jax.random.normal(k5, (dout,), jnp.float32)
        var = jax.random.uniform(k6, (dout,), jnp.float32, 0.5, 1.5)
        return (w, b, gamma, beta, mean, var)

    ks = jax.random.split(key, 6)
    return {
        "conv1": conv_block(ks[0], 6, 3, 5),
        "conv2": conv_block(ks[1], 16, 6, 5),
        "conv3": conv_block(ks[2], 26, 16, 5),
        "fc1": fc_block(ks[3], 120, 832 // 2),
        "fc2": fc_block(ks[4], 84, 120),
        "fc3": fc_block(ks[5], 2, 84, bn=False),
    }


if __name__ == "__main__":
    key = jax.random.PRNGKey(0)
    pkey, xkey = jax.random.split(key)
    params = init_params(pkey)
    # Input 3x60x60: 60 ->conv 56 ->pool 28 ->conv 24 ->pool 12 ->conv 8 ->pool 4
    # so the flattened feature is 26*4*4 = 416 = 832 // 2, matching the FC head.
    x = jax.random.normal(xkey, (2, 3, 60, 60), jnp.float32)

    fwd = jax.jit(functools.partial(celeb_net_forward, params))
    out = jax.block_until_ready(fwd(x))

    assert out.shape == (2, 2), out.shape
    assert out.dtype == jnp.float32
    assert bool(jnp.all((out >= 0.0) & (out <= 1.0)))   # sigmoid range
    print("KERNEL_OK")
</pallas_src>

<mosaic_0001>
module attributes {stable_mosaic.version = 11 : i64} {
  func.func @_conv_pool_kernel(%arg0: i32, %arg1: memref<4x1568x128xbf16, #tpu.memory_space<vmem>>, %arg2: memref<128x128xbf16, #tpu.memory_space<vmem>>, %arg3: memref<1x128xf32, #tpu.memory_space<vmem>>, %arg4: memref<1568x128xbf16, #tpu.memory_space<vmem>>) attributes {dimension_semantics = [#tpu.dimension_semantics<parallel>], iteration_bounds = array<i64: 1>, scalar_prefetch = 0 : i64, scratch_operands = 0 : i64, tpu.core_type = #tpu.core_type<tc>, window_params = [{transform_indices = @transform_0, window_bounds = array<i64: 4, 1568, 128>}, {pipeline_mode = #tpu.pipeline_mode<synchronous>, transform_indices = @transform_1, window_bounds = array<i64: 128, 128>}, {pipeline_mode = #tpu.pipeline_mode<synchronous>, transform_indices = @transform_2, window_bounds = array<i64: 1, 128>}, {transform_indices = @transform_3, window_bounds = array<i64: 1568, 128>}]} {
    %c0 = arith.constant 0 : index
    %c0_0 = arith.constant 0 : index
    %c0_1 = arith.constant 0 : index
    %0 = vector.load %arg1[%c0, %c0_0, %c0_1] : memref<4x1568x128xbf16, #tpu.memory_space<vmem>>, vector<4x1568x128xbf16>
    %1 = vector.shape_cast %0 : vector<4x1568x128xbf16> to vector<6272x128xbf16>
    %c0_2 = arith.constant 0 : index
    %c0_3 = arith.constant 0 : index
    %2 = vector.load %arg2[%c0_2, %c0_3] : memref<128x128xbf16, #tpu.memory_space<vmem>>, vector<128x128xbf16>
    %cst = arith.constant dense<0.000000e+00> : vector<6272x128xf32>
    %3 = tpu.matmul %1, %2, %cst {dimension_numbers = #tpu.dot_dimension_numbers<[1], [0], [0], [1], [0, 0, 1, 1], [], []>} : vector<6272x128xbf16>, vector<128x128xbf16>, vector<6272x128xf32> -> vector<6272x128xf32>
    %4 = vector.extract_strided_slice %3 {offsets = [0, 0], sizes = [1568, 128], strides = [1, 1]} : vector<6272x128xf32> to vector<1568x128xf32>
    %5 = vector.extract_strided_slice %3 {offsets = [1568, 0], sizes = [1568, 128], strides = [1, 1]} : vector<6272x128xf32> to vector<1568x128xf32>
    %6 = arith.maximumf %4, %5 : vector<1568x128xf32>
    %7 = vector.extract_strided_slice %3 {offsets = [3136, 0], sizes = [1568, 128], strides = [1, 1]} : vector<6272x128xf32> to vector<1568x128xf32>
    %8 = vector.extract_strided_slice %3 {offsets = [4704, 0], sizes = [1568, 128], strides = [1, 1]} : vector<6272x128xf32> to vector<1568x128xf32>
    %9 = arith.maximumf %7, %8 : vector<1568x128xf32>
    %10 = arith.maximumf %6, %9 : vector<1568x128xf32>
    %c0_4 = arith.constant 0 : index
    %c0_5 = arith.constant 0 : index
    %11 = vector.load %arg3[%c0_4, %c0_5] : memref<1x128xf32, #tpu.memory_space<vmem>>, vector<1x128xf32>
    %12 = vector.broadcast %11 : vector<1x128xf32> to vector<1568x128xf32>
    %13 = arith.addf %10, %12 : vector<1568x128xf32>
    %cst_6 = arith.constant 0.00999999977 : f32
    %14 = vector.broadcast %cst_6 : f32 to vector<1568x128xf32>
    %15 = arith.mulf %14, %13 : vector<1568x128xf32>
    %16 = arith.maximumf %13, %15 : vector<1568x128xf32>
    %17 = arith.truncf %16 : vector<1568x128xf32> to vector<1568x128xbf16>
    %c0_7 = arith.constant 0 : index
    %c0_8 = arith.constant 0 : index
    %18 = vector.load %arg4[%c0_7, %c0_8] : memref<1568x128xbf16, #tpu.memory_space<vmem>>, vector<1568x128xbf16>
    tpu.vector_store %arg4[%c0_7, %c0_8], %17 {strides = array<i32>} : memref<1568x128xbf16, #tpu.memory_space<vmem>>, vector<1568x128xbf16>,
    return
  }
  func.func @transform_0(%arg0: i32) -> (i32, i32, i32) {
    %c0_i32 = arith.constant 0 : i32
    %c0_i32_0 = arith.constant 0 : i32
    %c0_i32_1 = arith.constant 0 : i32
    return %c0_i32, %arg0, %c0_i32_0 : i32, i32, i32
  }
  func.func @transform_1(%arg0: i32) -> (i32, i32) {
    %c0_i32 = arith.constant 0 : i32
    %c0_i32_0 = arith.constant 0 : i32
    %c0_i32_1 = arith.constant 0 : i32
    return %c0_i32, %c0_i32_0 : i32, i32
  }
  func.func @transform_2(%arg0: i32) -> (i32, i32) {
    %c0_i32 = arith.constant 0 : i32
    %c0_i32_0 = arith.constant 0 : i32
    %c0_i32_1 = arith.constant 0 : i32
    return %c0_i32, %c0_i32_0 : i32, i32
  }
  func.func @transform_3(%arg0: i32) -> (i32, i32) {
    %c0_i32 = arith.constant 0 : i32
    %c0_i32_0 = arith.constant 0 : i32
    return %arg0, %c0_i32 : i32, i32
  }
}

module attributes {stable_mosaic.version = 11 : i64} {
  func.func @_conv_pool_kernel(%arg0: i32, %arg1: memref<4x288x256xbf16, #tpu.memory_space<vmem>>, %arg2: memref<256x128xbf16, #tpu.memory_space<vmem>>, %arg3: memref<1x128xf32, #tpu.memory_space<vmem>>, %arg4: memref<288x128xbf16, #tpu.memory_space<vmem>>) attributes {dimension_semantics = [#tpu.dimension_semantics<parallel>], iteration_bounds = array<i64: 1>, scalar_prefetch = 0 : i64, scratch_operands = 0 : i64, tpu.core_type = #tpu.core_type<tc>, window_params = [{transform_indices = @transform_0, window_bounds = array<i64: 4, 288, 256>}, {pipeline_mode = #tpu.pipeline_mode<synchronous>, transform_indices = @transform_1, window_bounds = array<i64: 256, 128>}, {pipeline_mode = #tpu.pipeline_mode<synchronous>, transform_indices = @transform_2, window_bounds = array<i64: 1, 128>}, {transform_indices = @transform_3, window_bounds = array<i64: 288, 128>}]} {
    %c0 = arith.constant 0 : index
    %c0_0 = arith.constant 0 : index
    %c0_1 = arith.constant 0 : index
    %0 = vector.load %arg1[%c0, %c0_0, %c0_1] : memref<4x288x256xbf16, #tpu.memory_space<vmem>>, vector<4x288x256xbf16>
    %1 = vector.shape_cast %0 : vector<4x288x256xbf16> to vector<1152x256xbf16>
    %c0_2 = arith.constant 0 : index
    %c0_3 = arith.constant 0 : index
    %2 = vector.load %arg2[%c0_2, %c0_3] : memref<256x128xbf16, #tpu.memory_space<vmem>>, vector<256x128xbf16>
    %cst = arith.constant dense<0.000000e+00> : vector<1152x128xf32>
    %3 = tpu.matmul %1, %2, %cst {dimension_numbers = #tpu.dot_dimension_numbers<[1], [0], [0], [1], [0, 0, 1, 1], [], []>} : vector<1152x256xbf16>, vector<256x128xbf16>, vector<1152x128xf32> -> vector<1152x128xf32>
    %4 = vector.extract_strided_slice %3 {offsets = [0, 0], sizes = [288, 128], strides = [1, 1]} : vector<1152x128xf32> to vector<288x128xf32>
    %5 = vector.extract_strided_slice %3 {offsets = [288, 0], sizes = [288, 128], strides = [1, 1]} : vector<1152x128xf32> to vector<288x128xf32>
    %6 = arith.maximumf %4, %5 : vector<288x128xf32>
    %7 = vector.extract_strided_slice %3 {offsets = [576, 0], sizes = [288, 128], strides = [1, 1]} : vector<1152x128xf32> to vector<288x128xf32>
    %8 = vector.extract_strided_slice %3 {offsets = [864, 0], sizes = [288, 128], strides = [1, 1]} : vector<1152x128xf32> to vector<288x128xf32>
    %9 = arith.maximumf %7, %8 : vector<288x128xf32>
    %10 = arith.maximumf %6, %9 : vector<288x128xf32>
    %c0_4 = arith.constant 0 : index
    %c0_5 = arith.constant 0 : index
    %11 = vector.load %arg3[%c0_4, %c0_5] : memref<1x128xf32, #tpu.memory_space<vmem>>, vector<1x128xf32>
    %12 = vector.broadcast %11 : vector<1x128xf32> to vector<288x128xf32>
    %13 = arith.addf %10, %12 : vector<288x128xf32>
    %cst_6 = arith.constant 0.00999999977 : f32
    %14 = vector.broadcast %cst_6 : f32 to vector<288x128xf32>
    %15 = arith.mulf %14, %13 : vector<288x128xf32>
    %16 = arith.maximumf %13, %15 : vector<288x128xf32>
    %17 = arith.truncf %16 : vector<288x128xf32> to vector<288x128xbf16>
    %c0_7 = arith.constant 0 : index
    %c0_8 = arith.constant 0 : index
    %18 = vector.load %arg4[%c0_7, %c0_8] : memref<288x128xbf16, #tpu.memory_space<vmem>>, vector<288x128xbf16>
    tpu.vector_store %arg4[%c0_7, %c0_8], %17 {strides = array<i32>} : memref<288x128xbf16, #tpu.memory_space<vmem>>, vector<288x128xbf16>,
    return
  }
  func.func @transform_0(%arg0: i32) -> (i32, i32, i32) {
    %c0_i32 = arith.constant 0 : i32
    %c0_i32_0 = arith.constant 0 : i32
    %c0_i32_1 = arith.constant 0 : i32
    return %c0_i32, %arg0, %c0_i32_0 : i32, i32, i32
  }
  func.func @transform_1(%arg0: i32) -> (i32, i32) {
    %c0_i32 = arith.constant 0 : i32
    %c0_i32_0 = arith.constant 0 : i32
    %c0_i32_1 = arith.constant 0 : i32
    return %c0_i32, %c0_i32_0 : i32, i32
  }
  func.func @transform_2(%arg0: i32) -> (i32, i32) {
    %c0_i32 = arith.constant 0 : i32
    %c0_i32_0 = arith.constant 0 : i32
    %c0_i32_1 = arith.constant 0 : i32
    return %c0_i32, %c0_i32_0 : i32, i32
  }
  func.func @transform_3(%arg0: i32) -> (i32, i32) {
    %c0_i32 = arith.constant 0 : i32
    %c0_i32_0 = arith.constant 0 : i32
    return %arg0, %c0_i32 : i32, i32
  }
}

module attributes {stable_mosaic.version = 11 : i64} {
  func.func @_conv3_fc_kernel(%arg0: i32, %arg1: memref<4x128x512xbf16, #tpu.memory_space<vmem>>, %arg2: memref<512x128xbf16, #tpu.memory_space<vmem>>, %arg3: memref<1x128xf32, #tpu.memory_space<vmem>>, %arg4: memref<16x128x128xbf16, #tpu.memory_space<vmem>>, %arg5: memref<1x128xf32, #tpu.memory_space<vmem>>, %arg6: memref<128x128xbf16, #tpu.memory_space<vmem>>, %arg7: memref<1x128xf32, #tpu.memory_space<vmem>>, %arg8: memref<128x128xbf16, #tpu.memory_space<vmem>>, %arg9: memref<1x128xf32, #tpu.memory_space<vmem>>, %arg10: memref<8x128xf32, #tpu.memory_space<vmem>>) attributes {dimension_semantics = [#tpu.dimension_semantics<arbitrary>], iteration_bounds = array<i64: 1>, scalar_prefetch = 0 : i64, scratch_operands = 0 : i64, tpu.core_type = #tpu.core_type<tc>, window_params = [{pipeline_mode = #tpu.pipeline_mode<synchronous>, transform_indices = @transform_0, window_bounds = array<i64: 4, 128, 512>}, {pipeline_mode = #tpu.pipeline_mode<synchronous>, transform_indices = @transform_1, window_bounds = array<i64: 512, 128>}, {pipeline_mode = #tpu.pipeline_mode<synchronous>, transform_indices = @transform_2, window_bounds = array<i64: 1, 128>}, {pipeline_mode = #tpu.pipeline_mode<synchronous>, transform_indices = @transform_3, window_bounds = array<i64: 16, 128, 128>}, {pipeline_mode = #tpu.pipeline_mode<synchronous>, transform_indices = @transform_4, window_bounds = array<i64: 1, 128>}, {pipeline_mode = #tpu.pipeline_mode<synchronous>, transform_indices = @transform_5, window_bounds = array<i64: 128, 128>}, {pipeline_mode = #tpu.pipeline_mode<synchronous>, transform_indices = @transform_6, window_bounds = array<i64: 1, 128>}, {pipeline_mode = #tpu.pipeline_mode<synchronous>, transform_indices = @transform_7, window_bounds = array<i64: 128, 128>}, {pipeline_mode = #tpu.pipeline_mode<synchronous>, transform_indices = @transform_8, window_bounds = array<i64: 1, 128>}, {pipeline_mode = #tpu.pipeline_mode<synchronous>, transform_indices = @transform_9, window_bounds = array<i64: 8, 128>}]} {
    %c0 = arith.constant 0 : index
    %c0_0 = arith.constant 0 : index
    %c0_1 = arith.constant 0 : index
    %0 = vector.load %arg1[%c0, %c0_0, %c0_1] : memref<4x128x512xbf16, #tpu.memory_space<vmem>>, vector<4x128x512xbf16>
    %1 = vector.shape_cast %0 : vector<4x128x512xbf16> to vector<512x512xbf16>
    %c0_2 = arith.constant 0 : index
    %c0_3 = arith.constant 0 : index
    %2 = vector.load %arg2[%c0_2, %c0_3] : memref<512x128xbf16, #tpu.memory_space<vmem>>, vector<512x128xbf16>
    %cst = arith.constant dense<0.000000e+00> : vector<512x128xf32>
    %3 = tpu.matmul %1, %2, %cst {dimension_numbers = #tpu.dot_dimension_numbers<[1], [0], [0], [1], [0, 0, 1, 1], [], []>} : vector<512x512xbf16>, vector<512x128xbf16>, vector<512x128xf32> -> vector<512x128xf32>
    %4 = vector.extract_strided_slice %3 {offsets = [0, 0], sizes = [128, 128], strides = [1, 1]} : vector<512x128xf32> to vector<128x128xf32>
    %5 = vector.extract_strided_slice %3 {offsets = [128, 0], sizes = [128, 128], strides = [1, 1]} : vector<512x128xf32> to vector<128x128xf32>
    %6 = arith.maximumf %4, %5 : vector<128x128xf32>
    %7 = vector.extract_strided_slice %3 {offsets = [256, 0], sizes = [128, 128], strides = [1, 1]} : vector<512x128xf32> to vector<128x128xf32>
    %8 = vector.extract_strided_slice %3 {offsets = [384, 0], sizes = [128, 128], strides = [1, 1]} : vector<512x128xf32> to vector<128x128xf32>
    %9 = arith.maximumf %7, %8 : vector<128x128xf32>
    %10 = arith.maximumf %6, %9 : vector<128x128xf32>
    %c0_4 = arith.constant 0 : index
    %c0_5 = arith.constant 0 : index
    %11 = vector.load %arg3[%c0_4, %c0_5] : memref<1x128xf32, #tpu.memory_space<vmem>>, vector<1x128xf32>
    %12 = vector.broadcast %11 : vector<1x128xf32> to vector<128x128xf32>
    %13 = arith.addf %10, %12 : vector<128x128xf32>
    %cst_6 = arith.constant 0.00999999977 : f32
    %14 = vector.broadcast %cst_6 : f32 to vector<128x128xf32>
    %15 = arith.mulf %14, %13 : vector<128x128xf32>
    %16 = arith.maximumf %13, %15 : vector<128x128xf32>
    %17 = arith.truncf %16 : vector<128x128xf32> to vector<128x128xbf16>
    %cst_7 = arith.constant 0.000000e+00 : f32
    %18 = vector.broadcast %cst_7 : f32 to vector<8x128xf32>
    %19 = vector.extract_strided_slice %17 {offsets = [0, 0], sizes = [8, 128], strides = [1, 1]} : vector<128x128xbf16> to vector<8x128xbf16>
    %c0_8 = arith.constant 0 : index
    %c0_9 = arith.constant 0 : index
    %c0_10 = arith.constant 0 : index
    %20 = vector.load %arg4[%c0_8, %c0_9, %c0_10] : memref<16x128x128xbf16, #tpu.memory_space<vmem>>, vector<1x128x128xbf16>
    %21 = vector.shape_cast %20 : vector<1x128x128xbf16> to vector<128x128xbf16>
    %cst_11 = arith.constant dense<0.000000e+00> : vector<8x128xf32>
    %22 = tpu.matmul %19, %21, %cst_11 {dimension_numbers = #tpu.dot_dimension_numbers<[1], [0], [0], [1], [0, 0, 1, 1], [], []>} : vector<8x128xbf16>, vector<128x128xbf16>, vector<8x128xf32> -> vector<8x128xf32>
    %23 = arith.addf %18, %22 : vector<8x128xf32>
    %24 = vector.extract_strided_slice %17 {offsets = [8, 0], sizes = [8, 128], strides = [1, 1]} : vector<128x128xbf16> to vector<8x128xbf16>
    %c1 = arith.constant 1 : index
    %c0_12 = arith.constant 0 : index
    %c0_13 = arith.constant 0 : index
    %25 = vector.load %arg4[%c1, %c0_12, %c0_13] : memref<16x128x128xbf16, #tpu.memory_space<vmem>>, vector<1x128x128xbf16>
    %26 = vector.shape_cast %25 : vector<1x128x128xbf16> to vector<128x128xbf16>
    %cst_14 = arith.constant dense<0.000000e+00> : vector<8x128xf32>
    %27 = tpu.matmul %24, %26, %cst_14 {dimension_numbers = #tpu.dot_dimension_numbers<[1], [0], [0], [1], [0, 0, 1, 1], [], []>} : vector<8x128xbf16>, vector<128x128xbf16>, vector<8x128xf32> -> vector<8x128xf32>
    %28 = arith.addf %23, %27 : vector<8x128xf32>
    %29 = vector.extract_strided_slice %17 {offsets = [16, 0], sizes = [8, 128], strides = [1, 1]} : vector<128x128xbf16> to vector<8x128xbf16>
    %c2 = arith.constant 2 : index
    %c0_15 = arith.constant 0 : index
    %c0_16 = arith.constant 0 : index
    %30 = vector.load %arg4[%c2, %c0_15, %c0_16] : memref<16x128x128xbf16, #tpu.memory_space<vmem>>, vector<1x128x128xbf16>
    %31 = vector.shape_cast %30 : vector<1x128x128xbf16> to vector<128x128xbf16>
    %cst_17 = arith.constant dense<0.000000e+00> : vector<8x128xf32>
    %32 = tpu.matmul %29, %31, %cst_17 {dimension_numbers = #tpu.dot_dimension_numbers<[1], [0], [0], [1], [0, 0, 1, 1], [], []>} : vector<8x128xbf16>, vector<128x128xbf16>, vector<8x128xf32> -> vector<8x128xf32>
    %33 = arith.addf %28, %32 : vector<8x128xf32>
    %34 = vector.extract_strided_slice %17 {offsets = [24, 0], sizes = [8, 128], strides = [1, 1]} : vector<128x128xbf16> to vector<8x128xbf16>
    %c3 = arith.constant 3 : index
    %c0_18 = arith.constant 0 : index
    %c0_19 = arith.constant 0 : index
    %35 = vector.load %arg4[%c3, %c0_18, %c0_19] : memref<16x128x128xbf16, #tpu.memory_space<vmem>>, vector<1x128x128xbf16>
    %36 = vector.shape_cast %35 : vector<1x128x128xbf16> to vector<128x128xbf16>
    %cst_20 = arith.constant dense<0.000000e+00> : vector<8x128xf32>
    %37 = tpu.matmul %34, %36, %cst_20 {dimension_numbers = #tpu.dot_dimension_numbers<[1], [0], [0], [1], [0, 0, 1, 1], [], []>} : vector<8x128xbf16>, vector<128x128xbf16>, vector<8x128xf32> -> vector<8x128xf32>
    %38 = arith.addf %33, %37 : vector<8x128xf32>
    %39 = vector.extract_strided_slice %17 {offsets = [32, 0], sizes = [8, 128], strides = [1, 1]} : vector<128x128xbf16> to vector<8x128xbf16>
    %c4 = arith.constant 4 : index
    %c0_21 = arith.constant 0 : index
    %c0_22 = arith.constant 0 : index
    %40 = vector.load %arg4[%c4, %c0_21, %c0_22] : memref<16x128x128xbf16, #tpu.memory_space<vmem>>, vector<1x128x128xbf16>
    %41 = vector.shape_cast %40 : vector<1x128x128xbf16> to vector<128x128xbf16>
    %cst_23 = arith.constant dense<0.000000e+00> : vector<8x128xf32>
    %42 = tpu.matmul %39, %41, %cst_23 {dimension_numbers = #tpu.dot_dimension_numbers<[1], [0], [0], [1], [0, 0, 1, 1], [], []>} : vector<8x128xbf16>, vector<128x128xbf16>, vector<8x128xf32> -> vector<8x128xf32>
    %43 = arith.addf %38, %42 : vector<8x128xf32>
    %44 = vector.extract_strided_slice %17 {offsets = [40, 0], sizes = [8, 128], strides = [1, 1]} : vector<128x128xbf16> to vector<8x128xbf16>
    %c5 = arith.constant 5 : index
    %c0_24 = arith.constant 0 : index
    %c0_25 = arith.constant 0 : index
    %45 = vector.load %arg4[%c5, %c0_24, %c0_25] : memref<16x128x128xbf16, #tpu.memory_space<vmem>>, vector<1x128x128xbf16>
    %46 = vector.shape_cast %45 : vector<1x128x128xbf16> to vector<128x128xbf16>
    %cst_26 = arith.constant dense<0.000000e+00> : vector<8x128xf32>
    %47 = tpu.matmul %44, %46, %cst_26 {dimension_numbers = #tpu.dot_dimension_numbers<[1], [0], [0], [1], [0, 0, 1, 1], [], []>} : vector<8x128xbf16>, vector<128x128xbf16>, vector<8x128xf32> -> vector<8x128xf32>
    %48 = arith.addf %43, %47 : vector<8x128xf32>
    %49 = vector.extract_strided_slice %17 {offsets = [48, 0], sizes = [8, 128], strides = [1, 1]} : vector<128x128xbf16> to vector<8x128xbf16>
    %c6 = arith.constant 6 : index
    %c0_27 = arith.constant 0 : index
    %c0_28 = arith.constant 0 : index
    %50 = vector.load %arg4[%c6, %c0_27, %c0_28] : memref<16x128x128xbf16, #tpu.memory_space<vmem>>, vector<1x128x128xbf16>
    %51 = vector.shape_cast %50 : vector<1x128x128xbf16> to vector<128x128xbf16>
    %cst_29 = arith.constant dense<0.000000e+00> : vector<8x128xf32>
    %52 = tpu.matmul %49, %51, %cst_29 {dimension_numbers = #tpu.dot_dimension_numbers<[1], [0], [0], [1], [0, 0, 1, 1], [], []>} : vector<8x128xbf16>, vector<128x128xbf16>, vector<8x128xf32> -> vector<8x128xf32>
    %53 = arith.addf %48, %52 : vector<8x128xf32>
    %54 = vector.extract_strided_slice %17 {offsets = [56, 0], sizes = [8, 128], strides = [1, 1]} : vector<128x128xbf16> to vector<8x128xbf16>
    %c7 = arith.constant 7 : index
    %c0_30 = arith.constant 0 : index
    %c0_31 = arith.constant 0 : index
    %55 = vector.load %arg4[%c7, %c0_30, %c0_31] : memref<16x128x128xbf16, #tpu.memory_space<vmem>>, vector<1x128x128xbf16>
    %56 = vector.shape_cast %55 : vector<1x128x128xbf16> to vector<128x128xbf16>
    %cst_32 = arith.constant dense<0.000000e+00> : vector<8x128xf32>
    %57 = tpu.matmul %54, %56, %cst_32 {dimension_numbers = #tpu.dot_dimension_numbers<[1], [0], [0], [1], [0, 0, 1, 1], [], []>} : vector<8x128xbf16>, vector<128x128xbf16>, vector<8x128xf32> -> vector<8x128xf32>
    %58 = arith.addf %53, %57 : vector<8x128xf32>
    %59 = vector.extract_strided_slice %17 {offsets = [64, 0], sizes = [8, 128], strides = [1, 1]} : vector<128x128xbf16> to vector<8x128xbf16>
    %c8 = arith.constant 8 : index
    %c0_33 = arith.constant 0 : index
    %c0_34 = arith.constant 0 : index
    %60 = vector.load %arg4[%c8, %c0_33, %c0_34] : memref<16x128x128xbf16, #tpu.memory_space<vmem>>, vector<1x128x128xbf16>
    %61 = vector.shape_cast %60 : vector<1x128x128xbf16> to vector<128x128xbf16>
    %cst_35 = arith.constant dense<0.000000e+00> : vector<8x128xf32>
    %62 = tpu.matmul %59, %61, %cst_35 {dimension_numbers = #tpu.dot_dimension_numbers<[1], [0], [0], [1], [0, 0, 1, 1], [], []>} : vector<8x128xbf16>, vector<128x128xbf16>, vector<8x128xf32> -> vector<8x128xf32>
    %63 = arith.addf %58, %62 : vector<8x128xf32>
    %64 = vector.extract_strided_slice %17 {offsets = [72, 0], sizes = [8, 128], strides = [1, 1]} : vector<128x128xbf16> to vector<8x128xbf16>
    %c9 = arith.constant 9 : index
    %c0_36 = arith.constant 0 : index
    %c0_37 = arith.constant 0 : index
    %65 = vector.load %arg4[%c9, %c0_36, %c0_37] : memref<16x128x128xbf16, #tpu.memory_space<vmem>>, vector<1x128x128xbf16>
    %66 = vector.shape_cast %65 : vector<1x128x128xbf16> to vector<128x128xbf16>
    %cst_38 = arith.constant dense<0.000000e+00> : vector<8x128xf32>
    %67 = tpu.matmul %64, %66, %cst_38 {dimension_numbers = #tpu.dot_dimension_numbers<[1], [0], [0], [1], [0, 0, 1, 1], [], []>} : vector<8x128xbf16>, vector<128x128xbf16>, vector<8x128xf32> -> vector<8x128xf32>
    %68 = arith.addf %63, %67 : vector<8x128xf32>
    %69 = vector.extract_strided_slice %17 {offsets = [80, 0], sizes = [8, 128], strides = [1, 1]} : vector<128x128xbf16> to vector<8x128xbf16>
    %c10 = arith.constant 10 : index
    %c0_39 = arith.constant 0 : index
    %c0_40 = arith.constant 0 : index
    %70 = vector.load %arg4[%c10, %c0_39, %c0_40] : memref<16x128x128xbf16, #tpu.memory_space<vmem>>, vector<1x128x128xbf16>
    %71 = vector.shape_cast %70 : vector<1x128x128xbf16> to vector<128x128xbf16>
    %cst_41 = arith.constant dense<0.000000e+00> : vector<8x128xf32>
    %72 = tpu.matmul %69, %71, %cst_41 {dimension_numbers = #tpu.dot_dimension_numbers<[1], [0], [0], [1], [0, 0, 1, 1], [], []>} : vector<8x128xbf16>, vector<128x128xbf16>, vector<8x128xf32> -> vector<8x128xf32>
    %73 = arith.addf %68, %72 : vector<8x128xf32>
    %74 = vector.extract_strided_slice %17 {offsets = [88, 0], sizes = [8, 128], strides = [1, 1]} : vector<128x128xbf16> to vector<8x128xbf16>
    %c11 = arith.constant 11 : index
    %c0_42 = arith.constant 0 : index
    %c0_43 = arith.constant 0 : index
    %75 = vector.load %arg4[%c11, %c0_42, %c0_43] : memref<16x128x128xbf16, #tpu.memory_space<vmem>>, vector<1x128x128xbf16>
    %76 = vector.shape_cast %75 : vector<1x128x128xbf16> to vector<128x128xbf16>
    %cst_44 = arith.constant dense<0.000000e+00> : vector<8x128xf32>
    %77 = tpu.matmul %74, %76, %cst_44 {dimension_numbers = #tpu.dot_dimension_numbers<[1], [0], [0], [1], [0, 0, 1, 1], [], []>} : vector<8x128xbf16>, vector<128x128xbf16>, vector<8x128xf32> -> vector<8x128xf32>
    %78 = arith.addf %73, %77 : vector<8x128xf32>
    %79 = vector.extract_strided_slice %17 {offsets = [96, 0], sizes = [8, 128], strides = [1, 1]} : vector<128x128xbf16> to vector<8x128xbf16>
    %c12 = arith.constant 12 : index
    %c0_45 = arith.constant 0 : index
    %c0_46 = arith.constant 0 : index
    %80 = vector.load %arg4[%c12, %c0_45, %c0_46] : memref<16x128x128xbf16, #tpu.memory_space<vmem>>, vector<1x128x128xbf16>
    %81 = vector.shape_cast %80 : vector<1x128x128xbf16> to vector<128x128xbf16>
    %cst_47 = arith.constant dense<0.000000e+00> : vector<8x128xf32>
    %82 = tpu.matmul %79, %81, %cst_47 {dimension_numbers = #tpu.dot_dimension_numbers<[1], [0], [0], [1], [0, 0, 1, 1], [], []>} : vector<8x128xbf16>, vector<128x128xbf16>, vector<8x128xf32> -> vector<8x128xf32>
    %83 = arith.addf %78, %82 : vector<8x128xf32>
    %84 = vector.extract_strided_slice %17 {offsets = [104, 0], sizes = [8, 128], strides = [1, 1]} : vector<128x128xbf16> to vector<8x128xbf16>
    %c13 = arith.constant 13 : index
    %c0_48 = arith.constant 0 : index
    %c0_49 = arith.constant 0 : index
    %85 = vector.load %arg4[%c13, %c0_48, %c0_49] : memref<16x128x128xbf16, #tpu.memory_space<vmem>>, vector<1x128x128xbf16>
    %86 = vector.shape_cast %85 : vector<1x128x128xbf16> to vector<128x128xbf16>
    %cst_50 = arith.constant dense<0.000000e+00> : vector<8x128xf32>
    %87 = tpu.matmul %84, %86, %cst_50 {dimension_numbers = #tpu.dot_dimension_numbers<[1], [0], [0], [1], [0, 0, 1, 1], [], []>} : vector<8x128xbf16>, vector<128x128xbf16>, vector<8x128xf32> -> vector<8x128xf32>
    %88 = arith.addf %83, %87 : vector<8x128xf32>
    %89 = vector.extract_strided_slice %17 {offsets = [112, 0], sizes = [8, 128], strides = [1, 1]} : vector<128x128xbf16> to vector<8x128xbf16>
    %c14 = arith.constant 14 : index
    %c0_51 = arith.constant 0 : index
    %c0_52 = arith.constant 0 : index
    %90 = vector.load %arg4[%c14, %c0_51, %c0_52] : memref<16x128x128xbf16, #tpu.memory_space<vmem>>, vector<1x128x128xbf16>
    %91 = vector.shape_cast %90 : vector<1x128x128xbf16> to vector<128x128xbf16>
    %cst_53 = arith.constant dense<0.000000e+00> : vector<8x128xf32>
    %92 = tpu.matmul %89, %91, %cst_53 {dimension_numbers = #tpu.dot_dimension_numbers<[1], [0], [0], [1], [0, 0, 1, 1], [], []>} : vector<8x128xbf16>, vector<128x128xbf16>, vector<8x128xf32> -> vector<8x128xf32>
    %93 = arith.addf %88, %92 : vector<8x128xf32>
    %94 = vector.extract_strided_slice %17 {offsets = [120, 0], sizes = [8, 128], strides = [1, 1]} : vector<128x128xbf16> to vector<8x128xbf16>
    %c15 = arith.constant 15 : index
    %c0_54 = arith.constant 0 : index
    %c0_55 = arith.constant 0 : index
    %95 = vector.load %arg4[%c15, %c0_54, %c0_55] : memref<16x128x128xbf16, #tpu.memory_space<vmem>>, vector<1x128x128xbf16>
    %96 = vector.shape_cast %95 : vector<1x128x128xbf16> to vector<128x128xbf16>
    %cst_56 = arith.constant dense<0.000000e+00> : vector<8x128xf32>
    %97 = tpu.matmul %94, %96, %cst_56 {dimension_numbers = #tpu.dot_dimension_numbers<[1], [0], [0], [1], [0, 0, 1, 1], [], []>} : vector<8x128xbf16>, vector<128x128xbf16>, vector<8x128xf32> -> vector<8x128xf32>
    %98 = arith.addf %93, %97 : vector<8x128xf32>
    %c0_57 = arith.constant 0 : index
    %c0_58 = arith.constant 0 : index
    %99 = vector.load %arg5[%c0_57, %c0_58] : memref<1x128xf32, #tpu.memory_space<vmem>>, vector<1x128xf32>
    %100 = vector.broadcast %99 : vector<1x128xf32> to vector<8x128xf32>
    %101 = arith.addf %98, %100 : vector<8x128xf32>
    %cst_59 = arith.constant 0.00999999977 : f32
    %102 = vector.broadcast %cst_59 : f32 to vector<8x128xf32>
    %103 = arith.mulf %102, %101 : vector<8x128xf32>
    %104 = arith.maximumf %101, %103 : vector<8x128xf32>
    %105 = arith.truncf %104 : vector<8x128xf32> to vector<8x128xbf16>
    %c0_60 = arith.constant 0 : index
    %c0_61 = arith.constant 0 : index
    %106 = vector.load %arg6[%c0_60, %c0_61] : memref<128x128xbf16, #tpu.memory_space<vmem>>, vector<128x128xbf16>
    %cst_62 = arith.constant dense<0.000000e+00> : vector<8x128xf32>
    %107 = tpu.matmul %105, %106, %cst_62 {dimension_numbers = #tpu.dot_dimension_numbers<[1], [0], [0], [1], [0, 0, 1, 1], [], []>} : vector<8x128xbf16>, vector<128x128xbf16>, vector<8x128xf32> -> vector<8x128xf32>
    %c0_63 = arith.constant 0 : index
    %c0_64 = arith.constant 0 : index
    %108 = vector.load %arg7[%c0_63, %c0_64] : memref<1x128xf32, #tpu.memory_space<vmem>>, vector<1x128xf32>
    %109 = vector.broadcast %108 : vector<1x128xf32> to vector<8x128xf32>
    %110 = arith.addf %107, %109 : vector<8x128xf32>
    %cst_65 = arith.constant 0.00999999977 : f32
    %111 = vector.broadcast %cst_65 : f32 to vector<8x128xf32>
    %112 = arith.mulf %111, %110 : vector<8x128xf32>
    %113 = arith.maximumf %110, %112 : vector<8x128xf32>
    %114 = arith.truncf %113 : vector<8x128xf32> to vector<8x128xbf16>
    %c0_66 = arith.constant 0 : index
    %c0_67 = arith.constant 0 : index
    %115 = vector.load %arg8[%c0_66, %c0_67] : memref<128x128xbf16, #tpu.memory_space<vmem>>, vector<128x128xbf16>
    %cst_68 = arith.constant dense<0.000000e+00> : vector<8x128xf32>
    %116 = tpu.matmul %114, %115, %cst_68 {dimension_numbers = #tpu.dot_dimension_numbers<[1], [0], [0], [1], [0, 0, 1, 1], [], []>} : vector<8x128xbf16>, vector<128x128xbf16>, vector<8x128xf32> -> vector<8x128xf32>
    %c0_69 = arith.constant 0 : index
    %c0_70 = arith.constant 0 : index
    %117 = vector.load %arg9[%c0_69, %c0_70] : memref<1x128xf32, #tpu.memory_space<vmem>>, vector<1x128xf32>
    %118 = vector.broadcast %117 : vector<1x128xf32> to vector<8x128xf32>
    %119 = arith.addf %116, %118 : vector<8x128xf32>
    %cst_71 = arith.constant 5.000000e-01 : f32
    %120 = vector.broadcast %cst_71 : f32 to vector<8x128xf32>
    %121 = arith.mulf %120, %119 : vector<8x128xf32>
    %122 = math.tanh %121 : vector<8x128xf32>
    %cst_72 = arith.constant 5.000000e-01 : f32
    %123 = vector.broadcast %cst_72 : f32 to vector<8x128xf32>
    %124 = arith.mulf %123, %122 : vector<8x128xf32>
    %cst_73 = arith.constant 5.000000e-01 : f32
    %125 = vector.broadcast %cst_73 : f32 to vector<8x128xf32>
    %126 = arith.addf %124, %125 : vector<8x128xf32>
    %c0_74 = arith.constant 0 : index
    %c0_75 = arith.constant 0 : index
    %127 = vector.load %arg10[%c0_74, %c0_75] : memref<8x128xf32, #tpu.memory_space<vmem>>, vector<8x128xf32>
    tpu.vector_store %arg10[%c0_74, %c0_75], %126 {strides = array<i32>} : memref<8x128xf32, #tpu.memory_space<vmem>>, vector<8x128xf32>,
    return
  }
  func.func @transform_0(%arg0: i32) -> (i32, i32, i32) {
    %c0_i32 = arith.constant 0 : i32
    %c0_i32_0 = arith.constant 0 : i32
    %c0_i32_1 = arith.constant 0 : i32
    %c0_i32_2 = arith.constant 0 : i32
    return %c0_i32, %c0_i32_0, %c0_i32_1 : i32, i32, i32
  }
  func.func @transform_1(%arg0: i32) -> (i32, i32) {
    %c0_i32 = arith.constant 0 : i32
    %c0_i32_0 = arith.constant 0 : i32
    %c0_i32_1 = arith.constant 0 : i32
    return %c0_i32, %c0_i32_0 : i32, i32
  }
  func.func @transform_2(%arg0: i32) -> (i32, i32) {
    %c0_i32 = arith.constant 0 : i32
    %c0_i32_0 = arith.constant 0 : i32
    %c0_i32_1 = arith.constant 0 : i32
    return %c0_i32, %c0_i32_0 : i32, i32
  }
  func.func @transform_3(%arg0: i32) -> (i32, i32, i32) {
    %c0_i32 = arith.constant 0 : i32
    %c0_i32_0 = arith.constant 0 : i32
    %c0_i32_1 = arith.constant 0 : i32
    %c0_i32_2 = arith.constant 0 : i32
    return %c0_i32, %c0_i32_0, %c0_i32_1 : i32, i32, i32
  }
  func.func @transform_4(%arg0: i32) -> (i32, i32) {
    %c0_i32 = arith.constant 0 : i32
    %c0_i32_0 = arith.constant 0 : i32
    %c0_i32_1 = arith.constant 0 : i32
    return %c0_i32, %c0_i32_0 : i32, i32
  }
  func.func @transform_5(%arg0: i32) -> (i32, i32) {
    %c0_i32 = arith.constant 0 : i32
    %c0_i32_0 = arith.constant 0 : i32
    %c0_i32_1 = arith.constant 0 : i32
    return %c0_i32, %c0_i32_0 : i32, i32
  }
  func.func @transform_6(%arg0: i32) -> (i32, i32) {
    %c0_i32 = arith.constant 0 : i32
    %c0_i32_0 = arith.constant 0 : i32
    %c0_i32_1 = arith.constant 0 : i32
    return %c0_i32, %c0_i32_0 : i32, i32
  }
  func.func @transform_7(%arg0: i32) -> (i32, i32) {
    %c0_i32 = arith.constant 0 : i32
    %c0_i32_0 = arith.constant 0 : i32
    %c0_i32_1 = arith.constant 0 : i32
    return %c0_i32, %c0_i32_0 : i32, i32
  }
  func.func @transform_8(%arg0: i32) -> (i32, i32) {
    %c0_i32 = arith.constant 0 : i32
    %c0_i32_0 = arith.constant 0 : i32
    %c0_i32_1 = arith.constant 0 : i32
    return %c0_i32, %c0_i32_0 : i32, i32
  }
  func.func @transform_9(%arg0: i32) -> (i32, i32) {
    %c0_i32 = arith.constant 0 : i32
    %c0_i32_0 = arith.constant 0 : i32
    %c0_i32_1 = arith.constant 0 : i32
    return %c0_i32, %c0_i32_0 : i32, i32
  }
}

</mosaic_0001>

<bundles_post_ra>
// kernel: celeb_net_forward.3
= control target key start
LH: loop header
LB: loop body
LE: loop exit
PB: predicated region body
PF: predicated region fallthrough
CT: control target
= control target key end

     0   :  { %s11116_s1 = inlined_call_operand.vmem [shape: bf16[128,128], index: 1, kind: input, shape index: {}]   ;;  %s11117_s0 = inlined_call_operand.vmem [shape: bf16[4,1568,128], index: 0, kind: input, shape index: {}]   ;;  %s11118_s2 = inlined_call_operand.vmem [shape: f32[1,128], index: 2, kind: input, shape index: {}]   ;;  %s11119_s3 = inlined_call_operand.vmem [shape: bf16[1568,128], index: 3, kind: output, shape index: {}]  }
   0x1   :  { %v8758_v0 = vld [vmem:[%s11116_s1 + $0x38] sm:$0xff]  ;;  %v8757_v1 = vld [vmem:[%s11116_s1 + $0x30] sm:$0xff]  ;;  %v8756_v2 = vld [vmem:[%s11116_s1 + $0x28] sm:$0xff] }
   0x2   :  { %3214 = vmatpush.bf16.msra.mxu0 %v8758_v0  ;;  %9346 = vmatpush.bf16.msra.mxu1 %v8758_v0  ;;  %v8755_v3 = vld [vmem:[%s11116_s1 + $0x20] sm:$0xff]  ;;  %v8754_v4 = vld [vmem:[%s11116_s1 + $0x18] sm:$0xff]  ;;  %v8753_v5 = vld [vmem:[%s11116_s1 + $0x10] sm:$0xff] }
   0x3   :  { %9347 = vmatpush.bf16.msra.mxu2 %v8758_v0  ;;  %9348 = vmatpush.bf16.msra.mxu3 %v8758_v0  ;;  %v8752_v6 = vld [vmem:[%s11116_s1 + $0x8] sm:$0xff]  ;;  %v8751_v7 = vld [vmem:[%s11116_s1] sm:$0xff]  ;;  %v8457_v9 = vld [vmem:[%s11117_s0 + $0x310] sm:$0xff] }
   0x4   :  { %v8359_v8 = vld [vmem:[%s11117_s0] sm:$0xff]  ;;  %v8653_v11 = vld [vmem:[%s11117_s0 + $0x930] sm:$0xff]  ;;  %v8360_v12 = vld [vmem:[%s11117_s0 + $0x8] sm:$0xff] }
   0x5   :  { %v8555_v10 = vld [vmem:[%s11117_s0 + $0x620] sm:$0xff]  ;;  %v8458_v13 = vld [vmem:[%s11117_s0 + $0x318] sm:$0xff]  ;;  %v8556_v14 = vld [vmem:[%s11117_s0 + $0x628] sm:$0xff] }
   0x6   :  { %3215 = vmatpush.bf16.msra.mxu0 %v8757_v1  ;;  %9349 = vmatpush.bf16.msra.mxu1 %v8757_v1  ;;  %v8654_v15 = vld [vmem:[%s11117_s0 + $0x938] sm:$0xff]  ;;  %v8361_v16 = vld [vmem:[%s11117_s0 + $0x10] sm:$0xff]  ;;  %v8459_v17 = vld [vmem:[%s11117_s0 + $0x320] sm:$0xff] }
   0x7   :  { %9350 = vmatpush.bf16.msra.mxu2 %v8757_v1  ;;  %9351 = vmatpush.bf16.msra.mxu3 %v8757_v1  ;;  %v8557_v18 = vld [vmem:[%s11117_s0 + $0x630] sm:$0xff]  ;;  %v8655_v19 = vld [vmem:[%s11117_s0 + $0x940] sm:$0xff]  ;;  %v8362_v20 = vld [vmem:[%s11117_s0 + $0x18] sm:$0xff] }
   0x8   :  { %v8460_v21 = vld [vmem:[%s11117_s0 + $0x328] sm:$0xff]  ;;  %v8558_v22 = vld [vmem:[%s11117_s0 + $0x638] sm:$0xff]  ;;  %v8363_v24 = vld [vmem:[%s11117_s0 + $0x20] sm:$0xff] }
   0x9   :  { %v8656_v23 = vld [vmem:[%s11117_s0 + $0x948] sm:$0xff]  ;;  %v8461_v25 = vld [vmem:[%s11117_s0 + $0x330] sm:$0xff]  ;;  %v8559_v26 = vld [vmem:[%s11117_s0 + $0x640] sm:$0xff] }
   0xa   :  { %3216 = vmatpush.bf16.msra.mxu0 %v8756_v2  ;;  %9352 = vmatpush.bf16.msra.mxu1 %v8756_v2  ;;  %v8657_v27 = vld [vmem:[%s11117_s0 + $0x950] sm:$0xff]  ;;  %v8364_v28 = vld [vmem:[%s11117_s0 + $0x28] sm:$0xff]  ;;  %v8462_v29 = vld [vmem:[%s11117_s0 + $0x338] sm:$0xff] }
   0xb   :  { %9353 = vmatpush.bf16.msra.mxu2 %v8756_v2  ;;  %9354 = vmatpush.bf16.msra.mxu3 %v8756_v2  ;;  %v8560_v30 = vld [vmem:[%s11117_s0 + $0x648] sm:$0xff]  ;;  %v8658_v31 = vld [vmem:[%s11117_s0 + $0x958] sm:$0xff]  ;;  %v8365_v32 = vld [vmem:[%s11117_s0 + $0x30] sm:$0xff] }
   0xc   :  { %v8463_v33 = vld [vmem:[%s11117_s0 + $0x340] sm:$0xff]  ;;  %v8561_v34 = vld [vmem:[%s11117_s0 + $0x650] sm:$0xff]  ;;  %v8366_v36 = vld [vmem:[%s11117_s0 + $0x38] sm:$0xff] }
   0xd   :  { %v8659_v35 = vld [vmem:[%s11117_s0 + $0x960] sm:$0xff]  ;;  %v8464_v37 = vld [vmem:[%s11117_s0 + $0x348] sm:$0xff]  ;;  %v8562_v38 = vld [vmem:[%s11117_s0 + $0x658] sm:$0xff] }
   0xe   :  { %3217 = vmatpush.bf16.msra.mxu0 %v8755_v3  ;;  %9355 = vmatpush.bf16.msra.mxu1 %v8755_v3  ;;  %v8660_v39 = vld [vmem:[%s11117_s0 + $0x968] sm:$0xff]  ;;  %v8367_v40 = vld [vmem:[%s11117_s0 + $0x40] sm:$0xff]  ;;  %v8465_v41 = vld [vmem:[%s11117_s0 + $0x350] sm:$0xff] }
   0xf   :  { %9356 = vmatpush.bf16.msra.mxu2 %v8755_v3  ;;  %9357 = vmatpush.bf16.msra.mxu3 %v8755_v3  ;;  %v8563_v44 = vld [vmem:[%s11117_s0 + $0x660] sm:$0xff]  ;;  %v8661_v45 = vld [vmem:[%s11117_s0 + $0x970] sm:$0xff]  ;;  %v8368_v56 = vld [vmem:[%s11117_s0 + $0x48] sm:$0xff] }
  0x10   :  { %v9531_v53 = vld [vmem:[%s11118_s2] ss:$0 sm:$0xff]  ;;  %v8466_v57 = vld [vmem:[%s11117_s0 + $0x358] sm:$0xff]  ;;  %v8564_v63 = vld [vmem:[%s11117_s0 + $0x668] sm:$0xff] }
  0x11   :  { %v8662_v0 = vld [vmem:[%s11117_s0 + $0x978] sm:$0xff] }
  0x12   :  { %3218 = vmatpush.bf16.msra.mxu0 %v8754_v4  ;;  %9358 = vmatpush.bf16.msra.mxu1 %v8754_v4 }
  0x13   :  { %9359 = vmatpush.bf16.msra.mxu2 %v8754_v4  ;;  %9360 = vmatpush.bf16.msra.mxu3 %v8754_v4 }
  0x16   :  { %3219 = vmatpush.bf16.msra.mxu0 %v8753_v5  ;;  %9361 = vmatpush.bf16.msra.mxu1 %v8753_v5 }
  0x17   :  { %9362 = vmatpush.bf16.msra.mxu2 %v8753_v5  ;;  %9363 = vmatpush.bf16.msra.mxu3 %v8753_v5 }
  0x1a   :  { %3220 = vmatpush.bf16.msra.mxu0 %v8752_v6  ;;  %9364 = vmatpush.bf16.msra.mxu1 %v8752_v6 }
  0x1b   :  { %9365 = vmatpush.bf16.msra.mxu2 %v8752_v6  ;;  %9366 = vmatpush.bf16.msra.mxu3 %v8752_v6 }
  0x1e   :  { %3221 = vmatpush.bf16.msra.mxu0 %v8751_v7  ;;  %9367 = vmatpush.bf16.msra.mxu1 %v8751_v7 }
  0x1f   :  { %9368 = vmatpush.bf16.msra.mxu2 %v8751_v7  ;;  %9369 = vmatpush.bf16.msra.mxu3 %v8751_v7 }
  0x21   :  { %3222 = vmatmul.bf16.vlgmr.msra.gmra.mxu0 %v8359_v8  ;;  %3712 = vmatmul.bf16.vlgmr.msra.gmra.mxu1 %v8457_v9 }
  0x22   :  { %4202 = vmatmul.bf16.vlgmr.msra.gmra.mxu2 %v8555_v10  ;;  %4692 = vmatmul.bf16.vlgmr.msra.gmra.mxu3 %v8653_v11 }
  0x31   :  { %3227 = vmatmul.bf16.gmra.mxu0 %v8360_v12  ;;  %3717 = vmatmul.bf16.gmra.mxu1 %v8458_v13 }
  0x32   :  { %4207 = vmatmul.bf16.gmra.mxu2 %v8556_v14  ;;  %4697 = vmatmul.bf16.gmra.mxu3 %v8654_v15 }
  0x41   :  { %3232 = vmatmul.bf16.gmra.mxu0 %v8361_v16  ;;  %3722 = vmatmul.bf16.gmra.mxu1 %v8459_v17  ;;  %v8369_v17 = vld [vmem:[%s11117_s0 + $0x50] sm:$0xff] }
  0x42   :  { %4212 = vmatmul.bf16.gmra.mxu2 %v8557_v18  ;;  %4702 = vmatmul.bf16.gmra.mxu3 %v8655_v19  ;;  %v8467_v18 = vld [vmem:[%s11117_s0 + $0x360] sm:$0xff] }
  0x51   :  { %3237 = vmatmul.bf16.gmra.mxu0 %v8362_v20  ;;  %3727 = vmatmul.bf16.gmra.mxu1 %v8460_v21 }
  0x52   :  { %4217 = vmatmul.bf16.gmra.mxu2 %v8558_v22  ;;  %4707 = vmatmul.bf16.gmra.mxu3 %v8656_v23 }
  0x61   :  { %3242 = vmatmul.bf16.gmra.mxu0 %v8363_v24  ;;  %3732 = vmatmul.bf16.gmra.mxu1 %v8461_v25  ;;  %v8565_v24 = vld [vmem:[%s11117_s0 + $0x670] sm:$0xff]  ;;  %v8663_v25 = vld [vmem:[%s11117_s0 + $0x980] sm:$0xff] }
  0x62   :  { %4222 = vmatmul.bf16.gmra.mxu2 %v8559_v26  ;;  %4712 = vmatmul.bf16.gmra.mxu3 %v8657_v27 }
  0x71   :  { %3247 = vmatmul.bf16.gmra.mxu0 %v8364_v28  ;;  %3737 = vmatmul.bf16.gmra.mxu1 %v8462_v29 }
  0x72   :  { %4227 = vmatmul.bf16.gmra.mxu2 %v8560_v30  ;;  %4717 = vmatmul.bf16.gmra.mxu3 %v8658_v31 }
  0x81   :  { %3252 = vmatmul.bf16.gmra.mxu0 %v8365_v32  ;;  %3742 = vmatmul.bf16.gmra.mxu1 %v8463_v33 }
  0x82   :  { %4232 = vmatmul.bf16.gmra.mxu2 %v8561_v34  ;;  %4722 = vmatmul.bf16.gmra.mxu3 %v8659_v35 }
  0x91   :  { %3257 = vmatmul.bf16.gmra.mxu0 %v8366_v36  ;;  %3747 = vmatmul.bf16.gmra.mxu1 %v8464_v37 }
  0x92   :  { %4237 = vmatmul.bf16.gmra.mxu2 %v8562_v38  ;;  %4727 = vmatmul.bf16.gmra.mxu3 %v8660_v39 }
  0x9e   :  { %v3223_v42 = vpop.f32.mrf.mxu0  ;;  %v3713_v43 = vpop.f32.mrf.mxu1 }
  0x9f   :  { %v5183_v48 = vmax.f32 %v3223_v42, %v3713_v43  ;;  %v8370_v42 = vld [vmem:[%s11117_s0 + $0x58] sm:$0xff]  ;;  %v8468_v43 = vld [vmem:[%s11117_s0 + $0x368] sm:$0xff] }
  0xa1   :  { %3262 = vmatmul.bf16.gmra.mxu0 %v8367_v40  ;;  %3752 = vmatmul.bf16.gmra.mxu1 %v8465_v41 }
  0xa2   :  { %4242 = vmatmul.bf16.gmra.mxu2 %v8563_v44  ;;  %4732 = vmatmul.bf16.gmra.mxu3 %v8661_v45 }
  0xa5   :  { %v4203_v46 = vpop.f32.mrf.mxu2  ;;  %v4693_v47 = vpop.f32.mrf.mxu3 }
  0xa6   :  { %v5379_v49 = vmax.f32 %v4203_v46, %v4693_v47  ;;  %v3225_v50 = vpop.f32.mrf.mxu0  ;;  %v3715_v51 = vpop.f32.mrf.mxu1 }
  0xa7   :  { %v5184_v59 = vmax.f32 %v3225_v50, %v3715_v51  ;;  %v8664_v50 = vld [vmem:[%s11117_s0 + $0x988] sm:$0xff] }
  0xa8   :  { %v5575_v52 = vmax.f32 %v5183_v48, %v5379_v49  ;;  %v8566_v49 = vld [vmem:[%s11117_s0 + $0x678] sm:$0xff] }
  0xaa   :  { %v5775_v58 = vadd.f32 %v9531_v53, %v5575_v52 }
  0xac   :  { %v5971_v2 = vmul.f32 0.01, %v5775_v58 }
  0xad   :  { %v4205_v54 = vpop.f32.mrf.mxu2  ;;  %v4695_v55 = vpop.f32.mrf.mxu3 }
  0xae   :  { %v5380_v60 = vmax.f32 %v4205_v54, %v4695_v55  ;;  %v3228_v61 = vpop.f32.mrf.mxu0  ;;  %v3718_v62 = vpop.f32.mrf.mxu1  ;;  %v6167_v7 = vmax.f32 %v5775_v58, %v5971_v2 }
  0xaf   :  { %v5185_v9 = vmax.f32 %v3228_v61, %v3718_v62 }
  0xb0   :  { %v5576_v1 = vmax.f32 %v5184_v59, %v5380_v60 }
  0xb1   :  { %3267 = vmatmul.bf16.gmra.mxu0 %v8368_v56  ;;  %3757 = vmatmul.bf16.gmra.mxu1 %v8466_v57 }
  0xb2   :  { %v5776_v3 = vadd.f32 %v9531_v53, %v5576_v1  ;;  %4247 = vmatmul.bf16.gmra.mxu2 %v8564_v63  ;;  %4737 = vmatmul.bf16.gmra.mxu3 %v8662_v0 }
  0xb4   :  { %v5972_v4 = vmul.f32 0.01, %v5776_v3 }
  0xb5   :  { %v4208_v5 = vpop.f32.mrf.mxu2  ;;  %v4698_v6 = vpop.f32.mrf.mxu3 }
  0xb6   :  { %v6168_v8 = vmax.f32 %v5776_v3, %v5972_v4  ;;  %v5381_v10 = vmax.f32 %v4208_v5, %v4698_v6  ;;  %v3230_v11 = vpop.f32.mrf.mxu0  ;;  %v3720_v12 = vpop.f32.mrf.mxu1  ;;  %v8371_v4 = vld [vmem:[%s11117_s0 + $0x60] sm:$0xff]  ;;  %v8469_v5 = vld [vmem:[%s11117_s0 + $0x370] sm:$0xff] }
  0xb7   :  { %v5186_v20 = vmax.f32 %v3230_v11, %v3720_v12  ;;  %v8567_v11 = vld [vmem:[%s11117_s0 + $0x680] sm:$0xff]  ;;  %v8665_v12 = vld [vmem:[%s11117_s0 + $0x990] sm:$0xff] }
  0xb8   :  { %v8762_v13 = vpack.c.bf16 %v6168_v8, %v6167_v7  ;;  %v5577_v14 = vmax.f32 %v5185_v9, %v5381_v10 }
  0xba   :  { %8763 = vst [vmem:[%s11119_s3] sm:$0xff] %v8762_v13   ;;  %v5777_v19 = vadd.f32 %v9531_v53, %v5577_v14 }
  0xbc   :  { %v5973_v27 = vmul.f32 0.01, %v5777_v19 }
  0xbd   :  { %v4210_v15 = vpop.f32.mrf.mxu2  ;;  %v4700_v16 = vpop.f32.mrf.mxu3 }
  0xbe   :  { %v5382_v21 = vmax.f32 %v4210_v15, %v4700_v16  ;;  %v3233_v22 = vpop.f32.mrf.mxu0  ;;  %v3723_v23 = vpop.f32.mrf.mxu1  ;;  %v6169_v32 = vmax.f32 %v5777_v19, %v5973_v27 }
  0xbf   :  { %v5187_v34 = vmax.f32 %v3233_v22, %v3723_v23 }
  0xc0   :  { %v5578_v26 = vmax.f32 %v5186_v20, %v5382_v21 }
  0xc1   :  { %3272 = vmatmul.bf16.gmra.mxu0 %v8369_v17  ;;  %3762 = vmatmul.bf16.gmra.mxu1 %v8467_v18 }
  0xc2   :  { %v5778_v28 = vadd.f32 %v9531_v53, %v5578_v26  ;;  %4252 = vmatmul.bf16.gmra.mxu2 %v8565_v24  ;;  %4742 = vmatmul.bf16.gmra.mxu3 %v8663_v25 }
  0xc4   :  { %v5974_v29 = vmul.f32 0.01, %v5778_v28 }
  0xc5   :  { %v4213_v30 = vpop.f32.mrf.mxu2  ;;  %v4703_v31 = vpop.f32.mrf.mxu3 }
  0xc6   :  { %v6170_v33 = vmax.f32 %v5778_v28, %v5974_v29  ;;  %v5383_v35 = vmax.f32 %v4213_v30, %v4703_v31  ;;  %v3235_v36 = vpop.f32.mrf.mxu0  ;;  %v3725_v37 = vpop.f32.mrf.mxu1  ;;  %v8372_v29 = vld [vmem:[%s11117_s0 + $0x68] sm:$0xff]  ;;  %v8470_v30 = vld [vmem:[%s11117_s0 + $0x378] sm:$0xff] }
  0xc7   :  { %v5188_v45 = vmax.f32 %v3235_v36, %v3725_v37  ;;  %v8568_v36 = vld [vmem:[%s11117_s0 + $0x688] sm:$0xff]  ;;  %v8666_v37 = vld [vmem:[%s11117_s0 + $0x998] sm:$0xff] }
  0xc8   :  { %v8767_v38 = vpack.c.bf16 %v6170_v33, %v6169_v32  ;;  %v5579_v39 = vmax.f32 %v5187_v34, %v5383_v35 }
  0xca   :  { %9249 = vst [vmem:[%s11119_s3 + $0x8] sm:$0xff] %v8767_v38   ;;  %v5779_v44 = vadd.f32 %v9531_v53, %v5579_v39 }
  0xcc   :  { %v5975_v52 = vmul.f32 0.01, %v5779_v44 }
  0xcd   :  { %v4215_v40 = vpop.f32.mrf.mxu2  ;;  %v4705_v41 = vpop.f32.mrf.mxu3 }
  0xce   :  { %v5384_v46 = vmax.f32 %v4215_v40, %v4705_v41  ;;  %v3238_v47 = vpop.f32.mrf.mxu0  ;;  %v3728_v48 = vpop.f32.mrf.mxu1  ;;  %v6171_v58 = vmax.f32 %v5779_v44, %v5975_v52 }
  0xcf   :  { %v5189_v60 = vmax.f32 %v3238_v47, %v3728_v48 }
  0xd0   :  { %v5580_v51 = vmax.f32 %v5188_v45, %v5384_v46 }
  0xd1   :  { %3277 = vmatmul.bf16.gmra.mxu0 %v8370_v42  ;;  %3767 = vmatmul.bf16.gmra.mxu1 %v8468_v43 }
  0xd2   :  { %v5780_v54 = vadd.f32 %v9531_v53, %v5580_v51  ;;  %4257 = vmatmul.bf16.gmra.mxu2 %v8566_v49  ;;  %4747 = vmatmul.bf16.gmra.mxu3 %v8664_v50 }
  0xd4   :  { %v5976_v55 = vmul.f32 0.01, %v5780_v54 }
  0xd5   :  { %v4218_v56 = vpop.f32.mrf.mxu2  ;;  %v4708_v57 = vpop.f32.mrf.mxu3 }
  0xd6   :  { %v6172_v59 = vmax.f32 %v5780_v54, %v5976_v55  ;;  %v5385_v61 = vmax.f32 %v4218_v56, %v4708_v57  ;;  %v3240_v62 = vpop.f32.mrf.mxu0  ;;  %v3730_v63 = vpop.f32.mrf.mxu1  ;;  %v8373_v55 = vld [vmem:[%s11117_s0 + $0x70] sm:$0xff]  ;;  %v8471_v56 = vld [vmem:[%s11117_s0 + $0x380] sm:$0xff] }
  0xd7   :  { %v5190_v7 = vmax.f32 %v3240_v62, %v3730_v63  ;;  %v8569_v62 = vld [vmem:[%s11117_s0 + $0x690] sm:$0xff]  ;;  %v8667_v63 = vld [vmem:[%s11117_s0 + $0x9a0] sm:$0xff] }
  0xd8   :  { %v8772_v0 = vpack.c.bf16 %v6172_v59, %v6171_v58  ;;  %v5581_v1 = vmax.f32 %v5189_v60, %v5385_v61 }
  0xda   :  { %9250 = vst [vmem:[%s11119_s3 + $0x10] sm:$0xff] %v8772_v0   ;;  %v5781_v6 = vadd.f32 %v9531_v53, %v5581_v1 }
  0xdc   :  { %v5977_v14 = vmul.f32 0.01, %v5781_v6 }
  0xdd   :  { %v4220_v2 = vpop.f32.mrf.mxu2  ;;  %v4710_v3 = vpop.f32.mrf.mxu3 }
  0xde   :  { %v5386_v8 = vmax.f32 %v4220_v2, %v4710_v3  ;;  %v3243_v9 = vpop.f32.mrf.mxu0  ;;  %v3733_v10 = vpop.f32.mrf.mxu1  ;;  %v6173_v19 = vmax.f32 %v5781_v6, %v5977_v14 }
  0xdf   :  { %v5191_v21 = vmax.f32 %v3243_v9, %v3733_v10 }
  0xe0   :  { %v5582_v13 = vmax.f32 %v5190_v7, %v5386_v8 }
  0xe1   :  { %3282 = vmatmul.bf16.gmra.mxu0 %v8371_v4  ;;  %3772 = vmatmul.bf16.gmra.mxu1 %v8469_v5 }
  0xe2   :  { %v5782_v15 = vadd.f32 %v9531_v53, %v5582_v13  ;;  %4262 = vmatmul.bf16.gmra.mxu2 %v8567_v11  ;;  %4752 = vmatmul.bf16.gmra.mxu3 %v8665_v12 }
  0xe4   :  { %v5978_v16 = vmul.f32 0.01, %v5782_v15 }
  0xe5   :  { %v4223_v17 = vpop.f32.mrf.mxu2  ;;  %v4713_v18 = vpop.f32.mrf.mxu3 }
  0xe6   :  { %v6174_v20 = vmax.f32 %v5782_v15, %v5978_v16  ;;  %v5387_v22 = vmax.f32 %v4223_v17, %v4713_v18  ;;  %v3245_v23 = vpop.f32.mrf.mxu0  ;;  %v3735_v24 = vpop.f32.mrf.mxu1  ;;  %v8374_v16 = vld [vmem:[%s11117_s0 + $0x78] sm:$0xff]  ;;  %v8472_v17 = vld [vmem:[%s11117_s0 + $0x388] sm:$0xff] }
  0xe7   :  { %v5192_v32 = vmax.f32 %v3245_v23, %v3735_v24  ;;  %v8570_v23 = vld [vmem:[%s11117_s0 + $0x698] sm:$0xff]  ;;  %v8668_v24 = vld [vmem:[%s11117_s0 + $0x9a8] sm:$0xff] }
  0xe8   :  { %v8777_v25 = vpack.c.bf16 %v6174_v20, %v6173_v19  ;;  %v5583_v26 = vmax.f32 %v5191_v21, %v5387_v22 }
  0xea   :  { %9251 = vst [vmem:[%s11119_s3 + $0x18] sm:$0xff] %v8777_v25   ;;  %v5783_v31 = vadd.f32 %v9531_v53, %v5583_v26 }
  0xec   :  { %v5979_v39 = vmul.f32 0.01, %v5783_v31 }
  0xed   :  { %v4225_v27 = vpop.f32.mrf.mxu2  ;;  %v4715_v28 = vpop.f32.mrf.mxu3 }
  0xee   :  { %v5388_v33 = vmax.f32 %v4225_v27, %v4715_v28  ;;  %v3248_v34 = vpop.f32.mrf.mxu0  ;;  %v3738_v35 = vpop.f32.mrf.mxu1  ;;  %v6175_v44 = vmax.f32 %v5783_v31, %v5979_v39 }
  0xef   :  { %v5193_v46 = vmax.f32 %v3248_v34, %v3738_v35 }
  0xf0   :  { %v5584_v38 = vmax.f32 %v5192_v32, %v5388_v33 }
  0xf1   :  { %3287 = vmatmul.bf16.gmra.mxu0 %v8372_v29  ;;  %3777 = vmatmul.bf16.gmra.mxu1 %v8470_v30 }
  0xf2   :  { %v5784_v40 = vadd.f32 %v9531_v53, %v5584_v38  ;;  %4267 = vmatmul.bf16.gmra.mxu2 %v8568_v36  ;;  %4757 = vmatmul.bf16.gmra.mxu3 %v8666_v37 }
  0xf4   :  { %v5980_v41 = vmul.f32 0.01, %v5784_v40 }
  0xf5   :  { %v4228_v42 = vpop.f32.mrf.mxu2  ;;  %v4718_v43 = vpop.f32.mrf.mxu3 }
  0xf6   :  { %v6176_v45 = vmax.f32 %v5784_v40, %v5980_v41  ;;  %v5389_v47 = vmax.f32 %v4228_v42, %v4718_v43  ;;  %v3250_v48 = vpop.f32.mrf.mxu0  ;;  %v3740_v49 = vpop.f32.mrf.mxu1  ;;  %v8375_v41 = vld [vmem:[%s11117_s0 + $0x80] sm:$0xff]  ;;  %v8473_v42 = vld [vmem:[%s11117_s0 + $0x390] sm:$0xff] }
  0xf7   :  { %v5194_v58 = vmax.f32 %v3250_v48, %v3740_v49  ;;  %v8571_v48 = vld [vmem:[%s11117_s0 + $0x6a0] sm:$0xff]  ;;  %v8669_v49 = vld [vmem:[%s11117_s0 + $0x9b0] sm:$0xff] }
  0xf8   :  { %v8782_v50 = vpack.c.bf16 %v6176_v45, %v6175_v44  ;;  %v5585_v51 = vmax.f32 %v5193_v46, %v5389_v47 }
  0xfa   :  { %9252 = vst [vmem:[%s11119_s3 + $0x20] sm:$0xff] %v8782_v50   ;;  %v5785_v57 = vadd.f32 %v9531_v53, %v5585_v51 }
  0xfc   :  { %v5981_v1 = vmul.f32 0.01, %v5785_v57 }
  0xfd   :  { %v4230_v52 = vpop.f32.mrf.mxu2  ;;  %v4720_v54 = vpop.f32.mrf.mxu3 }
  0xfe   :  { %v5390_v59 = vmax.f32 %v4230_v52, %v4720_v54  ;;  %v3253_v60 = vpop.f32.mrf.mxu0  ;;  %v3743_v61 = vpop.f32.mrf.mxu1  ;;  %v6177_v6 = vmax.f32 %v5785_v57, %v5981_v1 }
  0xff   :  { %v5195_v8 = vmax.f32 %v3253_v60, %v3743_v61 }
 0x100   :  { %v5586_v0 = vmax.f32 %v5194_v58, %v5390_v59 }
 0x101   :  { %3292 = vmatmul.bf16.gmra.mxu0 %v8373_v55  ;;  %3782 = vmatmul.bf16.gmra.mxu1 %v8471_v56 }
 0x102   :  { %v5786_v2 = vadd.f32 %v9531_v53, %v5586_v0  ;;  %4272 = vmatmul.bf16.gmra.mxu2 %v8569_v62  ;;  %4762 = vmatmul.bf16.gmra.mxu3 %v8667_v63 }
 0x104   :  { %v5982_v3 = vmul.f32 0.01, %v5786_v2 }
 0x105   :  { %v4233_v4 = vpop.f32.mrf.mxu2  ;;  %v4723_v5 = vpop.f32.mrf.mxu3 }
 0x106   :  { %v6178_v7 = vmax.f32 %v5786_v2, %v5982_v3  ;;  %v5391_v9 = vmax.f32 %v4233_v4, %v4723_v5  ;;  %v3255_v10 = vpop.f32.mrf.mxu0  ;;  %v3745_v11 = vpop.f32.mrf.mxu1  ;;  %v8376_v3 = vld [vmem:[%s11117_s0 + $0x88] sm:$0xff]  ;;  %v8474_v4 = vld [vmem:[%s11117_s0 + $0x398] sm:$0xff] }
 0x107   :  { %v5196_v19 = vmax.f32 %v3255_v10, %v3745_v11  ;;  %v8572_v10 = vld [vmem:[%s11117_s0 + $0x6a8] sm:$0xff]  ;;  %v8670_v11 = vld [vmem:[%s11117_s0 + $0x9b8] sm:$0xff] }
 0x108   :  { %v8787_v12 = vpack.c.bf16 %v6178_v7, %v6177_v6  ;;  %v5587_v13 = vmax.f32 %v5195_v8, %v5391_v9 }
 0x10a   :  { %9253 = vst [vmem:[%s11119_s3 + $0x28] sm:$0xff] %v8787_v12   ;;  %v5787_v18 = vadd.f32 %v9531_v53, %v5587_v13 }
 0x10c   :  { %v5983_v26 = vmul.f32 0.01, %v5787_v18 }
 0x10d   :  { %v4235_v14 = vpop.f32.mrf.mxu2  ;;  %v4725_v15 = vpop.f32.mrf.mxu3 }
 0x10e   :  { %v5392_v20 = vmax.f32 %v4235_v14, %v4725_v15  ;;  %v3258_v21 = vpop.f32.mrf.mxu0  ;;  %v3748_v22 = vpop.f32.mrf.mxu1  ;;  %v6179_v31 = vmax.f32 %v5787_v18, %v5983_v26 }
 0x10f   :  { %v5197_v33 = vmax.f32 %v3258_v21, %v3748_v22 }
 0x110   :  { %v5588_v25 = vmax.f32 %v5196_v19, %v5392_v20 }
 0x111   :  { %3297 = vmatmul.bf16.gmra.mxu0 %v8374_v16  ;;  %3787 = vmatmul.bf16.gmra.mxu1 %v8472_v17 }
 0x112   :  { %v5788_v27 = vadd.f32 %v9531_v53, %v5588_v25  ;;  %4277 = vmatmul.bf16.gmra.mxu2 %v8570_v23  ;;  %4767 = vmatmul.bf16.gmra.mxu3 %v8668_v24 }
 0x114   :  { %v5984_v28 = vmul.f32 0.01, %v5788_v27 }
 0x115   :  { %v4238_v29 = vpop.f32.mrf.mxu2  ;;  %v4728_v30 = vpop.f32.mrf.mxu3 }
 0x116   :  { %v6180_v32 = vmax.f32 %v5788_v27, %v5984_v28  ;;  %v5393_v34 = vmax.f32 %v4238_v29, %v4728_v30  ;;  %v3260_v35 = vpop.f32.mrf.mxu0  ;;  %v3750_v36 = vpop.f32.mrf.mxu1  ;;  %v8377_v28 = vld [vmem:[%s11117_s0 + $0x90] sm:$0xff]  ;;  %v8475_v29 = vld [vmem:[%s11117_s0 + $0x3a0] sm:$0xff] }
 0x117   :  { %v5198_v44 = vmax.f32 %v3260_v35, %v3750_v36  ;;  %v8573_v35 = vld [vmem:[%s11117_s0 + $0x6b0] sm:$0xff]  ;;  %v8671_v36 = vld [vmem:[%s11117_s0 + $0x9c0] sm:$0xff] }
 0x118   :  { %v8792_v37 = vpack.c.bf16 %v6180_v32, %v6179_v31  ;;  %v5589_v38 = vmax.f32 %v5197_v33, %v5393_v34 }
 0x11a   :  { %9254 = vst [vmem:[%s11119_s3 + $0x30] sm:$0xff] %v8792_v37   ;;  %v5789_v43 = vadd.f32 %v9531_v53, %v5589_v38 }
 0x11c   :  { %v5985_v51 = vmul.f32 0.01, %v5789_v43 }
 0x11d   :  { %v4240_v39 = vpop.f32.mrf.mxu2  ;;  %v4730_v40 = vpop.f32.mrf.mxu3 }
 0x11e   :  { %v5394_v45 = vmax.f32 %v4240_v39, %v4730_v40  ;;  %v3263_v46 = vpop.f32.mrf.mxu0  ;;  %v3753_v47 = vpop.f32.mrf.mxu1  ;;  %v6181_v57 = vmax.f32 %v5789_v43, %v5985_v51 }
 0x11f   :  { %v5199_v59 = vmax.f32 %v3263_v46, %v3753_v47 }
 0x120   :  { %v5590_v50 = vmax.f32 %v5198_v44, %v5394_v45 }
 0x121   :  { %3302 = vmatmul.bf16.gmra.mxu0 %v8375_v41  ;;  %3792 = vmatmul.bf16.gmra.mxu1 %v8473_v42 }
 0x122   :  { %v5790_v52 = vadd.f32 %v9531_v53, %v5590_v50  ;;  %4282 = vmatmul.bf16.gmra.mxu2 %v8571_v48  ;;  %4772 = vmatmul.bf16.gmra.mxu3 %v8669_v49 }
 0x124   :  { %v5986_v54 = vmul.f32 0.01, %v5790_v52 }
 0x125   :  { %v4243_v55 = vpop.f32.mrf.mxu2  ;;  %v4733_v56 = vpop.f32.mrf.mxu3 }
 0x126   :  { %v6182_v58 = vmax.f32 %v5790_v52, %v5986_v54  ;;  %v5395_v60 = vmax.f32 %v4243_v55, %v4733_v56  ;;  %v3265_v61 = vpop.f32.mrf.mxu0  ;;  %v3755_v62 = vpop.f32.mrf.mxu1  ;;  %v8378_v54 = vld [vmem:[%s11117_s0 + $0x98] sm:$0xff]  ;;  %v8476_v55 = vld [vmem:[%s11117_s0 + $0x3a8] sm:$0xff] }
 0x127   :  { %v5200_v6 = vmax.f32 %v3265_v61, %v3755_v62  ;;  %v8574_v61 = vld [vmem:[%s11117_s0 + $0x6b8] sm:$0xff]  ;;  %v8672_v62 = vld [vmem:[%s11117_s0 + $0x9c8] sm:$0xff] }
 0x128   :  { %v8797_v63 = vpack.c.bf16 %v6182_v58, %v6181_v57  ;;  %v5591_v0 = vmax.f32 %v5199_v59, %v5395_v60 }
 0x12a   :  { %9255 = vst [vmem:[%s11119_s3 + $0x38] sm:$0xff] %v8797_v63   ;;  %v5791_v5 = vadd.f32 %v9531_v53, %v5591_v0 }
 0x12c   :  { %v5987_v13 = vmul.f32 0.01, %v5791_v5 }
 0x12d   :  { %v4245_v1 = vpop.f32.mrf.mxu2  ;;  %v4735_v2 = vpop.f32.mrf.mxu3 }
 0x12e   :  { %v5396_v7 = vmax.f32 %v4245_v1, %v4735_v2  ;;  %v3268_v8 = vpop.f32.mrf.mxu0  ;;  %v3758_v9 = vpop.f32.mrf.mxu1  ;;  %v6183_v18 = vmax.f32 %v5791_v5, %v5987_v13 }
 0x12f   :  { %v5201_v20 = vmax.f32 %v3268_v8, %v3758_v9 }
 0x130   :  { %v5592_v12 = vmax.f32 %v5200_v6, %v5396_v7 }
 0x131   :  { %3307 = vmatmul.bf16.gmra.mxu0 %v8376_v3  ;;  %3797 = vmatmul.bf16.gmra.mxu1 %v8474_v4 }
 0x132   :  { %v5792_v14 = vadd.f32 %v9531_v53, %v5592_v12  ;;  %4287 = vmatmul.bf16.gmra.mxu2 %v8572_v10  ;;  %4777 = vmatmul.bf16.gmra.mxu3 %v8670_v11 }
 0x134   :  { %v5988_v15 = vmul.f32 0.01, %v5792_v14 }
 0x135   :  { %v4248_v16 = vpop.f32.mrf.mxu2  ;;  %v4738_v17 = vpop.f32.mrf.mxu3 }
 0x136   :  { %v6184_v19 = vmax.f32 %v5792_v14, %v5988_v15  ;;  %v5397_v21 = vmax.f32 %v4248_v16, %v4738_v17  ;;  %v3270_v22 = vpop.f32.mrf.mxu0  ;;  %v3760_v23 = vpop.f32.mrf.mxu1  ;;  %v8379_v15 = vld [vmem:[%s11117_s0 + $0xa0] sm:$0xff]  ;;  %v8477_v16 = vld [vmem:[%s11117_s0 + $0x3b0] sm:$0xff] }
 0x137   :  { %v5202_v31 = vmax.f32 %v3270_v22, %v3760_v23  ;;  %v8575_v22 = vld [vmem:[%s11117_s0 + $0x6c0] sm:$0xff]  ;;  %v8673_v23 = vld [vmem:[%s11117_s0 + $0x9d0] sm:$0xff] }
 0x138   :  { %v8802_v24 = vpack.c.bf16 %v6184_v19, %v6183_v18  ;;  %v5593_v25 = vmax.f32 %v5201_v20, %v5397_v21 }
 0x13a   :  { %9256 = vst [vmem:[%s11119_s3 + $0x40] sm:$0xff] %v8802_v24   ;;  %v5793_v30 = vadd.f32 %v9531_v53, %v5593_v25 }
 0x13c   :  { %v5989_v38 = vmul.f32 0.01, %v5793_v30 }
 0x13d   :  { %v4250_v26 = vpop.f32.mrf.mxu2  ;;  %v4740_v27 = vpop.f32.mrf.mxu3 }
 0x13e   :  { %v5398_v32 = vmax.f32 %v4250_v26, %v4740_v27  ;;  %v3273_v33 = vpop.f32.mrf.mxu0  ;;  %v3763_v34 = vpop.f32.mrf.mxu1  ;;  %v6185_v43 = vmax.f32 %v5793_v30, %v5989_v38 }
 0x13f   :  { %v5203_v45 = vmax.f32 %v3273_v33, %v3763_v34 }
 0x140   :  { %v5594_v37 = vmax.f32 %v5202_v31, %v5398_v32 }
 0x141   :  { %3312 = vmatmul.bf16.gmra.mxu0 %v8377_v28  ;;  %3802 = vmatmul.bf16.gmra.mxu1 %v8475_v29 }
 0x142   :  { %v5794_v39 = vadd.f32 %v9531_v53, %v5594_v37  ;;  %4292 = vmatmul.bf16.gmra.mxu2 %v8573_v35  ;;  %4782 = vmatmul.bf16.gmra.mxu3 %v8671_v36 }
 0x144   :  { %v5990_v40 = vmul.f32 0.01, %v5794_v39 }
 0x145   :  { %v4253_v41 = vpop.f32.mrf.mxu2  ;;  %v4743_v42 = vpop.f32.mrf.mxu3 }
 0x146   :  { %v6186_v44 = vmax.f32 %v5794_v39, %v5990_v40  ;;  %v5399_v46 = vmax.f32 %v4253_v41, %v4743_v42  ;;  %v3275_v47 = vpop.f32.mrf.mxu0  ;;  %v3765_v48 = vpop.f32.mrf.mxu1  ;;  %v8380_v40 = vld [vmem:[%s11117_s0 + $0xa8] sm:$0xff]  ;;  %v8478_v41 = vld [vmem:[%s11117_s0 + $0x3b8] sm:$0xff] }
 0x147   :  { %v5204_v57 = vmax.f32 %v3275_v47, %v3765_v48  ;;  %v8576_v47 = vld [vmem:[%s11117_s0 + $0x6c8] sm:$0xff]  ;;  %v8674_v48 = vld [vmem:[%s11117_s0 + $0x9d8] sm:$0xff] }
 0x148   :  { %v8807_v49 = vpack.c.bf16 %v6186_v44, %v6185_v43  ;;  %v5595_v50 = vmax.f32 %v5203_v45, %v5399_v46 }
 0x14a   :  { %9257 = vst [vmem:[%s11119_s3 + $0x48] sm:$0xff] %v8807_v49   ;;  %v5795_v56 = vadd.f32 %v9531_v53, %v5595_v50 }
 0x14c   :  { %v5991_v0 = vmul.f32 0.01, %v5795_v56 }
 0x14d   :  { %v4255_v51 = vpop.f32.mrf.mxu2  ;;  %v4745_v52 = vpop.f32.mrf.mxu3 }
 0x14e   :  { %v5400_v58 = vmax.f32 %v4255_v51, %v4745_v52  ;;  %v3278_v59 = vpop.f32.mrf.mxu0  ;;  %v3768_v60 = vpop.f32.mrf.mxu1  ;;  %v6187_v5 = vmax.f32 %v5795_v56, %v5991_v0 }
 0x14f   :  { %v5205_v7 = vmax.f32 %v3278_v59, %v3768_v60 }
 0x150   :  { %v5596_v63 = vmax.f32 %v5204_v57, %v5400_v58 }
 0x151   :  { %3317 = vmatmul.bf16.gmra.mxu0 %v8378_v54  ;;  %3807 = vmatmul.bf16.gmra.mxu1 %v8476_v55 }
 0x152   :  { %v5796_v1 = vadd.f32 %v9531_v53, %v5596_v63  ;;  %4297 = vmatmul.bf16.gmra.mxu2 %v8574_v61  ;;  %4787 = vmatmul.bf16.gmra.mxu3 %v8672_v62 }
 0x154   :  { %v5992_v2 = vmul.f32 0.01, %v5796_v1 }
 0x155   :  { %v4258_v3 = vpop.f32.mrf.mxu2  ;;  %v4748_v4 = vpop.f32.mrf.mxu3 }
 0x156   :  { %v6188_v6 = vmax.f32 %v5796_v1, %v5992_v2  ;;  %v5401_v8 = vmax.f32 %v4258_v3, %v4748_v4  ;;  %v3280_v9 = vpop.f32.mrf.mxu0  ;;  %v3770_v10 = vpop.f32.mrf.mxu1  ;;  %v8381_v2 = vld [vmem:[%s11117_s0 + $0xb0] sm:$0xff]  ;;  %v8479_v3 = vld [vmem:[%s11117_s0 + $0x3c0] sm:$0xff] }
 0x157   :  { %v5206_v18 = vmax.f32 %v3280_v9, %v3770_v10  ;;  %v8577_v9 = vld [vmem:[%s11117_s0 + $0x6d0] sm:$0xff]  ;;  %v8675_v10 = vld [vmem:[%s11117_s0 + $0x9e0] sm:$0xff] }
 0x158   :  { %v8812_v11 = vpack.c.bf16 %v6188_v6, %v6187_v5  ;;  %v5597_v12 = vmax.f32 %v5205_v7, %v5401_v8 }
 0x15a   :  { %9258 = vst [vmem:[%s11119_s3 + $0x50] sm:$0xff] %v8812_v11   ;;  %v5797_v17 = vadd.f32 %v9531_v53, %v5597_v12 }
 0x15c   :  { %v5993_v25 = vmul.f32 0.01, %v5797_v17 }
 0x15d   :  { %v4260_v13 = vpop.f32.mrf.mxu2  ;;  %v4750_v14 = vpop.f32.mrf.mxu3 }
 0x15e   :  { %v5402_v19 = vmax.f32 %v4260_v13, %v4750_v14  ;;  %v3283_v20 = vpop.f32.mrf.mxu0  ;;  %v3773_v21 = vpop.f32.mrf.mxu1  ;;  %v6189_v30 = vmax.f32 %v5797_v17, %v5993_v25 }
 0x15f   :  { %v5207_v32 = vmax.f32 %v3283_v20, %v3773_v21 }
 0x160   :  { %v5598_v24 = vmax.f32 %v5206_v18, %v5402_v19 }
 0x161   :  { %3322 = vmatmul.bf16.gmra.mxu0 %v8379_v15  ;;  %3812 = vmatmul.bf16.gmra.mxu1 %v8477_v16 }
 0x162   :  { %v5798_v26 = vadd.f32 %v9531_v53, %v5598_v24  ;;  %4302 = vmatmul.bf16.gmra.mxu2 %v8575_v22  ;;  %4792 = vmatmul.bf16.gmra.mxu3 %v8673_v23 }
 0x164   :  { %v5994_v27 = vmul.f32 0.01, %v5798_v26 }
 0x165   :  { %v4263_v28 = vpop.f32.mrf.mxu2  ;;  %v4753_v29 = vpop.f32.mrf.mxu3 }
 0x166   :  { %v6190_v31 = vmax.f32 %v5798_v26, %v5994_v27  ;;  %v5403_v33 = vmax.f32 %v4263_v28, %v4753_v29  ;;  %v3285_v34 = vpop.f32.mrf.mxu0  ;;  %v3775_v35 = vpop.f32.mrf.mxu1  ;;  %v8382_v27 = vld [vmem:[%s11117_s0 + $0xb8] sm:$0xff]  ;;  %v8480_v28 = vld [vmem:[%s11117_s0 + $0x3c8] sm:$0xff] }
 0x167   :  { %v5208_v43 = vmax.f32 %v3285_v34, %v3775_v35  ;;  %v8578_v34 = vld [vmem:[%s11117_s0 + $0x6d8] sm:$0xff]  ;;  %v8676_v35 = vld [vmem:[%s11117_s0 + $0x9e8] sm:$0xff] }
 0x168   :  { %v8817_v36 = vpack.c.bf16 %v6190_v31, %v6189_v30  ;;  %v5599_v37 = vmax.f32 %v5207_v32, %v5403_v33 }
 0x16a   :  { %9259 = vst [vmem:[%s11119_s3 + $0x58] sm:$0xff] %v8817_v36   ;;  %v5799_v42 = vadd.f32 %v9531_v53, %v5599_v37 }
 0x16c   :  { %v5995_v50 = vmul.f32 0.01, %v5799_v42 }
 0x16d   :  { %v4265_v38 = vpop.f32.mrf.mxu2  ;;  %v4755_v39 = vpop.f32.mrf.mxu3 }
 0x16e   :  { %v5404_v44 = vmax.f32 %v4265_v38, %v4755_v39  ;;  %v3288_v45 = vpop.f32.mrf.mxu0  ;;  %v3778_v46 = vpop.f32.mrf.mxu1  ;;  %v6191_v56 = vmax.f32 %v5799_v42, %v5995_v50 }
 0x16f   :  { %v5209_v58 = vmax.f32 %v3288_v45, %v3778_v46 }
 0x170   :  { %v5600_v49 = vmax.f32 %v5208_v43, %v5404_v44 }
 0x171   :  { %3327 = vmatmul.bf16.gmra.mxu0 %v8380_v40  ;;  %3817 = vmatmul.bf16.gmra.mxu1 %v8478_v41 }
 0x172   :  { %v5800_v51 = vadd.f32 %v9531_v53, %v5600_v49  ;;  %4307 = vmatmul.bf16.gmra.mxu2 %v8576_v47  ;;  %4797 = vmatmul.bf16.gmra.mxu3 %v8674_v48 }
 0x174   :  { %v5996_v52 = vmul.f32 0.01, %v5800_v51 }
 0x175   :  { %v4268_v54 = vpop.f32.mrf.mxu2  ;;  %v4758_v55 = vpop.f32.mrf.mxu3 }
 0x176   :  { %v6192_v57 = vmax.f32 %v5800_v51, %v5996_v52  ;;  %v5405_v59 = vmax.f32 %v4268_v54, %v4758_v55  ;;  %v3290_v60 = vpop.f32.mrf.mxu0  ;;  %v3780_v61 = vpop.f32.mrf.mxu1  ;;  %v8383_v52 = vld [vmem:[%s11117_s0 + $0xc0] sm:$0xff]  ;;  %v8481_v54 = vld [vmem:[%s11117_s0 + $0x3d0] sm:$0xff] }
 0x177   :  { %v5210_v5 = vmax.f32 %v3290_v60, %v3780_v61  ;;  %v8579_v60 = vld [vmem:[%s11117_s0 + $0x6e0] sm:$0xff]  ;;  %v8677_v61 = vld [vmem:[%s11117_s0 + $0x9f0] sm:$0xff] }
 0x178   :  { %v8822_v62 = vpack.c.bf16 %v6192_v57, %v6191_v56  ;;  %v5601_v63 = vmax.f32 %v5209_v58, %v5405_v59 }
 0x17a   :  { %9260 = vst [vmem:[%s11119_s3 + $0x60] sm:$0xff] %v8822_v62   ;;  %v5801_v4 = vadd.f32 %v9531_v53, %v5601_v63 }
 0x17c   :  { %v5997_v12 = vmul.f32 0.01, %v5801_v4 }
 0x17d   :  { %v4270_v0 = vpop.f32.mrf.mxu2  ;;  %v4760_v1 = vpop.f32.mrf.mxu3 }
 0x17e   :  { %v5406_v6 = vmax.f32 %v4270_v0, %v4760_v1  ;;  %v3293_v7 = vpop.f32.mrf.mxu0  ;;  %v3783_v8 = vpop.f32.mrf.mxu1  ;;  %v6193_v17 = vmax.f32 %v5801_v4, %v5997_v12 }
 0x17f   :  { %v5211_v19 = vmax.f32 %v3293_v7, %v3783_v8 }
 0x180   :  { %v5602_v11 = vmax.f32 %v5210_v5, %v5406_v6 }
 0x181   :  { %3332 = vmatmul.bf16.gmra.mxu0 %v8381_v2  ;;  %3822 = vmatmul.bf16.gmra.mxu1 %v8479_v3 }
 0x182   :  { %v5802_v13 = vadd.f32 %v9531_v53, %v5602_v11  ;;  %4312 = vmatmul.bf16.gmra.mxu2 %v8577_v9  ;;  %4802 = vmatmul.bf16.gmra.mxu3 %v8675_v10 }
 0x184   :  { %v5998_v14 = vmul.f32 0.01, %v5802_v13 }
 0x185   :  { %v4273_v15 = vpop.f32.mrf.mxu2  ;;  %v4763_v16 = vpop.f32.mrf.mxu3 }
 0x186   :  { %v6194_v18 = vmax.f32 %v5802_v13, %v5998_v14  ;;  %v5407_v20 = vmax.f32 %v4273_v15, %v4763_v16  ;;  %v3295_v21 = vpop.f32.mrf.mxu0  ;;  %v3785_v22 = vpop.f32.mrf.mxu1  ;;  %v8384_v14 = vld [vmem:[%s11117_s0 + $0xc8] sm:$0xff]  ;;  %v8482_v15 = vld [vmem:[%s11117_s0 + $0x3d8] sm:$0xff] }
 0x187   :  { %v5212_v30 = vmax.f32 %v3295_v21, %v3785_v22  ;;  %v8580_v21 = vld [vmem:[%s11117_s0 + $0x6e8] sm:$0xff]  ;;  %v8678_v22 = vld [vmem:[%s11117_s0 + $0x9f8] sm:$0xff] }
 0x188   :  { %v8827_v23 = vpack.c.bf16 %v6194_v18, %v6193_v17  ;;  %v5603_v24 = vmax.f32 %v5211_v19, %v5407_v20 }
 0x18a   :  { %9261 = vst [vmem:[%s11119_s3 + $0x68] sm:$0xff] %v8827_v23   ;;  %v5803_v29 = vadd.f32 %v9531_v53, %v5603_v24 }
 0x18c   :  { %v5999_v37 = vmul.f32 0.01, %v5803_v29 }
 0x18d   :  { %v4275_v25 = vpop.f32.mrf.mxu2  ;;  %v4765_v26 = vpop.f32.mrf.mxu3 }
 0x18e   :  { %v5408_v31 = vmax.f32 %v4275_v25, %v4765_v26  ;;  %v3298_v32 = vpop.f32.mrf.mxu0  ;;  %v3788_v33 = vpop.f32.mrf.mxu1  ;;  %v6195_v42 = vmax.f32 %v5803_v29, %v5999_v37 }
 0x18f   :  { %v5213_v44 = vmax.f32 %v3298_v32, %v3788_v33 }
 0x190   :  { %v5604_v36 = vmax.f32 %v5212_v30, %v5408_v31 }
 0x191   :  { %3337 = vmatmul.bf16.gmra.mxu0 %v8382_v27  ;;  %3827 = vmatmul.bf16.gmra.mxu1 %v8480_v28 }
 0x192   :  { %v5804_v38 = vadd.f32 %v9531_v53, %v5604_v36  ;;  %4317 = vmatmul.bf16.gmra.mxu2 %v8578_v34  ;;  %4807 = vmatmul.bf16.gmra.mxu3 %v8676_v35 }
 0x194   :  { %v6000_v39 = vmul.f32 0.01, %v5804_v38 }
 0x195   :  { %v4278_v40 = vpop.f32.mrf.mxu2  ;;  %v4768_v41 = vpop.f32.mrf.mxu3 }
 0x196   :  { %v6196_v43 = vmax.f32 %v5804_v38, %v6000_v39  ;;  %v5409_v45 = vmax.f32 %v4278_v40, %v4768_v41  ;;  %v3300_v46 = vpop.f32.mrf.mxu0  ;;  %v3790_v47 = vpop.f32.mrf.mxu1  ;;  %v8483_v39 = vld [vmem:[%s11117_s0 + $0x3e0] sm:$0xff] }
 0x197   :  { %v5214_v56 = vmax.f32 %v3300_v46, %v3790_v47  ;;  %v9831_v40 = vld [vmem:[%s11118_s2] ss:$0 sm:$0xff]  ;;  %v8581_v46 = vld [vmem:[%s11117_s0 + $0x6f0] sm:$0xff] }
 0x198   :  { %v8832_v48 = vpack.c.bf16 %v6196_v43, %v6195_v42  ;;  %v5605_v49 = vmax.f32 %v5213_v44, %v5409_v45  ;;  %v8679_v47 = vld [vmem:[%s11117_s0 + $0xa00] sm:$0xff] }
 0x19a   :  { %9262 = vst [vmem:[%s11119_s3 + $0x70] sm:$0xff] %v8832_v48   ;;  %v5805_v55 = vadd.f32 %v9531_v53, %v5605_v49 }
 0x19c   :  { %v6001_v63 = vmul.f32 0.01, %v5805_v55 }
 0x19d   :  { %v4280_v50 = vpop.f32.mrf.mxu2  ;;  %v4770_v51 = vpop.f32.mrf.mxu3 }
 0x19e   :  { %v5410_v57 = vmax.f32 %v4280_v50, %v4770_v51  ;;  %v3303_v58 = vpop.f32.mrf.mxu0  ;;  %v3793_v59 = vpop.f32.mrf.mxu1  ;;  %v6197_v4 = vmax.f32 %v5805_v55, %v6001_v63 }
 0x19f   :  { %v5215_v6 = vmax.f32 %v3303_v58, %v3793_v59 }
 0x1a0   :  { %v5606_v62 = vmax.f32 %v5214_v56, %v5410_v57 }
 0x1a1   :  { %3342 = vmatmul.bf16.gmra.mxu0 %v8383_v52  ;;  %3832 = vmatmul.bf16.gmra.mxu1 %v8481_v54 }
 0x1a2   :  { %v5806_v0 = vadd.f32 %v9531_v53, %v5606_v62  ;;  %4322 = vmatmul.bf16.gmra.mxu2 %v8579_v60  ;;  %4812 = vmatmul.bf16.gmra.mxu3 %v8677_v61 }
 0x1a4   :  { %v6002_v1 = vmul.f32 0.01, %v5806_v0 }
 0x1a5   :  { %v4283_v2 = vpop.f32.mrf.mxu2  ;;  %v4773_v3 = vpop.f32.mrf.mxu3 }
 0x1a6   :  { %v6198_v5 = vmax.f32 %v5806_v0, %v6002_v1  ;;  %v5411_v7 = vmax.f32 %v4283_v2, %v4773_v3  ;;  %v3305_v8 = vpop.f32.mrf.mxu0  ;;  %v3795_v9 = vpop.f32.mrf.mxu1  ;;  %v8386_v1 = vld [vmem:[%s11117_s0 + $0xd8] sm:$0xff]  ;;  %v8484_v2 = vld [vmem:[%s11117_s0 + $0x3e8] sm:$0xff] }
 0x1a7   :  { %v5216_v17 = vmax.f32 %v3305_v8, %v3795_v9  ;;  %v8582_v8 = vld [vmem:[%s11117_s0 + $0x6f8] sm:$0xff]  ;;  %v8680_v9 = vld [vmem:[%s11117_s0 + $0xa08] sm:$0xff] }
 0x1a8   :  { %v8837_v10 = vpack.c.bf16 %v6198_v5, %v6197_v4  ;;  %v5607_v11 = vmax.f32 %v5215_v6, %v5411_v7 }
 0x1aa   :  { %9263 = vst [vmem:[%s11119_s3 + $0x78] sm:$0xff] %v8837_v10   ;;  %v5807_v16 = vadd.f32 %v9531_v53, %v5607_v11 }
 0x1ac   :  { %v6003_v24 = vmul.f32 0.01, %v5807_v16 }
 0x1ad   :  { %v4285_v12 = vpop.f32.mrf.mxu2  ;;  %v4775_v13 = vpop.f32.mrf.mxu3 }
 0x1ae   :  { %v5412_v18 = vmax.f32 %v4285_v12, %v4775_v13  ;;  %v3308_v19 = vpop.f32.mrf.mxu0  ;;  %v3798_v20 = vpop.f32.mrf.mxu1  ;;  %v6199_v29 = vmax.f32 %v5807_v16, %v6003_v24 }
 0x1af   :  { %v5217_v31 = vmax.f32 %v3308_v19, %v3798_v20 }
 0x1b0   :  { %v5608_v23 = vmax.f32 %v5216_v17, %v5412_v18 }
 0x1b1   :  { %3347 = vmatmul.bf16.gmra.mxu0 %v8384_v14  ;;  %3837 = vmatmul.bf16.gmra.mxu1 %v8482_v15 }
 0x1b2   :  { %v5808_v25 = vadd.f32 %v9531_v53, %v5608_v23  ;;  %4327 = vmatmul.bf16.gmra.mxu2 %v8580_v21  ;;  %4817 = vmatmul.bf16.gmra.mxu3 %v8678_v22  ;;  %v8385_v53 = vld [vmem:[%s11117_s0 + $0xd0] sm:$0xff] }
 0x1b4   :  { %v6004_v26 = vmul.f32 0.01, %v5808_v25 }
 0x1b5   :  { %v4288_v27 = vpop.f32.mrf.mxu2  ;;  %v4778_v28 = vpop.f32.mrf.mxu3 }
 0x1b6   :  { %v6200_v30 = vmax.f32 %v5808_v25, %v6004_v26  ;;  %v5413_v32 = vmax.f32 %v4288_v27, %v4778_v28  ;;  %v3310_v33 = vpop.f32.mrf.mxu0  ;;  %v3800_v34 = vpop.f32.mrf.mxu1  ;;  %v8387_v26 = vld [vmem:[%s11117_s0 + $0xe0] sm:$0xff]  ;;  %v8485_v27 = vld [vmem:[%s11117_s0 + $0x3f0] sm:$0xff] }
 0x1b7   :  { %v5218_v42 = vmax.f32 %v3310_v33, %v3800_v34  ;;  %v8583_v33 = vld [vmem:[%s11117_s0 + $0x700] sm:$0xff]  ;;  %v8681_v34 = vld [vmem:[%s11117_s0 + $0xa10] sm:$0xff] }
 0x1b8   :  { %v8842_v35 = vpack.c.bf16 %v6200_v30, %v6199_v29  ;;  %v5609_v36 = vmax.f32 %v5217_v31, %v5413_v32 }
 0x1ba   :  { %9264 = vst [vmem:[%s11119_s3 + $0x80] sm:$0xff] %v8842_v35   ;;  %v5809_v41 = vadd.f32 %v9831_v40, %v5609_v36 }
 0x1bc   :  { %v6005_v49 = vmul.f32 0.01, %v5809_v41 }
 0x1bd   :  { %v4290_v37 = vpop.f32.mrf.mxu2  ;;  %v4780_v38 = vpop.f32.mrf.mxu3 }
 0x1be   :  { %v5414_v43 = vmax.f32 %v4290_v37, %v4780_v38  ;;  %v3313_v44 = vpop.f32.mrf.mxu0  ;;  %v3803_v45 = vpop.f32.mrf.mxu1  ;;  %v6201_v55 = vmax.f32 %v5809_v41, %v6005_v49 }
 0x1bf   :  { %v5219_v57 = vmax.f32 %v3313_v44, %v3803_v45 }
 0x1c0   :  { %v5610_v48 = vmax.f32 %v5218_v42, %v5414_v43 }
 0x1c1   :  { %3352 = vmatmul.bf16.gmra.mxu0 %v8385_v53  ;;  %3842 = vmatmul.bf16.gmra.mxu1 %v8483_v39 }
 0x1c2   :  { %v5810_v50 = vadd.f32 %v9831_v40, %v5610_v48  ;;  %4332 = vmatmul.bf16.gmra.mxu2 %v8581_v46  ;;  %4822 = vmatmul.bf16.gmra.mxu3 %v8679_v47 }
 0x1c4   :  { %v6006_v51 = vmul.f32 0.01, %v5810_v50 }
 0x1c5   :  { %v4293_v52 = vpop.f32.mrf.mxu2  ;;  %v4783_v54 = vpop.f32.mrf.mxu3 }
 0x1c6   :  { %v6202_v56 = vmax.f32 %v5810_v50, %v6006_v51  ;;  %v5415_v58 = vmax.f32 %v4293_v52, %v4783_v54  ;;  %v3315_v59 = vpop.f32.mrf.mxu0  ;;  %v3805_v60 = vpop.f32.mrf.mxu1  ;;  %v8388_v51 = vld [vmem:[%s11117_s0 + $0xe8] sm:$0xff]  ;;  %v8486_v52 = vld [vmem:[%s11117_s0 + $0x3f8] sm:$0xff] }
 0x1c7   :  { %v5220_v4 = vmax.f32 %v3315_v59, %v3805_v60  ;;  %v8584_v59 = vld [vmem:[%s11117_s0 + $0x708] sm:$0xff]  ;;  %v8682_v60 = vld [vmem:[%s11117_s0 + $0xa18] sm:$0xff] }
 0x1c8   :  { %v8847_v61 = vpack.c.bf16 %v6202_v56, %v6201_v55  ;;  %v5611_v62 = vmax.f32 %v5219_v57, %v5415_v58 }
 0x1ca   :  { %9265 = vst [vmem:[%s11119_s3 + $0x88] sm:$0xff] %v8847_v61   ;;  %v5811_v3 = vadd.f32 %v9831_v40, %v5611_v62 }
 0x1cc   :  { %v6007_v11 = vmul.f32 0.01, %v5811_v3 }
 0x1cd   :  { %v4295_v63 = vpop.f32.mrf.mxu2  ;;  %v4785_v0 = vpop.f32.mrf.mxu3 }
 0x1ce   :  { %v5416_v5 = vmax.f32 %v4295_v63, %v4785_v0  ;;  %v3318_v6 = vpop.f32.mrf.mxu0  ;;  %v3808_v7 = vpop.f32.mrf.mxu1  ;;  %v6203_v16 = vmax.f32 %v5811_v3, %v6007_v11 }
 0x1cf   :  { %v5221_v18 = vmax.f32 %v3318_v6, %v3808_v7 }
 0x1d0   :  { %v5612_v10 = vmax.f32 %v5220_v4, %v5416_v5 }
 0x1d1   :  { %3357 = vmatmul.bf16.gmra.mxu0 %v8386_v1  ;;  %3847 = vmatmul.bf16.gmra.mxu1 %v8484_v2 }
 0x1d2   :  { %v5812_v12 = vadd.f32 %v9831_v40, %v5612_v10  ;;  %4337 = vmatmul.bf16.gmra.mxu2 %v8582_v8  ;;  %4827 = vmatmul.bf16.gmra.mxu3 %v8680_v9 }
 0x1d4   :  { %v6008_v13 = vmul.f32 0.01, %v5812_v12 }
 0x1d5   :  { %v4298_v14 = vpop.f32.mrf.mxu2  ;;  %v4788_v15 = vpop.f32.mrf.mxu3 }
 0x1d6   :  { %v6204_v17 = vmax.f32 %v5812_v12, %v6008_v13  ;;  %v5417_v19 = vmax.f32 %v4298_v14, %v4788_v15  ;;  %v3320_v20 = vpop.f32.mrf.mxu0  ;;  %v3810_v21 = vpop.f32.mrf.mxu1  ;;  %v8389_v13 = vld [vmem:[%s11117_s0 + $0xf0] sm:$0xff]  ;;  %v8487_v14 = vld [vmem:[%s11117_s0 + $0x400] sm:$0xff] }
 0x1d7   :  { %v5222_v29 = vmax.f32 %v3320_v20, %v3810_v21  ;;  %v8585_v20 = vld [vmem:[%s11117_s0 + $0x710] sm:$0xff]  ;;  %v8683_v21 = vld [vmem:[%s11117_s0 + $0xa20] sm:$0xff] }
 0x1d8   :  { %v8852_v22 = vpack.c.bf16 %v6204_v17, %v6203_v16  ;;  %v5613_v23 = vmax.f32 %v5221_v18, %v5417_v19 }
 0x1da   :  { %9266 = vst [vmem:[%s11119_s3 + $0x90] sm:$0xff] %v8852_v22   ;;  %v5813_v28 = vadd.f32 %v9831_v40, %v5613_v23 }
 0x1dc   :  { %v6009_v36 = vmul.f32 0.01, %v5813_v28 }
 0x1dd   :  { %v4300_v24 = vpop.f32.mrf.mxu2  ;;  %v4790_v25 = vpop.f32.mrf.mxu3 }
 0x1de   :  { %v5418_v30 = vmax.f32 %v4300_v24, %v4790_v25  ;;  %v3323_v31 = vpop.f32.mrf.mxu0  ;;  %v3813_v32 = vpop.f32.mrf.mxu1  ;;  %v6205_v41 = vmax.f32 %v5813_v28, %v6009_v36 }
 0x1df   :  { %v5223_v43 = vmax.f32 %v3323_v31, %v3813_v32 }
 0x1e0   :  { %v5614_v35 = vmax.f32 %v5222_v29, %v5418_v30 }
 0x1e1   :  { %3362 = vmatmul.bf16.gmra.mxu0 %v8387_v26  ;;  %3852 = vmatmul.bf16.gmra.mxu1 %v8485_v27 }
 0x1e2   :  { %v5814_v37 = vadd.f32 %v9831_v40, %v5614_v35  ;;  %4342 = vmatmul.bf16.gmra.mxu2 %v8583_v33  ;;  %4832 = vmatmul.bf16.gmra.mxu3 %v8681_v34 }
 0x1e4   :  { %v6010_v38 = vmul.f32 0.01, %v5814_v37 }
 0x1e5   :  { %v4303_v53 = vpop.f32.mrf.mxu2  ;;  %v4793_v39 = vpop.f32.mrf.mxu3 }
 0x1e6   :  { %v6206_v42 = vmax.f32 %v5814_v37, %v6010_v38  ;;  %v5419_v44 = vmax.f32 %v4303_v53, %v4793_v39  ;;  %v3325_v45 = vpop.f32.mrf.mxu0  ;;  %v3815_v46 = vpop.f32.mrf.mxu1  ;;  %v8390_v38 = vld [vmem:[%s11117_s0 + $0xf8] sm:$0xff]  ;;  %v8488_v53 = vld [vmem:[%s11117_s0 + $0x408] sm:$0xff] }
 0x1e7   :  { %v5224_v55 = vmax.f32 %v3325_v45, %v3815_v46  ;;  %v8586_v45 = vld [vmem:[%s11117_s0 + $0x718] sm:$0xff]  ;;  %v8684_v46 = vld [vmem:[%s11117_s0 + $0xa28] sm:$0xff] }
 0x1e8   :  { %v8857_v47 = vpack.c.bf16 %v6206_v42, %v6205_v41  ;;  %v5615_v48 = vmax.f32 %v5223_v43, %v5419_v44 }
 0x1ea   :  { %9267 = vst [vmem:[%s11119_s3 + $0x98] sm:$0xff] %v8857_v47   ;;  %v5815_v54 = vadd.f32 %v9831_v40, %v5615_v48 }
 0x1ec   :  { %v6011_v62 = vmul.f32 0.01, %v5815_v54 }
 0x1ed   :  { %v4305_v49 = vpop.f32.mrf.mxu2  ;;  %v4795_v50 = vpop.f32.mrf.mxu3 }
 0x1ee   :  { %v5420_v56 = vmax.f32 %v4305_v49, %v4795_v50  ;;  %v3328_v57 = vpop.f32.mrf.mxu0  ;;  %v3818_v58 = vpop.f32.mrf.mxu1  ;;  %v6207_v3 = vmax.f32 %v5815_v54, %v6011_v62 }
 0x1ef   :  { %v5225_v5 = vmax.f32 %v3328_v57, %v3818_v58 }
 0x1f0   :  { %v5616_v61 = vmax.f32 %v5224_v55, %v5420_v56 }
 0x1f1   :  { %3367 = vmatmul.bf16.gmra.mxu0 %v8388_v51  ;;  %3857 = vmatmul.bf16.gmra.mxu1 %v8486_v52 }
 0x1f2   :  { %v5816_v63 = vadd.f32 %v9831_v40, %v5616_v61  ;;  %4347 = vmatmul.bf16.gmra.mxu2 %v8584_v59  ;;  %4837 = vmatmul.bf16.gmra.mxu3 %v8682_v60 }
 0x1f4   :  { %v6012_v0 = vmul.f32 0.01, %v5816_v63 }
 0x1f5   :  { %v4308_v1 = vpop.f32.mrf.mxu2  ;;  %v4798_v2 = vpop.f32.mrf.mxu3 }
 0x1f6   :  { %v6208_v4 = vmax.f32 %v5816_v63, %v6012_v0  ;;  %v5421_v6 = vmax.f32 %v4308_v1, %v4798_v2  ;;  %v3330_v7 = vpop.f32.mrf.mxu0  ;;  %v3820_v8 = vpop.f32.mrf.mxu1  ;;  %v8391_v0 = vld [vmem:[%s11117_s0 + $0x100] sm:$0xff]  ;;  %v8489_v1 = vld [vmem:[%s11117_s0 + $0x410] sm:$0xff] }
 0x1f7   :  { %v5226_v16 = vmax.f32 %v3330_v7, %v3820_v8  ;;  %v8587_v7 = vld [vmem:[%s11117_s0 + $0x720] sm:$0xff]  ;;  %v8685_v8 = vld [vmem:[%s11117_s0 + $0xa30] sm:$0xff] }
 0x1f8   :  { %v8862_v9 = vpack.c.bf16 %v6208_v4, %v6207_v3  ;;  %v5617_v10 = vmax.f32 %v5225_v5, %v5421_v6 }
 0x1fa   :  { %9268 = vst [vmem:[%s11119_s3 + $0xa0] sm:$0xff] %v8862_v9   ;;  %v5817_v15 = vadd.f32 %v9831_v40, %v5617_v10 }
 0x1fc   :  { %v6013_v23 = vmul.f32 0.01, %v5817_v15 }
 0x1fd   :  { %v4310_v11 = vpop.f32.mrf.mxu2  ;;  %v4800_v12 = vpop.f32.mrf.mxu3 }
 0x1fe   :  { %v5422_v17 = vmax.f32 %v4310_v11, %v4800_v12  ;;  %v3333_v18 = vpop.f32.mrf.mxu0  ;;  %v3823_v19 = vpop.f32.mrf.mxu1  ;;  %v6209_v28 = vmax.f32 %v5817_v15, %v6013_v23 }
 0x1ff   :  { %v5227_v30 = vmax.f32 %v3333_v18, %v3823_v19 }
 0x200   :  { %v5618_v22 = vmax.f32 %v5226_v16, %v5422_v17 }
 0x201   :  { %3372 = vmatmul.bf16.gmra.mxu0 %v8389_v13  ;;  %3862 = vmatmul.bf16.gmra.mxu1 %v8487_v14 }
 0x202   :  { %v5818_v24 = vadd.f32 %v9831_v40, %v5618_v22  ;;  %4352 = vmatmul.bf16.gmra.mxu2 %v8585_v20  ;;  %4842 = vmatmul.bf16.gmra.mxu3 %v8683_v21 }
 0x204   :  { %v6014_v25 = vmul.f32 0.01, %v5818_v24 }
 0x205   :  { %v4313_v26 = vpop.f32.mrf.mxu2  ;;  %v4803_v27 = vpop.f32.mrf.mxu3 }
 0x206   :  { %v6210_v29 = vmax.f32 %v5818_v24, %v6014_v25  ;;  %v5423_v31 = vmax.f32 %v4313_v26, %v4803_v27  ;;  %v3335_v32 = vpop.f32.mrf.mxu0  ;;  %v3825_v33 = vpop.f32.mrf.mxu1  ;;  %v8392_v25 = vld [vmem:[%s11117_s0 + $0x108] sm:$0xff]  ;;  %v8490_v26 = vld [vmem:[%s11117_s0 + $0x418] sm:$0xff] }
 0x207   :  { %v5228_v41 = vmax.f32 %v3335_v32, %v3825_v33  ;;  %v8588_v32 = vld [vmem:[%s11117_s0 + $0x728] sm:$0xff]  ;;  %v8686_v33 = vld [vmem:[%s11117_s0 + $0xa38] sm:$0xff] }
 0x208   :  { %v8867_v34 = vpack.c.bf16 %v6210_v29, %v6209_v28  ;;  %v5619_v35 = vmax.f32 %v5227_v30, %v5423_v31 }
 0x20a   :  { %9269 = vst [vmem:[%s11119_s3 + $0xa8] sm:$0xff] %v8867_v34   ;;  %v5819_v39 = vadd.f32 %v9831_v40, %v5619_v35 }
 0x20c   :  { %v6015_v48 = vmul.f32 0.01, %v5819_v39 }
 0x20d   :  { %v4315_v36 = vpop.f32.mrf.mxu2  ;;  %v4805_v37 = vpop.f32.mrf.mxu3 }
 0x20e   :  { %v5424_v42 = vmax.f32 %v4315_v36, %v4805_v37  ;;  %v3338_v43 = vpop.f32.mrf.mxu0  ;;  %v3828_v44 = vpop.f32.mrf.mxu1  ;;  %v6211_v54 = vmax.f32 %v5819_v39, %v6015_v48 }
 0x20f   :  { %v5229_v56 = vmax.f32 %v3338_v43, %v3828_v44 }
 0x210   :  { %v5620_v47 = vmax.f32 %v5228_v41, %v5424_v42 }
 0x211   :  { %3377 = vmatmul.bf16.gmra.mxu0 %v8390_v38  ;;  %3867 = vmatmul.bf16.gmra.mxu1 %v8488_v53 }
 0x212   :  { %v5820_v49 = vadd.f32 %v9831_v40, %v5620_v47  ;;  %4357 = vmatmul.bf16.gmra.mxu2 %v8586_v45  ;;  %4847 = vmatmul.bf16.gmra.mxu3 %v8684_v46 }
 0x214   :  { %v6016_v50 = vmul.f32 0.01, %v5820_v49 }
 0x215   :  { %v4318_v51 = vpop.f32.mrf.mxu2  ;;  %v4808_v52 = vpop.f32.mrf.mxu3 }
 0x216   :  { %v6212_v55 = vmax.f32 %v5820_v49, %v6016_v50  ;;  %v5425_v57 = vmax.f32 %v4318_v51, %v4808_v52  ;;  %v3340_v58 = vpop.f32.mrf.mxu0  ;;  %v3830_v59 = vpop.f32.mrf.mxu1  ;;  %v8393_v50 = vld [vmem:[%s11117_s0 + $0x110] sm:$0xff]  ;;  %v8491_v51 = vld [vmem:[%s11117_s0 + $0x420] sm:$0xff] }
 0x217   :  { %v5230_v3 = vmax.f32 %v3340_v58, %v3830_v59  ;;  %v8589_v58 = vld [vmem:[%s11117_s0 + $0x730] sm:$0xff]  ;;  %v8687_v59 = vld [vmem:[%s11117_s0 + $0xa40] sm:$0xff] }
 0x218   :  { %v8872_v60 = vpack.c.bf16 %v6212_v55, %v6211_v54  ;;  %v5621_v61 = vmax.f32 %v5229_v56, %v5425_v57 }
 0x21a   :  { %9270 = vst [vmem:[%s11119_s3 + $0xb0] sm:$0xff] %v8872_v60   ;;  %v5821_v2 = vadd.f32 %v9831_v40, %v5621_v61 }
 0x21c   :  { %v6017_v10 = vmul.f32 0.01, %v5821_v2 }
 0x21d   :  { %v4320_v62 = vpop.f32.mrf.mxu2  ;;  %v4810_v63 = vpop.f32.mrf.mxu3 }
 0x21e   :  { %v5426_v4 = vmax.f32 %v4320_v62, %v4810_v63  ;;  %v3343_v5 = vpop.f32.mrf.mxu0  ;;  %v3833_v6 = vpop.f32.mrf.mxu1  ;;  %v6213_v15 = vmax.f32 %v5821_v2, %v6017_v10 }
 0x21f   :  { %v5231_v17 = vmax.f32 %v3343_v5, %v3833_v6 }
 0x220   :  { %v5622_v9 = vmax.f32 %v5230_v3, %v5426_v4 }
 0x221   :  { %3382 = vmatmul.bf16.gmra.mxu0 %v8391_v0  ;;  %3872 = vmatmul.bf16.gmra.mxu1 %v8489_v1 }
 0x222   :  { %v5822_v11 = vadd.f32 %v9831_v40, %v5622_v9  ;;  %4362 = vmatmul.bf16.gmra.mxu2 %v8587_v7  ;;  %4852 = vmatmul.bf16.gmra.mxu3 %v8685_v8 }
 0x224   :  { %v6018_v12 = vmul.f32 0.01, %v5822_v11 }
 0x225   :  { %v4323_v13 = vpop.f32.mrf.mxu2  ;;  %v4813_v14 = vpop.f32.mrf.mxu3 }
 0x226   :  { %v6214_v16 = vmax.f32 %v5822_v11, %v6018_v12  ;;  %v5427_v18 = vmax.f32 %v4323_v13, %v4813_v14  ;;  %v3345_v19 = vpop.f32.mrf.mxu0  ;;  %v3835_v20 = vpop.f32.mrf.mxu1  ;;  %v8394_v12 = vld [vmem:[%s11117_s0 + $0x118] sm:$0xff]  ;;  %v8492_v13 = vld [vmem:[%s11117_s0 + $0x428] sm:$0xff] }
 0x227   :  { %v5232_v28 = vmax.f32 %v3345_v19, %v3835_v20  ;;  %v8590_v19 = vld [vmem:[%s11117_s0 + $0x738] sm:$0xff]  ;;  %v8688_v20 = vld [vmem:[%s11117_s0 + $0xa48] sm:$0xff] }
 0x228   :  { %v8877_v21 = vpack.c.bf16 %v6214_v16, %v6213_v15  ;;  %v5623_v22 = vmax.f32 %v5231_v17, %v5427_v18 }
 0x22a   :  { %9271 = vst [vmem:[%s11119_s3 + $0xb8] sm:$0xff] %v8877_v21   ;;  %v5823_v27 = vadd.f32 %v9831_v40, %v5623_v22 }
 0x22c   :  { %v6019_v35 = vmul.f32 0.01, %v5823_v27 }
 0x22d   :  { %v4325_v23 = vpop.f32.mrf.mxu2  ;;  %v4815_v24 = vpop.f32.mrf.mxu3 }
 0x22e   :  { %v5428_v29 = vmax.f32 %v4325_v23, %v4815_v24  ;;  %v3348_v30 = vpop.f32.mrf.mxu0  ;;  %v3838_v31 = vpop.f32.mrf.mxu1  ;;  %v6215_v39 = vmax.f32 %v5823_v27, %v6019_v35 }
 0x22f   :  { %v5233_v42 = vmax.f32 %v3348_v30, %v3838_v31 }
 0x230   :  { %v5624_v34 = vmax.f32 %v5232_v28, %v5428_v29 }
 0x231   :  { %3387 = vmatmul.bf16.gmra.mxu0 %v8392_v25  ;;  %3877 = vmatmul.bf16.gmra.mxu1 %v8490_v26 }
 0x232   :  { %v5824_v36 = vadd.f32 %v9831_v40, %v5624_v34  ;;  %4367 = vmatmul.bf16.gmra.mxu2 %v8588_v32  ;;  %4857 = vmatmul.bf16.gmra.mxu3 %v8686_v33 }
 0x234   :  { %v6020_v37 = vmul.f32 0.01, %v5824_v36 }
 0x235   :  { %v4328_v38 = vpop.f32.mrf.mxu2  ;;  %v4818_v53 = vpop.f32.mrf.mxu3 }
 0x236   :  { %v6216_v41 = vmax.f32 %v5824_v36, %v6020_v37  ;;  %v5429_v43 = vmax.f32 %v4328_v38, %v4818_v53  ;;  %v3350_v44 = vpop.f32.mrf.mxu0  ;;  %v3840_v45 = vpop.f32.mrf.mxu1  ;;  %v8395_v37 = vld [vmem:[%s11117_s0 + $0x120] sm:$0xff]  ;;  %v8493_v38 = vld [vmem:[%s11117_s0 + $0x430] sm:$0xff] }
 0x237   :  { %v5234_v54 = vmax.f32 %v3350_v44, %v3840_v45  ;;  %v8591_v44 = vld [vmem:[%s11117_s0 + $0x740] sm:$0xff]  ;;  %v8689_v45 = vld [vmem:[%s11117_s0 + $0xa50] sm:$0xff] }
 0x238   :  { %v8882_v46 = vpack.c.bf16 %v6216_v41, %v6215_v39  ;;  %v5625_v47 = vmax.f32 %v5233_v42, %v5429_v43 }
 0x23a   :  { %9272 = vst [vmem:[%s11119_s3 + $0xc0] sm:$0xff] %v8882_v46   ;;  %v5825_v52 = vadd.f32 %v9831_v40, %v5625_v47 }
 0x23c   :  { %v6021_v61 = vmul.f32 0.01, %v5825_v52 }
 0x23d   :  { %v4330_v48 = vpop.f32.mrf.mxu2  ;;  %v4820_v49 = vpop.f32.mrf.mxu3 }
 0x23e   :  { %v5430_v55 = vmax.f32 %v4330_v48, %v4820_v49  ;;  %v3353_v56 = vpop.f32.mrf.mxu0  ;;  %v3843_v57 = vpop.f32.mrf.mxu1  ;;  %v6217_v2 = vmax.f32 %v5825_v52, %v6021_v61 }
 0x23f   :  { %v5235_v4 = vmax.f32 %v3353_v56, %v3843_v57 }
 0x240   :  { %v5626_v60 = vmax.f32 %v5234_v54, %v5430_v55 }
 0x241   :  { %3392 = vmatmul.bf16.gmra.mxu0 %v8393_v50  ;;  %3882 = vmatmul.bf16.gmra.mxu1 %v8491_v51 }
 0x242   :  { %v5826_v62 = vadd.f32 %v9831_v40, %v5626_v60  ;;  %4372 = vmatmul.bf16.gmra.mxu2 %v8589_v58  ;;  %4862 = vmatmul.bf16.gmra.mxu3 %v8687_v59 }
 0x244   :  { %v6022_v63 = vmul.f32 0.01, %v5826_v62 }
 0x245   :  { %v4333_v0 = vpop.f32.mrf.mxu2  ;;  %v4823_v1 = vpop.f32.mrf.mxu3 }
 0x246   :  { %v6218_v3 = vmax.f32 %v5826_v62, %v6022_v63  ;;  %v5431_v5 = vmax.f32 %v4333_v0, %v4823_v1  ;;  %v3355_v6 = vpop.f32.mrf.mxu0  ;;  %v3845_v7 = vpop.f32.mrf.mxu1  ;;  %v8396_v63 = vld [vmem:[%s11117_s0 + $0x128] sm:$0xff]  ;;  %v8494_v0 = vld [vmem:[%s11117_s0 + $0x438] sm:$0xff] }
 0x247   :  { %v5236_v15 = vmax.f32 %v3355_v6, %v3845_v7  ;;  %v8592_v6 = vld [vmem:[%s11117_s0 + $0x748] sm:$0xff]  ;;  %v8690_v7 = vld [vmem:[%s11117_s0 + $0xa58] sm:$0xff] }
 0x248   :  { %v8887_v8 = vpack.c.bf16 %v6218_v3, %v6217_v2  ;;  %v5627_v9 = vmax.f32 %v5235_v4, %v5431_v5 }
 0x24a   :  { %9273 = vst [vmem:[%s11119_s3 + $0xc8] sm:$0xff] %v8887_v8   ;;  %v5827_v14 = vadd.f32 %v9831_v40, %v5627_v9 }
 0x24c   :  { %v6023_v22 = vmul.f32 0.01, %v5827_v14 }
 0x24d   :  { %v4335_v10 = vpop.f32.mrf.mxu2  ;;  %v4825_v11 = vpop.f32.mrf.mxu3 }
 0x24e   :  { %v5432_v16 = vmax.f32 %v4335_v10, %v4825_v11  ;;  %v3358_v17 = vpop.f32.mrf.mxu0  ;;  %v3848_v18 = vpop.f32.mrf.mxu1  ;;  %v6219_v27 = vmax.f32 %v5827_v14, %v6023_v22 }
 0x24f   :  { %v5237_v29 = vmax.f32 %v3358_v17, %v3848_v18 }
 0x250   :  { %v5628_v21 = vmax.f32 %v5236_v15, %v5432_v16 }
 0x251   :  { %3397 = vmatmul.bf16.gmra.mxu0 %v8394_v12  ;;  %3887 = vmatmul.bf16.gmra.mxu1 %v8492_v13 }
 0x252   :  { %v5828_v23 = vadd.f32 %v9831_v40, %v5628_v21  ;;  %4377 = vmatmul.bf16.gmra.mxu2 %v8590_v19  ;;  %4867 = vmatmul.bf16.gmra.mxu3 %v8688_v20 }
 0x254   :  { %v6024_v24 = vmul.f32 0.01, %v5828_v23 }
 0x255   :  { %v4338_v25 = vpop.f32.mrf.mxu2  ;;  %v4828_v26 = vpop.f32.mrf.mxu3 }
 0x256   :  { %v6220_v28 = vmax.f32 %v5828_v23, %v6024_v24  ;;  %v5433_v30 = vmax.f32 %v4338_v25, %v4828_v26  ;;  %v3360_v31 = vpop.f32.mrf.mxu0  ;;  %v3850_v32 = vpop.f32.mrf.mxu1  ;;  %v8397_v24 = vld [vmem:[%s11117_s0 + $0x130] sm:$0xff]  ;;  %v8495_v25 = vld [vmem:[%s11117_s0 + $0x440] sm:$0xff] }
 0x257   :  { %v5238_v39 = vmax.f32 %v3360_v31, %v3850_v32  ;;  %v8593_v31 = vld [vmem:[%s11117_s0 + $0x750] sm:$0xff]  ;;  %v8691_v32 = vld [vmem:[%s11117_s0 + $0xa60] sm:$0xff] }
 0x258   :  { %v8892_v33 = vpack.c.bf16 %v6220_v28, %v6219_v27  ;;  %v5629_v34 = vmax.f32 %v5237_v29, %v5433_v30 }
 0x25a   :  { %9274 = vst [vmem:[%s11119_s3 + $0xd0] sm:$0xff] %v8892_v33   ;;  %v5829_v53 = vadd.f32 %v9831_v40, %v5629_v34 }
 0x25c   :  { %v6025_v47 = vmul.f32 0.01, %v5829_v53 }
 0x25d   :  { %v4340_v35 = vpop.f32.mrf.mxu2  ;;  %v4830_v36 = vpop.f32.mrf.mxu3 }
 0x25e   :  { %v5434_v41 = vmax.f32 %v4340_v35, %v4830_v36  ;;  %v3363_v42 = vpop.f32.mrf.mxu0  ;;  %v3853_v43 = vpop.f32.mrf.mxu1  ;;  %v6221_v52 = vmax.f32 %v5829_v53, %v6025_v47 }
 0x25f   :  { %v5239_v55 = vmax.f32 %v3363_v42, %v3853_v43 }
 0x260   :  { %v5630_v46 = vmax.f32 %v5238_v39, %v5434_v41 }
 0x261   :  { %3402 = vmatmul.bf16.gmra.mxu0 %v8395_v37  ;;  %3892 = vmatmul.bf16.gmra.mxu1 %v8493_v38 }
 0x262   :  { %v5830_v48 = vadd.f32 %v9831_v40, %v5630_v46  ;;  %4382 = vmatmul.bf16.gmra.mxu2 %v8591_v44  ;;  %4872 = vmatmul.bf16.gmra.mxu3 %v8689_v45 }
 0x264   :  { %v6026_v49 = vmul.f32 0.01, %v5830_v48 }
 0x265   :  { %v4343_v50 = vpop.f32.mrf.mxu2  ;;  %v4833_v51 = vpop.f32.mrf.mxu3 }
 0x266   :  { %v6222_v54 = vmax.f32 %v5830_v48, %v6026_v49  ;;  %v5435_v56 = vmax.f32 %v4343_v50, %v4833_v51  ;;  %v3365_v57 = vpop.f32.mrf.mxu0  ;;  %v3855_v58 = vpop.f32.mrf.mxu1  ;;  %v8398_v49 = vld [vmem:[%s11117_s0 + $0x138] sm:$0xff]  ;;  %v8496_v50 = vld [vmem:[%s11117_s0 + $0x448] sm:$0xff] }
 0x267   :  { %v5240_v2 = vmax.f32 %v3365_v57, %v3855_v58  ;;  %v8594_v57 = vld [vmem:[%s11117_s0 + $0x758] sm:$0xff]  ;;  %v8692_v58 = vld [vmem:[%s11117_s0 + $0xa68] sm:$0xff] }
 0x268   :  { %v8897_v59 = vpack.c.bf16 %v6222_v54, %v6221_v52  ;;  %v5631_v60 = vmax.f32 %v5239_v55, %v5435_v56 }
 0x26a   :  { %9275 = vst [vmem:[%s11119_s3 + $0xd8] sm:$0xff] %v8897_v59   ;;  %v5831_v1 = vadd.f32 %v9831_v40, %v5631_v60 }
 0x26c   :  { %v6027_v9 = vmul.f32 0.01, %v5831_v1 }
 0x26d   :  { %v4345_v61 = vpop.f32.mrf.mxu2  ;;  %v4835_v62 = vpop.f32.mrf.mxu3 }
 0x26e   :  { %v5436_v3 = vmax.f32 %v4345_v61, %v4835_v62  ;;  %v3368_v4 = vpop.f32.mrf.mxu0  ;;  %v3858_v5 = vpop.f32.mrf.mxu1  ;;  %v6223_v14 = vmax.f32 %v5831_v1, %v6027_v9 }
 0x26f   :  { %v5241_v16 = vmax.f32 %v3368_v4, %v3858_v5 }
 0x270   :  { %v5632_v8 = vmax.f32 %v5240_v2, %v5436_v3 }
 0x271   :  { %3407 = vmatmul.bf16.gmra.mxu0 %v8396_v63  ;;  %3897 = vmatmul.bf16.gmra.mxu1 %v8494_v0 }
 0x272   :  { %v5832_v10 = vadd.f32 %v9831_v40, %v5632_v8  ;;  %4387 = vmatmul.bf16.gmra.mxu2 %v8592_v6  ;;  %4877 = vmatmul.bf16.gmra.mxu3 %v8690_v7 }
 0x274   :  { %v6028_v11 = vmul.f32 0.01, %v5832_v10 }
 0x275   :  { %v4348_v12 = vpop.f32.mrf.mxu2  ;;  %v4838_v13 = vpop.f32.mrf.mxu3 }
 0x276   :  { %v6224_v15 = vmax.f32 %v5832_v10, %v6028_v11  ;;  %v5437_v17 = vmax.f32 %v4348_v12, %v4838_v13  ;;  %v3370_v18 = vpop.f32.mrf.mxu0  ;;  %v3860_v19 = vpop.f32.mrf.mxu1  ;;  %v8399_v11 = vld [vmem:[%s11117_s0 + $0x140] sm:$0xff]  ;;  %v8497_v12 = vld [vmem:[%s11117_s0 + $0x450] sm:$0xff] }
 0x277   :  { %v5242_v27 = vmax.f32 %v3370_v18, %v3860_v19  ;;  %v8595_v18 = vld [vmem:[%s11117_s0 + $0x760] sm:$0xff]  ;;  %v8693_v19 = vld [vmem:[%s11117_s0 + $0xa70] sm:$0xff] }
 0x278   :  { %v8902_v20 = vpack.c.bf16 %v6224_v15, %v6223_v14  ;;  %v5633_v21 = vmax.f32 %v5241_v16, %v5437_v17 }
 0x27a   :  { %9276 = vst [vmem:[%s11119_s3 + $0xe0] sm:$0xff] %v8902_v20   ;;  %v5833_v26 = vadd.f32 %v9831_v40, %v5633_v21 }
 0x27c   :  { %v6029_v34 = vmul.f32 0.01, %v5833_v26 }
 0x27d   :  { %v4350_v22 = vpop.f32.mrf.mxu2  ;;  %v4840_v23 = vpop.f32.mrf.mxu3 }
 0x27e   :  { %v5438_v28 = vmax.f32 %v4350_v22, %v4840_v23  ;;  %v3373_v29 = vpop.f32.mrf.mxu0  ;;  %v3863_v30 = vpop.f32.mrf.mxu1  ;;  %v6225_v53 = vmax.f32 %v5833_v26, %v6029_v34 }
 0x27f   :  { %v5243_v41 = vmax.f32 %v3373_v29, %v3863_v30 }
 0x280   :  { %v5634_v33 = vmax.f32 %v5242_v27, %v5438_v28 }
 0x281   :  { %3412 = vmatmul.bf16.gmra.mxu0 %v8397_v24  ;;  %3902 = vmatmul.bf16.gmra.mxu1 %v8495_v25 }
 0x282   :  { %v5834_v35 = vadd.f32 %v9831_v40, %v5634_v33  ;;  %4392 = vmatmul.bf16.gmra.mxu2 %v8593_v31  ;;  %4882 = vmatmul.bf16.gmra.mxu3 %v8691_v32 }
 0x284   :  { %v6030_v36 = vmul.f32 0.01, %v5834_v35 }
 0x285   :  { %v4353_v37 = vpop.f32.mrf.mxu2  ;;  %v4843_v38 = vpop.f32.mrf.mxu3 }
 0x286   :  { %v6226_v39 = vmax.f32 %v5834_v35, %v6030_v36  ;;  %v5439_v42 = vmax.f32 %v4353_v37, %v4843_v38  ;;  %v3375_v43 = vpop.f32.mrf.mxu0  ;;  %v3865_v44 = vpop.f32.mrf.mxu1  ;;  %v8400_v36 = vld [vmem:[%s11117_s0 + $0x148] sm:$0xff]  ;;  %v8498_v37 = vld [vmem:[%s11117_s0 + $0x458] sm:$0xff] }
 0x287   :  { %v5244_v52 = vmax.f32 %v3375_v43, %v3865_v44  ;;  %v8596_v43 = vld [vmem:[%s11117_s0 + $0x768] sm:$0xff]  ;;  %v8694_v44 = vld [vmem:[%s11117_s0 + $0xa78] sm:$0xff] }
 0x288   :  { %v8907_v45 = vpack.c.bf16 %v6226_v39, %v6225_v53  ;;  %v5635_v46 = vmax.f32 %v5243_v41, %v5439_v42 }
 0x28a   :  { %9277 = vst [vmem:[%s11119_s3 + $0xe8] sm:$0xff] %v8907_v45   ;;  %v5835_v51 = vadd.f32 %v9831_v40, %v5635_v46 }
 0x28c   :  { %v6031_v60 = vmul.f32 0.01, %v5835_v51 }
 0x28d   :  { %v4355_v47 = vpop.f32.mrf.mxu2  ;;  %v4845_v48 = vpop.f32.mrf.mxu3 }
 0x28e   :  { %v5440_v54 = vmax.f32 %v4355_v47, %v4845_v48  ;;  %v3378_v55 = vpop.f32.mrf.mxu0  ;;  %v3868_v56 = vpop.f32.mrf.mxu1  ;;  %v6227_v1 = vmax.f32 %v5835_v51, %v6031_v60 }
 0x28f   :  { %v5245_v3 = vmax.f32 %v3378_v55, %v3868_v56 }
 0x290   :  { %v5636_v59 = vmax.f32 %v5244_v52, %v5440_v54 }
 0x291   :  { %3417 = vmatmul.bf16.gmra.mxu0 %v8398_v49  ;;  %3907 = vmatmul.bf16.gmra.mxu1 %v8496_v50 }
 0x292   :  { %v5836_v61 = vadd.f32 %v9831_v40, %v5636_v59  ;;  %4397 = vmatmul.bf16.gmra.mxu2 %v8594_v57  ;;  %4887 = vmatmul.bf16.gmra.mxu3 %v8692_v58 }
 0x294   :  { %v6032_v62 = vmul.f32 0.01, %v5836_v61 }
 0x295   :  { %v4358_v63 = vpop.f32.mrf.mxu2  ;;  %v4848_v0 = vpop.f32.mrf.mxu3 }
 0x296   :  { %v6228_v2 = vmax.f32 %v5836_v61, %v6032_v62  ;;  %v5441_v4 = vmax.f32 %v4358_v63, %v4848_v0  ;;  %v3380_v5 = vpop.f32.mrf.mxu0  ;;  %v3870_v6 = vpop.f32.mrf.mxu1  ;;  %v8401_v62 = vld [vmem:[%s11117_s0 + $0x150] sm:$0xff]  ;;  %v8499_v63 = vld [vmem:[%s11117_s0 + $0x460] sm:$0xff] }
 0x297   :  { %v5246_v14 = vmax.f32 %v3380_v5, %v3870_v6  ;;  %v8597_v5 = vld [vmem:[%s11117_s0 + $0x770] sm:$0xff]  ;;  %v8695_v6 = vld [vmem:[%s11117_s0 + $0xa80] sm:$0xff] }
 0x298   :  { %v8912_v7 = vpack.c.bf16 %v6228_v2, %v6227_v1  ;;  %v5637_v8 = vmax.f32 %v5245_v3, %v5441_v4 }
 0x29a   :  { %9278 = vst [vmem:[%s11119_s3 + $0xf0] sm:$0xff] %v8912_v7   ;;  %v5837_v13 = vadd.f32 %v9831_v40, %v5637_v8 }
 0x29c   :  { %v6033_v21 = vmul.f32 0.01, %v5837_v13 }
 0x29d   :  { %v4360_v9 = vpop.f32.mrf.mxu2  ;;  %v4850_v10 = vpop.f32.mrf.mxu3 }
 0x29e   :  { %v5442_v15 = vmax.f32 %v4360_v9, %v4850_v10  ;;  %v3383_v16 = vpop.f32.mrf.mxu0  ;;  %v3873_v17 = vpop.f32.mrf.mxu1  ;;  %v6229_v26 = vmax.f32 %v5837_v13, %v6033_v21 }
 0x29f   :  { %v5247_v28 = vmax.f32 %v3383_v16, %v3873_v17 }
 0x2a0   :  { %v5638_v20 = vmax.f32 %v5246_v14, %v5442_v15 }
 0x2a1   :  { %3422 = vmatmul.bf16.gmra.mxu0 %v8399_v11  ;;  %3912 = vmatmul.bf16.gmra.mxu1 %v8497_v12 }
 0x2a2   :  { %v5838_v22 = vadd.f32 %v9831_v40, %v5638_v20  ;;  %4402 = vmatmul.bf16.gmra.mxu2 %v8595_v18  ;;  %4892 = vmatmul.bf16.gmra.mxu3 %v8693_v19 }
 0x2a4   :  { %v6034_v23 = vmul.f32 0.01, %v5838_v22 }
 0x2a5   :  { %v4363_v24 = vpop.f32.mrf.mxu2  ;;  %v4853_v25 = vpop.f32.mrf.mxu3 }
 0x2a6   :  { %v6230_v27 = vmax.f32 %v5838_v22, %v6034_v23  ;;  %v5443_v29 = vmax.f32 %v4363_v24, %v4853_v25  ;;  %v3385_v30 = vpop.f32.mrf.mxu0  ;;  %v3875_v31 = vpop.f32.mrf.mxu1  ;;  %v8402_v23 = vld [vmem:[%s11117_s0 + $0x158] sm:$0xff]  ;;  %v8500_v24 = vld [vmem:[%s11117_s0 + $0x468] sm:$0xff] }
 0x2a7   :  { %v5248_v53 = vmax.f32 %v3385_v30, %v3875_v31  ;;  %v8598_v30 = vld [vmem:[%s11117_s0 + $0x778] sm:$0xff]  ;;  %v8696_v31 = vld [vmem:[%s11117_s0 + $0xa88] sm:$0xff] }
 0x2a8   :  { %v8917_v32 = vpack.c.bf16 %v6230_v27, %v6229_v26  ;;  %v5639_v33 = vmax.f32 %v5247_v28, %v5443_v29 }
 0x2aa   :  { %9279 = vst [vmem:[%s11119_s3 + $0xf8] sm:$0xff] %v8917_v32   ;;  %v5839_v38 = vadd.f32 %v9831_v40, %v5639_v33 }
 0x2ac   :  { %v6035_v46 = vmul.f32 0.01, %v5839_v38 }
 0x2ad   :  { %v4365_v34 = vpop.f32.mrf.mxu2  ;;  %v4855_v35 = vpop.f32.mrf.mxu3 }
 0x2ae   :  { %v5444_v39 = vmax.f32 %v4365_v34, %v4855_v35  ;;  %v3388_v41 = vpop.f32.mrf.mxu0  ;;  %v3878_v42 = vpop.f32.mrf.mxu1  ;;  %v6231_v51 = vmax.f32 %v5839_v38, %v6035_v46 }
 0x2af   :  { %v5249_v54 = vmax.f32 %v3388_v41, %v3878_v42 }
 0x2b0   :  { %v5640_v45 = vmax.f32 %v5248_v53, %v5444_v39 }
 0x2b1   :  { %3427 = vmatmul.bf16.gmra.mxu0 %v8400_v36  ;;  %3917 = vmatmul.bf16.gmra.mxu1 %v8498_v37 }
 0x2b2   :  { %v5840_v47 = vadd.f32 %v9831_v40, %v5640_v45  ;;  %4407 = vmatmul.bf16.gmra.mxu2 %v8596_v43  ;;  %4897 = vmatmul.bf16.gmra.mxu3 %v8694_v44 }
 0x2b4   :  { %v6036_v48 = vmul.f32 0.01, %v5840_v47 }
 0x2b5   :  { %v4368_v49 = vpop.f32.mrf.mxu2  ;;  %v4858_v50 = vpop.f32.mrf.mxu3 }
 0x2b6   :  { %v6232_v52 = vmax.f32 %v5840_v47, %v6036_v48  ;;  %v5445_v55 = vmax.f32 %v4368_v49, %v4858_v50  ;;  %v3390_v56 = vpop.f32.mrf.mxu0  ;;  %v3880_v57 = vpop.f32.mrf.mxu1  ;;  %v8403_v48 = vld [vmem:[%s11117_s0 + $0x160] sm:$0xff]  ;;  %v8501_v49 = vld [vmem:[%s11117_s0 + $0x470] sm:$0xff] }
 0x2b7   :  { %v5250_v1 = vmax.f32 %v3390_v56, %v3880_v57  ;;  %v8599_v56 = vld [vmem:[%s11117_s0 + $0x780] sm:$0xff]  ;;  %v8697_v57 = vld [vmem:[%s11117_s0 + $0xa90] sm:$0xff] }
 0x2b8   :  { %v8922_v58 = vpack.c.bf16 %v6232_v52, %v6231_v51  ;;  %v5641_v59 = vmax.f32 %v5249_v54, %v5445_v55 }
 0x2ba   :  { %9280 = vst [vmem:[%s11119_s3 + $0x100] sm:$0xff] %v8922_v58   ;;  %v5841_v0 = vadd.f32 %v9831_v40, %v5641_v59 }
 0x2bc   :  { %v6037_v8 = vmul.f32 0.01, %v5841_v0 }
 0x2bd   :  { %v4370_v60 = vpop.f32.mrf.mxu2  ;;  %v4860_v61 = vpop.f32.mrf.mxu3 }
 0x2be   :  { %v5446_v2 = vmax.f32 %v4370_v60, %v4860_v61  ;;  %v3393_v3 = vpop.f32.mrf.mxu0  ;;  %v3883_v4 = vpop.f32.mrf.mxu1  ;;  %v6233_v13 = vmax.f32 %v5841_v0, %v6037_v8 }
 0x2bf   :  { %v5251_v15 = vmax.f32 %v3393_v3, %v3883_v4 }
 0x2c0   :  { %v5642_v7 = vmax.f32 %v5250_v1, %v5446_v2 }
 0x2c1   :  { %3432 = vmatmul.bf16.gmra.mxu0 %v8401_v62  ;;  %3922 = vmatmul.bf16.gmra.mxu1 %v8499_v63 }
 0x2c2   :  { %v5842_v9 = vadd.f32 %v9831_v40, %v5642_v7  ;;  %4412 = vmatmul.bf16.gmra.mxu2 %v8597_v5  ;;  %4902 = vmatmul.bf16.gmra.mxu3 %v8695_v6 }
 0x2c4   :  { %v6038_v10 = vmul.f32 0.01, %v5842_v9 }
 0x2c5   :  { %v4373_v11 = vpop.f32.mrf.mxu2  ;;  %v4863_v12 = vpop.f32.mrf.mxu3 }
 0x2c6   :  { %v6234_v14 = vmax.f32 %v5842_v9, %v6038_v10  ;;  %v5447_v16 = vmax.f32 %v4373_v11, %v4863_v12  ;;  %v3395_v17 = vpop.f32.mrf.mxu0  ;;  %v3885_v18 = vpop.f32.mrf.mxu1  ;;  %v8404_v10 = vld [vmem:[%s11117_s0 + $0x168] sm:$0xff]  ;;  %v8502_v11 = vld [vmem:[%s11117_s0 + $0x478] sm:$0xff] }
 0x2c7   :  { %v5252_v26 = vmax.f32 %v3395_v17, %v3885_v18  ;;  %v8600_v17 = vld [vmem:[%s11117_s0 + $0x788] sm:$0xff]  ;;  %v8698_v18 = vld [vmem:[%s11117_s0 + $0xa98] sm:$0xff] }
 0x2c8   :  { %v8927_v19 = vpack.c.bf16 %v6234_v14, %v6233_v13  ;;  %v5643_v20 = vmax.f32 %v5251_v15, %v5447_v16 }
 0x2ca   :  { %9281 = vst [vmem:[%s11119_s3 + $0x108] sm:$0xff] %v8927_v19   ;;  %v5843_v25 = vadd.f32 %v9831_v40, %v5643_v20  ;;  %v10132_v40 = vld [vmem:[%s11118_s2] ss:$0 sm:$0xff] }
 0x2cc   :  { %v6039_v33 = vmul.f32 0.01, %v5843_v25 }
 0x2cd   :  { %v4375_v21 = vpop.f32.mrf.mxu2  ;;  %v4865_v22 = vpop.f32.mrf.mxu3 }
 0x2ce   :  { %v5448_v27 = vmax.f32 %v4375_v21, %v4865_v22  ;;  %v3398_v28 = vpop.f32.mrf.mxu0  ;;  %v3888_v29 = vpop.f32.mrf.mxu1  ;;  %v6235_v38 = vmax.f32 %v5843_v25, %v6039_v33 }
 0x2cf   :  { %v5253_v39 = vmax.f32 %v3398_v28, %v3888_v29 }
 0x2d0   :  { %v5644_v32 = vmax.f32 %v5252_v26, %v5448_v27 }
 0x2d1   :  { %3437 = vmatmul.bf16.gmra.mxu0 %v8402_v23  ;;  %3927 = vmatmul.bf16.gmra.mxu1 %v8500_v24 }
 0x2d2   :  { %v5844_v34 = vadd.f32 %v10132_v40, %v5644_v32  ;;  %4417 = vmatmul.bf16.gmra.mxu2 %v8598_v30  ;;  %4907 = vmatmul.bf16.gmra.mxu3 %v8696_v31 }
 0x2d4   :  { %v6040_v35 = vmul.f32 0.01, %v5844_v34 }
 0x2d5   :  { %v4378_v36 = vpop.f32.mrf.mxu2  ;;  %v4868_v37 = vpop.f32.mrf.mxu3 }
 0x2d6   :  { %v6236_v53 = vmax.f32 %v5844_v34, %v6040_v35  ;;  %v5449_v41 = vmax.f32 %v4378_v36, %v4868_v37  ;;  %v3400_v42 = vpop.f32.mrf.mxu0  ;;  %v3890_v43 = vpop.f32.mrf.mxu1  ;;  %v8405_v35 = vld [vmem:[%s11117_s0 + $0x170] sm:$0xff]  ;;  %v8503_v36 = vld [vmem:[%s11117_s0 + $0x480] sm:$0xff] }
 0x2d7   :  { %v5254_v51 = vmax.f32 %v3400_v42, %v3890_v43  ;;  %v8601_v42 = vld [vmem:[%s11117_s0 + $0x790] sm:$0xff]  ;;  %v8699_v43 = vld [vmem:[%s11117_s0 + $0xaa0] sm:$0xff] }
 0x2d8   :  { %v8932_v44 = vpack.c.bf16 %v6236_v53, %v6235_v38  ;;  %v5645_v45 = vmax.f32 %v5253_v39, %v5449_v41 }
 0x2da   :  { %9282 = vst [vmem:[%s11119_s3 + $0x110] sm:$0xff] %v8932_v44   ;;  %v5845_v50 = vadd.f32 %v10132_v40, %v5645_v45 }
 0x2dc   :  { %v6041_v59 = vmul.f32 0.01, %v5845_v50 }
 0x2dd   :  { %v4380_v46 = vpop.f32.mrf.mxu2  ;;  %v4870_v47 = vpop.f32.mrf.mxu3 }
 0x2de   :  { %v5450_v52 = vmax.f32 %v4380_v46, %v4870_v47  ;;  %v3403_v54 = vpop.f32.mrf.mxu0  ;;  %v3893_v55 = vpop.f32.mrf.mxu1  ;;  %v6237_v0 = vmax.f32 %v5845_v50, %v6041_v59 }
 0x2df   :  { %v5255_v2 = vmax.f32 %v3403_v54, %v3893_v55 }
 0x2e0   :  { %v5646_v58 = vmax.f32 %v5254_v51, %v5450_v52 }
 0x2e1   :  { %3442 = vmatmul.bf16.gmra.mxu0 %v8403_v48  ;;  %3932 = vmatmul.bf16.gmra.mxu1 %v8501_v49 }
 0x2e2   :  { %v5846_v60 = vadd.f32 %v10132_v40, %v5646_v58  ;;  %4422 = vmatmul.bf16.gmra.mxu2 %v8599_v56  ;;  %4912 = vmatmul.bf16.gmra.mxu3 %v8697_v57 }
 0x2e4   :  { %v6042_v61 = vmul.f32 0.01, %v5846_v60 }
 0x2e5   :  { %v4383_v62 = vpop.f32.mrf.mxu2  ;;  %v4873_v63 = vpop.f32.mrf.mxu3 }
 0x2e6   :  { %v6238_v1 = vmax.f32 %v5846_v60, %v6042_v61  ;;  %v5451_v3 = vmax.f32 %v4383_v62, %v4873_v63  ;;  %v3405_v4 = vpop.f32.mrf.mxu0  ;;  %v3895_v5 = vpop.f32.mrf.mxu1  ;;  %v8406_v61 = vld [vmem:[%s11117_s0 + $0x178] sm:$0xff]  ;;  %v8504_v62 = vld [vmem:[%s11117_s0 + $0x488] sm:$0xff] }
 0x2e7   :  { %v5256_v13 = vmax.f32 %v3405_v4, %v3895_v5  ;;  %v8602_v4 = vld [vmem:[%s11117_s0 + $0x798] sm:$0xff]  ;;  %v8700_v5 = vld [vmem:[%s11117_s0 + $0xaa8] sm:$0xff] }
 0x2e8   :  { %v8937_v6 = vpack.c.bf16 %v6238_v1, %v6237_v0  ;;  %v5647_v7 = vmax.f32 %v5255_v2, %v5451_v3 }
 0x2ea   :  { %9283 = vst [vmem:[%s11119_s3 + $0x118] sm:$0xff] %v8937_v6   ;;  %v5847_v12 = vadd.f32 %v10132_v40, %v5647_v7 }
 0x2ec   :  { %v6043_v20 = vmul.f32 0.01, %v5847_v12 }
 0x2ed   :  { %v4385_v8 = vpop.f32.mrf.mxu2  ;;  %v4875_v9 = vpop.f32.mrf.mxu3 }
 0x2ee   :  { %v5452_v14 = vmax.f32 %v4385_v8, %v4875_v9  ;;  %v3408_v15 = vpop.f32.mrf.mxu0  ;;  %v3898_v16 = vpop.f32.mrf.mxu1  ;;  %v6239_v25 = vmax.f32 %v5847_v12, %v6043_v20 }
 0x2ef   :  { %v5257_v27 = vmax.f32 %v3408_v15, %v3898_v16 }
 0x2f0   :  { %v5648_v19 = vmax.f32 %v5256_v13, %v5452_v14 }
 0x2f1   :  { %3447 = vmatmul.bf16.gmra.mxu0 %v8404_v10  ;;  %3937 = vmatmul.bf16.gmra.mxu1 %v8502_v11 }
 0x2f2   :  { %v5848_v21 = vadd.f32 %v10132_v40, %v5648_v19  ;;  %4427 = vmatmul.bf16.gmra.mxu2 %v8600_v17  ;;  %4917 = vmatmul.bf16.gmra.mxu3 %v8698_v18 }
 0x2f4   :  { %v6044_v22 = vmul.f32 0.01, %v5848_v21 }
 0x2f5   :  { %v4388_v23 = vpop.f32.mrf.mxu2  ;;  %v4878_v24 = vpop.f32.mrf.mxu3 }
 0x2f6   :  { %v6240_v26 = vmax.f32 %v5848_v21, %v6044_v22  ;;  %v5453_v28 = vmax.f32 %v4388_v23, %v4878_v24  ;;  %v3410_v29 = vpop.f32.mrf.mxu0  ;;  %v3900_v30 = vpop.f32.mrf.mxu1  ;;  %v8407_v22 = vld [vmem:[%s11117_s0 + $0x180] sm:$0xff]  ;;  %v8505_v23 = vld [vmem:[%s11117_s0 + $0x490] sm:$0xff] }
 0x2f7   :  { %v5258_v38 = vmax.f32 %v3410_v29, %v3900_v30  ;;  %v8603_v29 = vld [vmem:[%s11117_s0 + $0x7a0] sm:$0xff]  ;;  %v8701_v30 = vld [vmem:[%s11117_s0 + $0xab0] sm:$0xff] }
 0x2f8   :  { %v8942_v31 = vpack.c.bf16 %v6240_v26, %v6239_v25  ;;  %v5649_v32 = vmax.f32 %v5257_v27, %v5453_v28 }
 0x2fa   :  { %9284 = vst [vmem:[%s11119_s3 + $0x120] sm:$0xff] %v8942_v31   ;;  %v5849_v37 = vadd.f32 %v10132_v40, %v5649_v32 }
 0x2fc   :  { %v6045_v45 = vmul.f32 0.01, %v5849_v37 }
 0x2fd   :  { %v4390_v33 = vpop.f32.mrf.mxu2  ;;  %v4880_v34 = vpop.f32.mrf.mxu3 }
 0x2fe   :  { %v5454_v53 = vmax.f32 %v4390_v33, %v4880_v34  ;;  %v3413_v39 = vpop.f32.mrf.mxu0  ;;  %v3903_v41 = vpop.f32.mrf.mxu1  ;;  %v6241_v50 = vmax.f32 %v5849_v37, %v6045_v45 }
 0x2ff   :  { %v5259_v52 = vmax.f32 %v3413_v39, %v3903_v41 }
 0x300   :  { %v5650_v44 = vmax.f32 %v5258_v38, %v5454_v53 }
 0x301   :  { %3452 = vmatmul.bf16.gmra.mxu0 %v8405_v35  ;;  %3942 = vmatmul.bf16.gmra.mxu1 %v8503_v36 }
 0x302   :  { %v5850_v46 = vadd.f32 %v10132_v40, %v5650_v44  ;;  %4432 = vmatmul.bf16.gmra.mxu2 %v8601_v42  ;;  %4922 = vmatmul.bf16.gmra.mxu3 %v8699_v43 }
 0x304   :  { %v6046_v47 = vmul.f32 0.01, %v5850_v46 }
 0x305   :  { %v4393_v48 = vpop.f32.mrf.mxu2  ;;  %v4883_v49 = vpop.f32.mrf.mxu3 }
 0x306   :  { %v6242_v51 = vmax.f32 %v5850_v46, %v6046_v47  ;;  %v5455_v54 = vmax.f32 %v4393_v48, %v4883_v49  ;;  %v3415_v55 = vpop.f32.mrf.mxu0  ;;  %v3905_v56 = vpop.f32.mrf.mxu1  ;;  %v8408_v47 = vld [vmem:[%s11117_s0 + $0x188] sm:$0xff]  ;;  %v8506_v48 = vld [vmem:[%s11117_s0 + $0x498] sm:$0xff] }
 0x307   :  { %v5260_v0 = vmax.f32 %v3415_v55, %v3905_v56  ;;  %v8604_v55 = vld [vmem:[%s11117_s0 + $0x7a8] sm:$0xff]  ;;  %v8702_v56 = vld [vmem:[%s11117_s0 + $0xab8] sm:$0xff] }
 0x308   :  { %v8947_v57 = vpack.c.bf16 %v6242_v51, %v6241_v50  ;;  %v5651_v58 = vmax.f32 %v5259_v52, %v5455_v54 }
 0x30a   :  { %9285 = vst [vmem:[%s11119_s3 + $0x128] sm:$0xff] %v8947_v57   ;;  %v5851_v63 = vadd.f32 %v10132_v40, %v5651_v58 }
 0x30c   :  { %v6047_v7 = vmul.f32 0.01, %v5851_v63 }
 0x30d   :  { %v4395_v59 = vpop.f32.mrf.mxu2  ;;  %v4885_v60 = vpop.f32.mrf.mxu3 }
 0x30e   :  { %v5456_v1 = vmax.f32 %v4395_v59, %v4885_v60  ;;  %v3418_v2 = vpop.f32.mrf.mxu0  ;;  %v3908_v3 = vpop.f32.mrf.mxu1  ;;  %v6243_v12 = vmax.f32 %v5851_v63, %v6047_v7 }
 0x30f   :  { %v5261_v14 = vmax.f32 %v3418_v2, %v3908_v3 }
 0x310   :  { %v5652_v6 = vmax.f32 %v5260_v0, %v5456_v1 }
 0x311   :  { %3457 = vmatmul.bf16.gmra.mxu0 %v8406_v61  ;;  %3947 = vmatmul.bf16.gmra.mxu1 %v8504_v62 }
 0x312   :  { %v5852_v8 = vadd.f32 %v10132_v40, %v5652_v6  ;;  %4437 = vmatmul.bf16.gmra.mxu2 %v8602_v4  ;;  %4927 = vmatmul.bf16.gmra.mxu3 %v8700_v5 }
 0x314   :  { %v6048_v9 = vmul.f32 0.01, %v5852_v8 }
 0x315   :  { %v4398_v10 = vpop.f32.mrf.mxu2  ;;  %v4888_v11 = vpop.f32.mrf.mxu3 }
 0x316   :  { %v6244_v13 = vmax.f32 %v5852_v8, %v6048_v9  ;;  %v5457_v15 = vmax.f32 %v4398_v10, %v4888_v11  ;;  %v3420_v16 = vpop.f32.mrf.mxu0  ;;  %v3910_v17 = vpop.f32.mrf.mxu1  ;;  %v8409_v9 = vld [vmem:[%s11117_s0 + $0x190] sm:$0xff]  ;;  %v8507_v10 = vld [vmem:[%s11117_s0 + $0x4a0] sm:$0xff] }
 0x317   :  { %v5262_v25 = vmax.f32 %v3420_v16, %v3910_v17  ;;  %v8605_v16 = vld [vmem:[%s11117_s0 + $0x7b0] sm:$0xff]  ;;  %v8703_v17 = vld [vmem:[%s11117_s0 + $0xac0] sm:$0xff] }
 0x318   :  { %v8952_v18 = vpack.c.bf16 %v6244_v13, %v6243_v12  ;;  %v5653_v19 = vmax.f32 %v5261_v14, %v5457_v15 }
 0x31a   :  { %9286 = vst [vmem:[%s11119_s3 + $0x130] sm:$0xff] %v8952_v18   ;;  %v5853_v24 = vadd.f32 %v10132_v40, %v5653_v19 }
 0x31c   :  { %v6049_v32 = vmul.f32 0.01, %v5853_v24 }
 0x31d   :  { %v4400_v20 = vpop.f32.mrf.mxu2  ;;  %v4890_v21 = vpop.f32.mrf.mxu3 }
 0x31e   :  { %v5458_v26 = vmax.f32 %v4400_v20, %v4890_v21  ;;  %v3423_v27 = vpop.f32.mrf.mxu0  ;;  %v3913_v28 = vpop.f32.mrf.mxu1  ;;  %v6245_v37 = vmax.f32 %v5853_v24, %v6049_v32 }
 0x31f   :  { %v5263_v53 = vmax.f32 %v3423_v27, %v3913_v28 }
 0x320   :  { %v5654_v31 = vmax.f32 %v5262_v25, %v5458_v26 }
 0x321   :  { %3462 = vmatmul.bf16.gmra.mxu0 %v8407_v22  ;;  %3952 = vmatmul.bf16.gmra.mxu1 %v8505_v23 }
 0x322   :  { %v5854_v33 = vadd.f32 %v10132_v40, %v5654_v31  ;;  %4442 = vmatmul.bf16.gmra.mxu2 %v8603_v29  ;;  %4932 = vmatmul.bf16.gmra.mxu3 %v8701_v30 }
 0x324   :  { %v6050_v34 = vmul.f32 0.01, %v5854_v33 }
 0x325   :  { %v4403_v35 = vpop.f32.mrf.mxu2  ;;  %v4893_v36 = vpop.f32.mrf.mxu3 }
 0x326   :  { %v6246_v38 = vmax.f32 %v5854_v33, %v6050_v34  ;;  %v5459_v39 = vmax.f32 %v4403_v35, %v4893_v36  ;;  %v3425_v41 = vpop.f32.mrf.mxu0  ;;  %v3915_v42 = vpop.f32.mrf.mxu1  ;;  %v8410_v34 = vld [vmem:[%s11117_s0 + $0x198] sm:$0xff]  ;;  %v8508_v35 = vld [vmem:[%s11117_s0 + $0x4a8] sm:$0xff] }
 0x327   :  { %v5264_v50 = vmax.f32 %v3425_v41, %v3915_v42  ;;  %v8606_v41 = vld [vmem:[%s11117_s0 + $0x7b8] sm:$0xff]  ;;  %v8704_v42 = vld [vmem:[%s11117_s0 + $0xac8] sm:$0xff] }
 0x328   :  { %v8957_v43 = vpack.c.bf16 %v6246_v38, %v6245_v37  ;;  %v5655_v44 = vmax.f32 %v5263_v53, %v5459_v39 }
 0x32a   :  { %9287 = vst [vmem:[%s11119_s3 + $0x138] sm:$0xff] %v8957_v43   ;;  %v5855_v49 = vadd.f32 %v10132_v40, %v5655_v44 }
 0x32c   :  { %v6051_v58 = vmul.f32 0.01, %v5855_v49 }
 0x32d   :  { %v4405_v45 = vpop.f32.mrf.mxu2  ;;  %v4895_v46 = vpop.f32.mrf.mxu3 }
 0x32e   :  { %v5460_v51 = vmax.f32 %v4405_v45, %v4895_v46  ;;  %v3428_v52 = vpop.f32.mrf.mxu0  ;;  %v3918_v54 = vpop.f32.mrf.mxu1  ;;  %v6247_v63 = vmax.f32 %v5855_v49, %v6051_v58 }
 0x32f   :  { %v5265_v1 = vmax.f32 %v3428_v52, %v3918_v54 }
 0x330   :  { %v5656_v57 = vmax.f32 %v5264_v50, %v5460_v51 }
 0x331   :  { %3467 = vmatmul.bf16.gmra.mxu0 %v8408_v47  ;;  %3957 = vmatmul.bf16.gmra.mxu1 %v8506_v48 }
 0x332   :  { %v5856_v59 = vadd.f32 %v10132_v40, %v5656_v57  ;;  %4447 = vmatmul.bf16.gmra.mxu2 %v8604_v55  ;;  %4937 = vmatmul.bf16.gmra.mxu3 %v8702_v56 }
 0x334   :  { %v6052_v60 = vmul.f32 0.01, %v5856_v59 }
 0x335   :  { %v4408_v61 = vpop.f32.mrf.mxu2  ;;  %v4898_v62 = vpop.f32.mrf.mxu3 }
 0x336   :  { %v6248_v0 = vmax.f32 %v5856_v59, %v6052_v60  ;;  %v5461_v2 = vmax.f32 %v4408_v61, %v4898_v62  ;;  %v3430_v3 = vpop.f32.mrf.mxu0  ;;  %v3920_v4 = vpop.f32.mrf.mxu1  ;;  %v8411_v60 = vld [vmem:[%s11117_s0 + $0x1a0] sm:$0xff]  ;;  %v8509_v61 = vld [vmem:[%s11117_s0 + $0x4b0] sm:$0xff] }
 0x337   :  { %v5266_v12 = vmax.f32 %v3430_v3, %v3920_v4  ;;  %v8607_v3 = vld [vmem:[%s11117_s0 + $0x7c0] sm:$0xff]  ;;  %v8705_v4 = vld [vmem:[%s11117_s0 + $0xad0] sm:$0xff] }
 0x338   :  { %v8962_v5 = vpack.c.bf16 %v6248_v0, %v6247_v63  ;;  %v5657_v6 = vmax.f32 %v5265_v1, %v5461_v2 }
 0x33a   :  { %9288 = vst [vmem:[%s11119_s3 + $0x140] sm:$0xff] %v8962_v5   ;;  %v5857_v11 = vadd.f32 %v10132_v40, %v5657_v6 }
 0x33c   :  { %v6053_v19 = vmul.f32 0.01, %v5857_v11 }
 0x33d   :  { %v4410_v7 = vpop.f32.mrf.mxu2  ;;  %v4900_v8 = vpop.f32.mrf.mxu3 }
 0x33e   :  { %v5462_v13 = vmax.f32 %v4410_v7, %v4900_v8  ;;  %v3433_v14 = vpop.f32.mrf.mxu0  ;;  %v3923_v15 = vpop.f32.mrf.mxu1  ;;  %v6249_v24 = vmax.f32 %v5857_v11, %v6053_v19 }
 0x33f   :  { %v5267_v26 = vmax.f32 %v3433_v14, %v3923_v15 }
 0x340   :  { %v5658_v18 = vmax.f32 %v5266_v12, %v5462_v13 }
 0x341   :  { %3472 = vmatmul.bf16.gmra.mxu0 %v8409_v9  ;;  %3962 = vmatmul.bf16.gmra.mxu1 %v8507_v10 }
 0x342   :  { %v5858_v20 = vadd.f32 %v10132_v40, %v5658_v18  ;;  %4452 = vmatmul.bf16.gmra.mxu2 %v8605_v16  ;;  %4942 = vmatmul.bf16.gmra.mxu3 %v8703_v17 }
 0x344   :  { %v6054_v21 = vmul.f32 0.01, %v5858_v20 }
 0x345   :  { %v4413_v22 = vpop.f32.mrf.mxu2  ;;  %v4903_v23 = vpop.f32.mrf.mxu3 }
 0x346   :  { %v6250_v25 = vmax.f32 %v5858_v20, %v6054_v21  ;;  %v5463_v27 = vmax.f32 %v4413_v22, %v4903_v23  ;;  %v3435_v28 = vpop.f32.mrf.mxu0  ;;  %v3925_v29 = vpop.f32.mrf.mxu1  ;;  %v8412_v21 = vld [vmem:[%s11117_s0 + $0x1a8] sm:$0xff]  ;;  %v8510_v22 = vld [vmem:[%s11117_s0 + $0x4b8] sm:$0xff] }
 0x347   :  { %v5268_v37 = vmax.f32 %v3435_v28, %v3925_v29  ;;  %v8608_v28 = vld [vmem:[%s11117_s0 + $0x7c8] sm:$0xff]  ;;  %v8706_v29 = vld [vmem:[%s11117_s0 + $0xad8] sm:$0xff] }
 0x348   :  { %v8967_v30 = vpack.c.bf16 %v6250_v25, %v6249_v24  ;;  %v5659_v31 = vmax.f32 %v5267_v26, %v5463_v27 }
 0x34a   :  { %9289 = vst [vmem:[%s11119_s3 + $0x148] sm:$0xff] %v8967_v30   ;;  %v5859_v36 = vadd.f32 %v10132_v40, %v5659_v31 }
 0x34c   :  { %v6055_v44 = vmul.f32 0.01, %v5859_v36 }
 0x34d   :  { %v4415_v32 = vpop.f32.mrf.mxu2  ;;  %v4905_v33 = vpop.f32.mrf.mxu3 }
 0x34e   :  { %v5464_v38 = vmax.f32 %v4415_v32, %v4905_v33  ;;  %v3438_v53 = vpop.f32.mrf.mxu0  ;;  %v3928_v39 = vpop.f32.mrf.mxu1  ;;  %v6251_v49 = vmax.f32 %v5859_v36, %v6055_v44 }
 0x34f   :  { %v5269_v51 = vmax.f32 %v3438_v53, %v3928_v39 }
 0x350   :  { %v5660_v43 = vmax.f32 %v5268_v37, %v5464_v38 }
 0x351   :  { %3477 = vmatmul.bf16.gmra.mxu0 %v8410_v34  ;;  %3967 = vmatmul.bf16.gmra.mxu1 %v8508_v35 }
 0x352   :  { %v5860_v45 = vadd.f32 %v10132_v40, %v5660_v43  ;;  %4457 = vmatmul.bf16.gmra.mxu2 %v8606_v41  ;;  %4947 = vmatmul.bf16.gmra.mxu3 %v8704_v42 }
 0x354   :  { %v6056_v46 = vmul.f32 0.01, %v5860_v45 }
 0x355   :  { %v4418_v47 = vpop.f32.mrf.mxu2  ;;  %v4908_v48 = vpop.f32.mrf.mxu3 }
 0x356   :  { %v6252_v50 = vmax.f32 %v5860_v45, %v6056_v46  ;;  %v5465_v52 = vmax.f32 %v4418_v47, %v4908_v48  ;;  %v3440_v54 = vpop.f32.mrf.mxu0  ;;  %v3930_v55 = vpop.f32.mrf.mxu1  ;;  %v8413_v46 = vld [vmem:[%s11117_s0 + $0x1b0] sm:$0xff]  ;;  %v8511_v47 = vld [vmem:[%s11117_s0 + $0x4c0] sm:$0xff] }
 0x357   :  { %v5270_v63 = vmax.f32 %v3440_v54, %v3930_v55  ;;  %v8609_v54 = vld [vmem:[%s11117_s0 + $0x7d0] sm:$0xff]  ;;  %v8707_v55 = vld [vmem:[%s11117_s0 + $0xae0] sm:$0xff] }
 0x358   :  { %v8972_v56 = vpack.c.bf16 %v6252_v50, %v6251_v49  ;;  %v5661_v57 = vmax.f32 %v5269_v51, %v5465_v52 }
 0x35a   :  { %9290 = vst [vmem:[%s11119_s3 + $0x150] sm:$0xff] %v8972_v56   ;;  %v5861_v62 = vadd.f32 %v10132_v40, %v5661_v57 }
 0x35c   :  { %v6057_v6 = vmul.f32 0.01, %v5861_v62 }
 0x35d   :  { %v4420_v58 = vpop.f32.mrf.mxu2  ;;  %v4910_v59 = vpop.f32.mrf.mxu3 }
 0x35e   :  { %v5466_v0 = vmax.f32 %v4420_v58, %v4910_v59  ;;  %v3443_v1 = vpop.f32.mrf.mxu0  ;;  %v3933_v2 = vpop.f32.mrf.mxu1  ;;  %v6253_v11 = vmax.f32 %v5861_v62, %v6057_v6 }
 0x35f   :  { %v5271_v13 = vmax.f32 %v3443_v1, %v3933_v2 }
 0x360   :  { %v5662_v5 = vmax.f32 %v5270_v63, %v5466_v0 }
 0x361   :  { %3482 = vmatmul.bf16.gmra.mxu0 %v8411_v60  ;;  %3972 = vmatmul.bf16.gmra.mxu1 %v8509_v61 }
 0x362   :  { %v5862_v7 = vadd.f32 %v10132_v40, %v5662_v5  ;;  %4462 = vmatmul.bf16.gmra.mxu2 %v8607_v3  ;;  %4952 = vmatmul.bf16.gmra.mxu3 %v8705_v4 }
 0x364   :  { %v6058_v8 = vmul.f32 0.01, %v5862_v7 }
 0x365   :  { %v4423_v9 = vpop.f32.mrf.mxu2  ;;  %v4913_v10 = vpop.f32.mrf.mxu3 }
 0x366   :  { %v6254_v12 = vmax.f32 %v5862_v7, %v6058_v8  ;;  %v5467_v14 = vmax.f32 %v4423_v9, %v4913_v10  ;;  %v3445_v15 = vpop.f32.mrf.mxu0  ;;  %v3935_v16 = vpop.f32.mrf.mxu1  ;;  %v8414_v8 = vld [vmem:[%s11117_s0 + $0x1b8] sm:$0xff]  ;;  %v8512_v9 = vld [vmem:[%s11117_s0 + $0x4c8] sm:$0xff] }
 0x367   :  { %v5272_v24 = vmax.f32 %v3445_v15, %v3935_v16  ;;  %v8610_v15 = vld [vmem:[%s11117_s0 + $0x7d8] sm:$0xff]  ;;  %v8708_v16 = vld [vmem:[%s11117_s0 + $0xae8] sm:$0xff] }
 0x368   :  { %v8977_v17 = vpack.c.bf16 %v6254_v12, %v6253_v11  ;;  %v5663_v18 = vmax.f32 %v5271_v13, %v5467_v14 }
 0x36a   :  { %9291 = vst [vmem:[%s11119_s3 + $0x158] sm:$0xff] %v8977_v17   ;;  %v5863_v23 = vadd.f32 %v10132_v40, %v5663_v18 }
 0x36c   :  { %v6059_v31 = vmul.f32 0.01, %v5863_v23 }
 0x36d   :  { %v4425_v19 = vpop.f32.mrf.mxu2  ;;  %v4915_v20 = vpop.f32.mrf.mxu3 }
 0x36e   :  { %v5468_v25 = vmax.f32 %v4425_v19, %v4915_v20  ;;  %v3448_v26 = vpop.f32.mrf.mxu0  ;;  %v3938_v27 = vpop.f32.mrf.mxu1  ;;  %v6255_v36 = vmax.f32 %v5863_v23, %v6059_v31 }
 0x36f   :  { %v5273_v38 = vmax.f32 %v3448_v26, %v3938_v27 }
 0x370   :  { %v5664_v30 = vmax.f32 %v5272_v24, %v5468_v25 }
 0x371   :  { %3487 = vmatmul.bf16.gmra.mxu0 %v8412_v21  ;;  %3977 = vmatmul.bf16.gmra.mxu1 %v8510_v22 }
 0x372   :  { %v5864_v32 = vadd.f32 %v10132_v40, %v5664_v30  ;;  %4467 = vmatmul.bf16.gmra.mxu2 %v8608_v28  ;;  %4957 = vmatmul.bf16.gmra.mxu3 %v8706_v29 }
 0x374   :  { %v6060_v33 = vmul.f32 0.01, %v5864_v32 }
 0x375   :  { %v4428_v34 = vpop.f32.mrf.mxu2  ;;  %v4918_v35 = vpop.f32.mrf.mxu3 }
 0x376   :  { %v6256_v37 = vmax.f32 %v5864_v32, %v6060_v33  ;;  %v5469_v53 = vmax.f32 %v4428_v34, %v4918_v35  ;;  %v3450_v39 = vpop.f32.mrf.mxu0  ;;  %v3940_v41 = vpop.f32.mrf.mxu1  ;;  %v8415_v33 = vld [vmem:[%s11117_s0 + $0x1c0] sm:$0xff]  ;;  %v8513_v34 = vld [vmem:[%s11117_s0 + $0x4d0] sm:$0xff] }
 0x377   :  { %v5274_v49 = vmax.f32 %v3450_v39, %v3940_v41  ;;  %v8611_v39 = vld [vmem:[%s11117_s0 + $0x7e0] sm:$0xff]  ;;  %v8709_v41 = vld [vmem:[%s11117_s0 + $0xaf0] sm:$0xff] }
 0x378   :  { %v8982_v42 = vpack.c.bf16 %v6256_v37, %v6255_v36  ;;  %v5665_v43 = vmax.f32 %v5273_v38, %v5469_v53 }
 0x37a   :  { %9292 = vst [vmem:[%s11119_s3 + $0x160] sm:$0xff] %v8982_v42   ;;  %v5865_v48 = vadd.f32 %v10132_v40, %v5665_v43 }
 0x37c   :  { %v6061_v57 = vmul.f32 0.01, %v5865_v48 }
 0x37d   :  { %v4430_v44 = vpop.f32.mrf.mxu2  ;;  %v4920_v45 = vpop.f32.mrf.mxu3 }
 0x37e   :  { %v5470_v50 = vmax.f32 %v4430_v44, %v4920_v45  ;;  %v3453_v51 = vpop.f32.mrf.mxu0  ;;  %v3943_v52 = vpop.f32.mrf.mxu1  ;;  %v6257_v62 = vmax.f32 %v5865_v48, %v6061_v57 }
 0x37f   :  { %v5275_v0 = vmax.f32 %v3453_v51, %v3943_v52 }
 0x380   :  { %v5666_v56 = vmax.f32 %v5274_v49, %v5470_v50 }
 0x381   :  { %3492 = vmatmul.bf16.gmra.mxu0 %v8413_v46  ;;  %3982 = vmatmul.bf16.gmra.mxu1 %v8511_v47 }
 0x382   :  { %v5866_v58 = vadd.f32 %v10132_v40, %v5666_v56  ;;  %4472 = vmatmul.bf16.gmra.mxu2 %v8609_v54  ;;  %4962 = vmatmul.bf16.gmra.mxu3 %v8707_v55 }
 0x384   :  { %v6062_v59 = vmul.f32 0.01, %v5866_v58 }
 0x385   :  { %v4433_v60 = vpop.f32.mrf.mxu2  ;;  %v4923_v61 = vpop.f32.mrf.mxu3 }
 0x386   :  { %v6258_v63 = vmax.f32 %v5866_v58, %v6062_v59  ;;  %v5471_v1 = vmax.f32 %v4433_v60, %v4923_v61  ;;  %v3455_v2 = vpop.f32.mrf.mxu0  ;;  %v3945_v3 = vpop.f32.mrf.mxu1  ;;  %v8416_v59 = vld [vmem:[%s11117_s0 + $0x1c8] sm:$0xff]  ;;  %v8514_v60 = vld [vmem:[%s11117_s0 + $0x4d8] sm:$0xff] }
 0x387   :  { %v5276_v11 = vmax.f32 %v3455_v2, %v3945_v3  ;;  %v8612_v2 = vld [vmem:[%s11117_s0 + $0x7e8] sm:$0xff]  ;;  %v8710_v3 = vld [vmem:[%s11117_s0 + $0xaf8] sm:$0xff] }
 0x388   :  { %v8987_v4 = vpack.c.bf16 %v6258_v63, %v6257_v62  ;;  %v5667_v5 = vmax.f32 %v5275_v0, %v5471_v1 }
 0x38a   :  { %9293 = vst [vmem:[%s11119_s3 + $0x168] sm:$0xff] %v8987_v4   ;;  %v5867_v10 = vadd.f32 %v10132_v40, %v5667_v5 }
 0x38c   :  { %v6063_v18 = vmul.f32 0.01, %v5867_v10 }
 0x38d   :  { %v4435_v6 = vpop.f32.mrf.mxu2  ;;  %v4925_v7 = vpop.f32.mrf.mxu3 }
 0x38e   :  { %v5472_v12 = vmax.f32 %v4435_v6, %v4925_v7  ;;  %v3458_v13 = vpop.f32.mrf.mxu0  ;;  %v3948_v14 = vpop.f32.mrf.mxu1  ;;  %v6259_v23 = vmax.f32 %v5867_v10, %v6063_v18 }
 0x38f   :  { %v5277_v25 = vmax.f32 %v3458_v13, %v3948_v14 }
 0x390   :  { %v5668_v17 = vmax.f32 %v5276_v11, %v5472_v12 }
 0x391   :  { %3497 = vmatmul.bf16.gmra.mxu0 %v8414_v8  ;;  %3987 = vmatmul.bf16.gmra.mxu1 %v8512_v9 }
 0x392   :  { %v5868_v19 = vadd.f32 %v10132_v40, %v5668_v17  ;;  %4477 = vmatmul.bf16.gmra.mxu2 %v8610_v15  ;;  %4967 = vmatmul.bf16.gmra.mxu3 %v8708_v16 }
 0x394   :  { %v6064_v20 = vmul.f32 0.01, %v5868_v19 }
 0x395   :  { %v4438_v21 = vpop.f32.mrf.mxu2  ;;  %v4928_v22 = vpop.f32.mrf.mxu3 }
 0x396   :  { %v6260_v24 = vmax.f32 %v5868_v19, %v6064_v20  ;;  %v5473_v26 = vmax.f32 %v4438_v21, %v4928_v22  ;;  %v3460_v27 = vpop.f32.mrf.mxu0  ;;  %v3950_v28 = vpop.f32.mrf.mxu1  ;;  %v8417_v20 = vld [vmem:[%s11117_s0 + $0x1d0] sm:$0xff]  ;;  %v8515_v21 = vld [vmem:[%s11117_s0 + $0x4e0] sm:$0xff] }
 0x397   :  { %v5278_v36 = vmax.f32 %v3460_v27, %v3950_v28  ;;  %v8613_v27 = vld [vmem:[%s11117_s0 + $0x7f0] sm:$0xff]  ;;  %v8711_v28 = vld [vmem:[%s11117_s0 + $0xb00] sm:$0xff] }
 0x398   :  { %v8992_v29 = vpack.c.bf16 %v6260_v24, %v6259_v23  ;;  %v5669_v30 = vmax.f32 %v5277_v25, %v5473_v26 }
 0x39a   :  { %9294 = vst [vmem:[%s11119_s3 + $0x170] sm:$0xff] %v8992_v29   ;;  %v5869_v35 = vadd.f32 %v10132_v40, %v5669_v30 }
 0x39c   :  { %v6065_v43 = vmul.f32 0.01, %v5869_v35 }
 0x39d   :  { %v4440_v31 = vpop.f32.mrf.mxu2  ;;  %v4930_v32 = vpop.f32.mrf.mxu3 }
 0x39e   :  { %v5474_v37 = vmax.f32 %v4440_v31, %v4930_v32  ;;  %v3463_v38 = vpop.f32.mrf.mxu0  ;;  %v3953_v53 = vpop.f32.mrf.mxu1  ;;  %v6261_v48 = vmax.f32 %v5869_v35, %v6065_v43 }
 0x39f   :  { %v5279_v50 = vmax.f32 %v3463_v38, %v3953_v53 }
 0x3a0   :  { %v5670_v42 = vmax.f32 %v5278_v36, %v5474_v37 }
 0x3a1   :  { %3502 = vmatmul.bf16.gmra.mxu0 %v8415_v33  ;;  %3992 = vmatmul.bf16.gmra.mxu1 %v8513_v34 }
 0x3a2   :  { %v5870_v44 = vadd.f32 %v10132_v40, %v5670_v42  ;;  %4482 = vmatmul.bf16.gmra.mxu2 %v8611_v39  ;;  %4972 = vmatmul.bf16.gmra.mxu3 %v8709_v41 }
 0x3a4   :  { %v6066_v45 = vmul.f32 0.01, %v5870_v44 }
 0x3a5   :  { %v4443_v46 = vpop.f32.mrf.mxu2  ;;  %v4933_v47 = vpop.f32.mrf.mxu3 }
 0x3a6   :  { %v6262_v49 = vmax.f32 %v5870_v44, %v6066_v45  ;;  %v5475_v51 = vmax.f32 %v4443_v46, %v4933_v47  ;;  %v3465_v52 = vpop.f32.mrf.mxu0  ;;  %v3955_v54 = vpop.f32.mrf.mxu1  ;;  %v8418_v45 = vld [vmem:[%s11117_s0 + $0x1d8] sm:$0xff]  ;;  %v8516_v46 = vld [vmem:[%s11117_s0 + $0x4e8] sm:$0xff] }
 0x3a7   :  { %v5280_v62 = vmax.f32 %v3465_v52, %v3955_v54  ;;  %v8614_v52 = vld [vmem:[%s11117_s0 + $0x7f8] sm:$0xff]  ;;  %v8712_v54 = vld [vmem:[%s11117_s0 + $0xb08] sm:$0xff] }
 0x3a8   :  { %v8997_v55 = vpack.c.bf16 %v6262_v49, %v6261_v48  ;;  %v5671_v56 = vmax.f32 %v5279_v50, %v5475_v51 }
 0x3aa   :  { %9295 = vst [vmem:[%s11119_s3 + $0x178] sm:$0xff] %v8997_v55   ;;  %v5871_v61 = vadd.f32 %v10132_v40, %v5671_v56 }
 0x3ac   :  { %v6067_v5 = vmul.f32 0.01, %v5871_v61 }
 0x3ad   :  { %v4445_v57 = vpop.f32.mrf.mxu2  ;;  %v4935_v58 = vpop.f32.mrf.mxu3 }
 0x3ae   :  { %v5476_v63 = vmax.f32 %v4445_v57, %v4935_v58  ;;  %v3468_v0 = vpop.f32.mrf.mxu0  ;;  %v3958_v1 = vpop.f32.mrf.mxu1  ;;  %v6263_v10 = vmax.f32 %v5871_v61, %v6067_v5 }
 0x3af   :  { %v5281_v12 = vmax.f32 %v3468_v0, %v3958_v1 }
 0x3b0   :  { %v5672_v4 = vmax.f32 %v5280_v62, %v5476_v63 }
 0x3b1   :  { %3507 = vmatmul.bf16.gmra.mxu0 %v8416_v59  ;;  %3997 = vmatmul.bf16.gmra.mxu1 %v8514_v60 }
 0x3b2   :  { %v5872_v6 = vadd.f32 %v10132_v40, %v5672_v4  ;;  %4487 = vmatmul.bf16.gmra.mxu2 %v8612_v2  ;;  %4977 = vmatmul.bf16.gmra.mxu3 %v8710_v3 }
 0x3b4   :  { %v6068_v7 = vmul.f32 0.01, %v5872_v6 }
 0x3b5   :  { %v4448_v8 = vpop.f32.mrf.mxu2  ;;  %v4938_v9 = vpop.f32.mrf.mxu3 }
 0x3b6   :  { %v6264_v11 = vmax.f32 %v5872_v6, %v6068_v7  ;;  %v5477_v13 = vmax.f32 %v4448_v8, %v4938_v9  ;;  %v3470_v14 = vpop.f32.mrf.mxu0  ;;  %v3960_v15 = vpop.f32.mrf.mxu1  ;;  %v8419_v7 = vld [vmem:[%s11117_s0 + $0x1e0] sm:$0xff]  ;;  %v8517_v8 = vld [vmem:[%s11117_s0 + $0x4f0] sm:$0xff] }
 0x3b7   :  { %v5282_v23 = vmax.f32 %v3470_v14, %v3960_v15  ;;  %v8615_v14 = vld [vmem:[%s11117_s0 + $0x800] sm:$0xff]  ;;  %v8713_v15 = vld [vmem:[%s11117_s0 + $0xb10] sm:$0xff] }
 0x3b8   :  { %v9002_v16 = vpack.c.bf16 %v6264_v11, %v6263_v10  ;;  %v5673_v17 = vmax.f32 %v5281_v12, %v5477_v13 }
 0x3ba   :  { %9296 = vst [vmem:[%s11119_s3 + $0x180] sm:$0xff] %v9002_v16   ;;  %v5873_v22 = vadd.f32 %v10132_v40, %v5673_v17 }
 0x3bc   :  { %v6069_v30 = vmul.f32 0.01, %v5873_v22 }
 0x3bd   :  { %v4450_v18 = vpop.f32.mrf.mxu2  ;;  %v4940_v19 = vpop.f32.mrf.mxu3 }
 0x3be   :  { %v5478_v24 = vmax.f32 %v4450_v18, %v4940_v19  ;;  %v3473_v25 = vpop.f32.mrf.mxu0  ;;  %v3963_v26 = vpop.f32.mrf.mxu1  ;;  %v6265_v35 = vmax.f32 %v5873_v22, %v6069_v30 }
 0x3bf   :  { %v5283_v37 = vmax.f32 %v3473_v25, %v3963_v26 }
 0x3c0   :  { %v5674_v29 = vmax.f32 %v5282_v23, %v5478_v24 }
 0x3c1   :  { %3512 = vmatmul.bf16.gmra.mxu0 %v8417_v20  ;;  %4002 = vmatmul.bf16.gmra.mxu1 %v8515_v21 }
 0x3c2   :  { %v5874_v31 = vadd.f32 %v10132_v40, %v5674_v29  ;;  %4492 = vmatmul.bf16.gmra.mxu2 %v8613_v27  ;;  %4982 = vmatmul.bf16.gmra.mxu3 %v8711_v28 }
 0x3c4   :  { %v6070_v32 = vmul.f32 0.01, %v5874_v31 }
 0x3c5   :  { %v4453_v33 = vpop.f32.mrf.mxu2  ;;  %v4943_v34 = vpop.f32.mrf.mxu3 }
 0x3c6   :  { %v6266_v36 = vmax.f32 %v5874_v31, %v6070_v32  ;;  %v5479_v38 = vmax.f32 %v4453_v33, %v4943_v34  ;;  %v3475_v53 = vpop.f32.mrf.mxu0  ;;  %v3965_v39 = vpop.f32.mrf.mxu1  ;;  %v8518_v32 = vld [vmem:[%s11117_s0 + $0x4f8] sm:$0xff]  ;;  %v10436_v33 = vld [vmem:[%s11118_s2] ss:$0 sm:$0xff] }
 0x3c7   :  { %v5284_v48 = vmax.f32 %v3475_v53, %v3965_v39  ;;  %v8616_v53 = vld [vmem:[%s11117_s0 + $0x808] sm:$0xff]  ;;  %v8714_v39 = vld [vmem:[%s11117_s0 + $0xb18] sm:$0xff] }
 0x3c8   :  { %v9007_v41 = vpack.c.bf16 %v6266_v36, %v6265_v35  ;;  %v5675_v42 = vmax.f32 %v5283_v37, %v5479_v38 }
 0x3ca   :  { %9297 = vst [vmem:[%s11119_s3 + $0x188] sm:$0xff] %v9007_v41   ;;  %v5875_v47 = vadd.f32 %v10132_v40, %v5675_v42 }
 0x3cc   :  { %v6071_v56 = vmul.f32 0.01, %v5875_v47 }
 0x3cd   :  { %v4455_v43 = vpop.f32.mrf.mxu2  ;;  %v4945_v44 = vpop.f32.mrf.mxu3 }
 0x3ce   :  { %v5480_v49 = vmax.f32 %v4455_v43, %v4945_v44  ;;  %v3478_v50 = vpop.f32.mrf.mxu0  ;;  %v3968_v51 = vpop.f32.mrf.mxu1  ;;  %v6267_v61 = vmax.f32 %v5875_v47, %v6071_v56 }
 0x3cf   :  { %v5285_v63 = vmax.f32 %v3478_v50, %v3968_v51 }
 0x3d0   :  { %v5676_v55 = vmax.f32 %v5284_v48, %v5480_v49 }
 0x3d1   :  { %3517 = vmatmul.bf16.gmra.mxu0 %v8418_v45  ;;  %4007 = vmatmul.bf16.gmra.mxu1 %v8516_v46 }
 0x3d2   :  { %v5876_v57 = vadd.f32 %v10132_v40, %v5676_v55  ;;  %4497 = vmatmul.bf16.gmra.mxu2 %v8614_v52  ;;  %4987 = vmatmul.bf16.gmra.mxu3 %v8712_v54 }
 0x3d4   :  { %v6072_v58 = vmul.f32 0.01, %v5876_v57 }
 0x3d5   :  { %v4458_v59 = vpop.f32.mrf.mxu2  ;;  %v4948_v60 = vpop.f32.mrf.mxu3 }
 0x3d6   :  { %v6268_v62 = vmax.f32 %v5876_v57, %v6072_v58  ;;  %v5481_v0 = vmax.f32 %v4458_v59, %v4948_v60  ;;  %v3480_v1 = vpop.f32.mrf.mxu0  ;;  %v3970_v2 = vpop.f32.mrf.mxu1  ;;  %v8421_v58 = vld [vmem:[%s11117_s0 + $0x1f0] sm:$0xff]  ;;  %v8519_v59 = vld [vmem:[%s11117_s0 + $0x500] sm:$0xff] }
 0x3d7   :  { %v5286_v10 = vmax.f32 %v3480_v1, %v3970_v2  ;;  %v8617_v1 = vld [vmem:[%s11117_s0 + $0x810] sm:$0xff]  ;;  %v8715_v2 = vld [vmem:[%s11117_s0 + $0xb20] sm:$0xff] }
 0x3d8   :  { %v9012_v3 = vpack.c.bf16 %v6268_v62, %v6267_v61  ;;  %v5677_v4 = vmax.f32 %v5285_v63, %v5481_v0 }
 0x3da   :  { %9298 = vst [vmem:[%s11119_s3 + $0x190] sm:$0xff] %v9012_v3   ;;  %v5877_v9 = vadd.f32 %v10132_v40, %v5677_v4 }
 0x3dc   :  { %v6073_v17 = vmul.f32 0.01, %v5877_v9 }
 0x3dd   :  { %v4460_v5 = vpop.f32.mrf.mxu2  ;;  %v4950_v6 = vpop.f32.mrf.mxu3 }
 0x3de   :  { %v5482_v11 = vmax.f32 %v4460_v5, %v4950_v6  ;;  %v3483_v12 = vpop.f32.mrf.mxu0  ;;  %v3973_v13 = vpop.f32.mrf.mxu1  ;;  %v6269_v22 = vmax.f32 %v5877_v9, %v6073_v17 }
 0x3df   :  { %v5287_v24 = vmax.f32 %v3483_v12, %v3973_v13 }
 0x3e0   :  { %v5678_v16 = vmax.f32 %v5286_v10, %v5482_v11 }
 0x3e1   :  { %3522 = vmatmul.bf16.gmra.mxu0 %v8419_v7  ;;  %4012 = vmatmul.bf16.gmra.mxu1 %v8517_v8 }
 0x3e2   :  { %v5878_v18 = vadd.f32 %v10132_v40, %v5678_v16  ;;  %4502 = vmatmul.bf16.gmra.mxu2 %v8615_v14  ;;  %4992 = vmatmul.bf16.gmra.mxu3 %v8713_v15  ;;  %v8420_v40 = vld [vmem:[%s11117_s0 + $0x1e8] sm:$0xff] }
 0x3e4   :  { %v6074_v19 = vmul.f32 0.01, %v5878_v18 }
 0x3e5   :  { %v4463_v20 = vpop.f32.mrf.mxu2  ;;  %v4953_v21 = vpop.f32.mrf.mxu3 }
 0x3e6   :  { %v6270_v23 = vmax.f32 %v5878_v18, %v6074_v19  ;;  %v5483_v25 = vmax.f32 %v4463_v20, %v4953_v21  ;;  %v3485_v26 = vpop.f32.mrf.mxu0  ;;  %v3975_v27 = vpop.f32.mrf.mxu1  ;;  %v8422_v19 = vld [vmem:[%s11117_s0 + $0x1f8] sm:$0xff]  ;;  %v8520_v20 = vld [vmem:[%s11117_s0 + $0x508] sm:$0xff] }
 0x3e7   :  { %v5288_v35 = vmax.f32 %v3485_v26, %v3975_v27  ;;  %v8618_v26 = vld [vmem:[%s11117_s0 + $0x818] sm:$0xff]  ;;  %v8716_v27 = vld [vmem:[%s11117_s0 + $0xb28] sm:$0xff] }
 0x3e8   :  { %v9017_v28 = vpack.c.bf16 %v6270_v23, %v6269_v22  ;;  %v5679_v29 = vmax.f32 %v5287_v24, %v5483_v25 }
 0x3ea   :  { %9299 = vst [vmem:[%s11119_s3 + $0x198] sm:$0xff] %v9017_v28   ;;  %v5879_v34 = vadd.f32 %v10436_v33, %v5679_v29 }
 0x3ec   :  { %v6075_v42 = vmul.f32 0.01, %v5879_v34 }
 0x3ed   :  { %v4465_v30 = vpop.f32.mrf.mxu2  ;;  %v4955_v31 = vpop.f32.mrf.mxu3 }
 0x3ee   :  { %v5484_v36 = vmax.f32 %v4465_v30, %v4955_v31  ;;  %v3488_v37 = vpop.f32.mrf.mxu0  ;;  %v3978_v38 = vpop.f32.mrf.mxu1  ;;  %v6271_v47 = vmax.f32 %v5879_v34, %v6075_v42 }
 0x3ef   :  { %v5289_v49 = vmax.f32 %v3488_v37, %v3978_v38 }
 0x3f0   :  { %v5680_v41 = vmax.f32 %v5288_v35, %v5484_v36 }
 0x3f1   :  { %3527 = vmatmul.bf16.gmra.mxu0 %v8420_v40  ;;  %4017 = vmatmul.bf16.gmra.mxu1 %v8518_v32 }
 0x3f2   :  { %v5880_v43 = vadd.f32 %v10436_v33, %v5680_v41  ;;  %4507 = vmatmul.bf16.gmra.mxu2 %v8616_v53  ;;  %4997 = vmatmul.bf16.gmra.mxu3 %v8714_v39 }
 0x3f4   :  { %v6076_v44 = vmul.f32 0.01, %v5880_v43 }
 0x3f5   :  { %v4468_v45 = vpop.f32.mrf.mxu2  ;;  %v4958_v46 = vpop.f32.mrf.mxu3 }
 0x3f6   :  { %v6272_v48 = vmax.f32 %v5880_v43, %v6076_v44  ;;  %v5485_v50 = vmax.f32 %v4468_v45, %v4958_v46  ;;  %v3490_v51 = vpop.f32.mrf.mxu0  ;;  %v3980_v52 = vpop.f32.mrf.mxu1  ;;  %v8423_v44 = vld [vmem:[%s11117_s0 + $0x200] sm:$0xff]  ;;  %v8521_v45 = vld [vmem:[%s11117_s0 + $0x510] sm:$0xff] }
 0x3f7   :  { %v5290_v61 = vmax.f32 %v3490_v51, %v3980_v52  ;;  %v8619_v51 = vld [vmem:[%s11117_s0 + $0x820] sm:$0xff]  ;;  %v8717_v52 = vld [vmem:[%s11117_s0 + $0xb30] sm:$0xff] }
 0x3f8   :  { %v9022_v54 = vpack.c.bf16 %v6272_v48, %v6271_v47  ;;  %v5681_v55 = vmax.f32 %v5289_v49, %v5485_v50 }
 0x3fa   :  { %9300 = vst [vmem:[%s11119_s3 + $0x1a0] sm:$0xff] %v9022_v54   ;;  %v5881_v60 = vadd.f32 %v10436_v33, %v5681_v55 }
 0x3fc   :  { %v6077_v4 = vmul.f32 0.01, %v5881_v60 }
 0x3fd   :  { %v4470_v56 = vpop.f32.mrf.mxu2  ;;  %v4960_v57 = vpop.f32.mrf.mxu3 }
 0x3fe   :  { %v5486_v62 = vmax.f32 %v4470_v56, %v4960_v57  ;;  %v3493_v63 = vpop.f32.mrf.mxu0  ;;  %v3983_v0 = vpop.f32.mrf.mxu1  ;;  %v6273_v9 = vmax.f32 %v5881_v60, %v6077_v4 }
 0x3ff   :  { %v5291_v11 = vmax.f32 %v3493_v63, %v3983_v0 }
 0x400   :  { %v5682_v3 = vmax.f32 %v5290_v61, %v5486_v62 }
 0x401   :  { %3532 = vmatmul.bf16.gmra.mxu0 %v8421_v58  ;;  %4022 = vmatmul.bf16.gmra.mxu1 %v8519_v59 }
 0x402   :  { %v5882_v5 = vadd.f32 %v10436_v33, %v5682_v3  ;;  %4512 = vmatmul.bf16.gmra.mxu2 %v8617_v1  ;;  %5002 = vmatmul.bf16.gmra.mxu3 %v8715_v2 }
 0x404   :  { %v6078_v6 = vmul.f32 0.01, %v5882_v5 }
 0x405   :  { %v4473_v7 = vpop.f32.mrf.mxu2  ;;  %v4963_v8 = vpop.f32.mrf.mxu3 }
 0x406   :  { %v6274_v10 = vmax.f32 %v5882_v5, %v6078_v6  ;;  %v5487_v12 = vmax.f32 %v4473_v7, %v4963_v8  ;;  %v3495_v13 = vpop.f32.mrf.mxu0  ;;  %v3985_v14 = vpop.f32.mrf.mxu1  ;;  %v8424_v6 = vld [vmem:[%s11117_s0 + $0x208] sm:$0xff]  ;;  %v8522_v7 = vld [vmem:[%s11117_s0 + $0x518] sm:$0xff] }
 0x407   :  { %v5292_v22 = vmax.f32 %v3495_v13, %v3985_v14  ;;  %v8620_v13 = vld [vmem:[%s11117_s0 + $0x828] sm:$0xff]  ;;  %v8718_v14 = vld [vmem:[%s11117_s0 + $0xb38] sm:$0xff] }
 0x408   :  { %v9027_v15 = vpack.c.bf16 %v6274_v10, %v6273_v9  ;;  %v5683_v16 = vmax.f32 %v5291_v11, %v5487_v12 }
 0x40a   :  { %9301 = vst [vmem:[%s11119_s3 + $0x1a8] sm:$0xff] %v9027_v15   ;;  %v5883_v21 = vadd.f32 %v10436_v33, %v5683_v16 }
 0x40c   :  { %v6079_v29 = vmul.f32 0.01, %v5883_v21 }
 0x40d   :  { %v4475_v17 = vpop.f32.mrf.mxu2  ;;  %v4965_v18 = vpop.f32.mrf.mxu3 }
 0x40e   :  { %v5488_v23 = vmax.f32 %v4475_v17, %v4965_v18  ;;  %v3498_v24 = vpop.f32.mrf.mxu0  ;;  %v3988_v25 = vpop.f32.mrf.mxu1  ;;  %v6275_v34 = vmax.f32 %v5883_v21, %v6079_v29 }
 0x40f   :  { %v5293_v36 = vmax.f32 %v3498_v24, %v3988_v25 }
 0x410   :  { %v5684_v28 = vmax.f32 %v5292_v22, %v5488_v23 }
 0x411   :  { %3537 = vmatmul.bf16.gmra.mxu0 %v8422_v19  ;;  %4027 = vmatmul.bf16.gmra.mxu1 %v8520_v20 }
 0x412   :  { %v5884_v30 = vadd.f32 %v10436_v33, %v5684_v28  ;;  %4517 = vmatmul.bf16.gmra.mxu2 %v8618_v26  ;;  %5007 = vmatmul.bf16.gmra.mxu3 %v8716_v27 }
 0x414   :  { %v6080_v31 = vmul.f32 0.01, %v5884_v30 }
 0x415   :  { %v4478_v40 = vpop.f32.mrf.mxu2  ;;  %v4968_v32 = vpop.f32.mrf.mxu3 }
 0x416   :  { %v6276_v35 = vmax.f32 %v5884_v30, %v6080_v31  ;;  %v5489_v37 = vmax.f32 %v4478_v40, %v4968_v32  ;;  %v3500_v38 = vpop.f32.mrf.mxu0  ;;  %v3990_v53 = vpop.f32.mrf.mxu1  ;;  %v8425_v31 = vld [vmem:[%s11117_s0 + $0x210] sm:$0xff]  ;;  %v8523_v40 = vld [vmem:[%s11117_s0 + $0x520] sm:$0xff] }
 0x417   :  { %v5294_v47 = vmax.f32 %v3500_v38, %v3990_v53  ;;  %v8621_v38 = vld [vmem:[%s11117_s0 + $0x830] sm:$0xff]  ;;  %v8719_v53 = vld [vmem:[%s11117_s0 + $0xb40] sm:$0xff] }
 0x418   :  { %v9032_v39 = vpack.c.bf16 %v6276_v35, %v6275_v34  ;;  %v5685_v41 = vmax.f32 %v5293_v36, %v5489_v37 }
 0x41a   :  { %9302 = vst [vmem:[%s11119_s3 + $0x1b0] sm:$0xff] %v9032_v39   ;;  %v5885_v46 = vadd.f32 %v10436_v33, %v5685_v41 }
 0x41c   :  { %v6081_v55 = vmul.f32 0.01, %v5885_v46 }
 0x41d   :  { %v4480_v42 = vpop.f32.mrf.mxu2  ;;  %v4970_v43 = vpop.f32.mrf.mxu3 }
 0x41e   :  { %v5490_v48 = vmax.f32 %v4480_v42, %v4970_v43  ;;  %v3503_v49 = vpop.f32.mrf.mxu0  ;;  %v3993_v50 = vpop.f32.mrf.mxu1  ;;  %v6277_v60 = vmax.f32 %v5885_v46, %v6081_v55 }
 0x41f   :  { %v5295_v62 = vmax.f32 %v3503_v49, %v3993_v50 }
 0x420   :  { %v5686_v54 = vmax.f32 %v5294_v47, %v5490_v48 }
 0x421   :  { %3542 = vmatmul.bf16.gmra.mxu0 %v8423_v44  ;;  %4032 = vmatmul.bf16.gmra.mxu1 %v8521_v45 }
 0x422   :  { %v5886_v56 = vadd.f32 %v10436_v33, %v5686_v54  ;;  %4522 = vmatmul.bf16.gmra.mxu2 %v8619_v51  ;;  %5012 = vmatmul.bf16.gmra.mxu3 %v8717_v52 }
 0x424   :  { %v6082_v57 = vmul.f32 0.01, %v5886_v56 }
 0x425   :  { %v4483_v58 = vpop.f32.mrf.mxu2  ;;  %v4973_v59 = vpop.f32.mrf.mxu3 }
 0x426   :  { %v6278_v61 = vmax.f32 %v5886_v56, %v6082_v57  ;;  %v5491_v63 = vmax.f32 %v4483_v58, %v4973_v59  ;;  %v3505_v0 = vpop.f32.mrf.mxu0  ;;  %v3995_v1 = vpop.f32.mrf.mxu1  ;;  %v8426_v57 = vld [vmem:[%s11117_s0 + $0x218] sm:$0xff]  ;;  %v8524_v58 = vld [vmem:[%s11117_s0 + $0x528] sm:$0xff] }
 0x427   :  { %v5296_v9 = vmax.f32 %v3505_v0, %v3995_v1  ;;  %v8622_v0 = vld [vmem:[%s11117_s0 + $0x838] sm:$0xff]  ;;  %v8720_v1 = vld [vmem:[%s11117_s0 + $0xb48] sm:$0xff] }
 0x428   :  { %v9037_v2 = vpack.c.bf16 %v6278_v61, %v6277_v60  ;;  %v5687_v3 = vmax.f32 %v5295_v62, %v5491_v63 }
 0x42a   :  { %9303 = vst [vmem:[%s11119_s3 + $0x1b8] sm:$0xff] %v9037_v2   ;;  %v5887_v8 = vadd.f32 %v10436_v33, %v5687_v3 }
 0x42c   :  { %v6083_v16 = vmul.f32 0.01, %v5887_v8 }
 0x42d   :  { %v4485_v4 = vpop.f32.mrf.mxu2  ;;  %v4975_v5 = vpop.f32.mrf.mxu3 }
 0x42e   :  { %v5492_v10 = vmax.f32 %v4485_v4, %v4975_v5  ;;  %v3508_v11 = vpop.f32.mrf.mxu0  ;;  %v3998_v12 = vpop.f32.mrf.mxu1  ;;  %v6279_v21 = vmax.f32 %v5887_v8, %v6083_v16 }
 0x42f   :  { %v5297_v23 = vmax.f32 %v3508_v11, %v3998_v12 }
 0x430   :  { %v5688_v15 = vmax.f32 %v5296_v9, %v5492_v10 }
 0x431   :  { %3547 = vmatmul.bf16.gmra.mxu0 %v8424_v6  ;;  %4037 = vmatmul.bf16.gmra.mxu1 %v8522_v7 }
 0x432   :  { %v5888_v17 = vadd.f32 %v10436_v33, %v5688_v15  ;;  %4527 = vmatmul.bf16.gmra.mxu2 %v8620_v13  ;;  %5017 = vmatmul.bf16.gmra.mxu3 %v8718_v14 }
 0x434   :  { %v6084_v18 = vmul.f32 0.01, %v5888_v17 }
 0x435   :  { %v4488_v19 = vpop.f32.mrf.mxu2  ;;  %v4978_v20 = vpop.f32.mrf.mxu3 }
 0x436   :  { %v6280_v22 = vmax.f32 %v5888_v17, %v6084_v18  ;;  %v5493_v24 = vmax.f32 %v4488_v19, %v4978_v20  ;;  %v3510_v25 = vpop.f32.mrf.mxu0  ;;  %v4000_v26 = vpop.f32.mrf.mxu1  ;;  %v8427_v18 = vld [vmem:[%s11117_s0 + $0x220] sm:$0xff]  ;;  %v8525_v19 = vld [vmem:[%s11117_s0 + $0x530] sm:$0xff] }
 0x437   :  { %v5298_v34 = vmax.f32 %v3510_v25, %v4000_v26  ;;  %v8623_v25 = vld [vmem:[%s11117_s0 + $0x840] sm:$0xff]  ;;  %v8721_v26 = vld [vmem:[%s11117_s0 + $0xb50] sm:$0xff] }
 0x438   :  { %v9042_v27 = vpack.c.bf16 %v6280_v22, %v6279_v21  ;;  %v5689_v28 = vmax.f32 %v5297_v23, %v5493_v24 }
 0x43a   :  { %9304 = vst [vmem:[%s11119_s3 + $0x1c0] sm:$0xff] %v9042_v27   ;;  %v5889_v32 = vadd.f32 %v10436_v33, %v5689_v28 }
 0x43c   :  { %v6085_v41 = vmul.f32 0.01, %v5889_v32 }
 0x43d   :  { %v4490_v29 = vpop.f32.mrf.mxu2  ;;  %v4980_v30 = vpop.f32.mrf.mxu3 }
 0x43e   :  { %v5494_v35 = vmax.f32 %v4490_v29, %v4980_v30  ;;  %v3513_v36 = vpop.f32.mrf.mxu0  ;;  %v4003_v37 = vpop.f32.mrf.mxu1  ;;  %v6281_v46 = vmax.f32 %v5889_v32, %v6085_v41 }
 0x43f   :  { %v5299_v48 = vmax.f32 %v3513_v36, %v4003_v37 }
 0x440   :  { %v5690_v39 = vmax.f32 %v5298_v34, %v5494_v35 }
 0x441   :  { %3552 = vmatmul.bf16.gmra.mxu0 %v8425_v31  ;;  %4042 = vmatmul.bf16.gmra.mxu1 %v8523_v40 }
 0x442   :  { %v5890_v42 = vadd.f32 %v10436_v33, %v5690_v39  ;;  %4532 = vmatmul.bf16.gmra.mxu2 %v8621_v38  ;;  %5022 = vmatmul.bf16.gmra.mxu3 %v8719_v53 }
 0x444   :  { %v6086_v43 = vmul.f32 0.01, %v5890_v42 }
 0x445   :  { %v4493_v44 = vpop.f32.mrf.mxu2  ;;  %v4983_v45 = vpop.f32.mrf.mxu3 }
 0x446   :  { %v6282_v47 = vmax.f32 %v5890_v42, %v6086_v43  ;;  %v5495_v49 = vmax.f32 %v4493_v44, %v4983_v45  ;;  %v3515_v50 = vpop.f32.mrf.mxu0  ;;  %v4005_v51 = vpop.f32.mrf.mxu1  ;;  %v8428_v43 = vld [vmem:[%s11117_s0 + $0x228] sm:$0xff]  ;;  %v8526_v44 = vld [vmem:[%s11117_s0 + $0x538] sm:$0xff] }
 0x447   :  { %v5300_v60 = vmax.f32 %v3515_v50, %v4005_v51  ;;  %v8624_v50 = vld [vmem:[%s11117_s0 + $0x848] sm:$0xff]  ;;  %v8722_v51 = vld [vmem:[%s11117_s0 + $0xb58] sm:$0xff] }
 0x448   :  { %v9047_v52 = vpack.c.bf16 %v6282_v47, %v6281_v46  ;;  %v5691_v54 = vmax.f32 %v5299_v48, %v5495_v49 }
 0x44a   :  { %9305 = vst [vmem:[%s11119_s3 + $0x1c8] sm:$0xff] %v9047_v52   ;;  %v5891_v59 = vadd.f32 %v10436_v33, %v5691_v54 }
 0x44c   :  { %v6087_v3 = vmul.f32 0.01, %v5891_v59 }
 0x44d   :  { %v4495_v55 = vpop.f32.mrf.mxu2  ;;  %v4985_v56 = vpop.f32.mrf.mxu3 }
 0x44e   :  { %v5496_v61 = vmax.f32 %v4495_v55, %v4985_v56  ;;  %v3518_v62 = vpop.f32.mrf.mxu0  ;;  %v4008_v63 = vpop.f32.mrf.mxu1  ;;  %v6283_v8 = vmax.f32 %v5891_v59, %v6087_v3 }
 0x44f   :  { %v5301_v10 = vmax.f32 %v3518_v62, %v4008_v63 }
 0x450   :  { %v5692_v2 = vmax.f32 %v5300_v60, %v5496_v61 }
 0x451   :  { %3557 = vmatmul.bf16.gmra.mxu0 %v8426_v57  ;;  %4047 = vmatmul.bf16.gmra.mxu1 %v8524_v58 }
 0x452   :  { %v5892_v4 = vadd.f32 %v10436_v33, %v5692_v2  ;;  %4537 = vmatmul.bf16.gmra.mxu2 %v8622_v0  ;;  %5027 = vmatmul.bf16.gmra.mxu3 %v8720_v1 }
 0x454   :  { %v6088_v5 = vmul.f32 0.01, %v5892_v4 }
 0x455   :  { %v4498_v6 = vpop.f32.mrf.mxu2  ;;  %v4988_v7 = vpop.f32.mrf.mxu3 }
 0x456   :  { %v6284_v9 = vmax.f32 %v5892_v4, %v6088_v5  ;;  %v5497_v11 = vmax.f32 %v4498_v6, %v4988_v7  ;;  %v3520_v12 = vpop.f32.mrf.mxu0  ;;  %v4010_v13 = vpop.f32.mrf.mxu1  ;;  %v8429_v5 = vld [vmem:[%s11117_s0 + $0x230] sm:$0xff]  ;;  %v8527_v6 = vld [vmem:[%s11117_s0 + $0x540] sm:$0xff] }
 0x457   :  { %v5302_v21 = vmax.f32 %v3520_v12, %v4010_v13  ;;  %v8625_v12 = vld [vmem:[%s11117_s0 + $0x850] sm:$0xff]  ;;  %v8723_v13 = vld [vmem:[%s11117_s0 + $0xb60] sm:$0xff] }
 0x458   :  { %v9052_v14 = vpack.c.bf16 %v6284_v9, %v6283_v8  ;;  %v5693_v15 = vmax.f32 %v5301_v10, %v5497_v11 }
 0x45a   :  { %9306 = vst [vmem:[%s11119_s3 + $0x1d0] sm:$0xff] %v9052_v14   ;;  %v5893_v20 = vadd.f32 %v10436_v33, %v5693_v15 }
 0x45c   :  { %v6089_v28 = vmul.f32 0.01, %v5893_v20 }
 0x45d   :  { %v4500_v16 = vpop.f32.mrf.mxu2  ;;  %v4990_v17 = vpop.f32.mrf.mxu3 }
 0x45e   :  { %v5498_v22 = vmax.f32 %v4500_v16, %v4990_v17  ;;  %v3523_v23 = vpop.f32.mrf.mxu0  ;;  %v4013_v24 = vpop.f32.mrf.mxu1  ;;  %v6285_v32 = vmax.f32 %v5893_v20, %v6089_v28 }
 0x45f   :  { %v5303_v35 = vmax.f32 %v3523_v23, %v4013_v24 }
 0x460   :  { %v5694_v27 = vmax.f32 %v5302_v21, %v5498_v22 }
 0x461   :  { %3562 = vmatmul.bf16.gmra.mxu0 %v8427_v18  ;;  %4052 = vmatmul.bf16.gmra.mxu1 %v8525_v19 }
 0x462   :  { %v5894_v29 = vadd.f32 %v10436_v33, %v5694_v27  ;;  %4542 = vmatmul.bf16.gmra.mxu2 %v8623_v25  ;;  %5032 = vmatmul.bf16.gmra.mxu3 %v8721_v26 }
 0x464   :  { %v6090_v30 = vmul.f32 0.01, %v5894_v29 }
 0x465   :  { %v4503_v31 = vpop.f32.mrf.mxu2  ;;  %v4993_v40 = vpop.f32.mrf.mxu3 }
 0x466   :  { %v6286_v34 = vmax.f32 %v5894_v29, %v6090_v30  ;;  %v5499_v36 = vmax.f32 %v4503_v31, %v4993_v40  ;;  %v3525_v37 = vpop.f32.mrf.mxu0  ;;  %v4015_v38 = vpop.f32.mrf.mxu1  ;;  %v8430_v30 = vld [vmem:[%s11117_s0 + $0x238] sm:$0xff]  ;;  %v8528_v31 = vld [vmem:[%s11117_s0 + $0x548] sm:$0xff] }
 0x467   :  { %v5304_v46 = vmax.f32 %v3525_v37, %v4015_v38  ;;  %v8626_v37 = vld [vmem:[%s11117_s0 + $0x858] sm:$0xff]  ;;  %v8724_v38 = vld [vmem:[%s11117_s0 + $0xb68] sm:$0xff] }
 0x468   :  { %v9057_v53 = vpack.c.bf16 %v6286_v34, %v6285_v32  ;;  %v5695_v39 = vmax.f32 %v5303_v35, %v5499_v36 }
 0x46a   :  { %9307 = vst [vmem:[%s11119_s3 + $0x1d8] sm:$0xff] %v9057_v53   ;;  %v5895_v45 = vadd.f32 %v10436_v33, %v5695_v39 }
 0x46c   :  { %v6091_v54 = vmul.f32 0.01, %v5895_v45 }
 0x46d   :  { %v4505_v41 = vpop.f32.mrf.mxu2  ;;  %v4995_v42 = vpop.f32.mrf.mxu3 }
 0x46e   :  { %v5500_v47 = vmax.f32 %v4505_v41, %v4995_v42  ;;  %v3528_v48 = vpop.f32.mrf.mxu0  ;;  %v4018_v49 = vpop.f32.mrf.mxu1  ;;  %v6287_v59 = vmax.f32 %v5895_v45, %v6091_v54 }
 0x46f   :  { %v5305_v61 = vmax.f32 %v3528_v48, %v4018_v49 }
 0x470   :  { %v5696_v52 = vmax.f32 %v5304_v46, %v5500_v47 }
 0x471   :  { %3567 = vmatmul.bf16.gmra.mxu0 %v8428_v43  ;;  %4057 = vmatmul.bf16.gmra.mxu1 %v8526_v44 }
 0x472   :  { %v5896_v55 = vadd.f32 %v10436_v33, %v5696_v52  ;;  %4547 = vmatmul.bf16.gmra.mxu2 %v8624_v50  ;;  %5037 = vmatmul.bf16.gmra.mxu3 %v8722_v51 }
 0x474   :  { %v6092_v56 = vmul.f32 0.01, %v5896_v55 }
 0x475   :  { %v4508_v57 = vpop.f32.mrf.mxu2  ;;  %v4998_v58 = vpop.f32.mrf.mxu3 }
 0x476   :  { %v6288_v60 = vmax.f32 %v5896_v55, %v6092_v56  ;;  %v5501_v62 = vmax.f32 %v4508_v57, %v4998_v58  ;;  %v3530_v63 = vpop.f32.mrf.mxu0  ;;  %v4020_v0 = vpop.f32.mrf.mxu1  ;;  %v8431_v56 = vld [vmem:[%s11117_s0 + $0x240] sm:$0xff]  ;;  %v8529_v57 = vld [vmem:[%s11117_s0 + $0x550] sm:$0xff] }
 0x477   :  { %v5306_v8 = vmax.f32 %v3530_v63, %v4020_v0  ;;  %v8627_v63 = vld [vmem:[%s11117_s0 + $0x860] sm:$0xff]  ;;  %v8725_v0 = vld [vmem:[%s11117_s0 + $0xb70] sm:$0xff] }
 0x478   :  { %v9062_v1 = vpack.c.bf16 %v6288_v60, %v6287_v59  ;;  %v5697_v2 = vmax.f32 %v5305_v61, %v5501_v62 }
 0x47a   :  { %9308 = vst [vmem:[%s11119_s3 + $0x1e0] sm:$0xff] %v9062_v1   ;;  %v5897_v7 = vadd.f32 %v10436_v33, %v5697_v2 }
 0x47c   :  { %v6093_v15 = vmul.f32 0.01, %v5897_v7 }
 0x47d   :  { %v4510_v3 = vpop.f32.mrf.mxu2  ;;  %v5000_v4 = vpop.f32.mrf.mxu3 }
 0x47e   :  { %v5502_v9 = vmax.f32 %v4510_v3, %v5000_v4  ;;  %v3533_v10 = vpop.f32.mrf.mxu0  ;;  %v4023_v11 = vpop.f32.mrf.mxu1  ;;  %v6289_v20 = vmax.f32 %v5897_v7, %v6093_v15 }
 0x47f   :  { %v5307_v22 = vmax.f32 %v3533_v10, %v4023_v11 }
 0x480   :  { %v5698_v14 = vmax.f32 %v5306_v8, %v5502_v9 }
 0x481   :  { %3572 = vmatmul.bf16.gmra.mxu0 %v8429_v5  ;;  %4062 = vmatmul.bf16.gmra.mxu1 %v8527_v6 }
 0x482   :  { %v5898_v16 = vadd.f32 %v10436_v33, %v5698_v14  ;;  %4552 = vmatmul.bf16.gmra.mxu2 %v8625_v12  ;;  %5042 = vmatmul.bf16.gmra.mxu3 %v8723_v13 }
 0x484   :  { %v6094_v17 = vmul.f32 0.01, %v5898_v16 }
 0x485   :  { %v4513_v18 = vpop.f32.mrf.mxu2  ;;  %v5003_v19 = vpop.f32.mrf.mxu3 }
 0x486   :  { %v6290_v21 = vmax.f32 %v5898_v16, %v6094_v17  ;;  %v5503_v23 = vmax.f32 %v4513_v18, %v5003_v19  ;;  %v3535_v24 = vpop.f32.mrf.mxu0  ;;  %v4025_v25 = vpop.f32.mrf.mxu1  ;;  %v8432_v17 = vld [vmem:[%s11117_s0 + $0x248] sm:$0xff]  ;;  %v8530_v18 = vld [vmem:[%s11117_s0 + $0x558] sm:$0xff] }
 0x487   :  { %v5308_v32 = vmax.f32 %v3535_v24, %v4025_v25  ;;  %v8628_v24 = vld [vmem:[%s11117_s0 + $0x868] sm:$0xff]  ;;  %v8726_v25 = vld [vmem:[%s11117_s0 + $0xb78] sm:$0xff] }
 0x488   :  { %v9067_v26 = vpack.c.bf16 %v6290_v21, %v6289_v20  ;;  %v5699_v27 = vmax.f32 %v5307_v22, %v5503_v23 }
 0x48a   :  { %9309 = vst [vmem:[%s11119_s3 + $0x1e8] sm:$0xff] %v9067_v26   ;;  %v5899_v40 = vadd.f32 %v10436_v33, %v5699_v27 }
 0x48c   :  { %v6095_v39 = vmul.f32 0.01, %v5899_v40 }
 0x48d   :  { %v4515_v28 = vpop.f32.mrf.mxu2  ;;  %v5005_v29 = vpop.f32.mrf.mxu3 }
 0x48e   :  { %v5504_v34 = vmax.f32 %v4515_v28, %v5005_v29  ;;  %v3538_v35 = vpop.f32.mrf.mxu0  ;;  %v4028_v36 = vpop.f32.mrf.mxu1  ;;  %v6291_v45 = vmax.f32 %v5899_v40, %v6095_v39 }
 0x48f   :  { %v5309_v47 = vmax.f32 %v3538_v35, %v4028_v36 }
 0x490   :  { %v5700_v53 = vmax.f32 %v5308_v32, %v5504_v34 }
 0x491   :  { %3577 = vmatmul.bf16.gmra.mxu0 %v8430_v30  ;;  %4067 = vmatmul.bf16.gmra.mxu1 %v8528_v31 }
 0x492   :  { %v5900_v41 = vadd.f32 %v10436_v33, %v5700_v53  ;;  %4557 = vmatmul.bf16.gmra.mxu2 %v8626_v37  ;;  %5047 = vmatmul.bf16.gmra.mxu3 %v8724_v38 }
 0x494   :  { %v6096_v42 = vmul.f32 0.01, %v5900_v41 }
 0x495   :  { %v4518_v43 = vpop.f32.mrf.mxu2  ;;  %v5008_v44 = vpop.f32.mrf.mxu3 }
 0x496   :  { %v6292_v46 = vmax.f32 %v5900_v41, %v6096_v42  ;;  %v5505_v48 = vmax.f32 %v4518_v43, %v5008_v44  ;;  %v3540_v49 = vpop.f32.mrf.mxu0  ;;  %v4030_v50 = vpop.f32.mrf.mxu1  ;;  %v8433_v42 = vld [vmem:[%s11117_s0 + $0x250] sm:$0xff]  ;;  %v8531_v43 = vld [vmem:[%s11117_s0 + $0x560] sm:$0xff] }
 0x497   :  { %v5310_v59 = vmax.f32 %v3540_v49, %v4030_v50  ;;  %v8629_v49 = vld [vmem:[%s11117_s0 + $0x870] sm:$0xff]  ;;  %v8727_v50 = vld [vmem:[%s11117_s0 + $0xb80] sm:$0xff] }
 0x498   :  { %v9072_v51 = vpack.c.bf16 %v6292_v46, %v6291_v45  ;;  %v5701_v52 = vmax.f32 %v5309_v47, %v5505_v48 }
 0x49a   :  { %9310 = vst [vmem:[%s11119_s3 + $0x1f0] sm:$0xff] %v9072_v51   ;;  %v5901_v58 = vadd.f32 %v10436_v33, %v5701_v52 }
 0x49c   :  { %v6097_v2 = vmul.f32 0.01, %v5901_v58 }
 0x49d   :  { %v4520_v54 = vpop.f32.mrf.mxu2  ;;  %v5010_v55 = vpop.f32.mrf.mxu3 }
 0x49e   :  { %v5506_v60 = vmax.f32 %v4520_v54, %v5010_v55  ;;  %v3543_v61 = vpop.f32.mrf.mxu0  ;;  %v4033_v62 = vpop.f32.mrf.mxu1  ;;  %v6293_v7 = vmax.f32 %v5901_v58, %v6097_v2 }
 0x49f   :  { %v5311_v9 = vmax.f32 %v3543_v61, %v4033_v62 }
 0x4a0   :  { %v5702_v1 = vmax.f32 %v5310_v59, %v5506_v60 }
 0x4a1   :  { %3582 = vmatmul.bf16.gmra.mxu0 %v8431_v56  ;;  %4072 = vmatmul.bf16.gmra.mxu1 %v8529_v57 }
 0x4a2   :  { %v5902_v3 = vadd.f32 %v10436_v33, %v5702_v1  ;;  %4562 = vmatmul.bf16.gmra.mxu2 %v8627_v63  ;;  %5052 = vmatmul.bf16.gmra.mxu3 %v8725_v0 }
 0x4a4   :  { %v6098_v4 = vmul.f32 0.01, %v5902_v3 }
 0x4a5   :  { %v4523_v5 = vpop.f32.mrf.mxu2  ;;  %v5013_v6 = vpop.f32.mrf.mxu3 }
 0x4a6   :  { %v6294_v8 = vmax.f32 %v5902_v3, %v6098_v4  ;;  %v5507_v10 = vmax.f32 %v4523_v5, %v5013_v6  ;;  %v3545_v11 = vpop.f32.mrf.mxu0  ;;  %v4035_v12 = vpop.f32.mrf.mxu1  ;;  %v8434_v4 = vld [vmem:[%s11117_s0 + $0x258] sm:$0xff]  ;;  %v8532_v5 = vld [vmem:[%s11117_s0 + $0x568] sm:$0xff] }
 0x4a7   :  { %v5312_v20 = vmax.f32 %v3545_v11, %v4035_v12  ;;  %v8630_v11 = vld [vmem:[%s11117_s0 + $0x878] sm:$0xff]  ;;  %v8728_v12 = vld [vmem:[%s11117_s0 + $0xb88] sm:$0xff] }
 0x4a8   :  { %v9077_v13 = vpack.c.bf16 %v6294_v8, %v6293_v7  ;;  %v5703_v14 = vmax.f32 %v5311_v9, %v5507_v10 }
 0x4aa   :  { %9311 = vst [vmem:[%s11119_s3 + $0x1f8] sm:$0xff] %v9077_v13   ;;  %v5903_v19 = vadd.f32 %v10436_v33, %v5703_v14 }
 0x4ac   :  { %v6099_v27 = vmul.f32 0.01, %v5903_v19 }
 0x4ad   :  { %v4525_v15 = vpop.f32.mrf.mxu2  ;;  %v5015_v16 = vpop.f32.mrf.mxu3 }
 0x4ae   :  { %v5508_v21 = vmax.f32 %v4525_v15, %v5015_v16  ;;  %v3548_v22 = vpop.f32.mrf.mxu0  ;;  %v4038_v23 = vpop.f32.mrf.mxu1  ;;  %v6295_v40 = vmax.f32 %v5903_v19, %v6099_v27 }
 0x4af   :  { %v5313_v34 = vmax.f32 %v3548_v22, %v4038_v23 }
 0x4b0   :  { %v5704_v26 = vmax.f32 %v5312_v20, %v5508_v21 }
 0x4b1   :  { %3587 = vmatmul.bf16.gmra.mxu0 %v8432_v17  ;;  %4077 = vmatmul.bf16.gmra.mxu1 %v8530_v18 }
 0x4b2   :  { %v5904_v28 = vadd.f32 %v10436_v33, %v5704_v26  ;;  %4567 = vmatmul.bf16.gmra.mxu2 %v8628_v24  ;;  %5057 = vmatmul.bf16.gmra.mxu3 %v8726_v25 }
 0x4b4   :  { %v6100_v29 = vmul.f32 0.01, %v5904_v28 }
 0x4b5   :  { %v4528_v30 = vpop.f32.mrf.mxu2  ;;  %v5018_v31 = vpop.f32.mrf.mxu3 }
 0x4b6   :  { %v6296_v32 = vmax.f32 %v5904_v28, %v6100_v29  ;;  %v5509_v35 = vmax.f32 %v4528_v30, %v5018_v31  ;;  %v3550_v36 = vpop.f32.mrf.mxu0  ;;  %v4040_v37 = vpop.f32.mrf.mxu1  ;;  %v8435_v29 = vld [vmem:[%s11117_s0 + $0x260] sm:$0xff]  ;;  %v8533_v30 = vld [vmem:[%s11117_s0 + $0x570] sm:$0xff] }
 0x4b7   :  { %v5314_v45 = vmax.f32 %v3550_v36, %v4040_v37  ;;  %v8631_v36 = vld [vmem:[%s11117_s0 + $0x880] sm:$0xff]  ;;  %v8729_v37 = vld [vmem:[%s11117_s0 + $0xb90] sm:$0xff] }
 0x4b8   :  { %v9082_v38 = vpack.c.bf16 %v6296_v32, %v6295_v40  ;;  %v5705_v53 = vmax.f32 %v5313_v34, %v5509_v35 }
 0x4ba   :  { %9312 = vst [vmem:[%s11119_s3 + $0x200] sm:$0xff] %v9082_v38   ;;  %v5905_v44 = vadd.f32 %v10436_v33, %v5705_v53 }
 0x4bc   :  { %v6101_v52 = vmul.f32 0.01, %v5905_v44 }
 0x4bd   :  { %v4530_v39 = vpop.f32.mrf.mxu2  ;;  %v5020_v41 = vpop.f32.mrf.mxu3 }
 0x4be   :  { %v5510_v46 = vmax.f32 %v4530_v39, %v5020_v41  ;;  %v3553_v47 = vpop.f32.mrf.mxu0  ;;  %v4043_v48 = vpop.f32.mrf.mxu1  ;;  %v6297_v58 = vmax.f32 %v5905_v44, %v6101_v52 }
 0x4bf   :  { %v5315_v60 = vmax.f32 %v3553_v47, %v4043_v48 }
 0x4c0   :  { %v5706_v51 = vmax.f32 %v5314_v45, %v5510_v46 }
 0x4c1   :  { %3592 = vmatmul.bf16.gmra.mxu0 %v8433_v42  ;;  %4082 = vmatmul.bf16.gmra.mxu1 %v8531_v43 }
 0x4c2   :  { %v5906_v54 = vadd.f32 %v10436_v33, %v5706_v51  ;;  %4572 = vmatmul.bf16.gmra.mxu2 %v8629_v49  ;;  %5062 = vmatmul.bf16.gmra.mxu3 %v8727_v50 }
 0x4c4   :  { %v6102_v55 = vmul.f32 0.01, %v5906_v54 }
 0x4c5   :  { %v4533_v56 = vpop.f32.mrf.mxu2  ;;  %v5023_v57 = vpop.f32.mrf.mxu3 }
 0x4c6   :  { %v6298_v59 = vmax.f32 %v5906_v54, %v6102_v55  ;;  %v5511_v61 = vmax.f32 %v4533_v56, %v5023_v57  ;;  %v3555_v62 = vpop.f32.mrf.mxu0  ;;  %v4045_v63 = vpop.f32.mrf.mxu1  ;;  %v8436_v55 = vld [vmem:[%s11117_s0 + $0x268] sm:$0xff]  ;;  %v8534_v56 = vld [vmem:[%s11117_s0 + $0x578] sm:$0xff] }
 0x4c7   :  { %v5316_v7 = vmax.f32 %v3555_v62, %v4045_v63  ;;  %v8632_v62 = vld [vmem:[%s11117_s0 + $0x888] sm:$0xff]  ;;  %v8730_v63 = vld [vmem:[%s11117_s0 + $0xb98] sm:$0xff] }
 0x4c8   :  { %v9087_v0 = vpack.c.bf16 %v6298_v59, %v6297_v58  ;;  %v5707_v1 = vmax.f32 %v5315_v60, %v5511_v61 }
 0x4ca   :  { %9313 = vst [vmem:[%s11119_s3 + $0x208] sm:$0xff] %v9087_v0   ;;  %v5907_v6 = vadd.f32 %v10436_v33, %v5707_v1 }
 0x4cc   :  { %v6103_v14 = vmul.f32 0.01, %v5907_v6 }
 0x4cd   :  { %v4535_v2 = vpop.f32.mrf.mxu2  ;;  %v5025_v3 = vpop.f32.mrf.mxu3 }
 0x4ce   :  { %v5512_v8 = vmax.f32 %v4535_v2, %v5025_v3  ;;  %v3558_v9 = vpop.f32.mrf.mxu0  ;;  %v4048_v10 = vpop.f32.mrf.mxu1  ;;  %v6299_v19 = vmax.f32 %v5907_v6, %v6103_v14 }
 0x4cf   :  { %v5317_v21 = vmax.f32 %v3558_v9, %v4048_v10 }
 0x4d0   :  { %v5708_v13 = vmax.f32 %v5316_v7, %v5512_v8 }
 0x4d1   :  { %3597 = vmatmul.bf16.gmra.mxu0 %v8434_v4  ;;  %4087 = vmatmul.bf16.gmra.mxu1 %v8532_v5 }
 0x4d2   :  { %v5908_v15 = vadd.f32 %v10436_v33, %v5708_v13  ;;  %4577 = vmatmul.bf16.gmra.mxu2 %v8630_v11  ;;  %5067 = vmatmul.bf16.gmra.mxu3 %v8728_v12 }
 0x4d4   :  { %v6104_v16 = vmul.f32 0.01, %v5908_v15 }
 0x4d5   :  { %v4538_v17 = vpop.f32.mrf.mxu2  ;;  %v5028_v18 = vpop.f32.mrf.mxu3 }
 0x4d6   :  { %v6300_v20 = vmax.f32 %v5908_v15, %v6104_v16  ;;  %v5513_v22 = vmax.f32 %v4538_v17, %v5028_v18  ;;  %v3560_v23 = vpop.f32.mrf.mxu0  ;;  %v4050_v24 = vpop.f32.mrf.mxu1  ;;  %v8437_v16 = vld [vmem:[%s11117_s0 + $0x270] sm:$0xff]  ;;  %v8535_v17 = vld [vmem:[%s11117_s0 + $0x580] sm:$0xff] }
 0x4d7   :  { %v5318_v40 = vmax.f32 %v3560_v23, %v4050_v24  ;;  %v8633_v23 = vld [vmem:[%s11117_s0 + $0x890] sm:$0xff]  ;;  %v8731_v24 = vld [vmem:[%s11117_s0 + $0xba0] sm:$0xff] }
 0x4d8   :  { %v9092_v25 = vpack.c.bf16 %v6300_v20, %v6299_v19  ;;  %v5709_v26 = vmax.f32 %v5317_v21, %v5513_v22 }
 0x4da   :  { %9314 = vst [vmem:[%s11119_s3 + $0x210] sm:$0xff] %v9092_v25   ;;  %v5909_v31 = vadd.f32 %v10436_v33, %v5709_v26 }
 0x4dc   :  { %v6105_v53 = vmul.f32 0.01, %v5909_v31 }
 0x4dd   :  { %v4540_v27 = vpop.f32.mrf.mxu2  ;;  %v5030_v28 = vpop.f32.mrf.mxu3 }
 0x4de   :  { %v5514_v32 = vmax.f32 %v4540_v27, %v5030_v28  ;;  %v3563_v34 = vpop.f32.mrf.mxu0  ;;  %v4053_v35 = vpop.f32.mrf.mxu1  ;;  %v6301_v44 = vmax.f32 %v5909_v31, %v6105_v53 }
 0x4df   :  { %v5319_v46 = vmax.f32 %v3563_v34, %v4053_v35 }
 0x4e0   :  { %v5710_v38 = vmax.f32 %v5318_v40, %v5514_v32 }
 0x4e1   :  { %3602 = vmatmul.bf16.gmra.mxu0 %v8435_v29  ;;  %4092 = vmatmul.bf16.gmra.mxu1 %v8533_v30 }
 0x4e2   :  { %v5910_v39 = vadd.f32 %v10436_v33, %v5710_v38  ;;  %4582 = vmatmul.bf16.gmra.mxu2 %v8631_v36  ;;  %5072 = vmatmul.bf16.gmra.mxu3 %v8729_v37 }
 0x4e4   :  { %v6106_v41 = vmul.f32 0.01, %v5910_v39 }
 0x4e5   :  { %v4543_v42 = vpop.f32.mrf.mxu2  ;;  %v5033_v43 = vpop.f32.mrf.mxu3 }
 0x4e6   :  { %v6302_v45 = vmax.f32 %v5910_v39, %v6106_v41  ;;  %v5515_v47 = vmax.f32 %v4543_v42, %v5033_v43  ;;  %v3565_v48 = vpop.f32.mrf.mxu0  ;;  %v4055_v49 = vpop.f32.mrf.mxu1  ;;  %v8438_v41 = vld [vmem:[%s11117_s0 + $0x278] sm:$0xff]  ;;  %v8536_v42 = vld [vmem:[%s11117_s0 + $0x588] sm:$0xff] }
 0x4e7   :  { %v5320_v58 = vmax.f32 %v3565_v48, %v4055_v49  ;;  %v8634_v48 = vld [vmem:[%s11117_s0 + $0x898] sm:$0xff]  ;;  %v8732_v49 = vld [vmem:[%s11117_s0 + $0xba8] sm:$0xff] }
 0x4e8   :  { %v9097_v50 = vpack.c.bf16 %v6302_v45, %v6301_v44  ;;  %v5711_v51 = vmax.f32 %v5319_v46, %v5515_v47 }
 0x4ea   :  { %9315 = vst [vmem:[%s11119_s3 + $0x218] sm:$0xff] %v9097_v50   ;;  %v5911_v57 = vadd.f32 %v10436_v33, %v5711_v51 }
 0x4ec   :  { %v6107_v1 = vmul.f32 0.01, %v5911_v57 }
 0x4ed   :  { %v4545_v52 = vpop.f32.mrf.mxu2  ;;  %v5035_v54 = vpop.f32.mrf.mxu3 }
 0x4ee   :  { %v5516_v59 = vmax.f32 %v4545_v52, %v5035_v54  ;;  %v3568_v60 = vpop.f32.mrf.mxu0  ;;  %v4058_v61 = vpop.f32.mrf.mxu1  ;;  %v6303_v6 = vmax.f32 %v5911_v57, %v6107_v1 }
 0x4ef   :  { %v5321_v8 = vmax.f32 %v3568_v60, %v4058_v61 }
 0x4f0   :  { %v5712_v0 = vmax.f32 %v5320_v58, %v5516_v59 }
 0x4f1   :  { %3607 = vmatmul.bf16.gmra.mxu0 %v8436_v55  ;;  %4097 = vmatmul.bf16.gmra.mxu1 %v8534_v56 }
 0x4f2   :  { %v5912_v2 = vadd.f32 %v10436_v33, %v5712_v0  ;;  %4587 = vmatmul.bf16.gmra.mxu2 %v8632_v62  ;;  %5077 = vmatmul.bf16.gmra.mxu3 %v8730_v63 }
 0x4f4   :  { %v6108_v3 = vmul.f32 0.01, %v5912_v2 }
 0x4f5   :  { %v4548_v4 = vpop.f32.mrf.mxu2  ;;  %v5038_v5 = vpop.f32.mrf.mxu3 }
 0x4f6   :  { %v6304_v7 = vmax.f32 %v5912_v2, %v6108_v3  ;;  %v5517_v9 = vmax.f32 %v4548_v4, %v5038_v5  ;;  %v3570_v10 = vpop.f32.mrf.mxu0  ;;  %v4060_v11 = vpop.f32.mrf.mxu1  ;;  %v8439_v3 = vld [vmem:[%s11117_s0 + $0x280] sm:$0xff]  ;;  %v8537_v4 = vld [vmem:[%s11117_s0 + $0x590] sm:$0xff] }
 0x4f7   :  { %v5322_v19 = vmax.f32 %v3570_v10, %v4060_v11  ;;  %v8635_v10 = vld [vmem:[%s11117_s0 + $0x8a0] sm:$0xff]  ;;  %v8733_v11 = vld [vmem:[%s11117_s0 + $0xbb0] sm:$0xff] }
 0x4f8   :  { %v9102_v12 = vpack.c.bf16 %v6304_v7, %v6303_v6  ;;  %v5713_v13 = vmax.f32 %v5321_v8, %v5517_v9 }
 0x4fa   :  { %9316 = vst [vmem:[%s11119_s3 + $0x220] sm:$0xff] %v9102_v12   ;;  %v5913_v18 = vadd.f32 %v10436_v33, %v5713_v13  ;;  %v10737_v33 = vld [vmem:[%s11118_s2] ss:$0 sm:$0xff] }
 0x4fc   :  { %v6109_v26 = vmul.f32 0.01, %v5913_v18 }
 0x4fd   :  { %v4550_v14 = vpop.f32.mrf.mxu2  ;;  %v5040_v15 = vpop.f32.mrf.mxu3 }
 0x4fe   :  { %v5518_v20 = vmax.f32 %v4550_v14, %v5040_v15  ;;  %v3573_v21 = vpop.f32.mrf.mxu0  ;;  %v4063_v22 = vpop.f32.mrf.mxu1  ;;  %v6305_v31 = vmax.f32 %v5913_v18, %v6109_v26 }
 0x4ff   :  { %v5323_v32 = vmax.f32 %v3573_v21, %v4063_v22 }
 0x500   :  { %v5714_v25 = vmax.f32 %v5322_v19, %v5518_v20 }
 0x501   :  { %3612 = vmatmul.bf16.gmra.mxu0 %v8437_v16  ;;  %4102 = vmatmul.bf16.gmra.mxu1 %v8535_v17 }
 0x502   :  { %v5914_v27 = vadd.f32 %v10737_v33, %v5714_v25  ;;  %4592 = vmatmul.bf16.gmra.mxu2 %v8633_v23  ;;  %5082 = vmatmul.bf16.gmra.mxu3 %v8731_v24 }
 0x504   :  { %v6110_v28 = vmul.f32 0.01, %v5914_v27 }
 0x505   :  { %v4553_v29 = vpop.f32.mrf.mxu2  ;;  %v5043_v30 = vpop.f32.mrf.mxu3 }
 0x506   :  { %v6306_v40 = vmax.f32 %v5914_v27, %v6110_v28  ;;  %v5519_v34 = vmax.f32 %v4553_v29, %v5043_v30  ;;  %v3575_v35 = vpop.f32.mrf.mxu0  ;;  %v4065_v36 = vpop.f32.mrf.mxu1  ;;  %v8440_v28 = vld [vmem:[%s11117_s0 + $0x288] sm:$0xff]  ;;  %v8538_v29 = vld [vmem:[%s11117_s0 + $0x598] sm:$0xff] }
 0x507   :  { %v5324_v44 = vmax.f32 %v3575_v35, %v4065_v36  ;;  %v8636_v35 = vld [vmem:[%s11117_s0 + $0x8a8] sm:$0xff]  ;;  %v8734_v36 = vld [vmem:[%s11117_s0 + $0xbb8] sm:$0xff] }
 0x508   :  { %v9107_v37 = vpack.c.bf16 %v6306_v40, %v6305_v31  ;;  %v5715_v38 = vmax.f32 %v5323_v32, %v5519_v34 }
 0x50a   :  { %9317 = vst [vmem:[%s11119_s3 + $0x228] sm:$0xff] %v9107_v37   ;;  %v5915_v43 = vadd.f32 %v10737_v33, %v5715_v38 }
 0x50c   :  { %v6111_v51 = vmul.f32 0.01, %v5915_v43 }
 0x50d   :  { %v4555_v53 = vpop.f32.mrf.mxu2  ;;  %v5045_v39 = vpop.f32.mrf.mxu3 }
 0x50e   :  { %v5520_v45 = vmax.f32 %v4555_v53, %v5045_v39  ;;  %v3578_v46 = vpop.f32.mrf.mxu0  ;;  %v4068_v47 = vpop.f32.mrf.mxu1  ;;  %v6307_v57 = vmax.f32 %v5915_v43, %v6111_v51 }
 0x50f   :  { %v5325_v59 = vmax.f32 %v3578_v46, %v4068_v47 }
 0x510   :  { %v5716_v50 = vmax.f32 %v5324_v44, %v5520_v45 }
 0x511   :  { %3617 = vmatmul.bf16.gmra.mxu0 %v8438_v41  ;;  %4107 = vmatmul.bf16.gmra.mxu1 %v8536_v42 }
 0x512   :  { %v5916_v52 = vadd.f32 %v10737_v33, %v5716_v50  ;;  %4597 = vmatmul.bf16.gmra.mxu2 %v8634_v48  ;;  %5087 = vmatmul.bf16.gmra.mxu3 %v8732_v49 }
 0x514   :  { %v6112_v54 = vmul.f32 0.01, %v5916_v52 }
 0x515   :  { %v4558_v55 = vpop.f32.mrf.mxu2  ;;  %v5048_v56 = vpop.f32.mrf.mxu3 }
 0x516   :  { %v6308_v58 = vmax.f32 %v5916_v52, %v6112_v54  ;;  %v5521_v60 = vmax.f32 %v4558_v55, %v5048_v56  ;;  %v3580_v61 = vpop.f32.mrf.mxu0  ;;  %v4070_v62 = vpop.f32.mrf.mxu1  ;;  %v8441_v54 = vld [vmem:[%s11117_s0 + $0x290] sm:$0xff]  ;;  %v8539_v55 = vld [vmem:[%s11117_s0 + $0x5a0] sm:$0xff] }
 0x517   :  { %v5326_v6 = vmax.f32 %v3580_v61, %v4070_v62  ;;  %v8637_v61 = vld [vmem:[%s11117_s0 + $0x8b0] sm:$0xff]  ;;  %v8735_v62 = vld [vmem:[%s11117_s0 + $0xbc0] sm:$0xff] }
 0x518   :  { %v9112_v63 = vpack.c.bf16 %v6308_v58, %v6307_v57  ;;  %v5717_v0 = vmax.f32 %v5325_v59, %v5521_v60 }
 0x51a   :  { %9318 = vst [vmem:[%s11119_s3 + $0x230] sm:$0xff] %v9112_v63   ;;  %v5917_v5 = vadd.f32 %v10737_v33, %v5717_v0 }
 0x51c   :  { %v6113_v13 = vmul.f32 0.01, %v5917_v5 }
 0x51d   :  { %v4560_v1 = vpop.f32.mrf.mxu2  ;;  %v5050_v2 = vpop.f32.mrf.mxu3 }
 0x51e   :  { %v5522_v7 = vmax.f32 %v4560_v1, %v5050_v2  ;;  %v3583_v8 = vpop.f32.mrf.mxu0  ;;  %v4073_v9 = vpop.f32.mrf.mxu1  ;;  %v6309_v18 = vmax.f32 %v5917_v5, %v6113_v13 }
 0x51f   :  { %v5327_v20 = vmax.f32 %v3583_v8, %v4073_v9 }
 0x520   :  { %v5718_v12 = vmax.f32 %v5326_v6, %v5522_v7 }
 0x521   :  { %3622 = vmatmul.bf16.gmra.mxu0 %v8439_v3  ;;  %4112 = vmatmul.bf16.gmra.mxu1 %v8537_v4 }
 0x522   :  { %v5918_v14 = vadd.f32 %v10737_v33, %v5718_v12  ;;  %4602 = vmatmul.bf16.gmra.mxu2 %v8635_v10  ;;  %5092 = vmatmul.bf16.gmra.mxu3 %v8733_v11 }
 0x524   :  { %v6114_v15 = vmul.f32 0.01, %v5918_v14 }
 0x525   :  { %v4563_v16 = vpop.f32.mrf.mxu2  ;;  %v5053_v17 = vpop.f32.mrf.mxu3 }
 0x526   :  { %v6310_v19 = vmax.f32 %v5918_v14, %v6114_v15  ;;  %v5523_v21 = vmax.f32 %v4563_v16, %v5053_v17  ;;  %v3585_v22 = vpop.f32.mrf.mxu0  ;;  %v4075_v23 = vpop.f32.mrf.mxu1  ;;  %v8442_v15 = vld [vmem:[%s11117_s0 + $0x298] sm:$0xff]  ;;  %v8540_v16 = vld [vmem:[%s11117_s0 + $0x5a8] sm:$0xff] }
 0x527   :  { %v5328_v31 = vmax.f32 %v3585_v22, %v4075_v23  ;;  %v8638_v22 = vld [vmem:[%s11117_s0 + $0x8b8] sm:$0xff]  ;;  %v8736_v23 = vld [vmem:[%s11117_s0 + $0xbc8] sm:$0xff] }
 0x528   :  { %v9117_v24 = vpack.c.bf16 %v6310_v19, %v6309_v18  ;;  %v5719_v25 = vmax.f32 %v5327_v20, %v5523_v21 }
 0x52a   :  { %9319 = vst [vmem:[%s11119_s3 + $0x238] sm:$0xff] %v9117_v24   ;;  %v5919_v30 = vadd.f32 %v10737_v33, %v5719_v25 }
 0x52c   :  { %v6115_v38 = vmul.f32 0.01, %v5919_v30 }
 0x52d   :  { %v4565_v26 = vpop.f32.mrf.mxu2  ;;  %v5055_v27 = vpop.f32.mrf.mxu3 }
 0x52e   :  { %v5524_v40 = vmax.f32 %v4565_v26, %v5055_v27  ;;  %v3588_v32 = vpop.f32.mrf.mxu0  ;;  %v4078_v34 = vpop.f32.mrf.mxu1  ;;  %v6311_v43 = vmax.f32 %v5919_v30, %v6115_v38 }
 0x52f   :  { %v5329_v45 = vmax.f32 %v3588_v32, %v4078_v34 }
 0x530   :  { %v5720_v37 = vmax.f32 %v5328_v31, %v5524_v40 }
 0x531   :  { %3627 = vmatmul.bf16.gmra.mxu0 %v8440_v28  ;;  %4117 = vmatmul.bf16.gmra.mxu1 %v8538_v29 }
 0x532   :  { %v5920_v53 = vadd.f32 %v10737_v33, %v5720_v37  ;;  %4607 = vmatmul.bf16.gmra.mxu2 %v8636_v35  ;;  %5097 = vmatmul.bf16.gmra.mxu3 %v8734_v36 }
 0x534   :  { %v6116_v39 = vmul.f32 0.01, %v5920_v53 }
 0x535   :  { %v4568_v41 = vpop.f32.mrf.mxu2  ;;  %v5058_v42 = vpop.f32.mrf.mxu3 }
 0x536   :  { %v6312_v44 = vmax.f32 %v5920_v53, %v6116_v39  ;;  %v5525_v46 = vmax.f32 %v4568_v41, %v5058_v42  ;;  %v3590_v47 = vpop.f32.mrf.mxu0  ;;  %v4080_v48 = vpop.f32.mrf.mxu1  ;;  %v8443_v39 = vld [vmem:[%s11117_s0 + $0x2a0] sm:$0xff]  ;;  %v8541_v41 = vld [vmem:[%s11117_s0 + $0x5b0] sm:$0xff] }
 0x537   :  { %v5330_v57 = vmax.f32 %v3590_v47, %v4080_v48  ;;  %v8639_v47 = vld [vmem:[%s11117_s0 + $0x8c0] sm:$0xff]  ;;  %v8737_v48 = vld [vmem:[%s11117_s0 + $0xbd0] sm:$0xff] }
 0x538   :  { %v9122_v49 = vpack.c.bf16 %v6312_v44, %v6311_v43  ;;  %v5721_v50 = vmax.f32 %v5329_v45, %v5525_v46 }
 0x53a   :  { %9320 = vst [vmem:[%s11119_s3 + $0x240] sm:$0xff] %v9122_v49   ;;  %v5921_v56 = vadd.f32 %v10737_v33, %v5721_v50 }
 0x53c   :  { %v6117_v0 = vmul.f32 0.01, %v5921_v56 }
 0x53d   :  { %v4570_v51 = vpop.f32.mrf.mxu2  ;;  %v5060_v52 = vpop.f32.mrf.mxu3 }
 0x53e   :  { %v5526_v58 = vmax.f32 %v4570_v51, %v5060_v52  ;;  %v3593_v59 = vpop.f32.mrf.mxu0  ;;  %v4083_v60 = vpop.f32.mrf.mxu1  ;;  %v6313_v5 = vmax.f32 %v5921_v56, %v6117_v0 }
 0x53f   :  { %v5331_v7 = vmax.f32 %v3593_v59, %v4083_v60 }
 0x540   :  { %v5722_v63 = vmax.f32 %v5330_v57, %v5526_v58 }
 0x541   :  { %3632 = vmatmul.bf16.gmra.mxu0 %v8441_v54  ;;  %4122 = vmatmul.bf16.gmra.mxu1 %v8539_v55 }
 0x542   :  { %v5922_v1 = vadd.f32 %v10737_v33, %v5722_v63  ;;  %4612 = vmatmul.bf16.gmra.mxu2 %v8637_v61  ;;  %5102 = vmatmul.bf16.gmra.mxu3 %v8735_v62 }
 0x544   :  { %v6118_v2 = vmul.f32 0.01, %v5922_v1 }
 0x545   :  { %v4573_v3 = vpop.f32.mrf.mxu2  ;;  %v5063_v4 = vpop.f32.mrf.mxu3 }
 0x546   :  { %v6314_v6 = vmax.f32 %v5922_v1, %v6118_v2  ;;  %v5527_v8 = vmax.f32 %v4573_v3, %v5063_v4  ;;  %v3595_v9 = vpop.f32.mrf.mxu0  ;;  %v4085_v10 = vpop.f32.mrf.mxu1  ;;  %v8444_v2 = vld [vmem:[%s11117_s0 + $0x2a8] sm:$0xff]  ;;  %v8542_v3 = vld [vmem:[%s11117_s0 + $0x5b8] sm:$0xff] }
 0x547   :  { %v5332_v18 = vmax.f32 %v3595_v9, %v4085_v10  ;;  %v8640_v9 = vld [vmem:[%s11117_s0 + $0x8c8] sm:$0xff]  ;;  %v8738_v10 = vld [vmem:[%s11117_s0 + $0xbd8] sm:$0xff] }
 0x548   :  { %v9127_v11 = vpack.c.bf16 %v6314_v6, %v6313_v5  ;;  %v5723_v12 = vmax.f32 %v5331_v7, %v5527_v8 }
 0x54a   :  { %9321 = vst [vmem:[%s11119_s3 + $0x248] sm:$0xff] %v9127_v11   ;;  %v5923_v17 = vadd.f32 %v10737_v33, %v5723_v12 }
 0x54c   :  { %v6119_v25 = vmul.f32 0.01, %v5923_v17 }
 0x54d   :  { %v4575_v13 = vpop.f32.mrf.mxu2  ;;  %v5065_v14 = vpop.f32.mrf.mxu3 }
 0x54e   :  { %v5528_v19 = vmax.f32 %v4575_v13, %v5065_v14  ;;  %v3598_v20 = vpop.f32.mrf.mxu0  ;;  %v4088_v21 = vpop.f32.mrf.mxu1  ;;  %v6315_v30 = vmax.f32 %v5923_v17, %v6119_v25 }
 0x54f   :  { %v5333_v40 = vmax.f32 %v3598_v20, %v4088_v21 }
 0x550   :  { %v5724_v24 = vmax.f32 %v5332_v18, %v5528_v19 }
 0x551   :  { %3637 = vmatmul.bf16.gmra.mxu0 %v8442_v15  ;;  %4127 = vmatmul.bf16.gmra.mxu1 %v8540_v16 }
 0x552   :  { %v5924_v26 = vadd.f32 %v10737_v33, %v5724_v24  ;;  %4617 = vmatmul.bf16.gmra.mxu2 %v8638_v22  ;;  %5107 = vmatmul.bf16.gmra.mxu3 %v8736_v23 }
 0x554   :  { %v6120_v27 = vmul.f32 0.01, %v5924_v26 }
 0x555   :  { %v4578_v28 = vpop.f32.mrf.mxu2  ;;  %v5068_v29 = vpop.f32.mrf.mxu3 }
 0x556   :  { %v6316_v31 = vmax.f32 %v5924_v26, %v6120_v27  ;;  %v5529_v32 = vmax.f32 %v4578_v28, %v5068_v29  ;;  %v3600_v34 = vpop.f32.mrf.mxu0  ;;  %v4090_v35 = vpop.f32.mrf.mxu1  ;;  %v8445_v27 = vld [vmem:[%s11117_s0 + $0x2b0] sm:$0xff]  ;;  %v8543_v28 = vld [vmem:[%s11117_s0 + $0x5c0] sm:$0xff] }
 0x557   :  { %v5334_v43 = vmax.f32 %v3600_v34, %v4090_v35  ;;  %v8641_v34 = vld [vmem:[%s11117_s0 + $0x8d0] sm:$0xff]  ;;  %v8739_v35 = vld [vmem:[%s11117_s0 + $0xbe0] sm:$0xff] }
 0x558   :  { %v9132_v36 = vpack.c.bf16 %v6316_v31, %v6315_v30  ;;  %v5725_v37 = vmax.f32 %v5333_v40, %v5529_v32 }
 0x55a   :  { %9322 = vst [vmem:[%s11119_s3 + $0x250] sm:$0xff] %v9132_v36   ;;  %v5925_v42 = vadd.f32 %v10737_v33, %v5725_v37 }
 0x55c   :  { %v6121_v50 = vmul.f32 0.01, %v5925_v42 }
 0x55d   :  { %v4580_v38 = vpop.f32.mrf.mxu2  ;;  %v5070_v53 = vpop.f32.mrf.mxu3 }
 0x55e   :  { %v5530_v44 = vmax.f32 %v4580_v38, %v5070_v53  ;;  %v3603_v45 = vpop.f32.mrf.mxu0  ;;  %v4093_v46 = vpop.f32.mrf.mxu1  ;;  %v6317_v56 = vmax.f32 %v5925_v42, %v6121_v50 }
 0x55f   :  { %v5335_v58 = vmax.f32 %v3603_v45, %v4093_v46 }
 0x560   :  { %v5726_v49 = vmax.f32 %v5334_v43, %v5530_v44 }
 0x561   :  { %3642 = vmatmul.bf16.gmra.mxu0 %v8443_v39  ;;  %4132 = vmatmul.bf16.gmra.mxu1 %v8541_v41 }
 0x562   :  { %v5926_v51 = vadd.f32 %v10737_v33, %v5726_v49  ;;  %4622 = vmatmul.bf16.gmra.mxu2 %v8639_v47  ;;  %5112 = vmatmul.bf16.gmra.mxu3 %v8737_v48 }
 0x564   :  { %v6122_v52 = vmul.f32 0.01, %v5926_v51 }
 0x565   :  { %v4583_v54 = vpop.f32.mrf.mxu2  ;;  %v5073_v55 = vpop.f32.mrf.mxu3 }
 0x566   :  { %v6318_v57 = vmax.f32 %v5926_v51, %v6122_v52  ;;  %v5531_v59 = vmax.f32 %v4583_v54, %v5073_v55  ;;  %v3605_v60 = vpop.f32.mrf.mxu0  ;;  %v4095_v61 = vpop.f32.mrf.mxu1  ;;  %v8446_v52 = vld [vmem:[%s11117_s0 + $0x2b8] sm:$0xff]  ;;  %v8544_v54 = vld [vmem:[%s11117_s0 + $0x5c8] sm:$0xff] }
 0x567   :  { %v5336_v5 = vmax.f32 %v3605_v60, %v4095_v61  ;;  %v8642_v60 = vld [vmem:[%s11117_s0 + $0x8d8] sm:$0xff]  ;;  %v8740_v61 = vld [vmem:[%s11117_s0 + $0xbe8] sm:$0xff] }
 0x568   :  { %v9137_v62 = vpack.c.bf16 %v6318_v57, %v6317_v56  ;;  %v5727_v63 = vmax.f32 %v5335_v58, %v5531_v59 }
 0x56a   :  { %9323 = vst [vmem:[%s11119_s3 + $0x258] sm:$0xff] %v9137_v62   ;;  %v5927_v4 = vadd.f32 %v10737_v33, %v5727_v63 }
 0x56c   :  { %v6123_v12 = vmul.f32 0.01, %v5927_v4 }
 0x56d   :  { %v4585_v0 = vpop.f32.mrf.mxu2  ;;  %v5075_v1 = vpop.f32.mrf.mxu3 }
 0x56e   :  { %v5532_v6 = vmax.f32 %v4585_v0, %v5075_v1  ;;  %v3608_v7 = vpop.f32.mrf.mxu0  ;;  %v4098_v8 = vpop.f32.mrf.mxu1  ;;  %v6319_v17 = vmax.f32 %v5927_v4, %v6123_v12 }
 0x56f   :  { %v5337_v19 = vmax.f32 %v3608_v7, %v4098_v8 }
 0x570   :  { %v5728_v11 = vmax.f32 %v5336_v5, %v5532_v6 }
 0x571   :  { %3647 = vmatmul.bf16.gmra.mxu0 %v8444_v2  ;;  %4137 = vmatmul.bf16.gmra.mxu1 %v8542_v3 }
 0x572   :  { %v5928_v13 = vadd.f32 %v10737_v33, %v5728_v11  ;;  %4627 = vmatmul.bf16.gmra.mxu2 %v8640_v9  ;;  %5117 = vmatmul.bf16.gmra.mxu3 %v8738_v10 }
 0x574   :  { %v6124_v14 = vmul.f32 0.01, %v5928_v13 }
 0x575   :  { %v4588_v15 = vpop.f32.mrf.mxu2  ;;  %v5078_v16 = vpop.f32.mrf.mxu3 }
 0x576   :  { %v6320_v18 = vmax.f32 %v5928_v13, %v6124_v14  ;;  %v5533_v20 = vmax.f32 %v4588_v15, %v5078_v16  ;;  %v3610_v21 = vpop.f32.mrf.mxu0  ;;  %v4100_v22 = vpop.f32.mrf.mxu1  ;;  %v8447_v14 = vld [vmem:[%s11117_s0 + $0x2c0] sm:$0xff]  ;;  %v8545_v15 = vld [vmem:[%s11117_s0 + $0x5d0] sm:$0xff] }
 0x577   :  { %v5338_v30 = vmax.f32 %v3610_v21, %v4100_v22  ;;  %v8643_v21 = vld [vmem:[%s11117_s0 + $0x8e0] sm:$0xff]  ;;  %v8741_v22 = vld [vmem:[%s11117_s0 + $0xbf0] sm:$0xff] }
 0x578   :  { %v9142_v23 = vpack.c.bf16 %v6320_v18, %v6319_v17  ;;  %v5729_v24 = vmax.f32 %v5337_v19, %v5533_v20 }
 0x57a   :  { %9324 = vst [vmem:[%s11119_s3 + $0x260] sm:$0xff] %v9142_v23   ;;  %v5929_v29 = vadd.f32 %v10737_v33, %v5729_v24 }
 0x57c   :  { %v6125_v37 = vmul.f32 0.01, %v5929_v29 }
 0x57d   :  { %v4590_v25 = vpop.f32.mrf.mxu2  ;;  %v5080_v26 = vpop.f32.mrf.mxu3 }
 0x57e   :  { %v5534_v31 = vmax.f32 %v4590_v25, %v5080_v26  ;;  %v3613_v40 = vpop.f32.mrf.mxu0  ;;  %v4103_v32 = vpop.f32.mrf.mxu1  ;;  %v6321_v42 = vmax.f32 %v5929_v29, %v6125_v37 }
 0x57f   :  { %v5339_v44 = vmax.f32 %v3613_v40, %v4103_v32 }
 0x580   :  { %v5730_v36 = vmax.f32 %v5338_v30, %v5534_v31 }
 0x581   :  { %3652 = vmatmul.bf16.gmra.mxu0 %v8445_v27  ;;  %4142 = vmatmul.bf16.gmra.mxu1 %v8543_v28 }
 0x582   :  { %v5930_v38 = vadd.f32 %v10737_v33, %v5730_v36  ;;  %4632 = vmatmul.bf16.gmra.mxu2 %v8641_v34  ;;  %5122 = vmatmul.bf16.gmra.mxu3 %v8739_v35 }
 0x584   :  { %v6126_v53 = vmul.f32 0.01, %v5930_v38 }
 0x585   :  { %v4593_v39 = vpop.f32.mrf.mxu2  ;;  %v5083_v41 = vpop.f32.mrf.mxu3 }
 0x586   :  { %v6322_v43 = vmax.f32 %v5930_v38, %v6126_v53  ;;  %v5535_v45 = vmax.f32 %v4593_v39, %v5083_v41  ;;  %v3615_v46 = vpop.f32.mrf.mxu0  ;;  %v4105_v47 = vpop.f32.mrf.mxu1  ;;  %v8448_v53 = vld [vmem:[%s11117_s0 + $0x2c8] sm:$0xff]  ;;  %v8546_v39 = vld [vmem:[%s11117_s0 + $0x5d8] sm:$0xff] }
 0x587   :  { %v5340_v56 = vmax.f32 %v3615_v46, %v4105_v47  ;;  %v8644_v46 = vld [vmem:[%s11117_s0 + $0x8e8] sm:$0xff]  ;;  %v8742_v47 = vld [vmem:[%s11117_s0 + $0xbf8] sm:$0xff] }
 0x588   :  { %v9147_v48 = vpack.c.bf16 %v6322_v43, %v6321_v42  ;;  %v5731_v49 = vmax.f32 %v5339_v44, %v5535_v45 }
 0x58a   :  { %9325 = vst [vmem:[%s11119_s3 + $0x268] sm:$0xff] %v9147_v48   ;;  %v5931_v55 = vadd.f32 %v10737_v33, %v5731_v49 }
 0x58c   :  { %v6127_v63 = vmul.f32 0.01, %v5931_v55 }
 0x58d   :  { %v4595_v50 = vpop.f32.mrf.mxu2  ;;  %v5085_v51 = vpop.f32.mrf.mxu3 }
 0x58e   :  { %v5536_v57 = vmax.f32 %v4595_v50, %v5085_v51  ;;  %v3618_v58 = vpop.f32.mrf.mxu0  ;;  %v4108_v59 = vpop.f32.mrf.mxu1  ;;  %v6323_v4 = vmax.f32 %v5931_v55, %v6127_v63 }
 0x58f   :  { %v5341_v6 = vmax.f32 %v3618_v58, %v4108_v59 }
 0x590   :  { %v5732_v62 = vmax.f32 %v5340_v56, %v5536_v57 }
 0x591   :  { %3657 = vmatmul.bf16.gmra.mxu0 %v8446_v52  ;;  %4147 = vmatmul.bf16.gmra.mxu1 %v8544_v54 }
 0x592   :  { %v5932_v0 = vadd.f32 %v10737_v33, %v5732_v62  ;;  %4637 = vmatmul.bf16.gmra.mxu2 %v8642_v60  ;;  %5127 = vmatmul.bf16.gmra.mxu3 %v8740_v61 }
 0x594   :  { %v6128_v1 = vmul.f32 0.01, %v5932_v0 }
 0x595   :  { %v4598_v2 = vpop.f32.mrf.mxu2  ;;  %v5088_v3 = vpop.f32.mrf.mxu3 }
 0x596   :  { %v6324_v5 = vmax.f32 %v5932_v0, %v6128_v1  ;;  %v5537_v7 = vmax.f32 %v4598_v2, %v5088_v3  ;;  %v3620_v8 = vpop.f32.mrf.mxu0  ;;  %v4110_v9 = vpop.f32.mrf.mxu1  ;;  %v8449_v1 = vld [vmem:[%s11117_s0 + $0x2d0] sm:$0xff]  ;;  %v8547_v2 = vld [vmem:[%s11117_s0 + $0x5e0] sm:$0xff] }
 0x597   :  { %v5342_v17 = vmax.f32 %v3620_v8, %v4110_v9  ;;  %v8645_v8 = vld [vmem:[%s11117_s0 + $0x8f0] sm:$0xff]  ;;  %v8743_v9 = vld [vmem:[%s11117_s0 + $0xc00] sm:$0xff] }
 0x598   :  { %v9152_v10 = vpack.c.bf16 %v6324_v5, %v6323_v4  ;;  %v5733_v11 = vmax.f32 %v5341_v6, %v5537_v7 }
 0x59a   :  { %9326 = vst [vmem:[%s11119_s3 + $0x270] sm:$0xff] %v9152_v10   ;;  %v5933_v16 = vadd.f32 %v10737_v33, %v5733_v11 }
 0x59c   :  { %v6129_v24 = vmul.f32 0.01, %v5933_v16 }
 0x59d   :  { %v4600_v12 = vpop.f32.mrf.mxu2  ;;  %v5090_v13 = vpop.f32.mrf.mxu3 }
 0x59e   :  { %v5538_v18 = vmax.f32 %v4600_v12, %v5090_v13  ;;  %v3623_v19 = vpop.f32.mrf.mxu0  ;;  %v4113_v20 = vpop.f32.mrf.mxu1  ;;  %v6325_v29 = vmax.f32 %v5933_v16, %v6129_v24 }
 0x59f   :  { %v5343_v31 = vmax.f32 %v3623_v19, %v4113_v20 }
 0x5a0   :  { %v5734_v23 = vmax.f32 %v5342_v17, %v5538_v18 }
 0x5a1   :  { %3662 = vmatmul.bf16.gmra.mxu0 %v8447_v14  ;;  %4152 = vmatmul.bf16.gmra.mxu1 %v8545_v15 }
 0x5a2   :  { %v5934_v25 = vadd.f32 %v10737_v33, %v5734_v23  ;;  %4642 = vmatmul.bf16.gmra.mxu2 %v8643_v21  ;;  %5132 = vmatmul.bf16.gmra.mxu3 %v8741_v22 }
 0x5a4   :  { %v6130_v26 = vmul.f32 0.01, %v5934_v25 }
 0x5a5   :  { %v4603_v27 = vpop.f32.mrf.mxu2  ;;  %v5093_v28 = vpop.f32.mrf.mxu3 }
 0x5a6   :  { %v6326_v30 = vmax.f32 %v5934_v25, %v6130_v26  ;;  %v5539_v40 = vmax.f32 %v4603_v27, %v5093_v28  ;;  %v3625_v32 = vpop.f32.mrf.mxu0  ;;  %v4115_v34 = vpop.f32.mrf.mxu1  ;;  %v8450_v26 = vld [vmem:[%s11117_s0 + $0x2d8] sm:$0xff]  ;;  %v8548_v27 = vld [vmem:[%s11117_s0 + $0x5e8] sm:$0xff] }
 0x5a7   :  { %v5344_v42 = vmax.f32 %v3625_v32, %v4115_v34  ;;  %v8646_v32 = vld [vmem:[%s11117_s0 + $0x8f8] sm:$0xff]  ;;  %v8744_v34 = vld [vmem:[%s11117_s0 + $0xc08] sm:$0xff] }
 0x5a8   :  { %v9157_v35 = vpack.c.bf16 %v6326_v30, %v6325_v29  ;;  %v5735_v36 = vmax.f32 %v5343_v31, %v5539_v40 }
 0x5aa   :  { %9327 = vst [vmem:[%s11119_s3 + $0x278] sm:$0xff] %v9157_v35   ;;  %v5935_v41 = vadd.f32 %v10737_v33, %v5735_v36 }
 0x5ac   :  { %v6131_v49 = vmul.f32 0.01, %v5935_v41 }
 0x5ad   :  { %v4605_v37 = vpop.f32.mrf.mxu2  ;;  %v5095_v38 = vpop.f32.mrf.mxu3 }
 0x5ae   :  { %v5540_v43 = vmax.f32 %v4605_v37, %v5095_v38  ;;  %v3628_v44 = vpop.f32.mrf.mxu0  ;;  %v4118_v45 = vpop.f32.mrf.mxu1  ;;  %v6327_v55 = vmax.f32 %v5935_v41, %v6131_v49 }
 0x5af   :  { %v5345_v57 = vmax.f32 %v3628_v44, %v4118_v45 }
 0x5b0   :  { %v5736_v48 = vmax.f32 %v5344_v42, %v5540_v43 }
 0x5b1   :  { %3667 = vmatmul.bf16.gmra.mxu0 %v8448_v53  ;;  %4157 = vmatmul.bf16.gmra.mxu1 %v8546_v39 }
 0x5b2   :  { %v5936_v50 = vadd.f32 %v10737_v33, %v5736_v48  ;;  %4647 = vmatmul.bf16.gmra.mxu2 %v8644_v46  ;;  %5137 = vmatmul.bf16.gmra.mxu3 %v8742_v47 }
 0x5b4   :  { %v6132_v51 = vmul.f32 0.01, %v5936_v50 }
 0x5b5   :  { %v4608_v52 = vpop.f32.mrf.mxu2  ;;  %v5098_v54 = vpop.f32.mrf.mxu3 }
 0x5b6   :  { %v6328_v56 = vmax.f32 %v5936_v50, %v6132_v51  ;;  %v5541_v58 = vmax.f32 %v4608_v52, %v5098_v54  ;;  %v3630_v59 = vpop.f32.mrf.mxu0  ;;  %v4120_v60 = vpop.f32.mrf.mxu1  ;;  %v8451_v51 = vld [vmem:[%s11117_s0 + $0x2e0] sm:$0xff]  ;;  %v8549_v52 = vld [vmem:[%s11117_s0 + $0x5f0] sm:$0xff] }
 0x5b7   :  { %v5346_v4 = vmax.f32 %v3630_v59, %v4120_v60  ;;  %v8647_v59 = vld [vmem:[%s11117_s0 + $0x900] sm:$0xff]  ;;  %v8745_v60 = vld [vmem:[%s11117_s0 + $0xc10] sm:$0xff] }
 0x5b8   :  { %v9162_v61 = vpack.c.bf16 %v6328_v56, %v6327_v55  ;;  %v5737_v62 = vmax.f32 %v5345_v57, %v5541_v58 }
 0x5ba   :  { %9328 = vst [vmem:[%s11119_s3 + $0x280] sm:$0xff] %v9162_v61   ;;  %v5937_v3 = vadd.f32 %v10737_v33, %v5737_v62 }
 0x5bc   :  { %v6133_v11 = vmul.f32 0.01, %v5937_v3 }
 0x5bd   :  { %v4610_v63 = vpop.f32.mrf.mxu2  ;;  %v5100_v0 = vpop.f32.mrf.mxu3 }
 0x5be   :  { %v5542_v5 = vmax.f32 %v4610_v63, %v5100_v0  ;;  %v3633_v6 = vpop.f32.mrf.mxu0  ;;  %v4123_v7 = vpop.f32.mrf.mxu1  ;;  %v6329_v16 = vmax.f32 %v5937_v3, %v6133_v11 }
 0x5bf   :  { %v5347_v18 = vmax.f32 %v3633_v6, %v4123_v7 }
 0x5c0   :  { %v5738_v10 = vmax.f32 %v5346_v4, %v5542_v5 }
 0x5c1   :  { %3672 = vmatmul.bf16.gmra.mxu0 %v8449_v1  ;;  %4162 = vmatmul.bf16.gmra.mxu1 %v8547_v2 }
 0x5c2   :  { %v5938_v12 = vadd.f32 %v10737_v33, %v5738_v10  ;;  %4652 = vmatmul.bf16.gmra.mxu2 %v8645_v8  ;;  %5142 = vmatmul.bf16.gmra.mxu3 %v8743_v9 }
 0x5c4   :  { %v6134_v13 = vmul.f32 0.01, %v5938_v12 }
 0x5c5   :  { %v4613_v14 = vpop.f32.mrf.mxu2  ;;  %v5103_v15 = vpop.f32.mrf.mxu3 }
 0x5c6   :  { %v6330_v17 = vmax.f32 %v5938_v12, %v6134_v13  ;;  %v5543_v19 = vmax.f32 %v4613_v14, %v5103_v15  ;;  %v3635_v20 = vpop.f32.mrf.mxu0  ;;  %v4125_v21 = vpop.f32.mrf.mxu1  ;;  %v8452_v13 = vld [vmem:[%s11117_s0 + $0x2e8] sm:$0xff]  ;;  %v8550_v14 = vld [vmem:[%s11117_s0 + $0x5f8] sm:$0xff] }
 0x5c7   :  { %v5348_v29 = vmax.f32 %v3635_v20, %v4125_v21  ;;  %v8648_v20 = vld [vmem:[%s11117_s0 + $0x908] sm:$0xff]  ;;  %v8746_v21 = vld [vmem:[%s11117_s0 + $0xc18] sm:$0xff] }
 0x5c8   :  { %v9167_v22 = vpack.c.bf16 %v6330_v17, %v6329_v16  ;;  %v5739_v23 = vmax.f32 %v5347_v18, %v5543_v19 }
 0x5ca   :  { %9329 = vst [vmem:[%s11119_s3 + $0x288] sm:$0xff] %v9167_v22   ;;  %v5939_v28 = vadd.f32 %v10737_v33, %v5739_v23 }
 0x5cc   :  { %v6135_v36 = vmul.f32 0.01, %v5939_v28 }
 0x5cd   :  { %v4615_v24 = vpop.f32.mrf.mxu2  ;;  %v5105_v25 = vpop.f32.mrf.mxu3 }
 0x5ce   :  { %v5544_v30 = vmax.f32 %v4615_v24, %v5105_v25  ;;  %v3638_v31 = vpop.f32.mrf.mxu0  ;;  %v4128_v40 = vpop.f32.mrf.mxu1  ;;  %v6331_v41 = vmax.f32 %v5939_v28, %v6135_v36 }
 0x5cf   :  { %v5349_v43 = vmax.f32 %v3638_v31, %v4128_v40 }
 0x5d0   :  { %v5740_v35 = vmax.f32 %v5348_v29, %v5544_v30 }
 0x5d1   :  { %3677 = vmatmul.bf16.gmra.mxu0 %v8450_v26  ;;  %4167 = vmatmul.bf16.gmra.mxu1 %v8548_v27 }
 0x5d2   :  { %v5940_v37 = vadd.f32 %v10737_v33, %v5740_v35  ;;  %4657 = vmatmul.bf16.gmra.mxu2 %v8646_v32  ;;  %5147 = vmatmul.bf16.gmra.mxu3 %v8744_v34 }
 0x5d4   :  { %v6136_v38 = vmul.f32 0.01, %v5940_v37 }
 0x5d5   :  { %v4618_v53 = vpop.f32.mrf.mxu2  ;;  %v5108_v39 = vpop.f32.mrf.mxu3 }
 0x5d6   :  { %v6332_v42 = vmax.f32 %v5940_v37, %v6136_v38  ;;  %v5545_v44 = vmax.f32 %v4618_v53, %v5108_v39  ;;  %v3640_v45 = vpop.f32.mrf.mxu0  ;;  %v4130_v46 = vpop.f32.mrf.mxu1  ;;  %v8453_v38 = vld [vmem:[%s11117_s0 + $0x2f0] sm:$0xff]  ;;  %v8551_v53 = vld [vmem:[%s11117_s0 + $0x600] sm:$0xff] }
 0x5d7   :  { %v5350_v55 = vmax.f32 %v3640_v45, %v4130_v46  ;;  %v8649_v45 = vld [vmem:[%s11117_s0 + $0x910] sm:$0xff]  ;;  %v8747_v46 = vld [vmem:[%s11117_s0 + $0xc20] sm:$0xff] }
 0x5d8   :  { %v9172_v47 = vpack.c.bf16 %v6332_v42, %v6331_v41  ;;  %v5741_v48 = vmax.f32 %v5349_v43, %v5545_v44 }
 0x5da   :  { %9330 = vst [vmem:[%s11119_s3 + $0x290] sm:$0xff] %v9172_v47   ;;  %v5941_v54 = vadd.f32 %v10737_v33, %v5741_v48 }
 0x5dc   :  { %v6137_v62 = vmul.f32 0.01, %v5941_v54 }
 0x5dd   :  { %v4620_v49 = vpop.f32.mrf.mxu2  ;;  %v5110_v50 = vpop.f32.mrf.mxu3 }
 0x5de   :  { %v5546_v56 = vmax.f32 %v4620_v49, %v5110_v50  ;;  %v3643_v57 = vpop.f32.mrf.mxu0  ;;  %v4133_v58 = vpop.f32.mrf.mxu1  ;;  %v6333_v3 = vmax.f32 %v5941_v54, %v6137_v62 }
 0x5df   :  { %v5351_v5 = vmax.f32 %v3643_v57, %v4133_v58 }
 0x5e0   :  { %v5742_v61 = vmax.f32 %v5350_v55, %v5546_v56 }
 0x5e1   :  { %3682 = vmatmul.bf16.gmra.mxu0 %v8451_v51  ;;  %4172 = vmatmul.bf16.gmra.mxu1 %v8549_v52 }
 0x5e2   :  { %v5942_v63 = vadd.f32 %v10737_v33, %v5742_v61  ;;  %4662 = vmatmul.bf16.gmra.mxu2 %v8647_v59  ;;  %5152 = vmatmul.bf16.gmra.mxu3 %v8745_v60 }
 0x5e4   :  { %v6138_v0 = vmul.f32 0.01, %v5942_v63 }
 0x5e5   :  { %v4623_v1 = vpop.f32.mrf.mxu2  ;;  %v5113_v2 = vpop.f32.mrf.mxu3 }
 0x5e6   :  { %v6334_v4 = vmax.f32 %v5942_v63, %v6138_v0  ;;  %v5547_v6 = vmax.f32 %v4623_v1, %v5113_v2  ;;  %v3645_v7 = vpop.f32.mrf.mxu0  ;;  %v4135_v8 = vpop.f32.mrf.mxu1  ;;  %v8454_v0 = vld [vmem:[%s11117_s0 + $0x2f8] sm:$0xff]  ;;  %v8552_v1 = vld [vmem:[%s11117_s0 + $0x608] sm:$0xff] }
 0x5e7   :  { %v5352_v16 = vmax.f32 %v3645_v7, %v4135_v8  ;;  %v8650_v7 = vld [vmem:[%s11117_s0 + $0x918] sm:$0xff]  ;;  %v8748_v8 = vld [vmem:[%s11117_s0 + $0xc28] sm:$0xff] }
 0x5e8   :  { %v9177_v9 = vpack.c.bf16 %v6334_v4, %v6333_v3  ;;  %v5743_v10 = vmax.f32 %v5351_v5, %v5547_v6 }
 0x5ea   :  { %9331 = vst [vmem:[%s11119_s3 + $0x298] sm:$0xff] %v9177_v9   ;;  %v5943_v15 = vadd.f32 %v10737_v33, %v5743_v10 }
 0x5ec   :  { %v6139_v23 = vmul.f32 0.01, %v5943_v15 }
 0x5ed   :  { %v4625_v11 = vpop.f32.mrf.mxu2  ;;  %v5115_v12 = vpop.f32.mrf.mxu3 }
 0x5ee   :  { %v5548_v17 = vmax.f32 %v4625_v11, %v5115_v12  ;;  %v3648_v18 = vpop.f32.mrf.mxu0  ;;  %v4138_v19 = vpop.f32.mrf.mxu1  ;;  %v6335_v28 = vmax.f32 %v5943_v15, %v6139_v23 }
 0x5ef   :  { %v5353_v30 = vmax.f32 %v3648_v18, %v4138_v19 }
 0x5f0   :  { %v5744_v22 = vmax.f32 %v5352_v16, %v5548_v17 }
 0x5f1   :  { %3687 = vmatmul.bf16.gmra.mxu0 %v8452_v13  ;;  %4177 = vmatmul.bf16.gmra.mxu1 %v8550_v14 }
 0x5f2   :  { %v5944_v24 = vadd.f32 %v10737_v33, %v5744_v22  ;;  %4667 = vmatmul.bf16.gmra.mxu2 %v8648_v20  ;;  %5157 = vmatmul.bf16.gmra.mxu3 %v8746_v21 }
 0x5f4   :  { %v6140_v25 = vmul.f32 0.01, %v5944_v24 }
 0x5f5   :  { %v4628_v26 = vpop.f32.mrf.mxu2  ;;  %v5118_v27 = vpop.f32.mrf.mxu3 }
 0x5f6   :  { %v6336_v29 = vmax.f32 %v5944_v24, %v6140_v25  ;;  %v5549_v31 = vmax.f32 %v4628_v26, %v5118_v27  ;;  %v3650_v40 = vpop.f32.mrf.mxu0  ;;  %v4140_v32 = vpop.f32.mrf.mxu1  ;;  %v8553_v25 = vld [vmem:[%s11117_s0 + $0x610] sm:$0xff]  ;;  %v11041_v26 = vld [vmem:[%s11118_s2] ss:$0 sm:$0xff] }
 0x5f7   :  { %v5354_v41 = vmax.f32 %v3650_v40, %v4140_v32  ;;  %v8651_v40 = vld [vmem:[%s11117_s0 + $0x920] sm:$0xff]  ;;  %v8749_v32 = vld [vmem:[%s11117_s0 + $0xc30] sm:$0xff] }
 0x5f8   :  { %v9182_v34 = vpack.c.bf16 %v6336_v29, %v6335_v28  ;;  %v5745_v35 = vmax.f32 %v5353_v30, %v5549_v31 }
 0x5fa   :  { %9332 = vst [vmem:[%s11119_s3 + $0x2a0] sm:$0xff] %v9182_v34   ;;  %v5945_v39 = vadd.f32 %v10737_v33, %v5745_v35 }
 0x5fc   :  { %v6141_v48 = vmul.f32 0.01, %v5945_v39 }
 0x5fd   :  { %v4630_v36 = vpop.f32.mrf.mxu2  ;;  %v5120_v37 = vpop.f32.mrf.mxu3 }
 0x5fe   :  { %v5550_v42 = vmax.f32 %v4630_v36, %v5120_v37  ;;  %v3653_v43 = vpop.f32.mrf.mxu0  ;;  %v4143_v44 = vpop.f32.mrf.mxu1  ;;  %v6337_v54 = vmax.f32 %v5945_v39, %v6141_v48 }
 0x5ff   :  { %v5355_v56 = vmax.f32 %v3653_v43, %v4143_v44 }
 0x600   :  { %v5746_v47 = vmax.f32 %v5354_v41, %v5550_v42 }
 0x601   :  { %3692 = vmatmul.bf16.gmra.mxu0 %v8453_v38  ;;  %4182 = vmatmul.bf16.gmra.mxu1 %v8551_v53 }
 0x602   :  { %v5946_v49 = vadd.f32 %v10737_v33, %v5746_v47  ;;  %4672 = vmatmul.bf16.gmra.mxu2 %v8649_v45  ;;  %5162 = vmatmul.bf16.gmra.mxu3 %v8747_v46 }
 0x604   :  { %v6142_v50 = vmul.f32 0.01, %v5946_v49 }
 0x605   :  { %v4633_v51 = vpop.f32.mrf.mxu2  ;;  %v5123_v52 = vpop.f32.mrf.mxu3 }
 0x606   :  { %v6338_v55 = vmax.f32 %v5946_v49, %v6142_v50  ;;  %v5551_v57 = vmax.f32 %v4633_v51, %v5123_v52  ;;  %v3655_v58 = vpop.f32.mrf.mxu0  ;;  %v4145_v59 = vpop.f32.mrf.mxu1  ;;  %v8456_v50 = vld [vmem:[%s11117_s0 + $0x308] sm:$0xff]  ;;  %v8554_v51 = vld [vmem:[%s11117_s0 + $0x618] sm:$0xff] }
 0x607   :  { %v5356_v3 = vmax.f32 %v3655_v58, %v4145_v59  ;;  %v8652_v58 = vld [vmem:[%s11117_s0 + $0x928] sm:$0xff]  ;;  %v8750_v59 = vld [vmem:[%s11117_s0 + $0xc38] sm:$0xff] }
 0x608   :  { %v9187_v60 = vpack.c.bf16 %v6338_v55, %v6337_v54  ;;  %v5747_v61 = vmax.f32 %v5355_v56, %v5551_v57 }
 0x60a   :  { %9333 = vst [vmem:[%s11119_s3 + $0x2a8] sm:$0xff] %v9187_v60   ;;  %v5947_v2 = vadd.f32 %v10737_v33, %v5747_v61 }
 0x60c   :  { %v6143_v10 = vmul.f32 0.01, %v5947_v2 }
 0x60d   :  { %v4635_v62 = vpop.f32.mrf.mxu2  ;;  %v5125_v63 = vpop.f32.mrf.mxu3 }
 0x60e   :  { %v5552_v4 = vmax.f32 %v4635_v62, %v5125_v63  ;;  %v3658_v5 = vpop.f32.mrf.mxu0  ;;  %v4148_v6 = vpop.f32.mrf.mxu1  ;;  %v6339_v15 = vmax.f32 %v5947_v2, %v6143_v10 }
 0x60f   :  { %v5357_v17 = vmax.f32 %v3658_v5, %v4148_v6 }
 0x610   :  { %v5748_v9 = vmax.f32 %v5356_v3, %v5552_v4 }
 0x611   :  { %3697 = vmatmul.bf16.gmra.mxu0 %v8454_v0  ;;  %4187 = vmatmul.bf16.gmra.mxu1 %v8552_v1 }
 0x612   :  { %v5948_v11 = vadd.f32 %v10737_v33, %v5748_v9  ;;  %4677 = vmatmul.bf16.gmra.mxu2 %v8650_v7  ;;  %5167 = vmatmul.bf16.gmra.mxu3 %v8748_v8  ;;  %v8455_v33 = vld [vmem:[%s11117_s0 + $0x300] sm:$0xff] }
 0x614   :  { %v6144_v12 = vmul.f32 0.01, %v5948_v11 }
 0x615   :  { %v4638_v13 = vpop.f32.mrf.mxu2  ;;  %v5128_v14 = vpop.f32.mrf.mxu3 }
 0x616   :  { %v6340_v16 = vmax.f32 %v5948_v11, %v6144_v12  ;;  %v5553_v18 = vmax.f32 %v4638_v13, %v5128_v14  ;;  %v3660_v19 = vpop.f32.mrf.mxu0  ;;  %v4150_v20 = vpop.f32.mrf.mxu1 }
 0x617   :  { %v5358_v28 = vmax.f32 %v3660_v19, %v4150_v20 }
 0x618   :  { %v9192_v21 = vpack.c.bf16 %v6340_v16, %v6339_v15  ;;  %v5749_v22 = vmax.f32 %v5357_v17, %v5553_v18 }
 0x61a   :  { %9334 = vst [vmem:[%s11119_s3 + $0x2b0] sm:$0xff] %v9192_v21   ;;  %v5949_v27 = vadd.f32 %v11041_v26, %v5749_v22 }
 0x61c   :  { %v6145_v35 = vmul.f32 0.01, %v5949_v27 }
 0x61d   :  { %v4640_v23 = vpop.f32.mrf.mxu2  ;;  %v5130_v24 = vpop.f32.mrf.mxu3 }
 0x61e   :  { %v5554_v29 = vmax.f32 %v4640_v23, %v5130_v24  ;;  %v3663_v30 = vpop.f32.mrf.mxu0  ;;  %v4153_v31 = vpop.f32.mrf.mxu1  ;;  %v6341_v39 = vmax.f32 %v5949_v27, %v6145_v35 }
 0x61f   :  { %v5359_v42 = vmax.f32 %v3663_v30, %v4153_v31 }
 0x620   :  { %v5750_v34 = vmax.f32 %v5358_v28, %v5554_v29 }
 0x621   :  { %3702 = vmatmul.bf16.gmra.mxu0 %v8455_v33  ;;  %4192 = vmatmul.bf16.gmra.mxu1 %v8553_v25 }
 0x622   :  { %v5950_v36 = vadd.f32 %v11041_v26, %v5750_v34  ;;  %4682 = vmatmul.bf16.gmra.mxu2 %v8651_v40  ;;  %5172 = vmatmul.bf16.gmra.mxu3 %v8749_v32 }
 0x624   :  { %v6146_v37 = vmul.f32 0.01, %v5950_v36 }
 0x625   :  { %v4643_v38 = vpop.f32.mrf.mxu2  ;;  %v5133_v53 = vpop.f32.mrf.mxu3 }
 0x626   :  { %v6342_v41 = vmax.f32 %v5950_v36, %v6146_v37  ;;  %v5555_v43 = vmax.f32 %v4643_v38, %v5133_v53  ;;  %v3665_v44 = vpop.f32.mrf.mxu0  ;;  %v4155_v45 = vpop.f32.mrf.mxu1 }
 0x627   :  { %v5360_v54 = vmax.f32 %v3665_v44, %v4155_v45 }
 0x628   :  { %v9197_v46 = vpack.c.bf16 %v6342_v41, %v6341_v39  ;;  %v5751_v47 = vmax.f32 %v5359_v42, %v5555_v43 }
 0x62a   :  { %9335 = vst [vmem:[%s11119_s3 + $0x2b8] sm:$0xff] %v9197_v46   ;;  %v5951_v52 = vadd.f32 %v11041_v26, %v5751_v47 }
 0x62c   :  { %v6147_v61 = vmul.f32 0.01, %v5951_v52 }
 0x62d   :  { %v4645_v48 = vpop.f32.mrf.mxu2  ;;  %v5135_v49 = vpop.f32.mrf.mxu3 }
 0x62e   :  { %v5556_v55 = vmax.f32 %v4645_v48, %v5135_v49  ;;  %v3668_v56 = vpop.f32.mrf.mxu0  ;;  %v4158_v57 = vpop.f32.mrf.mxu1  ;;  %v6343_v2 = vmax.f32 %v5951_v52, %v6147_v61 }
 0x62f   :  { %v5361_v4 = vmax.f32 %v3668_v56, %v4158_v57 }
 0x630   :  { %v5752_v60 = vmax.f32 %v5360_v54, %v5556_v55 }
 0x631   :  { %3707 = vmatmul.bf16.gmra.mxu0 %v8456_v50  ;;  %4197 = vmatmul.bf16.gmra.mxu1 %v8554_v51 }
 0x632   :  { %v5952_v62 = vadd.f32 %v11041_v26, %v5752_v60  ;;  %4687 = vmatmul.bf16.gmra.mxu2 %v8652_v58  ;;  %5177 = vmatmul.bf16.gmra.mxu3 %v8750_v59 }
 0x634   :  { %v6148_v63 = vmul.f32 0.01, %v5952_v62 }
 0x635   :  { %v4648_v0 = vpop.f32.mrf.mxu2  ;;  %v5138_v1 = vpop.f32.mrf.mxu3 }
 0x636   :  { %v6344_v3 = vmax.f32 %v5952_v62, %v6148_v63  ;;  %v5557_v5 = vmax.f32 %v4648_v0, %v5138_v1  ;;  %v3670_v6 = vpop.f32.mrf.mxu0  ;;  %v4160_v7 = vpop.f32.mrf.mxu1 }
 0x637   :  { %v5362_v13 = vmax.f32 %v3670_v6, %v4160_v7 }
 0x638   :  { %v9202_v8 = vpack.c.bf16 %v6344_v3, %v6343_v2  ;;  %v5753_v9 = vmax.f32 %v5361_v4, %v5557_v5 }
 0x63a   :  { %9336 = vst [vmem:[%s11119_s3 + $0x2c0] sm:$0xff] %v9202_v8   ;;  %v5953_v12 = vadd.f32 %v11041_v26, %v5753_v9 }
 0x63c   :  { %v6149_v18 = vmul.f32 0.01, %v5953_v12 }
 0x63d   :  { %v4650_v10 = vpop.f32.mrf.mxu2  ;;  %v5140_v11 = vpop.f32.mrf.mxu3 }
 0x63e   :  { %v5558_v14 = vmax.f32 %v4650_v10, %v5140_v11  ;;  %v3673_v15 = vpop.f32.mrf.mxu0  ;;  %v4163_v16 = vpop.f32.mrf.mxu1  ;;  %v6345_v23 = vmax.f32 %v5953_v12, %v6149_v18 }
 0x63f   :  { %v5363_v33 = vmax.f32 %v3673_v15, %v4163_v16 }
 0x640   :  { %v5754_v17 = vmax.f32 %v5362_v13, %v5558_v14 }
 0x642   :  { %v5954_v19 = vadd.f32 %v11041_v26, %v5754_v17 }
 0x644   :  { %v6150_v20 = vmul.f32 0.01, %v5954_v19 }
 0x645   :  { %v4653_v21 = vpop.f32.mrf.mxu2  ;;  %v5143_v22 = vpop.f32.mrf.mxu3 }
 0x646   :  { %v6346_v24 = vmax.f32 %v5954_v19, %v6150_v20  ;;  %v5559_v25 = vmax.f32 %v4653_v21, %v5143_v22  ;;  %v3675_v27 = vpop.f32.mrf.mxu0  ;;  %v4165_v28 = vpop.f32.mrf.mxu1 }
 0x647   :  { %v5364_v34 = vmax.f32 %v3675_v27, %v4165_v28 }
 0x648   :  { %v9207_v29 = vpack.c.bf16 %v6346_v24, %v6345_v23  ;;  %v5755_v30 = vmax.f32 %v5363_v33, %v5559_v25 }
 0x64a   :  { %9337 = vst [vmem:[%s11119_s3 + $0x2c8] sm:$0xff] %v9207_v29   ;;  %v5955_v32 = vadd.f32 %v11041_v26, %v5755_v30 }
 0x64c   :  { %v6151_v53 = vmul.f32 0.01, %v5955_v32 }
 0x64d   :  { %v4655_v31 = vpop.f32.mrf.mxu2  ;;  %v5145_v40 = vpop.f32.mrf.mxu3 }
 0x64e   :  { %v5560_v35 = vmax.f32 %v4655_v31, %v5145_v40  ;;  %v3678_v36 = vpop.f32.mrf.mxu0  ;;  %v4168_v37 = vpop.f32.mrf.mxu1  ;;  %v6347_v44 = vmax.f32 %v5955_v32, %v6151_v53 }
 0x64f   :  { %v5365_v46 = vmax.f32 %v3678_v36, %v4168_v37 }
 0x650   :  { %v5756_v38 = vmax.f32 %v5364_v34, %v5560_v35 }
 0x652   :  { %v5956_v39 = vadd.f32 %v11041_v26, %v5756_v38 }
 0x654   :  { %v6152_v41 = vmul.f32 0.01, %v5956_v39 }
 0x655   :  { %v4658_v42 = vpop.f32.mrf.mxu2  ;;  %v5148_v43 = vpop.f32.mrf.mxu3 }
 0x656   :  { %v6348_v45 = vmax.f32 %v5956_v39, %v6152_v41  ;;  %v5561_v47 = vmax.f32 %v4658_v42, %v5148_v43  ;;  %v3680_v48 = vpop.f32.mrf.mxu0  ;;  %v4170_v49 = vpop.f32.mrf.mxu1 }
 0x657   :  { %v5366_v56 = vmax.f32 %v3680_v48, %v4170_v49 }
 0x658   :  { %v9212_v50 = vpack.c.bf16 %v6348_v45, %v6347_v44  ;;  %v5757_v51 = vmax.f32 %v5365_v46, %v5561_v47 }
 0x65a   :  { %9338 = vst [vmem:[%s11119_s3 + $0x2d0] sm:$0xff] %v9212_v50   ;;  %v5957_v55 = vadd.f32 %v11041_v26, %v5757_v51 }
 0x65c   :  { %v6153_v61 = vmul.f32 0.01, %v5957_v55 }
 0x65d   :  { %v4660_v52 = vpop.f32.mrf.mxu2  ;;  %v5150_v54 = vpop.f32.mrf.mxu3 }
 0x65e   :  { %v5562_v57 = vmax.f32 %v4660_v52, %v5150_v54  ;;  %v3683_v58 = vpop.f32.mrf.mxu0  ;;  %v4173_v59 = vpop.f32.mrf.mxu1  ;;  %v6349_v2 = vmax.f32 %v5957_v55, %v6153_v61 }
 0x65f   :  { %v5367_v4 = vmax.f32 %v3683_v58, %v4173_v59 }
 0x660   :  { %v5758_v60 = vmax.f32 %v5366_v56, %v5562_v57 }
 0x662   :  { %v5958_v62 = vadd.f32 %v11041_v26, %v5758_v60 }
 0x664   :  { %v6154_v63 = vmul.f32 0.01, %v5958_v62 }
 0x665   :  { %v4663_v0 = vpop.f32.mrf.mxu2  ;;  %v5153_v1 = vpop.f32.mrf.mxu3 }
 0x666   :  { %v6350_v3 = vmax.f32 %v5958_v62, %v6154_v63  ;;  %v5563_v5 = vmax.f32 %v4663_v0, %v5153_v1  ;;  %v3685_v6 = vpop.f32.mrf.mxu0  ;;  %v4175_v7 = vpop.f32.mrf.mxu1 }
 0x667   :  { %v5368_v13 = vmax.f32 %v3685_v6, %v4175_v7 }
 0x668   :  { %v9217_v8 = vpack.c.bf16 %v6350_v3, %v6349_v2  ;;  %v5759_v9 = vmax.f32 %v5367_v4, %v5563_v5 }
 0x66a   :  { %9339 = vst [vmem:[%s11119_s3 + $0x2d8] sm:$0xff] %v9217_v8   ;;  %v5959_v12 = vadd.f32 %v11041_v26, %v5759_v9 }
 0x66c   :  { %v6155_v18 = vmul.f32 0.01, %v5959_v12 }
 0x66d   :  { %v4665_v10 = vpop.f32.mrf.mxu2  ;;  %v5155_v11 = vpop.f32.mrf.mxu3 }
 0x66e   :  { %v5564_v14 = vmax.f32 %v4665_v10, %v5155_v11  ;;  %v3688_v15 = vpop.f32.mrf.mxu0  ;;  %v4178_v16 = vpop.f32.mrf.mxu1  ;;  %v6351_v23 = vmax.f32 %v5959_v12, %v6155_v18 }
 0x66f   :  { %v5369_v33 = vmax.f32 %v3688_v15, %v4178_v16 }
 0x670   :  { %v5760_v17 = vmax.f32 %v5368_v13, %v5564_v14 }
 0x672   :  { %v5960_v19 = vadd.f32 %v11041_v26, %v5760_v17 }
 0x674   :  { %v6156_v20 = vmul.f32 0.01, %v5960_v19 }
 0x675   :  { %v4668_v21 = vpop.f32.mrf.mxu2  ;;  %v5158_v22 = vpop.f32.mrf.mxu3 }
 0x676   :  { %v6352_v24 = vmax.f32 %v5960_v19, %v6156_v20  ;;  %v5565_v25 = vmax.f32 %v4668_v21, %v5158_v22  ;;  %v3690_v27 = vpop.f32.mrf.mxu0  ;;  %v4180_v28 = vpop.f32.mrf.mxu1 }
 0x677   :  { %v5370_v34 = vmax.f32 %v3690_v27, %v4180_v28 }
 0x678   :  { %v9222_v29 = vpack.c.bf16 %v6352_v24, %v6351_v23  ;;  %v5761_v30 = vmax.f32 %v5369_v33, %v5565_v25 }
 0x67a   :  { %9340 = vst [vmem:[%s11119_s3 + $0x2e0] sm:$0xff] %v9222_v29   ;;  %v5961_v32 = vadd.f32 %v11041_v26, %v5761_v30 }
 0x67c   :  { %v6157_v53 = vmul.f32 0.01, %v5961_v32 }
 0x67d   :  { %v4670_v31 = vpop.f32.mrf.mxu2  ;;  %v5160_v40 = vpop.f32.mrf.mxu3 }
 0x67e   :  { %v5566_v35 = vmax.f32 %v4670_v31, %v5160_v40  ;;  %v3693_v36 = vpop.f32.mrf.mxu0  ;;  %v4183_v37 = vpop.f32.mrf.mxu1  ;;  %v6353_v44 = vmax.f32 %v5961_v32, %v6157_v53 }
 0x67f   :  { %v5371_v46 = vmax.f32 %v3693_v36, %v4183_v37 }
 0x680   :  { %v5762_v38 = vmax.f32 %v5370_v34, %v5566_v35 }
 0x682   :  { %v5962_v39 = vadd.f32 %v11041_v26, %v5762_v38 }
 0x684   :  { %v6158_v41 = vmul.f32 0.01, %v5962_v39 }
 0x685   :  { %v4673_v42 = vpop.f32.mrf.mxu2  ;;  %v5163_v43 = vpop.f32.mrf.mxu3 }
 0x686   :  { %v6354_v45 = vmax.f32 %v5962_v39, %v6158_v41  ;;  %v5567_v47 = vmax.f32 %v4673_v42, %v5163_v43  ;;  %v3695_v48 = vpop.f32.mrf.mxu0  ;;  %v4185_v49 = vpop.f32.mrf.mxu1 }
 0x687   :  { %v5372_v56 = vmax.f32 %v3695_v48, %v4185_v49 }
 0x688   :  { %v9227_v50 = vpack.c.bf16 %v6354_v45, %v6353_v44  ;;  %v5763_v51 = vmax.f32 %v5371_v46, %v5567_v47 }
 0x68a   :  { %9341 = vst [vmem:[%s11119_s3 + $0x2e8] sm:$0xff] %v9227_v50   ;;  %v5963_v55 = vadd.f32 %v11041_v26, %v5763_v51 }
 0x68c   :  { %v6159_v61 = vmul.f32 0.01, %v5963_v55 }
 0x68d   :  { %v4675_v52 = vpop.f32.mrf.mxu2  ;;  %v5165_v54 = vpop.f32.mrf.mxu3 }
 0x68e   :  { %v5568_v57 = vmax.f32 %v4675_v52, %v5165_v54  ;;  %v3698_v58 = vpop.f32.mrf.mxu0  ;;  %v4188_v59 = vpop.f32.mrf.mxu1  ;;  %v6355_v2 = vmax.f32 %v5963_v55, %v6159_v61 }
 0x68f   :  { %v5373_v4 = vmax.f32 %v3698_v58, %v4188_v59 }
 0x690   :  { %v5764_v60 = vmax.f32 %v5372_v56, %v5568_v57 }
 0x692   :  { %v5964_v62 = vadd.f32 %v11041_v26, %v5764_v60 }
 0x694   :  { %v6160_v63 = vmul.f32 0.01, %v5964_v62 }
 0x695   :  { %v4678_v0 = vpop.f32.mrf.mxu2  ;;  %v5168_v1 = vpop.f32.mrf.mxu3 }
 0x696   :  { %v6356_v3 = vmax.f32 %v5964_v62, %v6160_v63  ;;  %v5569_v5 = vmax.f32 %v4678_v0, %v5168_v1  ;;  %v3700_v6 = vpop.f32.mrf.mxu0  ;;  %v4190_v7 = vpop.f32.mrf.mxu1 }
 0x697   :  { %v5374_v13 = vmax.f32 %v3700_v6, %v4190_v7 }
 0x698   :  { %v9232_v8 = vpack.c.bf16 %v6356_v3, %v6355_v2  ;;  %v5765_v9 = vmax.f32 %v5373_v4, %v5569_v5 }
 0x69a   :  { %9342 = vst [vmem:[%s11119_s3 + $0x2f0] sm:$0xff] %v9232_v8   ;;  %v5965_v12 = vadd.f32 %v11041_v26, %v5765_v9 }
 0x69c   :  { %v6161_v18 = vmul.f32 0.01, %v5965_v12 }
 0x69d   :  { %v4680_v10 = vpop.f32.mrf.mxu2  ;;  %v5170_v11 = vpop.f32.mrf.mxu3 }
 0x69e   :  { %v5570_v14 = vmax.f32 %v4680_v10, %v5170_v11  ;;  %v3703_v15 = vpop.f32.mrf.mxu0  ;;  %v4193_v16 = vpop.f32.mrf.mxu1  ;;  %v6357_v23 = vmax.f32 %v5965_v12, %v6161_v18 }
 0x69f   :  { %v5375_v33 = vmax.f32 %v3703_v15, %v4193_v16 }
 0x6a0   :  { %v5766_v17 = vmax.f32 %v5374_v13, %v5570_v14 }
 0x6a2   :  { %v5966_v19 = vadd.f32 %v11041_v26, %v5766_v17 }
 0x6a4   :  { %v6162_v20 = vmul.f32 0.01, %v5966_v19 }
 0x6a5   :  { %v4683_v21 = vpop.f32.mrf.mxu2  ;;  %v5173_v22 = vpop.f32.mrf.mxu3 }
 0x6a6   :  { %v6358_v24 = vmax.f32 %v5966_v19, %v6162_v20  ;;  %v5571_v25 = vmax.f32 %v4683_v21, %v5173_v22  ;;  %v3705_v27 = vpop.f32.mrf.mxu0  ;;  %v4195_v28 = vpop.f32.mrf.mxu1 }
 0x6a7   :  { %v5376_v34 = vmax.f32 %v3705_v27, %v4195_v28 }
 0x6a8   :  { %v9237_v29 = vpack.c.bf16 %v6358_v24, %v6357_v23  ;;  %v5767_v30 = vmax.f32 %v5375_v33, %v5571_v25 }
 0x6aa   :  { %9343 = vst [vmem:[%s11119_s3 + $0x2f8] sm:$0xff] %v9237_v29   ;;  %v5967_v32 = vadd.f32 %v11041_v26, %v5767_v30 }
 0x6ac   :  { %v6163_v53 = vmul.f32 0.01, %v5967_v32 }
 0x6ad   :  { %v4685_v31 = vpop.f32.mrf.mxu2  ;;  %v5175_v40 = vpop.f32.mrf.mxu3 }
 0x6ae   :  { %v5572_v35 = vmax.f32 %v4685_v31, %v5175_v40  ;;  %v3708_v37 = vpop.f32.mrf.mxu0  ;;  %v4198_v38 = vpop.f32.mrf.mxu1  ;;  %v6359_v44 = vmax.f32 %v5967_v32, %v6163_v53 }
 0x6af   :  { %v5377_v46 = vmax.f32 %v3708_v37, %v4198_v38 }
 0x6b0   :  { %v5768_v36 = vmax.f32 %v5376_v34, %v5572_v35 }
 0x6b2   :  { %v5968_v39 = vadd.f32 %v11041_v26, %v5768_v36 }
 0x6b4   :  { %v6164_v41 = vmul.f32 0.01, %v5968_v39 }
 0x6b5   :  { %v4688_v42 = vpop.f32.mrf.mxu2  ;;  %v5178_v43 = vpop.f32.mrf.mxu3 }
 0x6b6   :  { %v6360_v45 = vmax.f32 %v5968_v39, %v6164_v41  ;;  %v5573_v47 = vmax.f32 %v4688_v42, %v5178_v43  ;;  %v3710_v50 = vpop.f32.mrf.mxu0  ;;  %v4200_v51 = vpop.f32.mrf.mxu1 }
 0x6b7   :  { %v5378_v56 = vmax.f32 %v3710_v50, %v4200_v51 }
 0x6b8   :  { %v9242_v48 = vpack.c.bf16 %v6360_v45, %v6359_v44  ;;  %v5769_v49 = vmax.f32 %v5377_v46, %v5573_v47 }
 0x6ba   :  { %9344 = vst [vmem:[%s11119_s3 + $0x300] sm:$0xff] %v9242_v48   ;;  %v5969_v55 = vadd.f32 %v11041_v26, %v5769_v49 }
 0x6bc   :  { %v6165_v59 = vmul.f32 0.01, %v5969_v55 }
 0x6bd   :  { %v4690_v52 = vpop.f32.mrf.mxu2  ;;  %v5180_v54 = vpop.f32.mrf.mxu3 }
 0x6be   :  { %v5574_v57 = vmax.f32 %v4690_v52, %v5180_v54  ;;  %v6361_v62 = vmax.f32 %v5969_v55, %v6165_v59 }
 0x6c0   :  { %v5770_v58 = vmax.f32 %v5378_v56, %v5574_v57 }
 0x6c2   :  { %v5970_v60 = vadd.f32 %v11041_v26, %v5770_v58 }
 0x6c4   :  { %v6166_v61 = vmul.f32 0.01, %v5970_v60 }
 0x6c6   :  { %v6362_v63 = vmax.f32 %v5970_v60, %v6166_v61 }
 0x6c8   :  { %v9247_v0 = vpack.c.bf16 %v6362_v63, %v6361_v62 }
 0x6ca   :  { %9345 = vst [vmem:[%s11119_s3 + $0x308] sm:$0xff] %v9247_v0  }

// kernel: celeb_net_forward.4
= control target key start
LH: loop header
LB: loop body
LE: loop exit
PB: predicated region body
PF: predicated region fallthrough
CT: control target
= control target key end

     0   :  { %s4213_s1 = inlined_call_operand.vmem [shape: bf16[256,128], index: 1, kind: input, shape index: {}]   ;;  %s4214_s0 = inlined_call_operand.vmem [shape: bf16[4,288,256], index: 0, kind: input, shape index: {}]   ;;  %s4215_s2 = inlined_call_operand.vmem [shape: f32[1,128], index: 2, kind: input, shape index: {}]   ;;  %s4216_s3 = inlined_call_operand.vmem [shape: bf16[288,128], index: 3, kind: output, shape index: {}]  }
   0x1   :  { %v2831_v0 = vld [vmem:[%s4213_s1 + $0x38] sm:$0xff]  ;;  %v2830_v2 = vld [vmem:[%s4213_s1 + $0x30] sm:$0xff]  ;;  %v2829_v4 = vld [vmem:[%s4213_s1 + $0x28] sm:$0xff] }
   0x2   :  { %v2839_v1 = vld [vmem:[%s4213_s1 + $0x78] sm:$0xff]  ;;  %1006 = vmatpush.bf16.msra.mxu0 %v2831_v0  ;;  %2947 = vmatpush.bf16.msra.mxu2 %v2831_v0  ;;  %v2838_v3 = vld [vmem:[%s4213_s1 + $0x70] sm:$0xff]  ;;  %v2837_v5 = vld [vmem:[%s4213_s1 + $0x68] sm:$0xff] }
   0x3   :  { %1375 = vmatpush.bf16.msra.mxu1 %v2839_v1  ;;  %2955 = vmatpush.bf16.msra.mxu3 %v2839_v1  ;;  %v2828_v6 = vld [vmem:[%s4213_s1 + $0x20] sm:$0xff]  ;;  %v2827_v8 = vld [vmem:[%s4213_s1 + $0x18] sm:$0xff]  ;;  %v2826_v10 = vld [vmem:[%s4213_s1 + $0x10] sm:$0xff] }
   0x4   :  { %v2836_v7 = vld [vmem:[%s4213_s1 + $0x60] sm:$0xff]  ;;  %v2835_v9 = vld [vmem:[%s4213_s1 + $0x58] sm:$0xff]  ;;  %v2834_v11 = vld [vmem:[%s4213_s1 + $0x50] sm:$0xff] }
   0x5   :  { %v2825_v12 = vld [vmem:[%s4213_s1 + $0x8] sm:$0xff]  ;;  %v2824_v14 = vld [vmem:[%s4213_s1] sm:$0xff]  ;;  %v2050_v28 = vld [vmem:[%s4214_s0 + $0x10] sm:$0xf] }
   0x6   :  { %1007 = vmatpush.bf16.msra.mxu0 %v2830_v2  ;;  %2948 = vmatpush.bf16.msra.mxu2 %v2830_v2  ;;  %v2833_v13 = vld [vmem:[%s4213_s1 + $0x48] sm:$0xff]  ;;  %v2832_v15 = vld [vmem:[%s4213_s1 + $0x40] sm:$0xff]  ;;  %v2683_v29 = vld [vmem:[%s4214_s0 + $0x14] sm:$0xf0] }
   0x7   :  { %1376 = vmatpush.bf16.msra.mxu1 %v2838_v3  ;;  %2956 = vmatpush.bf16.msra.mxu3 %v2838_v3  ;;  %v2042_v16 = vld [vmem:[%s4214_s0] sm:$0xf]  ;;  %v2681_v17 = vld [vmem:[%s4214_s0 + $0x4] sm:$0xf0]  ;;  %v2680_v20 = vld [vmem:[%s4214_s0 + $0x4] sm:$0xf]  ;;  %v2051_v36 = vor.u32 %v2683_v29, %v2050_v28 }
   0x8   :  { %v2330_v18 = vld [vmem:[%s4214_s0 + $0x240] sm:$0xf]  ;;  %v2753_v19 = vld [vmem:[%s4214_s0 + $0x244] sm:$0xf0]  ;;  %v2044_v21 = vld [vmem:[%s4214_s0 + $0x8] sm:$0xf0]  ;;  %v2043_v24 = vor.u32 %v2681_v17, %v2042_v16 }
   0x9   :  { %v2752_v22 = vld [vmem:[%s4214_s0 + $0x244] sm:$0xf]  ;;  %v2332_v23 = vld [vmem:[%s4214_s0 + $0x248] sm:$0xf0]  ;;  %v2331_v25 = vor.u32 %v2753_v19, %v2330_v18  ;;  %v2047_v26 = vor.u32 %v2680_v20, %v2044_v21  ;;  %v2338_v30 = vld [vmem:[%s4214_s0 + $0x250] sm:$0xf] }
   0xa   :  { %1008 = vmatpush.bf16.msra.mxu0 %v2829_v4  ;;  %2949 = vmatpush.bf16.msra.mxu2 %v2829_v4  ;;  %v2335_v27 = vor.u32 %v2752_v22, %v2332_v23  ;;  %v2755_v31 = vld [vmem:[%s4214_s0 + $0x254] sm:$0xf0]  ;;  %v2682_v32 = vld [vmem:[%s4214_s0 + $0x14] sm:$0xf]  ;;  %v2052_v33 = vld [vmem:[%s4214_s0 + $0x18] sm:$0xf0] }
   0xb   :  { %1377 = vmatpush.bf16.msra.mxu1 %v2837_v5  ;;  %2957 = vmatpush.bf16.msra.mxu3 %v2837_v5  ;;  %v2754_v34 = vld [vmem:[%s4214_s0 + $0x254] sm:$0xf]  ;;  %v2340_v35 = vld [vmem:[%s4214_s0 + $0x258] sm:$0xf0]  ;;  %v2339_v37 = vor.u32 %v2755_v31, %v2338_v30  ;;  %v2055_v38 = vor.u32 %v2682_v32, %v2052_v33  ;;  %v2058_v40 = vld [vmem:[%s4214_s0 + $0x20] sm:$0xf] }
   0xc   :  { %v2343_v39 = vor.u32 %v2754_v34, %v2340_v35  ;;  %v2685_v41 = vld [vmem:[%s4214_s0 + $0x24] sm:$0xf0]  ;;  %v2346_v42 = vld [vmem:[%s4214_s0 + $0x260] sm:$0xf]  ;;  %v2684_v44 = vld [vmem:[%s4214_s0 + $0x24] sm:$0xf] }
   0xd   :  { %v2757_v43 = vld [vmem:[%s4214_s0 + $0x264] sm:$0xf0]  ;;  %v2060_v45 = vld [vmem:[%s4214_s0 + $0x28] sm:$0xf0]  ;;  %v2756_v46 = vld [vmem:[%s4214_s0 + $0x264] sm:$0xf]  ;;  %v2059_v48 = vor.u32 %v2685_v41, %v2058_v40 }
   0xe   :  { %1009 = vmatpush.bf16.msra.mxu0 %v2828_v6  ;;  %2950 = vmatpush.bf16.msra.mxu2 %v2828_v6  ;;  %v2348_v47 = vld [vmem:[%s4214_s0 + $0x268] sm:$0xf0]  ;;  %v2347_v49 = vor.u32 %v2757_v43, %v2346_v42  ;;  %v2063_v50 = vor.u32 %v2684_v44, %v2060_v45  ;;  %v2066_v52 = vld [vmem:[%s4214_s0 + $0x30] sm:$0xf]  ;;  %v2687_v53 = vld [vmem:[%s4214_s0 + $0x34] sm:$0xf0] }
   0xf   :  { %1378 = vmatpush.bf16.msra.mxu1 %v2836_v7  ;;  %2958 = vmatpush.bf16.msra.mxu3 %v2836_v7  ;;  %v2351_v51 = vor.u32 %v2756_v46, %v2348_v47  ;;  %v2354_v54 = vld [vmem:[%s4214_s0 + $0x270] sm:$0xf]  ;;  %v2759_v55 = vld [vmem:[%s4214_s0 + $0x274] sm:$0xf0]  ;;  %v2686_v56 = vld [vmem:[%s4214_s0 + $0x34] sm:$0xf]  ;;  %v2067_v60 = vor.u32 %v2687_v53, %v2066_v52 }
  0x10   :  { %v2068_v57 = vld [vmem:[%s4214_s0 + $0x38] sm:$0xf0]  ;;  %v2758_v58 = vld [vmem:[%s4214_s0 + $0x274] sm:$0xf]  ;;  %v2355_v61 = vor.u32 %v2759_v55, %v2354_v54  ;;  %v2074_v0 = vld [vmem:[%s4214_s0 + $0x40] sm:$0xf] }
  0x11   :  { %v2356_v59 = vld [vmem:[%s4214_s0 + $0x278] sm:$0xf0]  ;;  %v2071_v62 = vor.u32 %v2686_v56, %v2068_v57  ;;  %v2689_v1 = vld [vmem:[%s4214_s0 + $0x44] sm:$0xf0]  ;;  %v2362_v2 = vld [vmem:[%s4214_s0 + $0x280] sm:$0xf] }
  0x12   :  { %1010 = vmatpush.bf16.msra.mxu0 %v2827_v8  ;;  %2951 = vmatpush.bf16.msra.mxu2 %v2827_v8  ;;  %v2359_v63 = vor.u32 %v2758_v58, %v2356_v59  ;;  %v2761_v3 = vld [vmem:[%s4214_s0 + $0x284] sm:$0xf0]  ;;  %v2688_v4 = vld [vmem:[%s4214_s0 + $0x44] sm:$0xf]  ;;  %v2076_v5 = vld [vmem:[%s4214_s0 + $0x48] sm:$0xf0]  ;;  %v2075_v8 = vor.u32 %v2689_v1, %v2074_v0 }
  0x13   :  { %1379 = vmatpush.bf16.msra.mxu1 %v2835_v9  ;;  %2959 = vmatpush.bf16.msra.mxu3 %v2835_v9  ;;  %v2760_v6 = vld [vmem:[%s4214_s0 + $0x284] sm:$0xf]  ;;  %v2364_v7 = vld [vmem:[%s4214_s0 + $0x288] sm:$0xf0]  ;;  %v2363_v9 = vor.u32 %v2761_v3, %v2362_v2  ;;  %v2690_v16 = vld [vmem:[%s4214_s0 + $0x54] sm:$0xf] }
  0x14   :  { %v2084_v17 = vld [vmem:[%s4214_s0 + $0x58] sm:$0xf0]  ;;  %v2762_v18 = vld [vmem:[%s4214_s0 + $0x294] sm:$0xf]  ;;  %v2692_v28 = vld [vmem:[%s4214_s0 + $0x64] sm:$0xf] }
  0x15   :  { %v2372_v19 = vld [vmem:[%s4214_s0 + $0x298] sm:$0xf0]  ;;  %v2087_v22 = vor.u32 %v2690_v16, %v2084_v17  ;;  %v2092_v29 = vld [vmem:[%s4214_s0 + $0x68] sm:$0xf0]  ;;  %v2764_v30 = vld [vmem:[%s4214_s0 + $0x2a4] sm:$0xf] }
  0x16   :  { %1011 = vmatpush.bf16.msra.mxu0 %v2826_v10  ;;  %2952 = vmatpush.bf16.msra.mxu2 %v2826_v10  ;;  %v2079_v10 = vor.u32 %v2688_v4, %v2076_v5  ;;  %v2375_v23 = vor.u32 %v2762_v18, %v2372_v19  ;;  %v2380_v31 = vld [vmem:[%s4214_s0 + $0x2a8] sm:$0xf0]  ;;  %v2095_v34 = vor.u32 %v2692_v28, %v2092_v29  ;;  %v2694_v40 = vld [vmem:[%s4214_s0 + $0x74] sm:$0xf]  ;;  %v2100_v41 = vld [vmem:[%s4214_s0 + $0x78] sm:$0xf0] }
  0x17   :  { %1380 = vmatpush.bf16.msra.mxu1 %v2834_v11  ;;  %2960 = vmatpush.bf16.msra.mxu3 %v2834_v11  ;;  %v2367_v11 = vor.u32 %v2760_v6, %v2364_v7  ;;  %v2383_v35 = vor.u32 %v2764_v30, %v2380_v31  ;;  %v2766_v42 = vld [vmem:[%s4214_s0 + $0x2b4] sm:$0xf]  ;;  %v2388_v43 = vld [vmem:[%s4214_s0 + $0x2b8] sm:$0xf0]  ;;  %v2103_v46 = vor.u32 %v2694_v40, %v2100_v41  ;;  %v2696_v52 = vld [vmem:[%s4214_s0 + $0x84] sm:$0xf] }
  0x18   :  { %v2391_v47 = vor.u32 %v2766_v42, %v2388_v43  ;;  %v2108_v53 = vld [vmem:[%s4214_s0 + $0x88] sm:$0xf0]  ;;  %v2768_v54 = vld [vmem:[%s4214_s0 + $0x2c4] sm:$0xf]  ;;  %v2114_v5 = vld [vmem:[%s4214_s0 + $0x90] sm:$0xf] }
  0x19   :  { %v2396_v55 = vld [vmem:[%s4214_s0 + $0x2c8] sm:$0xf0]  ;;  %v2111_v59 = vor.u32 %v2696_v52, %v2108_v53  ;;  %v2699_v6 = vld [vmem:[%s4214_s0 + $0x94] sm:$0xf0]  ;;  %v2402_v7 = vld [vmem:[%s4214_s0 + $0x2d0] sm:$0xf] }
  0x1a   :  { %1012 = vmatpush.bf16.msra.mxu0 %v2825_v12  ;;  %2953 = vmatpush.bf16.msra.mxu2 %v2825_v12  ;;  %v2082_v12 = vld [vmem:[%s4214_s0 + $0x50] sm:$0xf]  ;;  %v2122_v29 = vld [vmem:[%s4214_s0 + $0xa0] sm:$0xf]  ;;  %v2701_v30 = vld [vmem:[%s4214_s0 + $0xa4] sm:$0xf0] }
  0x1b   :  { %1381 = vmatpush.bf16.msra.mxu1 %v2833_v13  ;;  %2961 = vmatpush.bf16.msra.mxu3 %v2833_v13  ;;  %v2691_v13 = vld [vmem:[%s4214_s0 + $0x54] sm:$0xf0]  ;;  %v2410_v31 = vld [vmem:[%s4214_s0 + $0x2e0] sm:$0xf]  ;;  %v2130_v53 = vld [vmem:[%s4214_s0 + $0xb0] sm:$0xf] }
  0x1c   :  { %v2083_v20 = vor.u32 %v2691_v13, %v2082_v12  ;;  %v2404_v12 = vld [vmem:[%s4214_s0 + $0x2d8] sm:$0xf0] }
  0x1e   :  { %1013 = vmatpush.bf16.msra.mxu0 %v2824_v14  ;;  %2954 = vmatpush.bf16.msra.mxu2 %v2824_v14  ;;  %v2370_v14 = vld [vmem:[%s4214_s0 + $0x290] sm:$0xf] }
  0x1f   :  { %1382 = vmatpush.bf16.msra.mxu1 %v2832_v15  ;;  %2962 = vmatpush.bf16.msra.mxu3 %v2832_v15  ;;  %v2763_v15 = vld [vmem:[%s4214_s0 + $0x294] sm:$0xf0] }
  0x20   :  { %v2371_v21 = vor.u32 %v2763_v15, %v2370_v14  ;;  %v2115_v15 = vor.u32 %v2699_v6, %v2114_v5 }
  0x21   :  { %1014 = vmatmul.bf16.vlgmr.msra.gmra.mxu0 %v2043_v24  ;;  %1194 = vmatmul.bf16.vlgmr.msra.gmra.mxu2 %v2331_v25  ;;  %v2090_v24 = vld [vmem:[%s4214_s0 + $0x60] sm:$0xf]  ;;  %v2693_v25 = vld [vmem:[%s4214_s0 + $0x64] sm:$0xf0] }
  0x22   :  { %1383 = vmatmul.bf16.vlgmr.msra.gmra.mxu1 %v2047_v26  ;;  %1563 = vmatmul.bf16.vlgmr.msra.gmra.mxu3 %v2335_v27  ;;  %v2378_v26 = vld [vmem:[%s4214_s0 + $0x2a0] sm:$0xf]  ;;  %v2765_v27 = vld [vmem:[%s4214_s0 + $0x2a4] sm:$0xf0]  ;;  %v2091_v32 = vor.u32 %v2693_v25, %v2090_v24 }
  0x23   :  { %v2379_v33 = vor.u32 %v2765_v27, %v2378_v26 }
  0x31   :  { %1019 = vmatmul.bf16.gmra.mxu0 %v2051_v36  ;;  %1199 = vmatmul.bf16.gmra.mxu2 %v2339_v37  ;;  %v2098_v36 = vld [vmem:[%s4214_s0 + $0x70] sm:$0xf]  ;;  %v2695_v37 = vld [vmem:[%s4214_s0 + $0x74] sm:$0xf0] }
  0x32   :  { %1388 = vmatmul.bf16.gmra.mxu1 %v2055_v38  ;;  %1568 = vmatmul.bf16.gmra.mxu3 %v2343_v39  ;;  %v2386_v38 = vld [vmem:[%s4214_s0 + $0x2b0] sm:$0xf]  ;;  %v2767_v39 = vld [vmem:[%s4214_s0 + $0x2b4] sm:$0xf0]  ;;  %v2099_v44 = vor.u32 %v2695_v37, %v2098_v36  ;;  %v2412_v36 = vld [vmem:[%s4214_s0 + $0x2e8] sm:$0xf0] }
  0x33   :  { %v2387_v45 = vor.u32 %v2767_v39, %v2386_v38  ;;  %v2123_v39 = vor.u32 %v2701_v30, %v2122_v29 }
  0x41   :  { %1024 = vmatmul.bf16.gmra.mxu0 %v2059_v48  ;;  %1204 = vmatmul.bf16.gmra.mxu2 %v2347_v49  ;;  %v2106_v48 = vld [vmem:[%s4214_s0 + $0x80] sm:$0xf]  ;;  %v2697_v49 = vld [vmem:[%s4214_s0 + $0x84] sm:$0xf0] }
  0x42   :  { %1393 = vmatmul.bf16.gmra.mxu1 %v2063_v50  ;;  %1573 = vmatmul.bf16.gmra.mxu3 %v2351_v51  ;;  %v2394_v50 = vld [vmem:[%s4214_s0 + $0x2c0] sm:$0xf]  ;;  %v2769_v51 = vld [vmem:[%s4214_s0 + $0x2c4] sm:$0xf0]  ;;  %v2107_v56 = vor.u32 %v2697_v49, %v2106_v48 }
  0x43   :  { %v2395_v57 = vor.u32 %v2769_v51, %v2394_v50 }
  0x51   :  { %1029 = vmatmul.bf16.gmra.mxu0 %v2067_v60  ;;  %1209 = vmatmul.bf16.gmra.mxu2 %v2355_v61  ;;  %v2399_v60 = vor.u32 %v2768_v54, %v2396_v55  ;;  %v2703_v54 = vld [vmem:[%s4214_s0 + $0xb4] sm:$0xf0]  ;;  %v2418_v55 = vld [vmem:[%s4214_s0 + $0x2f0] sm:$0xf] }
  0x52   :  { %1398 = vmatmul.bf16.gmra.mxu1 %v2071_v62  ;;  %1578 = vmatmul.bf16.gmra.mxu3 %v2359_v63 }
  0x61   :  { %1034 = vmatmul.bf16.gmra.mxu0 %v2075_v8  ;;  %1214 = vmatmul.bf16.gmra.mxu2 %v2363_v9  ;;  %v2771_v8 = vld [vmem:[%s4214_s0 + $0x2d4] sm:$0xf0]  ;;  %v2698_v9 = vld [vmem:[%s4214_s0 + $0x94] sm:$0xf] }
  0x62   :  { %1403 = vmatmul.bf16.gmra.mxu1 %v2079_v10  ;;  %1583 = vmatmul.bf16.gmra.mxu3 %v2367_v11  ;;  %v2116_v10 = vld [vmem:[%s4214_s0 + $0x98] sm:$0xf0]  ;;  %v2770_v11 = vld [vmem:[%s4214_s0 + $0x2d4] sm:$0xf]  ;;  %v2403_v16 = vor.u32 %v2771_v8, %v2402_v7 }
  0x63   :  { %v2119_v19 = vor.u32 %v2698_v9, %v2116_v10 }
  0x71   :  { %1039 = vmatmul.bf16.gmra.mxu0 %v2083_v20  ;;  %1219 = vmatmul.bf16.gmra.mxu2 %v2371_v21  ;;  %v2407_v20 = vor.u32 %v2770_v11, %v2404_v12 }
  0x72   :  { %1408 = vmatmul.bf16.gmra.mxu1 %v2087_v22  ;;  %1588 = vmatmul.bf16.gmra.mxu3 %v2375_v23 }
  0x81   :  { %1044 = vmatmul.bf16.gmra.mxu0 %v2091_v32  ;;  %1224 = vmatmul.bf16.gmra.mxu2 %v2379_v33  ;;  %v2773_v32 = vld [vmem:[%s4214_s0 + $0x2e4] sm:$0xf0]  ;;  %v2700_v33 = vld [vmem:[%s4214_s0 + $0xa4] sm:$0xf] }
  0x82   :  { %1413 = vmatmul.bf16.gmra.mxu1 %v2095_v34  ;;  %1593 = vmatmul.bf16.gmra.mxu3 %v2383_v35  ;;  %v2124_v34 = vld [vmem:[%s4214_s0 + $0xa8] sm:$0xf0]  ;;  %v2772_v35 = vld [vmem:[%s4214_s0 + $0x2e4] sm:$0xf]  ;;  %v2411_v40 = vor.u32 %v2773_v32, %v2410_v31 }
  0x83   :  { %v2127_v43 = vor.u32 %v2700_v33, %v2124_v34 }
  0x91   :  { %1049 = vmatmul.bf16.gmra.mxu0 %v2099_v44  ;;  %1229 = vmatmul.bf16.gmra.mxu2 %v2387_v45  ;;  %v2415_v44 = vor.u32 %v2772_v35, %v2412_v36 }
  0x92   :  { %1418 = vmatmul.bf16.gmra.mxu1 %v2103_v46  ;;  %1598 = vmatmul.bf16.gmra.mxu3 %v2391_v47 }
  0x9e   :  { %v1015_v58 = vpop.f32.mrf.mxu0 }
  0x9f   :  { %v1384_v61 = vpop.f32.mrf.mxu1 }
  0xa0   :  { %v3249_v62 = vadd.f32 %v1384_v61, %v1015_v58  ;;  %v2132_v58 = vld [vmem:[%s4214_s0 + $0xb8] sm:$0xf0] }
  0xa1   :  { %1054 = vmatmul.bf16.gmra.mxu0 %v2107_v56  ;;  %1234 = vmatmul.bf16.gmra.mxu2 %v2395_v57  ;;  %v2775_v56 = vld [vmem:[%s4214_s0 + $0x2f4] sm:$0xf0]  ;;  %v2702_v57 = vld [vmem:[%s4214_s0 + $0xb4] sm:$0xf] }
  0xa2   :  { %1423 = vmatmul.bf16.gmra.mxu1 %v2111_v59  ;;  %1603 = vmatmul.bf16.gmra.mxu3 %v2399_v60  ;;  %v2774_v59 = vld [vmem:[%s4214_s0 + $0x2f4] sm:$0xf]  ;;  %v2420_v60 = vld [vmem:[%s4214_s0 + $0x2f8] sm:$0xf0]  ;;  %v2135_v6 = vor.u32 %v2702_v57, %v2132_v58 }
  0xa3   :  { %v2423_v7 = vor.u32 %v2774_v59, %v2420_v60 }
  0xa4   :  { %v1195_v63 = vpop.f32.mrf.mxu2 }
  0xa5   :  { %v1564_v0 = vpop.f32.mrf.mxu3 }
  0xa6   :  { %v3251_v1 = vadd.f32 %v1564_v0, %v1195_v63  ;;  %v1017_v2 = vpop.f32.mrf.mxu0  ;;  %v2131_v0 = vor.u32 %v2703_v54, %v2130_v53  ;;  %v2148_v53 = vld [vmem:[%s4214_s0 + $0xd8] sm:$0xf0]  ;;  %v2778_v54 = vld [vmem:[%s4214_s0 + $0x314] sm:$0xf] }
  0xa7   :  { %v1386_v3 = vpop.f32.mrf.mxu1 }
  0xa8   :  { %v3253_v4 = vadd.f32 %v1386_v3, %v1017_v2  ;;  %v2419_v2 = vor.u32 %v2775_v56, %v2418_v55  ;;  %v2436_v55 = vld [vmem:[%s4214_s0 + $0x318] sm:$0xf0] }
  0xac   :  { %v1197_v13 = vpop.f32.mrf.mxu2 }
  0xad   :  { %v1566_v14 = vpop.f32.mrf.mxu3 }
  0xae   :  { %v3279_v17 = vadd.f32 %v1566_v14, %v1197_v13  ;;  %v1020_v18 = vpop.f32.mrf.mxu0 }
  0xaf   :  { %v1389_v21 = vpop.f32.mrf.mxu1 }
  0xb0   :  { %v3281_v22 = vadd.f32 %v1389_v21, %v1020_v18  ;;  %v2705_v18 = vld [vmem:[%s4214_s0 + $0xc4] sm:$0xf0]  ;;  %v2704_v21 = vld [vmem:[%s4214_s0 + $0xc4] sm:$0xf] }
  0xb1   :  { %1059 = vmatmul.bf16.gmra.mxu0 %v2115_v15  ;;  %1239 = vmatmul.bf16.gmra.mxu2 %v2403_v16  ;;  %v2138_v16 = vld [vmem:[%s4214_s0 + $0xc0] sm:$0xf] }
  0xb2   :  { %1428 = vmatmul.bf16.gmra.mxu1 %v2119_v19  ;;  %1608 = vmatmul.bf16.gmra.mxu3 %v2407_v20  ;;  %v2426_v19 = vld [vmem:[%s4214_s0 + $0x300] sm:$0xf]  ;;  %v2777_v20 = vld [vmem:[%s4214_s0 + $0x304] sm:$0xf0]  ;;  %v2139_v30 = vor.u32 %v2705_v18, %v2138_v16 }
  0xb3   :  { %v2427_v31 = vor.u32 %v2777_v20, %v2426_v19  ;;  %v2709_v16 = vld [vmem:[%s4214_s0 + $0xe4] sm:$0xf0]  ;;  %v2442_v18 = vld [vmem:[%s4214_s0 + $0x320] sm:$0xf]  ;;  %v2708_v20 = vld [vmem:[%s4214_s0 + $0xe4] sm:$0xf] }
  0xb4   :  { %v1200_v23 = vpop.f32.mrf.mxu2  ;;  %v2781_v19 = vld [vmem:[%s4214_s0 + $0x324] sm:$0xf0] }
  0xb5   :  { %v1569_v24 = vpop.f32.mrf.mxu3 }
  0xb6   :  { %v3283_v25 = vadd.f32 %v1569_v24, %v1200_v23  ;;  %v1022_v26 = vpop.f32.mrf.mxu0  ;;  %v2140_v23 = vld [vmem:[%s4214_s0 + $0xc8] sm:$0xf0]  ;;  %v2776_v24 = vld [vmem:[%s4214_s0 + $0x304] sm:$0xf] }
  0xb7   :  { %v1391_v27 = vpop.f32.mrf.mxu1  ;;  %v2143_v34 = vor.u32 %v2704_v21, %v2140_v23  ;;  %v2156_v21 = vld [vmem:[%s4214_s0 + $0xe8] sm:$0xf0]  ;;  %v2780_v23 = vld [vmem:[%s4214_s0 + $0x324] sm:$0xf] }
  0xb8   :  { %v3285_v28 = vadd.f32 %v1391_v27, %v1022_v26  ;;  %v2428_v26 = vld [vmem:[%s4214_s0 + $0x308] sm:$0xf0] }
  0xb9   :  { %v2431_v35 = vor.u32 %v2776_v24, %v2428_v26  ;;  %v2444_v24 = vld [vmem:[%s4214_s0 + $0x328] sm:$0xf0] }
  0xbc   :  { %v1202_v37 = vpop.f32.mrf.mxu2 }
  0xbd   :  { %v1571_v38 = vpop.f32.mrf.mxu3 }
  0xbe   :  { %v3311_v41 = vadd.f32 %v1571_v38, %v1202_v37  ;;  %v1025_v42 = vpop.f32.mrf.mxu0 }
  0xbf   :  { %v1394_v45 = vpop.f32.mrf.mxu1 }
  0xc0   :  { %v3313_v46 = vadd.f32 %v1394_v45, %v1025_v42  ;;  %v2146_v45 = vld [vmem:[%s4214_s0 + $0xd0] sm:$0xf] }
  0xc1   :  { %1064 = vmatmul.bf16.gmra.mxu0 %v2123_v39  ;;  %1244 = vmatmul.bf16.gmra.mxu2 %v2411_v40 }
  0xc2   :  { %1433 = vmatmul.bf16.gmra.mxu1 %v2127_v43  ;;  %1613 = vmatmul.bf16.gmra.mxu3 %v2415_v44 }
  0xc4   :  { %v1205_v47 = vpop.f32.mrf.mxu2 }
  0xc5   :  { %v1574_v48 = vpop.f32.mrf.mxu3 }
  0xc6   :  { %v3315_v49 = vadd.f32 %v1574_v48, %v1205_v47  ;;  %v1027_v50 = vpop.f32.mrf.mxu0  ;;  %v2707_v47 = vld [vmem:[%s4214_s0 + $0xd4] sm:$0xf0]  ;;  %v2434_v48 = vld [vmem:[%s4214_s0 + $0x310] sm:$0xf] }
  0xc7   :  { %v1396_v51 = vpop.f32.mrf.mxu1  ;;  %v2147_v58 = vor.u32 %v2707_v47, %v2146_v45 }
  0xc8   :  { %v3317_v52 = vadd.f32 %v1396_v51, %v1027_v50  ;;  %v2779_v50 = vld [vmem:[%s4214_s0 + $0x314] sm:$0xf0]  ;;  %v2706_v51 = vld [vmem:[%s4214_s0 + $0xd4] sm:$0xf] }
  0xc9   :  { %v2435_v59 = vor.u32 %v2779_v50, %v2434_v48  ;;  %v2162_v50 = vld [vmem:[%s4214_s0 + $0xf0] sm:$0xf] }
  0xcc   :  { %v1207_v61 = vpop.f32.mrf.mxu2 }
  0xcd   :  { %v1576_v63 = vpop.f32.mrf.mxu3 }
  0xce   :  { %v3343_v3 = vadd.f32 %v1576_v63, %v1207_v61  ;;  %v1030_v5 = vpop.f32.mrf.mxu0  ;;  %v2151_v63 = vor.u32 %v2706_v51, %v2148_v53  ;;  %v2711_v51 = vld [vmem:[%s4214_s0 + $0xf4] sm:$0xf0]  ;;  %v2450_v53 = vld [vmem:[%s4214_s0 + $0x330] sm:$0xf] }
  0xcf   :  { %v1399_v8 = vpop.f32.mrf.mxu1 }
  0xd0   :  { %v3345_v9 = vadd.f32 %v1399_v8, %v1030_v5 }
  0xd1   :  { %1069 = vmatmul.bf16.gmra.mxu0 %v2131_v0  ;;  %1249 = vmatmul.bf16.gmra.mxu2 %v2419_v2  ;;  %v2439_v0 = vor.u32 %v2778_v54, %v2436_v55  ;;  %v2783_v54 = vld [vmem:[%s4214_s0 + $0x334] sm:$0xf0]  ;;  %v2710_v55 = vld [vmem:[%s4214_s0 + $0xf4] sm:$0xf] }
  0xd2   :  { %1438 = vmatmul.bf16.gmra.mxu1 %v2135_v6  ;;  %1618 = vmatmul.bf16.gmra.mxu3 %v2423_v7 }
  0xd4   :  { %v1210_v10 = vpop.f32.mrf.mxu2 }
  0xd5   :  { %v1579_v11 = vpop.f32.mrf.mxu3 }
  0xd6   :  { %v3347_v12 = vadd.f32 %v1579_v11, %v1210_v10  ;;  %v1032_v13 = vpop.f32.mrf.mxu0 }
  0xd7   :  { %v1401_v14 = vpop.f32.mrf.mxu1 }
  0xd8   :  { %v3349_v15 = vadd.f32 %v1401_v14, %v1032_v13  ;;  %v2154_v14 = vld [vmem:[%s4214_s0 + $0xe0] sm:$0xf] }
  0xdc   :  { %v1212_v27 = vpop.f32.mrf.mxu2 }
  0xdd   :  { %v1581_v29 = vpop.f32.mrf.mxu3 }
  0xde   :  { %v3375_v32 = vadd.f32 %v1581_v29, %v1212_v27  ;;  %v1035_v33 = vpop.f32.mrf.mxu0  ;;  %v2155_v29 = vor.u32 %v2709_v16, %v2154_v14 }
  0xdf   :  { %v1404_v36 = vpop.f32.mrf.mxu1 }
  0xe0   :  { %v3377_v37 = vadd.f32 %v1404_v36, %v1035_v33 }
  0xe1   :  { %1074 = vmatmul.bf16.gmra.mxu0 %v2139_v30  ;;  %1254 = vmatmul.bf16.gmra.mxu2 %v2427_v31  ;;  %v2443_v30 = vor.u32 %v2781_v19, %v2442_v18 }
  0xe2   :  { %1443 = vmatmul.bf16.gmra.mxu1 %v2143_v34  ;;  %1623 = vmatmul.bf16.gmra.mxu3 %v2431_v35  ;;  %v2159_v34 = vor.u32 %v2708_v20, %v2156_v21  ;;  %v2447_v35 = vor.u32 %v2780_v23, %v2444_v24  ;;  %v2170_v24 = vld [vmem:[%s4214_s0 + $0x100] sm:$0xf] }
  0xe4   :  { %v1215_v38 = vpop.f32.mrf.mxu2 }
  0xe5   :  { %v1584_v39 = vpop.f32.mrf.mxu3 }
  0xe6   :  { %v3379_v40 = vadd.f32 %v1584_v39, %v1215_v38  ;;  %v1037_v42 = vpop.f32.mrf.mxu0 }
  0xe7   :  { %v1406_v43 = vpop.f32.mrf.mxu1 }
  0xe8   :  { %v3381_v44 = vadd.f32 %v1406_v43, %v1037_v42 }
  0xec   :  { %v1217_v56 = vpop.f32.mrf.mxu2 }
  0xed   :  { %v1586_v57 = vpop.f32.mrf.mxu3 }
  0xee   :  { %v3407_v60 = vadd.f32 %v1586_v57, %v1217_v56  ;;  %v1040_v61 = vpop.f32.mrf.mxu0  ;;  %v2164_v56 = vld [vmem:[%s4214_s0 + $0xf8] sm:$0xf0]  ;;  %v2782_v57 = vld [vmem:[%s4214_s0 + $0x334] sm:$0xf] }
  0xef   :  { %v1409_v2 = vpop.f32.mrf.mxu1 }
  0xf0   :  { %v3409_v5 = vadd.f32 %v1409_v2, %v1040_v61 }
  0xf1   :  { %1079 = vmatmul.bf16.gmra.mxu0 %v2147_v58  ;;  %1259 = vmatmul.bf16.gmra.mxu2 %v2435_v59  ;;  %v2452_v58 = vld [vmem:[%s4214_s0 + $0x338] sm:$0xf0] }
  0xf2   :  { %1448 = vmatmul.bf16.gmra.mxu1 %v2151_v63  ;;  %1628 = vmatmul.bf16.gmra.mxu3 %v2439_v0  ;;  %v2163_v63 = vor.u32 %v2711_v51, %v2162_v50  ;;  %v2451_v0 = vor.u32 %v2783_v54, %v2450_v53 }
  0xf4   :  { %v1220_v6 = vpop.f32.mrf.mxu2 }
  0xf5   :  { %v1589_v7 = vpop.f32.mrf.mxu3 }
  0xf6   :  { %v3411_v8 = vadd.f32 %v1589_v7, %v1220_v6  ;;  %v1042_v10 = vpop.f32.mrf.mxu0  ;;  %v2167_v7 = vor.u32 %v2710_v55, %v2164_v56 }
  0xf7   :  { %v1411_v11 = vpop.f32.mrf.mxu1 }
  0xf8   :  { %v3413_v13 = vadd.f32 %v1411_v11, %v1042_v10  ;;  %v2455_v10 = vor.u32 %v2782_v57, %v2452_v58 }
  0xfc   :  { %v1222_v26 = vpop.f32.mrf.mxu2 }
  0xfd   :  { %v1591_v27 = vpop.f32.mrf.mxu3 }
  0xfe   :  { %v3439_v31 = vadd.f32 %v1591_v27, %v1222_v26  ;;  %v1045_v33 = vpop.f32.mrf.mxu0  ;;  %v2713_v26 = vld [vmem:[%s4214_s0 + $0x104] sm:$0xf0]  ;;  %v2458_v27 = vld [vmem:[%s4214_s0 + $0x340] sm:$0xf] }
  0xff   :  { %v1414_v36 = vpop.f32.mrf.mxu1 }
 0x100   :  { %v3441_v38 = vadd.f32 %v1414_v36, %v1045_v33  ;;  %v2172_v33 = vld [vmem:[%s4214_s0 + $0x108] sm:$0xf0] }
 0x101   :  { %1084 = vmatmul.bf16.gmra.mxu0 %v2155_v29  ;;  %1264 = vmatmul.bf16.gmra.mxu2 %v2443_v30  ;;  %v2785_v29 = vld [vmem:[%s4214_s0 + $0x344] sm:$0xf0]  ;;  %v2712_v30 = vld [vmem:[%s4214_s0 + $0x104] sm:$0xf] }
 0x102   :  { %1453 = vmatmul.bf16.gmra.mxu1 %v2159_v34  ;;  %1633 = vmatmul.bf16.gmra.mxu3 %v2447_v35  ;;  %v2784_v34 = vld [vmem:[%s4214_s0 + $0x344] sm:$0xf]  ;;  %v2460_v35 = vld [vmem:[%s4214_s0 + $0x348] sm:$0xf0]  ;;  %v2175_v51 = vor.u32 %v2712_v30, %v2172_v33 }
 0x103   :  { %v2463_v53 = vor.u32 %v2784_v34, %v2460_v35 }
 0x104   :  { %v1225_v39 = vpop.f32.mrf.mxu2 }
 0x105   :  { %v1594_v42 = vpop.f32.mrf.mxu3 }
 0x106   :  { %v3443_v43 = vadd.f32 %v1594_v42, %v1225_v39  ;;  %v1047_v45 = vpop.f32.mrf.mxu0  ;;  %v2171_v42 = vor.u32 %v2713_v26, %v2170_v24 }
 0x107   :  { %v1416_v47 = vpop.f32.mrf.mxu1 }
 0x108   :  { %v3445_v48 = vadd.f32 %v1416_v47, %v1047_v45  ;;  %v2459_v45 = vor.u32 %v2785_v29, %v2458_v27 }
 0x10c   :  { %v1227_v59 = vpop.f32.mrf.mxu2 }
 0x10d   :  { %v1596_v61 = vpop.f32.mrf.mxu3 }
 0x10e   :  { %v3471_v2 = vadd.f32 %v1596_v61, %v1227_v59  ;;  %v1050_v6 = vpop.f32.mrf.mxu0 }
 0x10f   :  { %v1419_v11 = vpop.f32.mrf.mxu1 }
 0x110   :  { %v3473_v14 = vadd.f32 %v1419_v11, %v1050_v6  ;;  %v2715_v6 = vld [vmem:[%s4214_s0 + $0x114] sm:$0xf0]  ;;  %v2714_v11 = vld [vmem:[%s4214_s0 + $0x114] sm:$0xf] }
 0x111   :  { %1089 = vmatmul.bf16.gmra.mxu0 %v2163_v63  ;;  %1269 = vmatmul.bf16.gmra.mxu2 %v2451_v0  ;;  %v2178_v0 = vld [vmem:[%s4214_s0 + $0x110] sm:$0xf] }
 0x112   :  { %1458 = vmatmul.bf16.gmra.mxu1 %v2167_v7  ;;  %1638 = vmatmul.bf16.gmra.mxu3 %v2455_v10  ;;  %v2466_v7 = vld [vmem:[%s4214_s0 + $0x350] sm:$0xf]  ;;  %v2787_v10 = vld [vmem:[%s4214_s0 + $0x354] sm:$0xf0]  ;;  %v2179_v26 = vor.u32 %v2715_v6, %v2178_v0  ;;  %v2188_v0 = vld [vmem:[%s4214_s0 + $0x128] sm:$0xf0] }
 0x113   :  { %v2467_v27 = vor.u32 %v2787_v10, %v2466_v7  ;;  %v2788_v6 = vld [vmem:[%s4214_s0 + $0x364] sm:$0xf]  ;;  %v2476_v7 = vld [vmem:[%s4214_s0 + $0x368] sm:$0xf0] }
 0x114   :  { %v1230_v16 = vpop.f32.mrf.mxu2 }
 0x115   :  { %v1599_v18 = vpop.f32.mrf.mxu3 }
 0x116   :  { %v3475_v19 = vadd.f32 %v1599_v18, %v1230_v16  ;;  %v1052_v20 = vpop.f32.mrf.mxu0  ;;  %v2180_v16 = vld [vmem:[%s4214_s0 + $0x118] sm:$0xf0]  ;;  %v2786_v18 = vld [vmem:[%s4214_s0 + $0x354] sm:$0xf] }
 0x117   :  { %v1421_v21 = vpop.f32.mrf.mxu1  ;;  %v2183_v33 = vor.u32 %v2714_v11, %v2180_v16 }
 0x118   :  { %v3477_v23 = vadd.f32 %v1421_v21, %v1052_v20  ;;  %v2468_v20 = vld [vmem:[%s4214_s0 + $0x358] sm:$0xf0] }
 0x119   :  { %v2471_v34 = vor.u32 %v2786_v18, %v2468_v20 }
 0x11c   :  { %v1232_v36 = vpop.f32.mrf.mxu2 }
 0x11d   :  { %v1601_v39 = vpop.f32.mrf.mxu3 }
 0x11e   :  { %v3503_v47 = vadd.f32 %v1601_v39, %v1232_v36  ;;  %v1055_v50 = vpop.f32.mrf.mxu0 }
 0x11f   :  { %v1424_v54 = vpop.f32.mrf.mxu1 }
 0x120   :  { %v3505_v55 = vadd.f32 %v1424_v54, %v1055_v50  ;;  %v2186_v54 = vld [vmem:[%s4214_s0 + $0x120] sm:$0xf] }
 0x121   :  { %1094 = vmatmul.bf16.gmra.mxu0 %v2171_v42  ;;  %1274 = vmatmul.bf16.gmra.mxu2 %v2459_v45 }
 0x122   :  { %1463 = vmatmul.bf16.gmra.mxu1 %v2175_v51  ;;  %1643 = vmatmul.bf16.gmra.mxu3 %v2463_v53 }
 0x124   :  { %v1235_v56 = vpop.f32.mrf.mxu2 }
 0x125   :  { %v1604_v57 = vpop.f32.mrf.mxu3 }
 0x126   :  { %v3507_v58 = vadd.f32 %v1604_v57, %v1235_v56  ;;  %v1057_v59 = vpop.f32.mrf.mxu0  ;;  %v2717_v56 = vld [vmem:[%s4214_s0 + $0x124] sm:$0xf0]  ;;  %v2474_v57 = vld [vmem:[%s4214_s0 + $0x360] sm:$0xf] }
 0x127   :  { %v1426_v61 = vpop.f32.mrf.mxu1  ;;  %v2187_v16 = vor.u32 %v2717_v56, %v2186_v54  ;;  %v2719_v54 = vld [vmem:[%s4214_s0 + $0x134] sm:$0xf0]  ;;  %v2482_v56 = vld [vmem:[%s4214_s0 + $0x370] sm:$0xf] }
 0x128   :  { %v3509_v63 = vadd.f32 %v1426_v61, %v1057_v59  ;;  %v2789_v59 = vld [vmem:[%s4214_s0 + $0x364] sm:$0xf0]  ;;  %v2716_v61 = vld [vmem:[%s4214_s0 + $0x124] sm:$0xf] }
 0x129   :  { %v2475_v18 = vor.u32 %v2789_v59, %v2474_v57  ;;  %v2791_v57 = vld [vmem:[%s4214_s0 + $0x374] sm:$0xf0]  ;;  %v2718_v59 = vld [vmem:[%s4214_s0 + $0x134] sm:$0xf] }
 0x12c   :  { %v1237_v21 = vpop.f32.mrf.mxu2 }
 0x12d   :  { %v1606_v24 = vpop.f32.mrf.mxu3 }
 0x12e   :  { %v3535_v29 = vadd.f32 %v1606_v24, %v1237_v21  ;;  %v1060_v30 = vpop.f32.mrf.mxu0  ;;  %v2191_v24 = vor.u32 %v2716_v61, %v2188_v0  ;;  %v2196_v61 = vld [vmem:[%s4214_s0 + $0x138] sm:$0xf0]  ;;  %v2790_v0 = vld [vmem:[%s4214_s0 + $0x374] sm:$0xf] }
 0x12f   :  { %v1429_v35 = vpop.f32.mrf.mxu1 }
 0x130   :  { %v3537_v36 = vadd.f32 %v1429_v35, %v1060_v30 }
 0x131   :  { %1099 = vmatmul.bf16.gmra.mxu0 %v2179_v26  ;;  %1279 = vmatmul.bf16.gmra.mxu2 %v2467_v27  ;;  %v2479_v26 = vor.u32 %v2788_v6, %v2476_v7  ;;  %v2484_v6 = vld [vmem:[%s4214_s0 + $0x378] sm:$0xf0] }
 0x132   :  { %1468 = vmatmul.bf16.gmra.mxu1 %v2183_v33  ;;  %1648 = vmatmul.bf16.gmra.mxu3 %v2471_v34 }
 0x134   :  { %v1240_v39 = vpop.f32.mrf.mxu2 }
 0x135   :  { %v1609_v42 = vpop.f32.mrf.mxu3 }
 0x136   :  { %v3539_v45 = vadd.f32 %v1609_v42, %v1240_v39  ;;  %v1062_v50 = vpop.f32.mrf.mxu0 }
 0x137   :  { %v1431_v51 = vpop.f32.mrf.mxu1 }
 0x138   :  { %v3541_v53 = vadd.f32 %v1431_v51, %v1062_v50  ;;  %v2194_v51 = vld [vmem:[%s4214_s0 + $0x130] sm:$0xf] }
 0x13c   :  { %v1242_v10 = vpop.f32.mrf.mxu2 }
 0x13d   :  { %v1611_v11 = vpop.f32.mrf.mxu3 }
 0x13e   :  { %v3567_v20 = vadd.f32 %v1611_v11, %v1242_v10  ;;  %v1065_v21 = vpop.f32.mrf.mxu0  ;;  %v2195_v11 = vor.u32 %v2719_v54, %v2194_v51  ;;  %v2202_v54 = vld [vmem:[%s4214_s0 + $0x140] sm:$0xf] }
 0x13f   :  { %v1434_v27 = vpop.f32.mrf.mxu1 }
 0x140   :  { %v3569_v30 = vadd.f32 %v1434_v27, %v1065_v21 }
 0x141   :  { %1104 = vmatmul.bf16.gmra.mxu0 %v2187_v16  ;;  %1284 = vmatmul.bf16.gmra.mxu2 %v2475_v18  ;;  %v2483_v16 = vor.u32 %v2791_v57, %v2482_v56  ;;  %v2721_v56 = vld [vmem:[%s4214_s0 + $0x144] sm:$0xf0]  ;;  %v2490_v57 = vld [vmem:[%s4214_s0 + $0x380] sm:$0xf] }
 0x142   :  { %4217 = vst [vmem:[#allocation2_spill] sm:$0xff] %v3569_v30  ;;  %1473 = vmatmul.bf16.gmra.mxu1 %v2191_v24  ;;  %1653 = vmatmul.bf16.gmra.mxu3 %v2479_v26  ;;  %v2199_v24 = vor.u32 %v2718_v59, %v2196_v61  ;;  %v2487_v26 = vor.u32 %v2790_v0, %v2484_v6  ;;  %v2793_v59 = vld [vmem:[%s4214_s0 + $0x384] sm:$0xf0]  ;;  %v2792_v61 = vld [vmem:[%s4214_s0 + $0x384] sm:$0xf] }
 0x143   :  { %v2492_v0 = vld [vmem:[%s4214_s0 + $0x388] sm:$0xf0] }
 0x144   :  { %v1245_v33 = vpop.f32.mrf.mxu2 }
 0x145   :  { %v1614_v34 = vpop.f32.mrf.mxu3 }
 0x146   :  { %v3571_v35 = vadd.f32 %v1614_v34, %v1245_v33  ;;  %v1067_v39 = vpop.f32.mrf.mxu0 }
 0x147   :  { %v1436_v42 = vpop.f32.mrf.mxu1 }
 0x148   :  { %4218 = vst [vmem:[#allocation3_spill] sm:$0xff] %v3571_v35  ;;  %v3573_v50 = vadd.f32 %v1436_v42, %v1067_v39 }
 0x14a   :  { %4219 = vst [vmem:[#allocation4_spill] sm:$0xff] %v3573_v50 }
 0x14c   :  { %v1247_v7 = vpop.f32.mrf.mxu2 }
 0x14d   :  { %v1616_v10 = vpop.f32.mrf.mxu3 }
 0x14e   :  { %v3599_v18 = vadd.f32 %v1616_v10, %v1247_v7  ;;  %v1070_v21 = vpop.f32.mrf.mxu0  ;;  %v2203_v10 = vor.u32 %v2721_v56, %v2202_v54  ;;  %v2210_v56 = vld [vmem:[%s4214_s0 + $0x150] sm:$0xf] }
 0x14f   :  { %v1439_v27 = vpop.f32.mrf.mxu1 }
 0x150   :  { %4220 = vst [vmem:[#allocation5_spill] sm:$0xff] %v3599_v18  ;;  %v3601_v33 = vadd.f32 %v1439_v27, %v1070_v21 }
 0x151   :  { %1109 = vmatmul.bf16.gmra.mxu0 %v2195_v11  ;;  %1289 = vmatmul.bf16.gmra.mxu2 %v2483_v16  ;;  %v2491_v11 = vor.u32 %v2793_v59, %v2490_v57  ;;  %v2723_v57 = vld [vmem:[%s4214_s0 + $0x154] sm:$0xf0]  ;;  %v2498_v59 = vld [vmem:[%s4214_s0 + $0x390] sm:$0xf] }
 0x152   :  { %4221 = vst [vmem:[#allocation6_spill] sm:$0xff] %v3601_v33  ;;  %1478 = vmatmul.bf16.gmra.mxu1 %v2199_v24  ;;  %1658 = vmatmul.bf16.gmra.mxu3 %v2487_v26  ;;  %v2495_v26 = vor.u32 %v2792_v61, %v2492_v0 }
 0x154   :  { %v1250_v34 = vpop.f32.mrf.mxu2 }
 0x155   :  { %v1619_v39 = vpop.f32.mrf.mxu3 }
 0x156   :  { %v3603_v42 = vadd.f32 %v1619_v39, %v1250_v34  ;;  %v1072_v50 = vpop.f32.mrf.mxu0 }
 0x157   :  { %v1441_v35 = vpop.f32.mrf.mxu1 }
 0x158   :  { %4222 = vst [vmem:[#allocation7_spill] sm:$0xff] %v3603_v42  ;;  %v3605_v51 = vadd.f32 %v1441_v35, %v1072_v50  ;;  %v2720_v35 = vld [vmem:[%s4214_s0 + $0x144] sm:$0xf]  ;;  %v2204_v50 = vld [vmem:[%s4214_s0 + $0x148] sm:$0xf0] }
 0x159   :  { %v2207_v24 = vor.u32 %v2720_v35, %v2204_v50  ;;  %v2794_v35 = vld [vmem:[%s4214_s0 + $0x394] sm:$0xf]  ;;  %v2500_v50 = vld [vmem:[%s4214_s0 + $0x398] sm:$0xf0] }
 0x15a   :  { %4223 = vst [vmem:[#allocation8_spill] sm:$0xff] %v3605_v51 }
 0x15c   :  { %v1252_v6 = vpop.f32.mrf.mxu2 }
 0x15d   :  { %v1621_v7 = vpop.f32.mrf.mxu3 }
 0x15e   :  { %v3631_v16 = vadd.f32 %v1621_v7, %v1252_v6  ;;  %v1075_v21 = vpop.f32.mrf.mxu0  ;;  %v2211_v6 = vor.u32 %v2723_v57, %v2210_v56  ;;  %v2218_v57 = vld [vmem:[%s4214_s0 + $0x160] sm:$0xf] }
 0x15f   :  { %v1444_v27 = vpop.f32.mrf.mxu1 }
 0x160   :  { %4224 = vst [vmem:[#allocation9_spill] sm:$0xff] %v3631_v16  ;;  %v3633_v34 = vadd.f32 %v1444_v27, %v1075_v21 }
 0x161   :  { %1114 = vmatmul.bf16.gmra.mxu0 %v2203_v10  ;;  %1294 = vmatmul.bf16.gmra.mxu2 %v2491_v11 }
 0x162   :  { %4225 = vst [vmem:[#allocation10_spill] sm:$0xff] %v3633_v34  ;;  %1483 = vmatmul.bf16.gmra.mxu1 %v2207_v24  ;;  %1663 = vmatmul.bf16.gmra.mxu3 %v2495_v26  ;;  %v2503_v24 = vor.u32 %v2794_v35, %v2500_v50 }
 0x164   :  { %v1255_v39 = vpop.f32.mrf.mxu2 }
 0x165   :  { %v1624_v51 = vpop.f32.mrf.mxu3 }
 0x166   :  { %v3635_v42 = vadd.f32 %v1624_v51, %v1255_v39  ;;  %v1077_v33 = vpop.f32.mrf.mxu0  ;;  %v2795_v51 = vld [vmem:[%s4214_s0 + $0x394] sm:$0xf0] }
 0x167   :  { %v1446_v18 = vpop.f32.mrf.mxu1  ;;  %v2499_v7 = vor.u32 %v2795_v51, %v2498_v59  ;;  %v2725_v59 = vld [vmem:[%s4214_s0 + $0x164] sm:$0xf0]  ;;  %v2506_v51 = vld [vmem:[%s4214_s0 + $0x3a0] sm:$0xf] }
 0x168   :  { %4226 = vst [vmem:[#allocation11_spill] sm:$0xff] %v3635_v42  ;;  %v3637_v54 = vadd.f32 %v1446_v18, %v1077_v33  ;;  %v2722_v18 = vld [vmem:[%s4214_s0 + $0x154] sm:$0xf]  ;;  %v2212_v33 = vld [vmem:[%s4214_s0 + $0x158] sm:$0xf0] }
 0x169   :  { %v2215_v21 = vor.u32 %v2722_v18, %v2212_v33  ;;  %v2796_v18 = vld [vmem:[%s4214_s0 + $0x3a4] sm:$0xf]  ;;  %v2508_v33 = vld [vmem:[%s4214_s0 + $0x3a8] sm:$0xf0] }
 0x16a   :  { %4227 = vst [vmem:[#allocation12_spill] sm:$0xff] %v3637_v54 }
 0x16c   :  { %v1257_v61 = vpop.f32.mrf.mxu2 }
 0x16d   :  { %v1626_v0 = vpop.f32.mrf.mxu3 }
 0x16e   :  { %v3663_v10 = vadd.f32 %v1626_v0, %v1257_v61  ;;  %v1080_v11 = vpop.f32.mrf.mxu0  ;;  %v2219_v61 = vor.u32 %v2725_v59, %v2218_v57  ;;  %v2226_v59 = vld [vmem:[%s4214_s0 + $0x170] sm:$0xf] }
 0x16f   :  { %v1449_v26 = vpop.f32.mrf.mxu1 }
 0x170   :  { %4228 = vst [vmem:[#allocation13_spill] sm:$0xff] %v3663_v10  ;;  %v3665_v27 = vadd.f32 %v1449_v26, %v1080_v11 }
 0x171   :  { %1119 = vmatmul.bf16.gmra.mxu0 %v2211_v6  ;;  %1299 = vmatmul.bf16.gmra.mxu2 %v2499_v7 }
 0x172   :  { %4229 = vst [vmem:[#allocation14_spill] sm:$0xff] %v3665_v27  ;;  %1488 = vmatmul.bf16.gmra.mxu1 %v2215_v21  ;;  %1668 = vmatmul.bf16.gmra.mxu3 %v2503_v24  ;;  %v2511_v21 = vor.u32 %v2796_v18, %v2508_v33 }
 0x174   :  { %v1260_v39 = vpop.f32.mrf.mxu2 }
 0x175   :  { %v1629_v54 = vpop.f32.mrf.mxu3 }
 0x176   :  { %v3667_v42 = vadd.f32 %v1629_v54, %v1260_v39  ;;  %v1082_v34 = vpop.f32.mrf.mxu0  ;;  %v2797_v54 = vld [vmem:[%s4214_s0 + $0x3a4] sm:$0xf0] }
 0x177   :  { %v1451_v16 = vpop.f32.mrf.mxu1  ;;  %v2507_v0 = vor.u32 %v2797_v54, %v2506_v51  ;;  %v2727_v51 = vld [vmem:[%s4214_s0 + $0x174] sm:$0xf0]  ;;  %v2514_v54 = vld [vmem:[%s4214_s0 + $0x3b0] sm:$0xf] }
 0x178   :  { %4230 = vst [vmem:[#allocation15_spill] sm:$0xff] %v3667_v42  ;;  %v3669_v56 = vadd.f32 %v1451_v16, %v1082_v34  ;;  %v2724_v16 = vld [vmem:[%s4214_s0 + $0x164] sm:$0xf]  ;;  %v2220_v34 = vld [vmem:[%s4214_s0 + $0x168] sm:$0xf0] }
 0x179   :  { %v2223_v11 = vor.u32 %v2724_v16, %v2220_v34  ;;  %v2798_v16 = vld [vmem:[%s4214_s0 + $0x3b4] sm:$0xf]  ;;  %v2516_v34 = vld [vmem:[%s4214_s0 + $0x3b8] sm:$0xf0] }
 0x17a   :  { %4231 = vst [vmem:[#allocation16_spill] sm:$0xff] %v3669_v56 }
 0x17c   :  { %v1262_v35 = vpop.f32.mrf.mxu2 }
 0x17d   :  { %v1631_v50 = vpop.f32.mrf.mxu3 }
 0x17e   :  { %v3695_v6 = vadd.f32 %v1631_v50, %v1262_v35  ;;  %v1085_v7 = vpop.f32.mrf.mxu0  ;;  %v2227_v35 = vor.u32 %v2727_v51, %v2226_v59  ;;  %v2234_v51 = vld [vmem:[%s4214_s0 + $0x180] sm:$0xf] }
 0x17f   :  { %v1454_v24 = vpop.f32.mrf.mxu1 }
 0x180   :  { %4232 = vst [vmem:[#allocation17_spill] sm:$0xff] %v3695_v6  ;;  %v3697_v26 = vadd.f32 %v1454_v24, %v1085_v7 }
 0x181   :  { %1124 = vmatmul.bf16.gmra.mxu0 %v2219_v61  ;;  %1304 = vmatmul.bf16.gmra.mxu2 %v2507_v0 }
 0x182   :  { %4233 = vst [vmem:[#allocation18_spill] sm:$0xff] %v3697_v26  ;;  %1493 = vmatmul.bf16.gmra.mxu1 %v2223_v11  ;;  %1673 = vmatmul.bf16.gmra.mxu3 %v2511_v21  ;;  %v2519_v11 = vor.u32 %v2798_v16, %v2516_v34 }
 0x184   :  { %v1265_v39 = vpop.f32.mrf.mxu2 }
 0x185   :  { %v1634_v56 = vpop.f32.mrf.mxu3 }
 0x186   :  { %v3699_v42 = vadd.f32 %v1634_v56, %v1265_v39  ;;  %v1087_v27 = vpop.f32.mrf.mxu0  ;;  %v2799_v56 = vld [vmem:[%s4214_s0 + $0x3b4] sm:$0xf0] }
 0x187   :  { %v1456_v10 = vpop.f32.mrf.mxu1  ;;  %v2515_v50 = vor.u32 %v2799_v56, %v2514_v54  ;;  %v2729_v54 = vld [vmem:[%s4214_s0 + $0x184] sm:$0xf0]  ;;  %v2522_v56 = vld [vmem:[%s4214_s0 + $0x3c0] sm:$0xf] }
 0x188   :  { %4234 = vst [vmem:[#allocation19_spill] sm:$0xff] %v3699_v42  ;;  %v3701_v57 = vadd.f32 %v1456_v10, %v1087_v27  ;;  %v2726_v10 = vld [vmem:[%s4214_s0 + $0x174] sm:$0xf]  ;;  %v2228_v27 = vld [vmem:[%s4214_s0 + $0x178] sm:$0xf0] }
 0x189   :  { %v2231_v7 = vor.u32 %v2726_v10, %v2228_v27  ;;  %v2800_v10 = vld [vmem:[%s4214_s0 + $0x3c4] sm:$0xf]  ;;  %v2524_v27 = vld [vmem:[%s4214_s0 + $0x3c8] sm:$0xf0] }
 0x18a   :  { %4235 = vst [vmem:[#allocation20_spill] sm:$0xff] %v3701_v57 }
 0x18c   :  { %v1267_v18 = vpop.f32.mrf.mxu2 }
 0x18d   :  { %v1636_v33 = vpop.f32.mrf.mxu3 }
 0x18e   :  { %v3727_v61 = vadd.f32 %v1636_v33, %v1267_v18  ;;  %v1090_v0 = vpop.f32.mrf.mxu0  ;;  %v2235_v18 = vor.u32 %v2729_v54, %v2234_v51  ;;  %v2242_v54 = vld [vmem:[%s4214_s0 + $0x190] sm:$0xf] }
 0x18f   :  { %v1459_v21 = vpop.f32.mrf.mxu1 }
 0x190   :  { %4236 = vst [vmem:[#allocation21_spill] sm:$0xff] %v3727_v61  ;;  %v3729_v24 = vadd.f32 %v1459_v21, %v1090_v0 }
 0x191   :  { %1129 = vmatmul.bf16.gmra.mxu0 %v2227_v35  ;;  %1309 = vmatmul.bf16.gmra.mxu2 %v2515_v50 }
 0x192   :  { %4237 = vst [vmem:[#allocation22_spill] sm:$0xff] %v3729_v24  ;;  %1498 = vmatmul.bf16.gmra.mxu1 %v2231_v7  ;;  %1678 = vmatmul.bf16.gmra.mxu3 %v2519_v11  ;;  %v2527_v7 = vor.u32 %v2800_v10, %v2524_v27 }
 0x194   :  { %v1270_v39 = vpop.f32.mrf.mxu2 }
 0x195   :  { %v1639_v57 = vpop.f32.mrf.mxu3 }
 0x196   :  { %v3731_v42 = vadd.f32 %v1639_v57, %v1270_v39  ;;  %v1092_v26 = vpop.f32.mrf.mxu0  ;;  %v2801_v57 = vld [vmem:[%s4214_s0 + $0x3c4] sm:$0xf0] }
 0x197   :  { %v1461_v6 = vpop.f32.mrf.mxu1  ;;  %v2523_v33 = vor.u32 %v2801_v57, %v2522_v56  ;;  %v2731_v56 = vld [vmem:[%s4214_s0 + $0x194] sm:$0xf0]  ;;  %v2530_v57 = vld [vmem:[%s4214_s0 + $0x3d0] sm:$0xf] }
 0x198   :  { %4238 = vst [vmem:[#allocation23_spill] sm:$0xff] %v3731_v42  ;;  %v3733_v59 = vadd.f32 %v1461_v6, %v1092_v26  ;;  %v2728_v6 = vld [vmem:[%s4214_s0 + $0x184] sm:$0xf]  ;;  %v2236_v26 = vld [vmem:[%s4214_s0 + $0x188] sm:$0xf0] }
 0x199   :  { %v2239_v0 = vor.u32 %v2728_v6, %v2236_v26  ;;  %v2802_v6 = vld [vmem:[%s4214_s0 + $0x3d4] sm:$0xf]  ;;  %v2532_v26 = vld [vmem:[%s4214_s0 + $0x3d8] sm:$0xf0] }
 0x19a   :  { %4239 = vst [vmem:[#allocation24_spill] sm:$0xff] %v3733_v59 }
 0x19c   :  { %v1272_v16 = vpop.f32.mrf.mxu2 }
 0x19d   :  { %v1641_v34 = vpop.f32.mrf.mxu3 }
 0x19e   :  { %v3759_v35 = vadd.f32 %v1641_v34, %v1272_v16  ;;  %v1095_v50 = vpop.f32.mrf.mxu0  ;;  %v2243_v16 = vor.u32 %v2731_v56, %v2242_v54  ;;  %v2250_v56 = vld [vmem:[%s4214_s0 + $0x1a0] sm:$0xf] }
 0x19f   :  { %v1464_v11 = vpop.f32.mrf.mxu1 }
 0x1a0   :  { %4240 = vst [vmem:[#allocation25_spill] sm:$0xff] %v3759_v35  ;;  %v3761_v21 = vadd.f32 %v1464_v11, %v1095_v50 }
 0x1a1   :  { %1134 = vmatmul.bf16.gmra.mxu0 %v2235_v18  ;;  %1314 = vmatmul.bf16.gmra.mxu2 %v2523_v33 }
 0x1a2   :  { %4241 = vst [vmem:[#allocation26_spill] sm:$0xff] %v3761_v21  ;;  %1503 = vmatmul.bf16.gmra.mxu1 %v2239_v0  ;;  %1683 = vmatmul.bf16.gmra.mxu3 %v2527_v7  ;;  %v2535_v0 = vor.u32 %v2802_v6, %v2532_v26 }
 0x1a4   :  { %v1275_v39 = vpop.f32.mrf.mxu2 }
 0x1a5   :  { %v1644_v59 = vpop.f32.mrf.mxu3 }
 0x1a6   :  { %v3763_v42 = vadd.f32 %v1644_v59, %v1275_v39  ;;  %v1097_v24 = vpop.f32.mrf.mxu0  ;;  %v2803_v59 = vld [vmem:[%s4214_s0 + $0x3d4] sm:$0xf0] }
 0x1a7   :  { %v1466_v61 = vpop.f32.mrf.mxu1  ;;  %v2531_v34 = vor.u32 %v2803_v59, %v2530_v57  ;;  %v2733_v57 = vld [vmem:[%s4214_s0 + $0x1a4] sm:$0xf0]  ;;  %v2538_v59 = vld [vmem:[%s4214_s0 + $0x3e0] sm:$0xf] }
 0x1a8   :  { %4242 = vst [vmem:[#allocation27_spill] sm:$0xff] %v3763_v42  ;;  %v3765_v51 = vadd.f32 %v1466_v61, %v1097_v24  ;;  %v2730_v61 = vld [vmem:[%s4214_s0 + $0x194] sm:$0xf]  ;;  %v2244_v24 = vld [vmem:[%s4214_s0 + $0x198] sm:$0xf0] }
 0x1a9   :  { %v2247_v50 = vor.u32 %v2730_v61, %v2244_v24  ;;  %v2804_v61 = vld [vmem:[%s4214_s0 + $0x3e4] sm:$0xf]  ;;  %v2540_v24 = vld [vmem:[%s4214_s0 + $0x3e8] sm:$0xf0] }
 0x1aa   :  { %4243 = vst [vmem:[#allocation28_spill] sm:$0xff] %v3765_v51 }
 0x1ac   :  { %v1277_v10 = vpop.f32.mrf.mxu2 }
 0x1ad   :  { %v1646_v27 = vpop.f32.mrf.mxu3 }
 0x1ae   :  { %v3791_v18 = vadd.f32 %v1646_v27, %v1277_v10  ;;  %v1100_v33 = vpop.f32.mrf.mxu0  ;;  %v2251_v10 = vor.u32 %v2733_v57, %v2250_v56  ;;  %v2258_v57 = vld [vmem:[%s4214_s0 + $0x1b0] sm:$0xf] }
 0x1af   :  { %v1469_v7 = vpop.f32.mrf.mxu1 }
 0x1b0   :  { %4244 = vst [vmem:[#allocation29_spill] sm:$0xff] %v3791_v18  ;;  %v3793_v11 = vadd.f32 %v1469_v7, %v1100_v33 }
 0x1b1   :  { %1139 = vmatmul.bf16.gmra.mxu0 %v2243_v16  ;;  %1319 = vmatmul.bf16.gmra.mxu2 %v2531_v34 }
 0x1b2   :  { %4245 = vst [vmem:[#allocation30_spill] sm:$0xff] %v3793_v11  ;;  %1508 = vmatmul.bf16.gmra.mxu1 %v2247_v50  ;;  %1688 = vmatmul.bf16.gmra.mxu3 %v2535_v0  ;;  %v2543_v50 = vor.u32 %v2804_v61, %v2540_v24 }
 0x1b4   :  { %v1280_v39 = vpop.f32.mrf.mxu2 }
 0x1b5   :  { %v1649_v51 = vpop.f32.mrf.mxu3 }
 0x1b6   :  { %v3795_v42 = vadd.f32 %v1649_v51, %v1280_v39  ;;  %v1102_v21 = vpop.f32.mrf.mxu0  ;;  %v2805_v51 = vld [vmem:[%s4214_s0 + $0x3e4] sm:$0xf0] }
 0x1b7   :  { %v1471_v35 = vpop.f32.mrf.mxu1  ;;  %v2539_v27 = vor.u32 %v2805_v51, %v2538_v59  ;;  %v2735_v59 = vld [vmem:[%s4214_s0 + $0x1b4] sm:$0xf0] }
 0x1b8   :  { %4246 = vst [vmem:[#allocation31_spill] sm:$0xff] %v3795_v42  ;;  %v3797_v54 = vadd.f32 %v1471_v35, %v1102_v21  ;;  %v2732_v35 = vld [vmem:[%s4214_s0 + $0x1a4] sm:$0xf]  ;;  %v2252_v21 = vld [vmem:[%s4214_s0 + $0x1a8] sm:$0xf0] }
 0x1b9   :  { %v2255_v33 = vor.u32 %v2732_v35, %v2252_v21  ;;  %v2546_v35 = vld [vmem:[%s4214_s0 + $0x3f0] sm:$0xf]  ;;  %v3854_v21 = vld [vmem:[%s4215_s2] ss:$0 sm:$0xff] }
 0x1ba   :  { %4247 = vst [vmem:[#allocation32_spill] sm:$0xff] %v3797_v54 }
 0x1bc   :  { %v1282_v6 = vpop.f32.mrf.mxu2 }
 0x1bd   :  { %v1651_v26 = vpop.f32.mrf.mxu3 }
 0x1be   :  { %v3823_v16 = vadd.f32 %v1651_v26, %v1282_v6  ;;  %v1105_v34 = vpop.f32.mrf.mxu0  ;;  %v2259_v26 = vor.u32 %v2735_v59, %v2258_v57 }
 0x1bf   :  { %v1474_v0 = vpop.f32.mrf.mxu1 }
 0x1c0   :  { %4248 = vst [vmem:[#allocation33_spill] sm:$0xff] %v3823_v16  ;;  %v1475_v7 = vadd.f32 %v1474_v0, %v1105_v34 }
 0x1c1   :  { %1144 = vmatmul.bf16.gmra.mxu0 %v2251_v10  ;;  %1324 = vmatmul.bf16.gmra.mxu2 %v2539_v27 }
 0x1c2   :  { %1513 = vmatmul.bf16.gmra.mxu1 %v2255_v33  ;;  %1693 = vmatmul.bf16.gmra.mxu3 %v2543_v50  ;;  %v1744_v30 = vmax.f32 %v3249_v62, %v1475_v7  ;;  %v2734_v62 = vld [vmem:[%s4214_s0 + $0x1b4] sm:$0xf] }
 0x1c4   :  { %v1285_v39 = vpop.f32.mrf.mxu2 }
 0x1c5   :  { %v1654_v54 = vpop.f32.mrf.mxu3 }
 0x1c6   :  { %v1655_v42 = vadd.f32 %v1654_v54, %v1285_v39  ;;  %v1107_v11 = vpop.f32.mrf.mxu0  ;;  %v2807_v54 = vld [vmem:[%s4214_s0 + $0x3f4] sm:$0xf0] }
 0x1c7   :  { %v1476_v18 = vpop.f32.mrf.mxu1  ;;  %v2547_v10 = vor.u32 %v2807_v54, %v2546_v35 }
 0x1c8   :  { %v1780_v56 = vmax.f32 %v3251_v1, %v1655_v42  ;;  %v2260_v1 = vld [vmem:[%s4214_s0 + $0x1b8] sm:$0xf0]  ;;  %v1477_v61 = vadd.f32 %v1476_v18, %v1107_v11 }
 0x1c9   :  { %v2548_v42 = vld [vmem:[%s4214_s0 + $0x3f8] sm:$0xf0]  ;;  %v2263_v33 = vor.u32 %v2734_v62, %v2260_v1 }
 0x1ca   :  { %v1816_v51 = vmax.f32 %v1744_v30, %v1780_v56  ;;  %v2806_v30 = vld [vmem:[%s4214_s0 + $0x3f4] sm:$0xf]  ;;  %v1745_v39 = vmax.f32 %v3253_v4, %v1477_v61  ;;  %v2266_v61 = vld [vmem:[%s4214_s0 + $0x1c0] sm:$0xf] }
 0x1cb   :  { %v2551_v50 = vor.u32 %v2806_v30, %v2548_v42 }
 0x1cc   :  { %v1287_v24 = vpop.f32.mrf.mxu2  ;;  %v1856_v7 = vadd.f32 %v3854_v21, %v1816_v51 }
 0x1cd   :  { %v1656_v6 = vpop.f32.mrf.mxu3 }
 0x1ce   :  { %v1657_v27 = vadd.f32 %v1656_v6, %v1287_v24  ;;  %v1110_v34 = vpop.f32.mrf.mxu0  ;;  %v1892_v18 = vmul.f32 0.01, %v1856_v7 }
 0x1cf   :  { %v1479_v0 = vpop.f32.mrf.mxu1 }
 0x1d0   :  { %v1781_v56 = vmax.f32 %v3279_v17, %v1657_v27  ;;  %v1480_v57 = vadd.f32 %v1479_v0, %v1110_v34  ;;  %v1928_v51 = vmax.f32 %v1856_v7, %v1892_v18  ;;  %v2808_v27 = vld [vmem:[%s4214_s0 + $0x404] sm:$0xf]  ;;  %v2556_v34 = vld [vmem:[%s4214_s0 + $0x408] sm:$0xf0] }
 0x1d1   :  { %1149 = vmatmul.bf16.gmra.mxu0 %v2259_v26  ;;  %1329 = vmatmul.bf16.gmra.mxu2 %v2547_v10  ;;  %v2554_v26 = vld [vmem:[%s4214_s0 + $0x400] sm:$0xf]  ;;  %v2268_v10 = vld [vmem:[%s4214_s0 + $0x1c8] sm:$0xf0] }
 0x1d2   :  { %v1817_v16 = vmax.f32 %v1745_v39, %v1781_v56  ;;  %1518 = vmatmul.bf16.gmra.mxu1 %v2263_v33  ;;  %1698 = vmatmul.bf16.gmra.mxu3 %v2551_v50  ;;  %v1746_v4 = vmax.f32 %v3281_v22, %v1480_v57  ;;  %v2809_v22 = vld [vmem:[%s4214_s0 + $0x404] sm:$0xf0]  ;;  %v2559_v57 = vor.u32 %v2808_v27, %v2556_v34 }
 0x1d3   :  { %v2555_v39 = vor.u32 %v2809_v22, %v2554_v26 }
 0x1d4   :  { %v1857_v11 = vadd.f32 %v3854_v21, %v1817_v16  ;;  %v1290_v59 = vpop.f32.mrf.mxu2  ;;  %v2737_v16 = vld [vmem:[%s4214_s0 + $0x1c4] sm:$0xf0] }
 0x1d5   :  { %v1659_v35 = vpop.f32.mrf.mxu3  ;;  %v2267_v7 = vor.u32 %v2737_v16, %v2266_v61 }
 0x1d6   :  { %v1893_v54 = vmul.f32 0.01, %v1857_v11  ;;  %v1660_v62 = vadd.f32 %v1659_v35, %v1290_v59  ;;  %v1112_v1 = vpop.f32.mrf.mxu0 }
 0x1d7   :  { %v1481_v30 = vpop.f32.mrf.mxu1 }
 0x1d8   :  { %v1929_v42 = vmax.f32 %v1857_v11, %v1893_v54  ;;  %v1782_v17 = vmax.f32 %v3283_v25, %v1660_v62  ;;  %v2736_v25 = vld [vmem:[%s4214_s0 + $0x1c4] sm:$0xf]  ;;  %v1482_v33 = vadd.f32 %v1481_v30, %v1112_v1 }
 0x1d9   :  { %v2271_v11 = vor.u32 %v2736_v25, %v2268_v10  ;;  %v2274_v25 = vld [vmem:[%s4214_s0 + $0x1d0] sm:$0xf]  ;;  %v2739_v10 = vld [vmem:[%s4214_s0 + $0x1d4] sm:$0xf0] }
 0x1da   :  { %v2843_v24 = vpack.c.bf16 %v1929_v42, %v1928_v51  ;;  %v1818_v6 = vmax.f32 %v1746_v4, %v1782_v17  ;;  %v1747_v54 = vmax.f32 %v3285_v28, %v1482_v33  ;;  %v2562_v33 = vld [vmem:[%s4214_s0 + $0x410] sm:$0xf] }
 0x1dc   :  { %2844 = vst [vmem:[%s4216_s3] sm:$0xff] %v2843_v24   ;;  %v1292_v50 = vpop.f32.mrf.mxu2  ;;  %v1858_v35 = vadd.f32 %v3854_v21, %v1818_v6 }
 0x1dd   :  { %v1661_v0 = vpop.f32.mrf.mxu3 }
 0x1de   :  { %v1662_v56 = vadd.f32 %v1661_v0, %v1292_v50  ;;  %v1115_v18 = vpop.f32.mrf.mxu0  ;;  %v1894_v1 = vmul.f32 0.01, %v1858_v35  ;;  %v2276_v50 = vld [vmem:[%s4214_s0 + $0x1d8] sm:$0xf0]  ;;  %v2810_v0 = vld [vmem:[%s4214_s0 + $0x414] sm:$0xf] }
 0x1df   :  { %v1484_v59 = vpop.f32.mrf.mxu1 }
 0x1e0   :  { %v1783_v62 = vmax.f32 %v3311_v41, %v1662_v56  ;;  %v1485_v42 = vadd.f32 %v1484_v59, %v1115_v18  ;;  %v1930_v6 = vmax.f32 %v1858_v35, %v1894_v1 }
 0x1e1   :  { %1154 = vmatmul.bf16.gmra.mxu0 %v2267_v7  ;;  %1334 = vmatmul.bf16.gmra.mxu2 %v2555_v39  ;;  %v2564_v7 = vld [vmem:[%s4214_s0 + $0x418] sm:$0xf0] }
 0x1e2   :  { %v1819_v51 = vmax.f32 %v1747_v54, %v1783_v62  ;;  %1523 = vmatmul.bf16.gmra.mxu1 %v2271_v11  ;;  %1703 = vmatmul.bf16.gmra.mxu3 %v2559_v57  ;;  %v1748_v28 = vmax.f32 %v3313_v46, %v1485_v42  ;;  %v2811_v46 = vld [vmem:[%s4214_s0 + $0x414] sm:$0xf0]  ;;  %v2275_v11 = vor.u32 %v2739_v10, %v2274_v25 }
 0x1e3   :  { %v2563_v57 = vor.u32 %v2811_v46, %v2562_v33  ;;  %v2567_v62 = vor.u32 %v2810_v0, %v2564_v7  ;;  %v2812_v0 = vld [vmem:[%s4214_s0 + $0x424] sm:$0xf]  ;;  %v2572_v7 = vld [vmem:[%s4214_s0 + $0x428] sm:$0xf0] }
 0x1e4   :  { %v1859_v30 = vadd.f32 %v3854_v21, %v1819_v51  ;;  %v1295_v4 = vpop.f32.mrf.mxu2 }
 0x1e5   :  { %v1664_v17 = vpop.f32.mrf.mxu3 }
 0x1e6   :  { %v1895_v61 = vmul.f32 0.01, %v1859_v30  ;;  %v1665_v16 = vadd.f32 %v1664_v17, %v1295_v4  ;;  %v1117_v24 = vpop.f32.mrf.mxu0 }
 0x1e7   :  { %v1486_v26 = vpop.f32.mrf.mxu1 }
 0x1e8   :  { %v1931_v22 = vmax.f32 %v1859_v30, %v1895_v61  ;;  %v1784_v41 = vmax.f32 %v3315_v49, %v1665_v16  ;;  %v2738_v49 = vld [vmem:[%s4214_s0 + $0x1d4] sm:$0xf]  ;;  %v1487_v39 = vadd.f32 %v1486_v26, %v1117_v24 }
 0x1e9   :  { %v2279_v54 = vor.u32 %v2738_v49, %v2276_v50  ;;  %v2570_v49 = vld [vmem:[%s4214_s0 + $0x420] sm:$0xf]  ;;  %v2284_v50 = vld [vmem:[%s4214_s0 + $0x1e8] sm:$0xf0] }
 0x1ea   :  { %v2848_v27 = vpack.c.bf16 %v1931_v22, %v1930_v6  ;;  %v1820_v34 = vmax.f32 %v1748_v28, %v1784_v41  ;;  %v1749_v30 = vmax.f32 %v3317_v52, %v1487_v39 }
 0x1ec   :  { %2930 = vst [vmem:[%s4216_s3 + $0x8] sm:$0xff] %v2848_v27   ;;  %v1297_v56 = vpop.f32.mrf.mxu2  ;;  %v1860_v1 = vadd.f32 %v3854_v21, %v1820_v34  ;;  %v2282_v27 = vld [vmem:[%s4214_s0 + $0x1e0] sm:$0xf]  ;;  %v2741_v34 = vld [vmem:[%s4214_s0 + $0x1e4] sm:$0xf0] }
 0x1ed   :  { %v1666_v18 = vpop.f32.mrf.mxu3 }
 0x1ee   :  { %v1667_v59 = vadd.f32 %v1666_v18, %v1297_v56  ;;  %v1120_v35 = vpop.f32.mrf.mxu0  ;;  %v1896_v17 = vmul.f32 0.01, %v1860_v1 }
 0x1ef   :  { %v1489_v51 = vpop.f32.mrf.mxu1 }
 0x1f0   :  { %v1785_v42 = vmax.f32 %v3343_v3, %v1667_v59  ;;  %v1490_v16 = vadd.f32 %v1489_v51, %v1120_v35  ;;  %v1932_v25 = vmax.f32 %v1860_v1, %v1896_v17 }
 0x1f1   :  { %1159 = vmatmul.bf16.gmra.mxu0 %v2275_v11  ;;  %1339 = vmatmul.bf16.gmra.mxu2 %v2563_v57  ;;  %v2283_v11 = vor.u32 %v2741_v34, %v2282_v27 }
 0x1f2   :  { %v1821_v4 = vmax.f32 %v1749_v30, %v1785_v42  ;;  %1528 = vmatmul.bf16.gmra.mxu1 %v2279_v54  ;;  %1708 = vmatmul.bf16.gmra.mxu3 %v2567_v62  ;;  %v1750_v52 = vmax.f32 %v3345_v9, %v1490_v16  ;;  %v2813_v9 = vld [vmem:[%s4214_s0 + $0x424] sm:$0xf0]  ;;  %v2575_v62 = vor.u32 %v2812_v0, %v2572_v7 }
 0x1f3   :  { %v2571_v57 = vor.u32 %v2813_v9, %v2570_v49  ;;  %v2814_v49 = vld [vmem:[%s4214_s0 + $0x434] sm:$0xf]  ;;  %v2580_v9 = vld [vmem:[%s4214_s0 + $0x438] sm:$0xf0] }
 0x1f4   :  { %v1861_v61 = vadd.f32 %v3854_v21, %v1821_v4  ;;  %v1300_v24 = vpop.f32.mrf.mxu2 }
 0x1f5   :  { %v1669_v26 = vpop.f32.mrf.mxu3 }
 0x1f6   :  { %v1897_v6 = vmul.f32 0.01, %v1861_v61  ;;  %v1670_v22 = vadd.f32 %v1669_v26, %v1300_v24  ;;  %v1122_v28 = vpop.f32.mrf.mxu0 }
 0x1f7   :  { %v1491_v41 = vpop.f32.mrf.mxu1 }
 0x1f8   :  { %v1933_v10 = vmax.f32 %v1861_v61, %v1897_v6  ;;  %v1786_v3 = vmax.f32 %v3347_v12, %v1670_v22  ;;  %v2740_v12 = vld [vmem:[%s4214_s0 + $0x1e4] sm:$0xf]  ;;  %v1492_v39 = vadd.f32 %v1491_v41, %v1122_v28 }
 0x1f9   :  { %v2287_v54 = vor.u32 %v2740_v12, %v2284_v50 }
 0x1fa   :  { %v2853_v33 = vpack.c.bf16 %v1933_v10, %v1932_v25  ;;  %v1822_v46 = vmax.f32 %v1750_v52, %v1786_v3  ;;  %v1751_v30 = vmax.f32 %v3349_v15, %v1492_v39  ;;  %v2290_v52 = vld [vmem:[%s4214_s0 + $0x1f0] sm:$0xf]  ;;  %v2743_v3 = vld [vmem:[%s4214_s0 + $0x1f4] sm:$0xf0] }
 0x1fb   :  { %v2291_v7 = vor.u32 %v2743_v3, %v2290_v52  ;;  %v2816_v52 = vld [vmem:[%s4214_s0 + $0x444] sm:$0xf]  ;;  %v2588_v3 = vld [vmem:[%s4214_s0 + $0x448] sm:$0xf0] }
 0x1fc   :  { %2931 = vst [vmem:[%s4216_s3 + $0x10] sm:$0xff] %v2853_v33   ;;  %v1302_v56 = vpop.f32.mrf.mxu2  ;;  %v1862_v1 = vadd.f32 %v3854_v21, %v1822_v46  ;;  %v2578_v33 = vld [vmem:[%s4214_s0 + $0x430] sm:$0xf]  ;;  %v2292_v46 = vld [vmem:[%s4214_s0 + $0x1f8] sm:$0xf0] }
 0x1fd   :  { %v1671_v18 = vpop.f32.mrf.mxu3 }
 0x1fe   :  { %v1672_v59 = vadd.f32 %v1671_v18, %v1302_v56  ;;  %v1125_v35 = vpop.f32.mrf.mxu0  ;;  %v1898_v17 = vmul.f32 0.01, %v1862_v1 }
 0x1ff   :  { %v1494_v51 = vpop.f32.mrf.mxu1 }
 0x200   :  { %v1787_v42 = vmax.f32 %v3375_v32, %v1672_v59  ;;  %v1495_v16 = vadd.f32 %v1494_v51, %v1125_v35  ;;  %v1934_v25 = vmax.f32 %v1862_v1, %v1898_v17 }
 0x201   :  { %1164 = vmatmul.bf16.gmra.mxu0 %v2283_v11  ;;  %1344 = vmatmul.bf16.gmra.mxu2 %v2571_v57  ;;  %v2583_v57 = vor.u32 %v2814_v49, %v2580_v9 }
 0x202   :  { %v1823_v4 = vmax.f32 %v1751_v30, %v1787_v42  ;;  %1533 = vmatmul.bf16.gmra.mxu1 %v2287_v54  ;;  %1713 = vmatmul.bf16.gmra.mxu3 %v2575_v62  ;;  %v1752_v15 = vmax.f32 %v3377_v37, %v1495_v16  ;;  %v2815_v37 = vld [vmem:[%s4214_s0 + $0x434] sm:$0xf0] }
 0x203   :  { %v2579_v39 = vor.u32 %v2815_v37, %v2578_v33 }
 0x204   :  { %v1863_v61 = vadd.f32 %v3854_v21, %v1823_v4  ;;  %v1305_v24 = vpop.f32.mrf.mxu2 }
 0x205   :  { %v1674_v26 = vpop.f32.mrf.mxu3 }
 0x206   :  { %v1899_v6 = vmul.f32 0.01, %v1863_v61  ;;  %v1675_v22 = vadd.f32 %v1674_v26, %v1305_v24  ;;  %v1127_v28 = vpop.f32.mrf.mxu0 }
 0x207   :  { %v1496_v41 = vpop.f32.mrf.mxu1 }
 0x208   :  { %v1935_v10 = vmax.f32 %v1863_v61, %v1899_v6  ;;  %v1788_v32 = vmax.f32 %v3379_v40, %v1675_v22  ;;  %v2742_v40 = vld [vmem:[%s4214_s0 + $0x1f4] sm:$0xf]  ;;  %v1497_v12 = vadd.f32 %v1496_v41, %v1127_v28  ;;  %v2298_v28 = vld [vmem:[%s4214_s0 + $0x200] sm:$0xf]  ;;  %v2745_v41 = vld [vmem:[%s4214_s0 + $0x204] sm:$0xf0] }
 0x209   :  { %v2295_v11 = vor.u32 %v2742_v40, %v2292_v46  ;;  %v2299_v37 = vor.u32 %v2745_v41, %v2298_v28 }
 0x20a   :  { %v2858_v27 = vpack.c.bf16 %v1935_v10, %v1934_v25  ;;  %v1824_v34 = vmax.f32 %v1752_v15, %v1788_v32  ;;  %v1753_v54 = vmax.f32 %v3381_v44, %v1497_v12  ;;  %v2586_v15 = vld [vmem:[%s4214_s0 + $0x440] sm:$0xf]  ;;  %v2300_v32 = vld [vmem:[%s4214_s0 + $0x208] sm:$0xf0]  ;;  %v2591_v12 = vor.u32 %v2816_v52, %v2588_v3 }
 0x20c   :  { %2932 = vst [vmem:[%s4216_s3 + $0x18] sm:$0xff] %v2858_v27   ;;  %v1307_v50 = vpop.f32.mrf.mxu2  ;;  %v1864_v35 = vadd.f32 %v3854_v21, %v1824_v34 }
 0x20d   :  { %v1676_v0 = vpop.f32.mrf.mxu3 }
 0x20e   :  { %v1677_v56 = vadd.f32 %v1676_v0, %v1307_v50  ;;  %v1130_v18 = vpop.f32.mrf.mxu0  ;;  %v1900_v1 = vmul.f32 0.01, %v1864_v35 }
 0x20f   :  { %v1499_v59 = vpop.f32.mrf.mxu1 }
 0x210   :  { %v1789_v62 = vmax.f32 %v3407_v60, %v1677_v56  ;;  %v1500_v42 = vadd.f32 %v1499_v59, %v1130_v18  ;;  %v1936_v6 = vmax.f32 %v1864_v35, %v1900_v1 }
 0x211   :  { %1169 = vmatmul.bf16.gmra.mxu0 %v2291_v7  ;;  %1349 = vmatmul.bf16.gmra.mxu2 %v2579_v39 }
 0x212   :  { %v1825_v51 = vmax.f32 %v1753_v54, %v1789_v62  ;;  %1538 = vmatmul.bf16.gmra.mxu1 %v2295_v11  ;;  %1718 = vmatmul.bf16.gmra.mxu3 %v2583_v57  ;;  %v1754_v44 = vmax.f32 %v3409_v5, %v1500_v42  ;;  %v2817_v5 = vld [vmem:[%s4214_s0 + $0x444] sm:$0xf0] }
 0x213   :  { %v2587_v40 = vor.u32 %v2817_v5, %v2586_v15 }
 0x214   :  { %v1865_v30 = vadd.f32 %v3854_v21, %v1825_v51  ;;  %v1310_v4 = vpop.f32.mrf.mxu2 }
 0x215   :  { %v1679_v17 = vpop.f32.mrf.mxu3 }
 0x216   :  { %v1901_v61 = vmul.f32 0.01, %v1865_v30  ;;  %v1680_v16 = vadd.f32 %v1679_v17, %v1310_v4  ;;  %v1132_v24 = vpop.f32.mrf.mxu0  ;;  %v2306_v4 = vld [vmem:[%s4214_s0 + $0x210] sm:$0xf]  ;;  %v2747_v17 = vld [vmem:[%s4214_s0 + $0x214] sm:$0xf0] }
 0x217   :  { %v1501_v26 = vpop.f32.mrf.mxu1  ;;  %v2307_v41 = vor.u32 %v2747_v17, %v2306_v4 }
 0x218   :  { %v1937_v22 = vmax.f32 %v1865_v30, %v1901_v61  ;;  %v1790_v60 = vmax.f32 %v3411_v8, %v1680_v16  ;;  %v2744_v8 = vld [vmem:[%s4214_s0 + $0x204] sm:$0xf]  ;;  %v1502_v27 = vadd.f32 %v1501_v26, %v1132_v24  ;;  %v2594_v24 = vld [vmem:[%s4214_s0 + $0x450] sm:$0xf]  ;;  %v2308_v26 = vld [vmem:[%s4214_s0 + $0x218] sm:$0xf0] }
 0x219   :  { %v2303_v9 = vor.u32 %v2744_v8, %v2300_v32 }
 0x21a   :  { %v2863_v25 = vpack.c.bf16 %v1937_v22, %v1936_v6  ;;  %v1826_v10 = vmax.f32 %v1754_v44, %v1790_v60  ;;  %v1755_v7 = vmax.f32 %v3413_v13, %v1502_v27  ;;  %v2818_v6 = vld [vmem:[%s4214_s0 + $0x454] sm:$0xf]  ;;  %v2596_v22 = vld [vmem:[%s4214_s0 + $0x458] sm:$0xf0] }
 0x21b   :  { %v2599_v8 = vor.u32 %v2818_v6, %v2596_v22 }
 0x21c   :  { %2933 = vst [vmem:[%s4216_s3 + $0x20] sm:$0xff] %v2863_v25   ;;  %v1312_v34 = vpop.f32.mrf.mxu2  ;;  %v1866_v0 = vadd.f32 %v3854_v21, %v1826_v10 }
 0x21d   :  { %v1681_v33 = vpop.f32.mrf.mxu3 }
 0x21e   :  { %v1682_v46 = vadd.f32 %v1681_v33, %v1312_v34  ;;  %v1135_v49 = vpop.f32.mrf.mxu0  ;;  %v1902_v18 = vmul.f32 0.01, %v1866_v0 }
 0x21f   :  { %v1504_v50 = vpop.f32.mrf.mxu1 }
 0x220   :  { %v1791_v39 = vmax.f32 %v3439_v31, %v1682_v46  ;;  %v1505_v57 = vadd.f32 %v1504_v50, %v1135_v49  ;;  %v1938_v30 = vmax.f32 %v1866_v0, %v1902_v18  ;;  %v2749_v18 = vld [vmem:[%s4214_s0 + $0x224] sm:$0xf0] }
 0x221   :  { %1174 = vmatmul.bf16.gmra.mxu0 %v2299_v37  ;;  %1354 = vmatmul.bf16.gmra.mxu2 %v2587_v40 }
 0x222   :  { %v1827_v56 = vmax.f32 %v1755_v7, %v1791_v39  ;;  %1543 = vmatmul.bf16.gmra.mxu1 %v2303_v9  ;;  %1723 = vmatmul.bf16.gmra.mxu3 %v2591_v12  ;;  %v1756_v13 = vmax.f32 %v3441_v38, %v1505_v57  ;;  %v2819_v38 = vld [vmem:[%s4214_s0 + $0x454] sm:$0xf0] }
 0x223   :  { %v2595_v25 = vor.u32 %v2819_v38, %v2594_v24 }
 0x224   :  { %v1867_v11 = vadd.f32 %v3854_v21, %v1827_v56  ;;  %v1315_v59 = vpop.f32.mrf.mxu2  ;;  %v2314_v56 = vld [vmem:[%s4214_s0 + $0x220] sm:$0xf] }
 0x225   :  { %v1684_v35 = vpop.f32.mrf.mxu3 }
 0x226   :  { %v1903_v54 = vmul.f32 0.01, %v1867_v11  ;;  %v1685_v62 = vadd.f32 %v1684_v35, %v1315_v59  ;;  %v1137_v51 = vpop.f32.mrf.mxu0  ;;  %v2602_v59 = vld [vmem:[%s4214_s0 + $0x460] sm:$0xf]  ;;  %v2316_v35 = vld [vmem:[%s4214_s0 + $0x228] sm:$0xf0] }
 0x227   :  { %v1506_v1 = vpop.f32.mrf.mxu1 }
 0x228   :  { %v1939_v42 = vmax.f32 %v1867_v11, %v1903_v54  ;;  %v1792_v31 = vmax.f32 %v3443_v43, %v1685_v62  ;;  %v2746_v43 = vld [vmem:[%s4214_s0 + $0x214] sm:$0xf]  ;;  %v1507_v44 = vadd.f32 %v1506_v1, %v1137_v51  ;;  %v2820_v54 = vld [vmem:[%s4214_s0 + $0x464] sm:$0xf]  ;;  %v2604_v62 = vld [vmem:[%s4214_s0 + $0x468] sm:$0xf0] }
 0x229   :  { %v2311_v5 = vor.u32 %v2746_v43, %v2308_v26 }
 0x22a   :  { %v2868_v61 = vpack.c.bf16 %v1939_v42, %v1938_v30  ;;  %v1828_v16 = vmax.f32 %v1756_v13, %v1792_v31  ;;  %v1757_v3 = vmax.f32 %v3445_v48, %v1507_v44  ;;  %v2315_v42 = vor.u32 %v2749_v18, %v2314_v56 }
 0x22c   :  { %2934 = vst [vmem:[%s4216_s3 + $0x28] sm:$0xff] %v2868_v61   ;;  %v1317_v60 = vpop.f32.mrf.mxu2  ;;  %v1868_v52 = vadd.f32 %v3854_v21, %v1828_v16  ;;  %v2607_v61 = vor.u32 %v2820_v54, %v2604_v62 }
 0x22d   :  { %v1686_v28 = vpop.f32.mrf.mxu3 }
 0x22e   :  { %v1687_v10 = vadd.f32 %v1686_v28, %v1317_v60  ;;  %v1140_v15 = vpop.f32.mrf.mxu0  ;;  %v1904_v33 = vmul.f32 0.01, %v1868_v52 }
 0x22f   :  { %v1509_v32 = vpop.f32.mrf.mxu1 }
 0x230   :  { %v1793_v27 = vmax.f32 %v3471_v2, %v1687_v10  ;;  %v1510_v40 = vadd.f32 %v1509_v32, %v1140_v15  ;;  %v1940_v7 = vmax.f32 %v1868_v52, %v1904_v33  ;;  %v2322_v32 = vld [vmem:[%s4214_s0 + $0x230] sm:$0xf]  ;;  %v2751_v52 = vld [vmem:[%s4214_s0 + $0x234] sm:$0xf0]  ;;  %v2324_v33 = vld [vmem:[%s4214_s0 + $0x238] sm:$0xf0] }
 0x231   :  { %1179 = vmatmul.bf16.gmra.mxu0 %v2307_v41  ;;  %1359 = vmatmul.bf16.gmra.mxu2 %v2595_v25 }
 0x232   :  { %v1829_v34 = vmax.f32 %v1757_v3, %v1793_v27  ;;  %1548 = vmatmul.bf16.gmra.mxu1 %v2311_v5  ;;  %1728 = vmatmul.bf16.gmra.mxu3 %v2599_v8  ;;  %v1758_v48 = vmax.f32 %v3473_v14, %v1510_v40  ;;  %v2821_v14 = vld [vmem:[%s4214_s0 + $0x464] sm:$0xf0]  ;;  %v2612_v40 = vld [vmem:[%s4214_s0 + $0x478] sm:$0xf0] }
 0x233   :  { %v2603_v13 = vor.u32 %v2821_v14, %v2602_v59 }
 0x234   :  { %v1869_v37 = vadd.f32 %v3854_v21, %v1829_v34  ;;  %v1320_v46 = vpop.f32.mrf.mxu2  ;;  %v2610_v34 = vld [vmem:[%s4214_s0 + $0x470] sm:$0xf] }
 0x235   :  { %v1689_v49 = vpop.f32.mrf.mxu3 }
 0x236   :  { %v1905_v9 = vmul.f32 0.01, %v1869_v37  ;;  %v1690_v12 = vadd.f32 %v1689_v49, %v1320_v46  ;;  %v1142_v50 = vpop.f32.mrf.mxu0 }
 0x237   :  { %v1511_v0 = vpop.f32.mrf.mxu1 }
 0x238   :  { %v1941_v39 = vmax.f32 %v1869_v37, %v1905_v9  ;;  %v1794_v2 = vmax.f32 %v3475_v19, %v1690_v12  ;;  %v2748_v19 = vld [vmem:[%s4214_s0 + $0x224] sm:$0xf]  ;;  %v1512_v51 = vadd.f32 %v1511_v0, %v1142_v50  ;;  %v2822_v37 = vld [vmem:[%s4214_s0 + $0x474] sm:$0xf]  ;;  %v2323_v12 = vor.u32 %v2751_v52, %v2322_v32  ;;  %v4250_v52 = vld [vmem:[#allocation3_spill] sm:$0xff] }
 0x239   :  { %v2319_v17 = vor.u32 %v2748_v19, %v2316_v35 }
 0x23a   :  { %v2873_v11 = vpack.c.bf16 %v1941_v39, %v1940_v7  ;;  %v1830_v57 = vmax.f32 %v1758_v48, %v1794_v2  ;;  %v1759_v38 = vmax.f32 %v3477_v23, %v1512_v51  ;;  %v2615_v48 = vor.u32 %v2822_v37, %v2612_v40 }
 0x23c   :  { %2935 = vst [vmem:[%s4216_s3 + $0x30] sm:$0xff] %v2873_v11   ;;  %v1322_v1 = vpop.f32.mrf.mxu2  ;;  %v1870_v24 = vadd.f32 %v3854_v21, %v1830_v57 }
 0x23d   :  { %v1691_v30 = vpop.f32.mrf.mxu3 }
 0x23e   :  { %v1692_v31 = vadd.f32 %v1691_v30, %v1322_v1  ;;  %v1145_v4 = vpop.f32.mrf.mxu0  ;;  %v1906_v6 = vmul.f32 0.01, %v1870_v24 }
 0x23f   :  { %v1514_v16 = vpop.f32.mrf.mxu1 }
 0x240   :  { %v1795_v43 = vmax.f32 %v3503_v47, %v1692_v31  ;;  %v1515_v44 = vadd.f32 %v1514_v16, %v1145_v4  ;;  %v1942_v5 = vmax.f32 %v1870_v24, %v1906_v6 }
 0x241   :  { %1184 = vmatmul.bf16.gmra.mxu0 %v2315_v42  ;;  %1364 = vmatmul.bf16.gmra.mxu2 %v2603_v13 }
 0x242   :  { %v1831_v26 = vmax.f32 %v1759_v38, %v1795_v43  ;;  %1553 = vmatmul.bf16.gmra.mxu1 %v2319_v17  ;;  %1733 = vmatmul.bf16.gmra.mxu3 %v2607_v61  ;;  %v1760_v23 = vmax.f32 %v3505_v55, %v1515_v44  ;;  %v2823_v55 = vld [vmem:[%s4214_s0 + $0x474] sm:$0xf0] }
 0x243   :  { %v2611_v50 = vor.u32 %v2823_v55, %v2610_v34 }
 0x244   :  { %v1871_v22 = vadd.f32 %v3854_v21, %v1831_v26  ;;  %v1325_v60 = vpop.f32.mrf.mxu2 }
 0x245   :  { %v1694_v28 = vpop.f32.mrf.mxu3 }
 0x246   :  { %v1907_v41 = vmul.f32 0.01, %v1871_v22  ;;  %v1695_v25 = vadd.f32 %v1694_v28, %v1325_v60  ;;  %v1147_v10 = vpop.f32.mrf.mxu0 }
 0x247   :  { %v1516_v15 = vpop.f32.mrf.mxu1 }
 0x248   :  { %v1943_v8 = vmax.f32 %v1871_v22, %v1907_v41  ;;  %v1796_v47 = vmax.f32 %v3507_v58, %v1695_v25  ;;  %v2750_v58 = vld [vmem:[%s4214_s0 + $0x234] sm:$0xf]  ;;  %v1517_v46 = vadd.f32 %v1516_v15, %v1147_v10 }
 0x249   :  { %v2327_v39 = vor.u32 %v2750_v58, %v2324_v33 }
 0x24a   :  { %v2878_v3 = vpack.c.bf16 %v1943_v8, %v1942_v5  ;;  %v1832_v27 = vmax.f32 %v1760_v23, %v1796_v47  ;;  %v1761_v18 = vmax.f32 %v3509_v63, %v1517_v46  ;;  %v4249_v47 = vld [vmem:[#allocation2_spill] sm:$0xff]  ;;  %v4251_v46 = vld [vmem:[#allocation4_spill] sm:$0xff] }
 0x24c   :  { %2936 = vst [vmem:[%s4216_s3 + $0x38] sm:$0xff] %v2878_v3   ;;  %v1327_v49 = vpop.f32.mrf.mxu2  ;;  %v1872_v56 = vadd.f32 %v3854_v21, %v1832_v27 }
 0x24d   :  { %v1696_v9 = vpop.f32.mrf.mxu3 }
 0x24e   :  { %v1697_v0 = vadd.f32 %v1696_v9, %v1327_v49  ;;  %v1150_v7 = vpop.f32.mrf.mxu0  ;;  %v1908_v59 = vmul.f32 0.01, %v1872_v56  ;;  %v4252_v9 = vld [vmem:[#allocation5_spill] sm:$0xff] }
 0x24f   :  { %v1519_v2 = vpop.f32.mrf.mxu1 }
 0x250   :  { %v1797_v11 = vmax.f32 %v3535_v29, %v1697_v0  ;;  %v1520_v19 = vadd.f32 %v1519_v2, %v1150_v7  ;;  %v1944_v42 = vmax.f32 %v1872_v56, %v1908_v59 }
 0x251   :  { %1189 = vmatmul.bf16.gmra.mxu0 %v2323_v12  ;;  %1369 = vmatmul.bf16.gmra.mxu2 %v2611_v50 }
 0x252   :  { %v1833_v57 = vmax.f32 %v1761_v18, %v1797_v11  ;;  %1558 = vmatmul.bf16.gmra.mxu1 %v2327_v39  ;;  %1738 = vmatmul.bf16.gmra.mxu3 %v2615_v48  ;;  %v1762_v63 = vmax.f32 %v3537_v36, %v1520_v19  ;;  %v4253_v19 = vld [vmem:[#allocation6_spill] sm:$0xff] }
 0x254   :  { %v1873_v14 = vadd.f32 %v3854_v21, %v1833_v57  ;;  %v1330_v35 = vpop.f32.mrf.mxu2 }
 0x255   :  { %v1699_v54 = vpop.f32.mrf.mxu3 }
 0x256   :  { %v1909_v62 = vmul.f32 0.01, %v1873_v14  ;;  %v1700_v51 = vadd.f32 %v1699_v54, %v1330_v35  ;;  %v1152_v1 = vpop.f32.mrf.mxu0  ;;  %v4254_v54 = vld [vmem:[#allocation7_spill] sm:$0xff] }
 0x257   :  { %v1521_v30 = vpop.f32.mrf.mxu1 }
 0x258   :  { %v1945_v13 = vmax.f32 %v1873_v14, %v1909_v62  ;;  %v1798_v29 = vmax.f32 %v3539_v45, %v1700_v51  ;;  %v1522_v17 = vadd.f32 %v1521_v30, %v1152_v1 }
 0x25a   :  { %v2883_v31 = vpack.c.bf16 %v1945_v13, %v1944_v42  ;;  %v1834_v4 = vmax.f32 %v1762_v63, %v1798_v29  ;;  %v1763_v6 = vmax.f32 %v3541_v53, %v1522_v17  ;;  %v4255_v17 = vld [vmem:[#allocation8_spill] sm:$0xff] }
 0x25c   :  { %2937 = vst [vmem:[%s4216_s3 + $0x40] sm:$0xff] %v2883_v31   ;;  %v1332_v61 = vpop.f32.mrf.mxu2  ;;  %v1874_v26 = vadd.f32 %v3854_v21, %v1834_v4 }
 0x25d   :  { %v1701_v16 = vpop.f32.mrf.mxu3 }
 0x25e   :  { %v1702_v24 = vadd.f32 %v1701_v16, %v1332_v61  ;;  %v1155_v38 = vpop.f32.mrf.mxu0  ;;  %v1910_v45 = vmul.f32 0.01, %v1874_v26  ;;  %v4256_v16 = vld [vmem:[#allocation9_spill] sm:$0xff] }
 0x25f   :  { %v1524_v43 = vpop.f32.mrf.mxu1 }
 0x260   :  { %v1799_v36 = vmax.f32 %v3567_v20, %v1702_v24  ;;  %v1525_v60 = vadd.f32 %v1524_v43, %v1155_v38  ;;  %v1946_v8 = vmax.f32 %v1874_v26, %v1910_v45 }
 0x262   :  { %v1835_v22 = vmax.f32 %v1763_v6, %v1799_v36  ;;  %v1764_v32 = vmax.f32 %v4249_v47, %v1525_v60 }
 0x264   :  { %v1875_v44 = vadd.f32 %v3854_v21, %v1835_v22  ;;  %v1335_v28 = vpop.f32.mrf.mxu2 }
 0x265   :  { %v1704_v41 = vpop.f32.mrf.mxu3 }
 0x266   :  { %v1911_v25 = vmul.f32 0.01, %v1875_v44  ;;  %v1705_v10 = vadd.f32 %v1704_v41, %v1335_v28  ;;  %v1157_v15 = vpop.f32.mrf.mxu0 }
 0x267   :  { %v1526_v5 = vpop.f32.mrf.mxu1 }
 0x268   :  { %v1947_v23 = vmax.f32 %v1875_v44, %v1911_v25  ;;  %v1800_v3 = vmax.f32 %v4250_v52, %v1705_v10  ;;  %v1527_v20 = vadd.f32 %v1526_v5, %v1157_v15  ;;  %v4257_v10 = vld [vmem:[#allocation10_spill] sm:$0xff]  ;;  %v4258_v5 = vld [vmem:[#allocation11_spill] sm:$0xff] }
 0x26a   :  { %v2888_v53 = vpack.c.bf16 %v1947_v23, %v1946_v8  ;;  %v1836_v27 = vmax.f32 %v1764_v32, %v1800_v3  ;;  %v1765_v49 = vmax.f32 %v4251_v46, %v1527_v20 }
 0x26c   :  { %2938 = vst [vmem:[%s4216_s3 + $0x48] sm:$0xff] %v2888_v53   ;;  %v1337_v34 = vpop.f32.mrf.mxu2  ;;  %v1876_v40 = vadd.f32 %v3854_v21, %v1836_v27 }
 0x26d   :  { %v1706_v55 = vpop.f32.mrf.mxu3 }
 0x26e   :  { %v1707_v58 = vadd.f32 %v1706_v55, %v1337_v34  ;;  %v1160_v33 = vpop.f32.mrf.mxu0  ;;  %v1912_v0 = vmul.f32 0.01, %v1876_v40  ;;  %v4259_v55 = vld [vmem:[#allocation12_spill] sm:$0xff] }
 0x26f   :  { %v1529_v37 = vpop.f32.mrf.mxu1 }
 0x270   :  { %v1801_v12 = vmax.f32 %v4252_v9, %v1707_v58  ;;  %v1530_v39 = vadd.f32 %v1529_v37, %v1160_v33  ;;  %v1948_v59 = vmax.f32 %v1876_v40, %v1912_v0  ;;  %v4260_v33 = vld [vmem:[#allocation13_spill] sm:$0xff] }
 0x272   :  { %v1837_v50 = vmax.f32 %v1765_v49, %v1801_v12  ;;  %v1766_v35 = vmax.f32 %v4253_v19, %v1530_v39 }
 0x274   :  { %v1877_v7 = vadd.f32 %v3854_v21, %v1837_v50  ;;  %v1340_v48 = vpop.f32.mrf.mxu2 }
 0x275   :  { %v1709_v2 = vpop.f32.mrf.mxu3 }
 0x276   :  { %v1913_v56 = vmul.f32 0.01, %v1877_v7  ;;  %v1710_v18 = vadd.f32 %v1709_v2, %v1340_v48  ;;  %v1162_v11 = vpop.f32.mrf.mxu0 }
 0x277   :  { %v1531_v57 = vpop.f32.mrf.mxu1 }
 0x278   :  { %v1949_v14 = vmax.f32 %v1877_v7, %v1913_v56  ;;  %v1802_v62 = vmax.f32 %v4254_v54, %v1710_v18  ;;  %v1532_v30 = vadd.f32 %v1531_v57, %v1162_v11  ;;  %v4261_v18 = vld [vmem:[#allocation14_spill] sm:$0xff]  ;;  %v4262_v57 = vld [vmem:[#allocation15_spill] sm:$0xff] }
 0x27a   :  { %v2893_v51 = vpack.c.bf16 %v1949_v14, %v1948_v59  ;;  %v1838_v1 = vmax.f32 %v1766_v35, %v1802_v62  ;;  %v1767_v61 = vmax.f32 %v4255_v17, %v1532_v30 }
 0x27c   :  { %2939 = vst [vmem:[%s4216_s3 + $0x50] sm:$0xff] %v2893_v51   ;;  %v1342_v42 = vpop.f32.mrf.mxu2  ;;  %v1878_v4 = vadd.f32 %v3854_v21, %v1838_v1 }
 0x27d   :  { %v1711_v13 = vpop.f32.mrf.mxu3 }
 0x27e   :  { %v1712_v63 = vadd.f32 %v1711_v13, %v1342_v42  ;;  %v1165_v29 = vpop.f32.mrf.mxu0  ;;  %v1914_v43 = vmul.f32 0.01, %v1878_v4  ;;  %v4263_v13 = vld [vmem:[#allocation16_spill] sm:$0xff] }
 0x27f   :  { %v1534_v31 = vpop.f32.mrf.mxu1 }
 0x280   :  { %v1803_v24 = vmax.f32 %v4256_v16, %v1712_v63  ;;  %v1535_v6 = vadd.f32 %v1534_v31, %v1165_v29  ;;  %v1950_v41 = vmax.f32 %v1878_v4, %v1914_v43  ;;  %v4264_v29 = vld [vmem:[#allocation17_spill] sm:$0xff] }
 0x282   :  { %v1839_v38 = vmax.f32 %v1767_v61, %v1803_v24  ;;  %v1768_v15 = vmax.f32 %v4257_v10, %v1535_v6 }
 0x284   :  { %v1879_v26 = vadd.f32 %v3854_v21, %v1839_v38  ;;  %v1345_v36 = vpop.f32.mrf.mxu2 }
 0x285   :  { %v1714_v22 = vpop.f32.mrf.mxu3 }
 0x286   :  { %v1915_v45 = vmul.f32 0.01, %v1879_v26  ;;  %v1715_v44 = vadd.f32 %v1714_v22, %v1345_v36  ;;  %v1167_v60 = vpop.f32.mrf.mxu0 }
 0x287   :  { %v1536_v28 = vpop.f32.mrf.mxu1 }
 0x288   :  { %v1951_v25 = vmax.f32 %v1879_v26, %v1915_v45  ;;  %v1804_v8 = vmax.f32 %v4258_v5, %v1715_v44  ;;  %v1537_v32 = vadd.f32 %v1536_v28, %v1167_v60  ;;  %v4265_v44 = vld [vmem:[#allocation18_spill] sm:$0xff]  ;;  %v4266_v28 = vld [vmem:[#allocation19_spill] sm:$0xff] }
 0x28a   :  { %v2898_v23 = vpack.c.bf16 %v1951_v25, %v1950_v41  ;;  %v1840_v47 = vmax.f32 %v1768_v15, %v1804_v8  ;;  %v1769_v58 = vmax.f32 %v4259_v55, %v1537_v32 }
 0x28c   :  { %2940 = vst [vmem:[%s4216_s3 + $0x58] sm:$0xff] %v2898_v23   ;;  %v1347_v52 = vpop.f32.mrf.mxu2  ;;  %v1880_v34 = vadd.f32 %v3854_v21, %v1840_v47 }
 0x28d   :  { %v1716_v3 = vpop.f32.mrf.mxu3 }
 0x28e   :  { %v1717_v53 = vadd.f32 %v1716_v3, %v1347_v52  ;;  %v1170_v27 = vpop.f32.mrf.mxu0  ;;  %v1916_v46 = vmul.f32 0.01, %v1880_v34  ;;  %v4267_v3 = vld [vmem:[#allocation20_spill] sm:$0xff] }
 0x28f   :  { %v1539_v20 = vpop.f32.mrf.mxu1 }
 0x290   :  { %v1805_v37 = vmax.f32 %v4260_v33, %v1717_v53  ;;  %v1540_v9 = vadd.f32 %v1539_v20, %v1170_v27  ;;  %v1952_v2 = vmax.f32 %v1880_v34, %v1916_v46  ;;  %v4268_v27 = vld [vmem:[#allocation21_spill] sm:$0xff] }
 0x292   :  { %v1841_v40 = vmax.f32 %v1769_v58, %v1805_v37  ;;  %v1770_v11 = vmax.f32 %v4261_v18, %v1540_v9  ;;  %v4180_v58 = vld [vmem:[%s4215_s2] ss:$0 sm:$0xff] }
 0x294   :  { %v1881_v49 = vadd.f32 %v3854_v21, %v1841_v40  ;;  %v1350_v12 = vpop.f32.mrf.mxu2 }
 0x295   :  { %v1719_v50 = vpop.f32.mrf.mxu3 }
 0x296   :  { %v1917_v0 = vmul.f32 0.01, %v1881_v49  ;;  %v1720_v7 = vadd.f32 %v1719_v50, %v1350_v12  ;;  %v1172_v39 = vpop.f32.mrf.mxu0 }
 0x297   :  { %v1541_v48 = vpop.f32.mrf.mxu1 }
 0x298   :  { %v1953_v56 = vmax.f32 %v1881_v49, %v1917_v0  ;;  %v1806_v59 = vmax.f32 %v4262_v57, %v1720_v7  ;;  %v1542_v35 = vadd.f32 %v1541_v48, %v1172_v39  ;;  %v4269_v7 = vld [vmem:[#allocation22_spill] sm:$0xff]  ;;  %v4270_v48 = vld [vmem:[#allocation23_spill] sm:$0xff] }
 0x29a   :  { %v2903_v14 = vpack.c.bf16 %v1953_v56, %v1952_v2  ;;  %v1842_v19 = vmax.f32 %v1770_v11, %v1806_v59  ;;  %v1771_v63 = vmax.f32 %v4263_v13, %v1542_v35 }
 0x29c   :  { %2941 = vst [vmem:[%s4216_s3 + $0x60] sm:$0xff] %v2903_v14   ;;  %v1352_v54 = vpop.f32.mrf.mxu2  ;;  %v1882_v42 = vadd.f32 %v3854_v21, %v1842_v19 }
 0x29d   :  { %v1721_v62 = vpop.f32.mrf.mxu3 }
 0x29e   :  { %v1722_v51 = vadd.f32 %v1721_v62, %v1352_v54  ;;  %v1175_v1 = vpop.f32.mrf.mxu0  ;;  %v1918_v17 = vmul.f32 0.01, %v1882_v42  ;;  %v4271_v62 = vld [vmem:[#allocation24_spill] sm:$0xff] }
 0x29f   :  { %v1544_v30 = vpop.f32.mrf.mxu1 }
 0x2a0   :  { %v1807_v31 = vmax.f32 %v4264_v29, %v1722_v51  ;;  %v1545_v16 = vadd.f32 %v1544_v30, %v1175_v1  ;;  %v1954_v22 = vmax.f32 %v1882_v42, %v1918_v17  ;;  %v4272_v1 = vld [vmem:[#allocation25_spill] sm:$0xff] }
 0x2a2   :  { %v1843_v4 = vmax.f32 %v1771_v63, %v1807_v31  ;;  %v1772_v60 = vmax.f32 %v4265_v44, %v1545_v16 }
 0x2a4   :  { %v1883_v61 = vadd.f32 %v3854_v21, %v1843_v4  ;;  %v1355_v24 = vpop.f32.mrf.mxu2 }
 0x2a5   :  { %v1724_v38 = vpop.f32.mrf.mxu3 }
 0x2a6   :  { %v1919_v43 = vmul.f32 0.01, %v1883_v61  ;;  %v1725_v26 = vadd.f32 %v1724_v38, %v1355_v24  ;;  %v1177_v6 = vpop.f32.mrf.mxu0 }
 0x2a7   :  { %v1546_v36 = vpop.f32.mrf.mxu1 }
 0x2a8   :  { %v1955_v45 = vmax.f32 %v1883_v61, %v1919_v43  ;;  %v1808_v41 = vmax.f32 %v4266_v28, %v1725_v26  ;;  %v1547_v15 = vadd.f32 %v1546_v36, %v1177_v6  ;;  %v4273_v26 = vld [vmem:[#allocation26_spill] sm:$0xff]  ;;  %v4274_v36 = vld [vmem:[#allocation27_spill] sm:$0xff] }
 0x2aa   :  { %v2908_v25 = vpack.c.bf16 %v1955_v45, %v1954_v22  ;;  %v1844_v10 = vmax.f32 %v1772_v60, %v1808_v41  ;;  %v1773_v53 = vmax.f32 %v4267_v3, %v1547_v15 }
 0x2ac   :  { %2942 = vst [vmem:[%s4216_s3 + $0x68] sm:$0xff] %v2908_v25   ;;  %v1357_v5 = vpop.f32.mrf.mxu2  ;;  %v1884_v52 = vadd.f32 %v3854_v21, %v1844_v10 }
 0x2ad   :  { %v1726_v8 = vpop.f32.mrf.mxu3 }
 0x2ae   :  { %v1727_v23 = vadd.f32 %v1726_v8, %v1357_v5  ;;  %v1180_v47 = vpop.f32.mrf.mxu0  ;;  %v1920_v55 = vmul.f32 0.01, %v1884_v52  ;;  %v4275_v8 = vld [vmem:[#allocation28_spill] sm:$0xff] }
 0x2af   :  { %v1549_v32 = vpop.f32.mrf.mxu1 }
 0x2b0   :  { %v1809_v20 = vmax.f32 %v4268_v27, %v1727_v23  ;;  %v1550_v37 = vadd.f32 %v1549_v32, %v1180_v47  ;;  %v1956_v50 = vmax.f32 %v1884_v52, %v1920_v55  ;;  %v4276_v47 = vld [vmem:[#allocation29_spill] sm:$0xff] }
 0x2b2   :  { %v1845_v34 = vmax.f32 %v1773_v53, %v1809_v20  ;;  %v1774_v39 = vmax.f32 %v4269_v7, %v1550_v37 }
 0x2b4   :  { %v1885_v33 = vadd.f32 %v4180_v58, %v1845_v34  ;;  %v1360_v40 = vpop.f32.mrf.mxu2 }
 0x2b5   :  { %v1729_v46 = vpop.f32.mrf.mxu3 }
 0x2b6   :  { %v1921_v49 = vmul.f32 0.01, %v1885_v33  ;;  %v1730_v9 = vadd.f32 %v1729_v46, %v1360_v40  ;;  %v1182_v12 = vpop.f32.mrf.mxu0  ;;  %v4277_v46 = vld [vmem:[#allocation30_spill] sm:$0xff] }
 0x2b7   :  { %v1551_v21 = vpop.f32.mrf.mxu1 }
 0x2b8   :  { %v1957_v0 = vmax.f32 %v1885_v33, %v1921_v49  ;;  %v1810_v2 = vmax.f32 %v4270_v48, %v1730_v9  ;;  %v1552_v11 = vadd.f32 %v1551_v21, %v1182_v12  ;;  %v4278_v9 = vld [vmem:[#allocation31_spill] sm:$0xff] }
 0x2ba   :  { %v2913_v56 = vpack.c.bf16 %v1957_v0, %v1956_v50  ;;  %v1846_v18 = vmax.f32 %v1774_v39, %v1810_v2  ;;  %v1775_v51 = vmax.f32 %v4271_v62, %v1552_v11  ;;  %v4279_v11 = vld [vmem:[#allocation32_spill] sm:$0xff] }
 0x2bc   :  { %2943 = vst [vmem:[%s4216_s3 + $0x70] sm:$0xff] %v2913_v56   ;;  %v1362_v57 = vpop.f32.mrf.mxu2  ;;  %v1886_v54 = vadd.f32 %v4180_v58, %v1846_v18 }
 0x2bd   :  { %v1731_v59 = vpop.f32.mrf.mxu3 }
 0x2be   :  { %v1732_v14 = vadd.f32 %v1731_v59, %v1362_v57  ;;  %v1185_v19 = vpop.f32.mrf.mxu0  ;;  %v1922_v13 = vmul.f32 0.01, %v1886_v54  ;;  %v4280_v59 = vld [vmem:[#allocation33_spill] sm:$0xff] }
 0x2bf   :  { %v1554_v35 = vpop.f32.mrf.mxu1 }
 0x2c0   :  { %v1811_v30 = vmax.f32 %v4272_v1, %v1732_v14  ;;  %v1555_v29 = vadd.f32 %v1554_v35, %v1185_v19  ;;  %v1958_v38 = vmax.f32 %v1886_v54, %v1922_v13 }
 0x2c2   :  { %v1847_v42 = vmax.f32 %v1775_v51, %v1811_v30  ;;  %v1776_v6 = vmax.f32 %v4273_v26, %v1555_v29 }
 0x2c4   :  { %v1887_v63 = vadd.f32 %v4180_v58, %v1847_v42  ;;  %v1365_v31 = vpop.f32.mrf.mxu2 }
 0x2c5   :  { %v1734_v4 = vpop.f32.mrf.mxu3 }
 0x2c6   :  { %v1923_v17 = vmul.f32 0.01, %v1887_v63  ;;  %v1735_v61 = vadd.f32 %v1734_v4, %v1365_v31  ;;  %v1187_v16 = vpop.f32.mrf.mxu0 }
 0x2c7   :  { %v1556_v24 = vpop.f32.mrf.mxu1 }
 0x2c8   :  { %v1959_v43 = vmax.f32 %v1887_v63, %v1923_v17  ;;  %v1812_v22 = vmax.f32 %v4274_v36, %v1735_v61  ;;  %v1557_v60 = vadd.f32 %v1556_v24, %v1187_v16 }
 0x2ca   :  { %v2918_v45 = vpack.c.bf16 %v1959_v43, %v1958_v38  ;;  %v1848_v44 = vmax.f32 %v1776_v6, %v1812_v22  ;;  %v1777_v23 = vmax.f32 %v4275_v8, %v1557_v60 }
 0x2cc   :  { %2944 = vst [vmem:[%s4216_s3 + $0x78] sm:$0xff] %v2918_v45   ;;  %v1367_v28 = vpop.f32.mrf.mxu2  ;;  %v1888_v5 = vadd.f32 %v4180_v58, %v1848_v44 }
 0x2cd   :  { %v1736_v41 = vpop.f32.mrf.mxu3 }
 0x2ce   :  { %v1737_v25 = vadd.f32 %v1736_v41, %v1367_v28  ;;  %v1190_v10 = vpop.f32.mrf.mxu0  ;;  %v1924_v3 = vmul.f32 0.01, %v1888_v5 }
 0x2cf   :  { %v1559_v15 = vpop.f32.mrf.mxu1 }
 0x2d0   :  { %v1813_v32 = vmax.f32 %v4276_v47, %v1737_v25  ;;  %v1560_v27 = vadd.f32 %v1559_v15, %v1190_v10  ;;  %v1960_v37 = vmax.f32 %v1888_v5, %v1924_v3 }
 0x2d2   :  { %v1849_v52 = vmax.f32 %v1777_v23, %v1813_v32  ;;  %v1778_v49 = vmax.f32 %v4277_v46, %v1560_v27 }
 0x2d4   :  { %v1889_v53 = vadd.f32 %v4180_v58, %v1849_v52  ;;  %v1370_v20 = vpop.f32.mrf.mxu2 }
 0x2d5   :  { %v1739_v34 = vpop.f32.mrf.mxu3 }
 0x2d6   :  { %v1925_v55 = vmul.f32 0.01, %v1889_v53  ;;  %v1740_v33 = vadd.f32 %v1739_v34, %v1370_v20  ;;  %v1192_v21 = vpop.f32.mrf.mxu0 }
 0x2d7   :  { %v1561_v50 = vpop.f32.mrf.mxu1 }
 0x2d8   :  { %v1961_v40 = vmax.f32 %v1889_v53, %v1925_v55  ;;  %v1814_v12 = vmax.f32 %v4278_v9, %v1740_v33  ;;  %v1562_v39 = vadd.f32 %v1561_v50, %v1192_v21 }
 0x2da   :  { %v2923_v0 = vpack.c.bf16 %v1961_v40, %v1960_v37  ;;  %v1850_v7 = vmax.f32 %v1778_v49, %v1814_v12  ;;  %v1779_v57 = vmax.f32 %v4279_v11, %v1562_v39 }
 0x2dc   :  { %2945 = vst [vmem:[%s4216_s3 + $0x80] sm:$0xff] %v2923_v0   ;;  %v1372_v48 = vpop.f32.mrf.mxu2  ;;  %v1890_v18 = vadd.f32 %v4180_v58, %v1850_v7 }
 0x2dd   :  { %v1741_v2 = vpop.f32.mrf.mxu3 }
 0x2de   :  { %v1742_v56 = vadd.f32 %v1741_v2, %v1372_v48  ;;  %v1926_v35 = vmul.f32 0.01, %v1890_v18 }
 0x2e0   :  { %v1815_v14 = vmax.f32 %v4280_v59, %v1742_v56  ;;  %v1962_v51 = vmax.f32 %v1890_v18, %v1926_v35 }
 0x2e2   :  { %v1851_v19 = vmax.f32 %v1779_v57, %v1815_v14 }
 0x2e4   :  { %v1891_v54 = vadd.f32 %v4180_v58, %v1851_v19 }
 0x2e6   :  { %v1927_v62 = vmul.f32 0.01, %v1891_v54 }
 0x2e8   :  { %v1963_v1 = vmax.f32 %v1891_v54, %v1927_v62 }
 0x2ea   :  { %v2928_v30 = vpack.c.bf16 %v1963_v1, %v1962_v51 }
 0x2ec   :  { %2946 = vst [vmem:[%s4216_s3 + $0x88] sm:$0xff] %v2928_v30  }

// kernel: celeb_net_forward.5
= control target key start
LH: loop header
LB: loop body
LE: loop exit
PB: predicated region body
PF: predicated region fallthrough
CT: control target
= control target key end

     0   :  { %s6664_s1 = inlined_call_operand.vmem [shape: bf16[512,128], index: 1, kind: input, shape index: {}]   ;;  %s6665_s0 = inlined_call_operand.vmem [shape: bf16[4,128,512], index: 0, kind: input, shape index: {}]   ;;  %s6666_s3 = inlined_call_operand.vmem [shape: bf16[16,128,128], index: 3, kind: input, shape index: {}]   ;;  %s6667_s2 = inlined_call_operand.vmem [shape: f32[1,128], index: 2, kind: input, shape index: {}]   ;;  %s6668_s4 = inlined_call_operand.vmem [shape: f32[1,128], index: 4, kind: input, shape index: {}]   ;;  %s6669_s6 = inlined_call_operand.vmem [shape: f32[1,128], index: 6, kind: input, shape index: {}]   ;;  %s6670_s5 = inlined_call_operand.vmem [shape: bf16[128,128], index: 5, kind: input, shape index: {}]   ;;  %s6671_s7 = inlined_call_operand.vmem [shape: bf16[128,128], index: 7, kind: input, shape index: {}]   ;;  %s6672_s8 = inlined_call_operand.vmem [shape: f32[1,128], index: 8, kind: input, shape index: {}]   ;;  %s6673_s9 = inlined_call_operand.vmem [shape: f32[8,128], index: 9, kind: output, shape index: {}]  }
   0x1   :  { %v4882_v0 = vld [vmem:[%s6664_s1 + $0x38] sm:$0xff]  ;;  %v4881_v4 = vld [vmem:[%s6664_s1 + $0x30] sm:$0xff]  ;;  %v4880_v8 = vld [vmem:[%s6664_s1 + $0x28] sm:$0xff] }
   0x2   :  { %v4890_v1 = vld [vmem:[%s6664_s1 + $0x78] sm:$0xff]  ;;  %1056 = vmatpush.bf16.msra.mxu0 %v4882_v0  ;;  %v4889_v5 = vld [vmem:[%s6664_s1 + $0x70] sm:$0xff]  ;;  %v4888_v9 = vld [vmem:[%s6664_s1 + $0x68] sm:$0xff] }
   0x3   :  { %v4898_v2 = vld [vmem:[%s6664_s1 + $0xb8] sm:$0xff]  ;;  %1225 = vmatpush.bf16.msra.mxu1 %v4890_v1  ;;  %v4897_v6 = vld [vmem:[%s6664_s1 + $0xb0] sm:$0xff]  ;;  %v4896_v10 = vld [vmem:[%s6664_s1 + $0xa8] sm:$0xff] }
   0x4   :  { %v4906_v3 = vld [vmem:[%s6664_s1 + $0xf8] sm:$0xff]  ;;  %1394 = vmatpush.bf16.msra.mxu2 %v4898_v2  ;;  %v4905_v7 = vld [vmem:[%s6664_s1 + $0xf0] sm:$0xff]  ;;  %v4904_v11 = vld [vmem:[%s6664_s1 + $0xe8] sm:$0xff] }
   0x5   :  { %1563 = vmatpush.bf16.msra.mxu3 %v4906_v3  ;;  %v4879_v12 = vld [vmem:[%s6664_s1 + $0x20] sm:$0xff]  ;;  %v4878_v16 = vld [vmem:[%s6664_s1 + $0x18] sm:$0xff]  ;;  %v4877_v20 = vld [vmem:[%s6664_s1 + $0x10] sm:$0xff] }
   0x6   :  { %1057 = vmatpush.bf16.msra.mxu0 %v4881_v4  ;;  %v4887_v13 = vld [vmem:[%s6664_s1 + $0x60] sm:$0xff]  ;;  %v4886_v17 = vld [vmem:[%s6664_s1 + $0x58] sm:$0xff]  ;;  %v4885_v21 = vld [vmem:[%s6664_s1 + $0x50] sm:$0xff] }
   0x7   :  { %1226 = vmatpush.bf16.msra.mxu1 %v4889_v5  ;;  %v4895_v14 = vld [vmem:[%s6664_s1 + $0xa0] sm:$0xff]  ;;  %v4894_v18 = vld [vmem:[%s6664_s1 + $0x98] sm:$0xff]  ;;  %v4893_v22 = vld [vmem:[%s6664_s1 + $0x90] sm:$0xff] }
   0x8   :  { %1395 = vmatpush.bf16.msra.mxu2 %v4897_v6  ;;  %v4903_v15 = vld [vmem:[%s6664_s1 + $0xe0] sm:$0xff]  ;;  %v4902_v19 = vld [vmem:[%s6664_s1 + $0xd8] sm:$0xff]  ;;  %v4901_v23 = vld [vmem:[%s6664_s1 + $0xd0] sm:$0xff] }
   0x9   :  { %1564 = vmatpush.bf16.msra.mxu3 %v4905_v7  ;;  %v4876_v24 = vld [vmem:[%s6664_s1 + $0x8] sm:$0xff]  ;;  %v4875_v28 = vld [vmem:[%s6664_s1] sm:$0xff]  ;;  %v4749_v33 = vld [vmem:[%s6665_s0 + $0xc] sm:$0xf0] }
   0xa   :  { %1058 = vmatpush.bf16.msra.mxu0 %v4880_v8  ;;  %v4884_v25 = vld [vmem:[%s6664_s1 + $0x48] sm:$0xff]  ;;  %v4883_v29 = vld [vmem:[%s6664_s1 + $0x40] sm:$0xff]  ;;  %v3295_v35 = vld [vmem:[%s6665_s0 + $0x10] sm:$0xf0] }
   0xb   :  { %1227 = vmatpush.bf16.msra.mxu1 %v4888_v9  ;;  %v4892_v26 = vld [vmem:[%s6664_s1 + $0x88] sm:$0xff]  ;;  %v4891_v30 = vld [vmem:[%s6664_s1 + $0x80] sm:$0xff]  ;;  %v4750_v37 = vld [vmem:[%s6665_s0 + $0x14] sm:$0xf0] }
   0xc   :  { %1396 = vmatpush.bf16.msra.mxu2 %v4896_v10  ;;  %v4900_v27 = vld [vmem:[%s6664_s1 + $0xc8] sm:$0xff]  ;;  %v4899_v31 = vld [vmem:[%s6664_s1 + $0xc0] sm:$0xff]  ;;  %v3303_v39 = vld [vmem:[%s6665_s0 + $0x18] sm:$0xf0] }
   0xd   :  { %1565 = vmatpush.bf16.msra.mxu3 %v4904_v11  ;;  %v3293_v32 = vld [vmem:[%s6665_s0] sm:$0xf]  ;;  %v4747_v34 = vld [vmem:[%s6665_s0 + $0x4] sm:$0xf]  ;;  %v3301_v36 = vld [vmem:[%s6665_s0 + $0x8] sm:$0xf] }
   0xe   :  { %1059 = vmatpush.bf16.msra.mxu0 %v4879_v12  ;;  %v4748_v38 = vld [vmem:[%s6665_s0 + $0xc] sm:$0xf]  ;;  %v3294_v40 = vor.u32 %v4749_v33, %v3293_v32  ;;  %v3298_v41 = vor.u32 %v4747_v34, %v3295_v35  ;;  %v3302_v42 = vor.u32 %v4750_v37, %v3301_v36  ;;  %v3309_v44 = vld [vmem:[%s6665_s0 + $0x20] sm:$0xf]  ;;  %v4753_v45 = vld [vmem:[%s6665_s0 + $0x2c] sm:$0xf0] }
   0xf   :  { %1228 = vmatpush.bf16.msra.mxu1 %v4887_v13  ;;  %v3306_v43 = vor.u32 %v4748_v38, %v3303_v39  ;;  %v4751_v46 = vld [vmem:[%s6665_s0 + $0x24] sm:$0xf]  ;;  %v3311_v47 = vld [vmem:[%s6665_s0 + $0x30] sm:$0xf0]  ;;  %v3317_v48 = vld [vmem:[%s6665_s0 + $0x28] sm:$0xf]  ;;  %v3310_v52 = vor.u32 %v4753_v45, %v3309_v44 }
  0x10   :  { %1397 = vmatpush.bf16.msra.mxu2 %v4895_v14  ;;  %v4754_v49 = vld [vmem:[%s6665_s0 + $0x34] sm:$0xf0]  ;;  %v4752_v50 = vld [vmem:[%s6665_s0 + $0x2c] sm:$0xf]  ;;  %v3319_v51 = vld [vmem:[%s6665_s0 + $0x38] sm:$0xf0]  ;;  %v3314_v53 = vor.u32 %v4751_v46, %v3311_v47 }
  0x11   :  { %1566 = vmatpush.bf16.msra.mxu3 %v4903_v15  ;;  %v3318_v54 = vor.u32 %v4754_v49, %v3317_v48  ;;  %v3322_v55 = vor.u32 %v4752_v50, %v3319_v51  ;;  %v3325_v56 = vld [vmem:[%s6665_s0 + $0x40] sm:$0xf]  ;;  %v4757_v57 = vld [vmem:[%s6665_s0 + $0x4c] sm:$0xf0]  ;;  %v4755_v58 = vld [vmem:[%s6665_s0 + $0x44] sm:$0xf] }
  0x12   :  { %1060 = vmatpush.bf16.msra.mxu0 %v4878_v16  ;;  %v3327_v59 = vld [vmem:[%s6665_s0 + $0x50] sm:$0xf0]  ;;  %v3333_v60 = vld [vmem:[%s6665_s0 + $0x48] sm:$0xf]  ;;  %v4758_v61 = vld [vmem:[%s6665_s0 + $0x54] sm:$0xf0]  ;;  %v3326_v0 = vor.u32 %v4757_v57, %v3325_v56 }
  0x13   :  { %1229 = vmatpush.bf16.msra.mxu1 %v4886_v17  ;;  %v4756_v62 = vld [vmem:[%s6665_s0 + $0x4c] sm:$0xf]  ;;  %v3335_v63 = vld [vmem:[%s6665_s0 + $0x58] sm:$0xf0]  ;;  %v3330_v1 = vor.u32 %v4755_v58, %v3327_v59  ;;  %v3334_v2 = vor.u32 %v4758_v61, %v3333_v60  ;;  %v3341_v4 = vld [vmem:[%s6665_s0 + $0x60] sm:$0xf] }
  0x14   :  { %1398 = vmatpush.bf16.msra.mxu2 %v4894_v18  ;;  %v3338_v3 = vor.u32 %v4756_v62, %v3335_v63  ;;  %v4761_v5 = vld [vmem:[%s6665_s0 + $0x6c] sm:$0xf0]  ;;  %v4759_v6 = vld [vmem:[%s6665_s0 + $0x64] sm:$0xf]  ;;  %v3343_v7 = vld [vmem:[%s6665_s0 + $0x70] sm:$0xf0] }
  0x15   :  { %1567 = vmatpush.bf16.msra.mxu3 %v4902_v19  ;;  %v3349_v8 = vld [vmem:[%s6665_s0 + $0x68] sm:$0xf]  ;;  %v4762_v9 = vld [vmem:[%s6665_s0 + $0x74] sm:$0xf0]  ;;  %v4760_v10 = vld [vmem:[%s6665_s0 + $0x6c] sm:$0xf]  ;;  %v3342_v12 = vor.u32 %v4761_v5, %v3341_v4  ;;  %v3346_v13 = vor.u32 %v4759_v6, %v3343_v7 }
  0x16   :  { %1061 = vmatpush.bf16.msra.mxu0 %v4877_v20  ;;  %v3351_v11 = vld [vmem:[%s6665_s0 + $0x78] sm:$0xf0]  ;;  %v3350_v14 = vor.u32 %v4762_v9, %v3349_v8  ;;  %v3357_v20 = vld [vmem:[%s6665_s0 + $0x80] sm:$0xf]  ;;  %v4769_v33 = vld [vmem:[%s6665_s0 + $0xac] sm:$0xf0] }
  0x17   :  { %1230 = vmatpush.bf16.msra.mxu1 %v4885_v21  ;;  %v3354_v15 = vor.u32 %v4760_v10, %v3351_v11  ;;  %v4930_v16 = vld [vmem:[%s6666_s3 + $0xb8] sm:$0xff]  ;;  %v4765_v21 = vld [vmem:[%s6665_s0 + $0x8c] sm:$0xf0]  ;;  %v3373_v32 = vld [vmem:[%s6665_s0 + $0xa0] sm:$0xf] }
  0x18   :  { %1399 = vmatpush.bf16.msra.mxu2 %v4893_v22  ;;  %v4922_v17 = vld [vmem:[%s6666_s3 + $0x78] sm:$0xff]  ;;  %v4763_v22 = vld [vmem:[%s6665_s0 + $0x84] sm:$0xf]  ;;  %v3375_v35 = vld [vmem:[%s6665_s0 + $0xb0] sm:$0xf0] }
  0x19   :  { %1568 = vmatpush.bf16.msra.mxu3 %v4901_v23  ;;  %v4938_v18 = vld [vmem:[%s6666_s3 + $0xf8] sm:$0xff]  ;;  %v3359_v23 = vld [vmem:[%s6665_s0 + $0x90] sm:$0xf0]  ;;  %v4767_v34 = vld [vmem:[%s6665_s0 + $0xa4] sm:$0xf] }
  0x1a   :  { %1062 = vmatpush.bf16.msra.mxu0 %v4876_v24  ;;  %v4914_v19 = vld [vmem:[%s6666_s3 + $0x38] sm:$0xff]  ;;  %v3365_v24 = vld [vmem:[%s6665_s0 + $0x88] sm:$0xf]  ;;  %v4768_v38 = vld [vmem:[%s6665_s0 + $0xac] sm:$0xf] }
  0x1b   :  { %1231 = vmatpush.bf16.msra.mxu1 %v4884_v25  ;;  %v4766_v25 = vld [vmem:[%s6665_s0 + $0x94] sm:$0xf0]  ;;  %v3381_v36 = vld [vmem:[%s6665_s0 + $0xa8] sm:$0xf]  ;;  %v3383_v39 = vld [vmem:[%s6665_s0 + $0xb8] sm:$0xf0] }
  0x1c   :  { %1400 = vmatpush.bf16.msra.mxu2 %v4892_v26  ;;  %v4764_v26 = vld [vmem:[%s6665_s0 + $0x8c] sm:$0xf]  ;;  %v4770_v37 = vld [vmem:[%s6665_s0 + $0xb4] sm:$0xf0]  ;;  %v3389_v44 = vld [vmem:[%s6665_s0 + $0xc0] sm:$0xf] }
  0x1d   :  { %1569 = vmatpush.bf16.msra.mxu3 %v4900_v27  ;;  %v3367_v27 = vld [vmem:[%s6665_s0 + $0x98] sm:$0xf0]  ;;  %v4773_v45 = vld [vmem:[%s6665_s0 + $0xcc] sm:$0xf0]  ;;  %v4771_v46 = vld [vmem:[%s6665_s0 + $0xc4] sm:$0xf] }
  0x1e   :  { %1063 = vmatpush.bf16.msra.mxu0 %v4875_v28  ;;  %v3358_v28 = vor.u32 %v4765_v21, %v3357_v20  ;;  %v3391_v47 = vld [vmem:[%s6665_s0 + $0xd0] sm:$0xf0]  ;;  %v3397_v48 = vld [vmem:[%s6665_s0 + $0xc8] sm:$0xf]  ;;  %v4774_v49 = vld [vmem:[%s6665_s0 + $0xd4] sm:$0xf0] }
  0x1f   :  { %1232 = vmatpush.bf16.msra.mxu1 %v4883_v29  ;;  %v3362_v29 = vor.u32 %v4763_v22, %v3359_v23  ;;  %v4772_v50 = vld [vmem:[%s6665_s0 + $0xcc] sm:$0xf]  ;;  %v3399_v51 = vld [vmem:[%s6665_s0 + $0xd8] sm:$0xf0]  ;;  %v3405_v56 = vld [vmem:[%s6665_s0 + $0xe0] sm:$0xf] }
  0x20   :  { %1401 = vmatpush.bf16.msra.mxu2 %v4891_v30  ;;  %v3366_v30 = vor.u32 %v4766_v25, %v3365_v24  ;;  %v4777_v57 = vld [vmem:[%s6665_s0 + $0xec] sm:$0xf0]  ;;  %v4775_v58 = vld [vmem:[%s6665_s0 + $0xe4] sm:$0xf]  ;;  %v3407_v59 = vld [vmem:[%s6665_s0 + $0xf0] sm:$0xf0] }
  0x21   :  { %1570 = vmatpush.bf16.msra.mxu3 %v4899_v31  ;;  %1064 = vmatmul.bf16.vlgmr.msra.gmra.mxu0 %v3294_v40  ;;  %v3370_v31 = vor.u32 %v4764_v26, %v3367_v27  ;;  %v3374_v40 = vor.u32 %v4769_v33, %v3373_v32  ;;  %v3413_v60 = vld [vmem:[%s6665_s0 + $0xe8] sm:$0xf]  ;;  %v4778_v61 = vld [vmem:[%s6665_s0 + $0xf4] sm:$0xf0]  ;;  %v4776_v62 = vld [vmem:[%s6665_s0 + $0xec] sm:$0xf] }
  0x22   :  { %1233 = vmatmul.bf16.vlgmr.msra.gmra.mxu1 %v3298_v41  ;;  %1929 = vmatpush.bf16.msrb.mxu0 %v4922_v17  ;;  %v3378_v41 = vor.u32 %v4767_v34, %v3375_v35  ;;  %v3415_v63 = vld [vmem:[%s6665_s0 + $0xf8] sm:$0xf0]  ;;  %v4929_v4 = vld [vmem:[%s6666_s3 + $0xb0] sm:$0xff]  ;;  %v3421_v5 = vld [vmem:[%s6665_s0 + $0x100] sm:$0xf] }
  0x23   :  { %1402 = vmatmul.bf16.vlgmr.msra.gmra.mxu2 %v3302_v42  ;;  %1990 = vmatpush.bf16.msrb.mxu1 %v4914_v19  ;;  %v3382_v42 = vor.u32 %v4770_v37, %v3381_v36  ;;  %v4781_v6 = vld [vmem:[%s6665_s0 + $0x10c] sm:$0xf0]  ;;  %v4779_v7 = vld [vmem:[%s6665_s0 + $0x104] sm:$0xf]  ;;  %v3423_v8 = vld [vmem:[%s6665_s0 + $0x110] sm:$0xf0] }
  0x24   :  { %1571 = vmatmul.bf16.vlgmr.msra.gmra.mxu3 %v3306_v43  ;;  %2068 = vmatpush.bf16.msrb.mxu2 %v4930_v16  ;;  %v3386_v43 = vor.u32 %v4768_v38, %v3383_v39  ;;  %v3429_v9 = vld [vmem:[%s6665_s0 + $0x108] sm:$0xf]  ;;  %v4782_v10 = vld [vmem:[%s6665_s0 + $0x114] sm:$0xf0]  ;;  %v4780_v11 = vld [vmem:[%s6665_s0 + $0x10c] sm:$0xf] }
  0x25   :  { %2147 = vmatpush.bf16.msrb.mxu3 %v4938_v18  ;;  %v3430_v17 = vor.u32 %v4782_v10, %v3429_v9  ;;  %v4921_v20 = vld [vmem:[%s6666_s3 + $0x70] sm:$0xff]  ;;  %v4783_v32 = vld [vmem:[%s6665_s0 + $0x124] sm:$0xf]  ;;  %v3445_v34 = vld [vmem:[%s6665_s0 + $0x128] sm:$0xf] }
  0x26   :  { %v4937_v21 = vld [vmem:[%s6666_s3 + $0xf0] sm:$0xff]  ;;  %1930 = vmatpush.bf16.msrb.mxu0 %v4921_v20  ;;  %v4786_v35 = vld [vmem:[%s6665_s0 + $0x134] sm:$0xf0]  ;;  %v4784_v36 = vld [vmem:[%s6665_s0 + $0x12c] sm:$0xf] }
  0x27   :  { %v4913_v22 = vld [vmem:[%s6666_s3 + $0x30] sm:$0xff]  ;;  %v3447_v37 = vld [vmem:[%s6665_s0 + $0x138] sm:$0xf0]  ;;  %v4791_v20 = vld [vmem:[%s6665_s0 + $0x164] sm:$0xf] }
  0x28   :  { %2069 = vmatpush.bf16.msrb.mxu2 %v4929_v4  ;;  %1991 = vmatpush.bf16.msrb.mxu1 %v4913_v22  ;;  %v3439_v33 = vld [vmem:[%s6665_s0 + $0x130] sm:$0xf0]  ;;  %v3477_v22 = vld [vmem:[%s6665_s0 + $0x168] sm:$0xf] }
  0x29   :  { %2148 = vmatpush.bf16.msrb.mxu3 %v4937_v21  ;;  %v3471_v21 = vld [vmem:[%s6665_s0 + $0x170] sm:$0xf0] }
  0x31   :  { %1069 = vmatmul.bf16.gmra.mxu0 %v3310_v52  ;;  %v3390_v52 = vor.u32 %v4773_v45, %v3389_v44  ;;  %v3446_v45 = vor.u32 %v4786_v35, %v3445_v34 }
  0x32   :  { %1238 = vmatmul.bf16.gmra.mxu1 %v3314_v53  ;;  %v3394_v53 = vor.u32 %v4771_v46, %v3391_v47  ;;  %v3450_v46 = vor.u32 %v4784_v36, %v3447_v37 }
  0x33   :  { %1407 = vmatmul.bf16.gmra.mxu2 %v3318_v54  ;;  %v3398_v54 = vor.u32 %v4774_v49, %v3397_v48 }
  0x34   :  { %1576 = vmatmul.bf16.gmra.mxu3 %v3322_v55  ;;  %v3402_v55 = vor.u32 %v4772_v50, %v3399_v51 }
  0x41   :  { %1074 = vmatmul.bf16.gmra.mxu0 %v3326_v0  ;;  %v3406_v0 = vor.u32 %v4777_v57, %v3405_v56  ;;  %v3453_v56 = vld [vmem:[%s6665_s0 + $0x140] sm:$0xf]  ;;  %v4789_v57 = vld [vmem:[%s6665_s0 + $0x14c] sm:$0xf0] }
  0x42   :  { %1243 = vmatmul.bf16.gmra.mxu1 %v3330_v1  ;;  %v3410_v1 = vor.u32 %v4775_v58, %v3407_v59  ;;  %v4787_v58 = vld [vmem:[%s6665_s0 + $0x144] sm:$0xf]  ;;  %v3455_v59 = vld [vmem:[%s6665_s0 + $0x150] sm:$0xf0] }
  0x43   :  { %1412 = vmatmul.bf16.gmra.mxu2 %v3334_v2  ;;  %v3414_v2 = vor.u32 %v4778_v61, %v3413_v60  ;;  %v3461_v60 = vld [vmem:[%s6665_s0 + $0x148] sm:$0xf]  ;;  %v4790_v61 = vld [vmem:[%s6665_s0 + $0x154] sm:$0xf0] }
  0x44   :  { %1581 = vmatmul.bf16.gmra.mxu3 %v3338_v3  ;;  %v3418_v3 = vor.u32 %v4776_v62, %v3415_v63  ;;  %v4788_v62 = vld [vmem:[%s6665_s0 + $0x14c] sm:$0xf]  ;;  %v3463_v63 = vld [vmem:[%s6665_s0 + $0x158] sm:$0xf0] }
  0x51   :  { %1079 = vmatmul.bf16.gmra.mxu0 %v3342_v12  ;;  %v3431_v12 = vld [vmem:[%s6665_s0 + $0x118] sm:$0xf0] }
  0x52   :  { %1248 = vmatmul.bf16.gmra.mxu1 %v3346_v13  ;;  %v3422_v13 = vor.u32 %v4781_v6, %v3421_v5  ;;  %v3434_v18 = vor.u32 %v4780_v11, %v3431_v12 }
  0x53   :  { %1417 = vmatmul.bf16.gmra.mxu2 %v3350_v14  ;;  %v3426_v14 = vor.u32 %v4779_v7, %v3423_v8  ;;  %v3462_v7 = vor.u32 %v4790_v61, %v3461_v60  ;;  %v3466_v8 = vor.u32 %v4788_v62, %v3463_v63 }
  0x54   :  { %1586 = vmatmul.bf16.gmra.mxu3 %v3354_v15 }
  0x61   :  { %1084 = vmatmul.bf16.gmra.mxu0 %v3358_v28 }
  0x62   :  { %1253 = vmatmul.bf16.gmra.mxu1 %v3362_v29 }
  0x63   :  { %1422 = vmatmul.bf16.gmra.mxu2 %v3366_v30  ;;  %v3437_v30 = vld [vmem:[%s6665_s0 + $0x120] sm:$0xf] }
  0x64   :  { %1591 = vmatmul.bf16.gmra.mxu3 %v3370_v31  ;;  %v4785_v31 = vld [vmem:[%s6665_s0 + $0x12c] sm:$0xf0] }
  0x71   :  { %1089 = vmatmul.bf16.gmra.mxu0 %v3374_v40  ;;  %v3438_v40 = vor.u32 %v4785_v31, %v3437_v30  ;;  %v3474_v30 = vor.u32 %v4791_v20, %v3471_v21  ;;  %v4802_v20 = vld [vmem:[%s6665_s0 + $0x1b4] sm:$0xf0]  ;;  %v4800_v21 = vld [vmem:[%s6665_s0 + $0x1ac] sm:$0xf] }
  0x72   :  { %1258 = vmatmul.bf16.gmra.mxu1 %v3378_v41  ;;  %v3442_v41 = vor.u32 %v4783_v32, %v3439_v33 }
  0x73   :  { %1427 = vmatmul.bf16.gmra.mxu2 %v3382_v42 }
  0x74   :  { %1596 = vmatmul.bf16.gmra.mxu3 %v3386_v43 }
  0x81   :  { %1094 = vmatmul.bf16.gmra.mxu0 %v3390_v52 }
  0x82   :  { %1263 = vmatmul.bf16.gmra.mxu1 %v3394_v53 }
  0x83   :  { %1432 = vmatmul.bf16.gmra.mxu2 %v3398_v54 }
  0x84   :  { %1601 = vmatmul.bf16.gmra.mxu3 %v3402_v55 }
  0x91   :  { %1099 = vmatmul.bf16.gmra.mxu0 %v3406_v0 }
  0x92   :  { %1268 = vmatmul.bf16.gmra.mxu1 %v3410_v1 }
  0x93   :  { %1437 = vmatmul.bf16.gmra.mxu2 %v3414_v2  ;;  %v3454_v2 = vor.u32 %v4789_v57, %v3453_v56 }
  0x94   :  { %1606 = vmatmul.bf16.gmra.mxu3 %v3418_v3  ;;  %v3458_v3 = vor.u32 %v4787_v58, %v3455_v59 }
  0x9e   :  { %v1065_v15 = vpop.f32.mrf.mxu0 }
  0x9f   :  { %v1234_v16 = vpop.f32.mrf.mxu1 }
  0xa0   :  { %v1235_v19 = vadd.f32 %v1234_v16, %v1065_v15 }
  0xa1   :  { %1104 = vmatmul.bf16.gmra.mxu0 %v3422_v13 }
  0xa2   :  { %1273 = vmatmul.bf16.gmra.mxu1 %v3426_v14 }
  0xa3   :  { %1442 = vmatmul.bf16.gmra.mxu2 %v3430_v17 }
  0xa4   :  { %1611 = vmatmul.bf16.gmra.mxu3 %v3434_v18  ;;  %v3469_v18 = vld [vmem:[%s6665_s0 + $0x160] sm:$0xf] }
  0xa6   :  { %v1403_v23 = vpop.f32.mrf.mxu2  ;;  %v1067_v26 = vpop.f32.mrf.mxu0 }
  0xa7   :  { %v1572_v24 = vpop.f32.mrf.mxu3  ;;  %v1404_v25 = vadd.f32 %v1403_v23, %v1235_v19  ;;  %v1236_v27 = vpop.f32.mrf.mxu1  ;;  %v4793_v19 = vld [vmem:[%s6665_s0 + $0x16c] sm:$0xf0]  ;;  %v4794_v23 = vld [vmem:[%s6665_s0 + $0x174] sm:$0xf0] }
  0xa8   :  { %v1237_v28 = vadd.f32 %v1236_v27, %v1067_v26  ;;  %v3478_v34 = vor.u32 %v4794_v23, %v3477_v22  ;;  %v3511_v22 = vld [vmem:[%s6665_s0 + $0x1b8] sm:$0xf0] }
  0xa9   :  { %v5443_v29 = vadd.f32 %v1572_v24, %v1404_v25  ;;  %v4792_v24 = vld [vmem:[%s6665_s0 + $0x16c] sm:$0xf]  ;;  %v3479_v25 = vld [vmem:[%s6665_s0 + $0x178] sm:$0xf0] }
  0xaa   :  { %v3482_v35 = vor.u32 %v4792_v24, %v3479_v25 }
  0xae   :  { %v1405_v38 = vpop.f32.mrf.mxu2  ;;  %v1070_v43 = vpop.f32.mrf.mxu0 }
  0xaf   :  { %v1574_v39 = vpop.f32.mrf.mxu3  ;;  %v1406_v42 = vadd.f32 %v1405_v38, %v1237_v28  ;;  %v1239_v44 = vpop.f32.mrf.mxu1  ;;  %v3470_v28 = vor.u32 %v4793_v19, %v3469_v18  ;;  %v3503_v18 = vld [vmem:[%s6665_s0 + $0x1b0] sm:$0xf0]  ;;  %v3509_v19 = vld [vmem:[%s6665_s0 + $0x1a8] sm:$0xf] }
  0xb0   :  { %v1240_v47 = vadd.f32 %v1239_v44, %v1070_v43 }
  0xb1   :  { %v5469_v48 = vadd.f32 %v1574_v39, %v1406_v42  ;;  %1109 = vmatmul.bf16.gmra.mxu0 %v3438_v40 }
  0xb2   :  { %1278 = vmatmul.bf16.gmra.mxu1 %v3442_v41 }
  0xb3   :  { %1447 = vmatmul.bf16.gmra.mxu2 %v3446_v45  ;;  %v4928_v45 = vld [vmem:[%s6666_s3 + $0xa8] sm:$0xff] }
  0xb4   :  { %1616 = vmatmul.bf16.gmra.mxu3 %v3450_v46  ;;  %v3485_v46 = vld [vmem:[%s6665_s0 + $0x180] sm:$0xf]  ;;  %2070 = vmatpush.bf16.msrb.mxu2 %v4928_v45  ;;  %v4805_v45 = vld [vmem:[%s6665_s0 + $0x1cc] sm:$0xf0] }
  0xb6   :  { %v1408_v49 = vpop.f32.mrf.mxu2  ;;  %v1072_v52 = vpop.f32.mrf.mxu0 }
  0xb7   :  { %v1577_v50 = vpop.f32.mrf.mxu3  ;;  %v1409_v51 = vadd.f32 %v1408_v49, %v1240_v47  ;;  %v1241_v53 = vpop.f32.mrf.mxu1  ;;  %v4797_v47 = vld [vmem:[%s6665_s0 + $0x18c] sm:$0xf0]  ;;  %v4795_v49 = vld [vmem:[%s6665_s0 + $0x184] sm:$0xf] }
  0xb8   :  { %v1242_v54 = vadd.f32 %v1241_v53, %v1072_v52  ;;  %v4798_v52 = vld [vmem:[%s6665_s0 + $0x194] sm:$0xf0]  ;;  %v4796_v53 = vld [vmem:[%s6665_s0 + $0x18c] sm:$0xf]  ;;  %v3486_v58 = vor.u32 %v4797_v47, %v3485_v46  ;;  %v4803_v46 = vld [vmem:[%s6665_s0 + $0x1c4] sm:$0xf] }
  0xb9   :  { %v5471_v55 = vadd.f32 %v1577_v50, %v1409_v51  ;;  %v3487_v50 = vld [vmem:[%s6665_s0 + $0x190] sm:$0xf0]  ;;  %v3493_v51 = vld [vmem:[%s6665_s0 + $0x188] sm:$0xf] }
  0xba   :  { %v3490_v59 = vor.u32 %v4795_v49, %v3487_v50  ;;  %v3494_v63 = vor.u32 %v4798_v52, %v3493_v51  ;;  %v3519_v47 = vld [vmem:[%s6665_s0 + $0x1d0] sm:$0xf0]  ;;  %v3525_v49 = vld [vmem:[%s6665_s0 + $0x1c8] sm:$0xf]  ;;  %v4806_v50 = vld [vmem:[%s6665_s0 + $0x1d4] sm:$0xf0] }
  0xbb   :  { %v4804_v51 = vld [vmem:[%s6665_s0 + $0x1cc] sm:$0xf]  ;;  %v3527_v52 = vld [vmem:[%s6665_s0 + $0x1d8] sm:$0xf0] }
  0xbe   :  { %v1410_v0 = vpop.f32.mrf.mxu2  ;;  %v1075_v5 = vpop.f32.mrf.mxu0 }
  0xbf   :  { %v1579_v1 = vpop.f32.mrf.mxu3  ;;  %v1411_v4 = vadd.f32 %v1410_v0, %v1242_v54  ;;  %v1244_v6 = vpop.f32.mrf.mxu1  ;;  %v3495_v54 = vld [vmem:[%s6665_s0 + $0x198] sm:$0xf0] }
  0xc0   :  { %v1245_v9 = vadd.f32 %v1244_v6, %v1075_v5  ;;  %v3498_v0 = vor.u32 %v4796_v53, %v3495_v54  ;;  %v4912_v5 = vld [vmem:[%s6666_s3 + $0x28] sm:$0xff] }
  0xc1   :  { %v5497_v10 = vadd.f32 %v1579_v1, %v1411_v4  ;;  %1114 = vmatmul.bf16.gmra.mxu0 %v3454_v2  ;;  %v4936_v4 = vld [vmem:[%s6666_s3 + $0xe8] sm:$0xff]  ;;  %1992 = vmatpush.bf16.msrb.mxu1 %v4912_v5 }
  0xc2   :  { %1283 = vmatmul.bf16.gmra.mxu1 %v3458_v3  ;;  %v4920_v3 = vld [vmem:[%s6666_s3 + $0x68] sm:$0xff]  ;;  %2149 = vmatpush.bf16.msrb.mxu3 %v4936_v4 }
  0xc3   :  { %1452 = vmatmul.bf16.gmra.mxu2 %v3462_v7  ;;  %1931 = vmatpush.bf16.msrb.mxu0 %v4920_v3 }
  0xc4   :  { %1621 = vmatmul.bf16.gmra.mxu3 %v3466_v8 }
  0xc6   :  { %v1413_v11 = vpop.f32.mrf.mxu2  ;;  %v1077_v14 = vpop.f32.mrf.mxu0 }
  0xc7   :  { %v1582_v12 = vpop.f32.mrf.mxu3  ;;  %v1414_v13 = vadd.f32 %v1413_v11, %v1245_v9  ;;  %v1246_v15 = vpop.f32.mrf.mxu1 }
  0xc8   :  { %v1247_v16 = vadd.f32 %v1246_v15, %v1077_v14  ;;  %v3501_v14 = vld [vmem:[%s6665_s0 + $0x1a0] sm:$0xf]  ;;  %v4801_v15 = vld [vmem:[%s6665_s0 + $0x1ac] sm:$0xf0] }
  0xc9   :  { %v5499_v17 = vadd.f32 %v1582_v12, %v1414_v13  ;;  %v3502_v25 = vor.u32 %v4801_v15, %v3501_v14  ;;  %v3535_v14 = vld [vmem:[%s6665_s0 + $0x1f0] sm:$0xf0]  ;;  %v3541_v15 = vld [vmem:[%s6665_s0 + $0x1e8] sm:$0xf] }
  0xce   :  { %v1415_v26 = vpop.f32.mrf.mxu2  ;;  %v1080_v32 = vpop.f32.mrf.mxu0 }
  0xcf   :  { %v1584_v27 = vpop.f32.mrf.mxu3  ;;  %v1416_v31 = vadd.f32 %v1415_v26, %v1247_v16  ;;  %v1249_v33 = vpop.f32.mrf.mxu1  ;;  %v4799_v16 = vld [vmem:[%s6665_s0 + $0x1a4] sm:$0xf] }
  0xd0   :  { %v1250_v36 = vadd.f32 %v1249_v33, %v1080_v32  ;;  %v3506_v26 = vor.u32 %v4799_v16, %v3503_v18  ;;  %v3514_v32 = vor.u32 %v4800_v21, %v3511_v22  ;;  %v4810_v16 = vld [vmem:[%s6665_s0 + $0x1f4] sm:$0xf0]  ;;  %v4808_v18 = vld [vmem:[%s6665_s0 + $0x1ec] sm:$0xf] }
  0xd1   :  { %v5525_v37 = vadd.f32 %v1584_v27, %v1416_v31  ;;  %1119 = vmatmul.bf16.gmra.mxu0 %v3470_v28  ;;  %v3510_v31 = vor.u32 %v4802_v20, %v3509_v19  ;;  %v3543_v19 = vld [vmem:[%s6665_s0 + $0x1f8] sm:$0xf0] }
  0xd2   :  { %1288 = vmatmul.bf16.gmra.mxu1 %v3474_v30 }
  0xd3   :  { %1457 = vmatmul.bf16.gmra.mxu2 %v3478_v34 }
  0xd4   :  { %1626 = vmatmul.bf16.gmra.mxu3 %v3482_v35 }
  0xd6   :  { %v1418_v38 = vpop.f32.mrf.mxu2  ;;  %v1082_v41 = vpop.f32.mrf.mxu0 }
  0xd7   :  { %v1587_v39 = vpop.f32.mrf.mxu3  ;;  %v1419_v40 = vadd.f32 %v1418_v38, %v1250_v36  ;;  %v1251_v42 = vpop.f32.mrf.mxu1 }
  0xd8   :  { %v1252_v43 = vadd.f32 %v1251_v42, %v1082_v41 }
  0xd9   :  { %v5527_v44 = vadd.f32 %v1587_v39, %v1419_v40 }
  0xde   :  { %v1420_v56 = vpop.f32.mrf.mxu2  ;;  %v1085_v61 = vpop.f32.mrf.mxu0 }
  0xdf   :  { %v1589_v57 = vpop.f32.mrf.mxu3  ;;  %v1421_v60 = vadd.f32 %v1420_v56, %v1252_v43  ;;  %v1254_v62 = vpop.f32.mrf.mxu1  ;;  %v3517_v43 = vld [vmem:[%s6665_s0 + $0x1c0] sm:$0xf] }
  0xe0   :  { %v1255_v1 = vadd.f32 %v1254_v62, %v1085_v61  ;;  %v3518_v56 = vor.u32 %v4805_v45, %v3517_v43  ;;  %v3526_v61 = vor.u32 %v4806_v50, %v3525_v49  ;;  %v3530_v62 = vor.u32 %v4804_v51, %v3527_v52  ;;  %v4813_v43 = vld [vmem:[%s6665_s0 + $0x20c] sm:$0xf0]  ;;  %v4811_v45 = vld [vmem:[%s6665_s0 + $0x204] sm:$0xf]  ;;  %v4814_v50 = vld [vmem:[%s6665_s0 + $0x214] sm:$0xf0] }
  0xe1   :  { %v5556_v2 = vadd.f32 %v1589_v57, %v1421_v60  ;;  %1124 = vmatmul.bf16.gmra.mxu0 %v3486_v58  ;;  %v3522_v57 = vor.u32 %v4803_v46, %v3519_v47  ;;  %v3551_v46 = vld [vmem:[%s6665_s0 + $0x210] sm:$0xf0]  ;;  %v3557_v47 = vld [vmem:[%s6665_s0 + $0x208] sm:$0xf]  ;;  %v4927_v49 = vld [vmem:[%s6666_s3 + $0xa0] sm:$0xff] }
  0xe2   :  { %1293 = vmatmul.bf16.gmra.mxu1 %v3490_v59  ;;  %v4812_v51 = vld [vmem:[%s6665_s0 + $0x20c] sm:$0xf]  ;;  %v3559_v52 = vld [vmem:[%s6665_s0 + $0x218] sm:$0xf0]  ;;  %2071 = vmatpush.bf16.msrb.mxu2 %v4927_v49 }
  0xe3   :  { %1462 = vmatmul.bf16.gmra.mxu2 %v3494_v63 }
  0xe4   :  { %1631 = vmatmul.bf16.gmra.mxu3 %v3498_v0 }
  0xe6   :  { %v1423_v6 = vpop.f32.mrf.mxu2  ;;  %v1087_v9 = vpop.f32.mrf.mxu0 }
  0xe7   :  { %v1592_v7 = vpop.f32.mrf.mxu3  ;;  %v1424_v8 = vadd.f32 %v1423_v6, %v1255_v1  ;;  %v1256_v11 = vpop.f32.mrf.mxu1 }
  0xe8   :  { %v1257_v12 = vadd.f32 %v1256_v11, %v1087_v9  ;;  %v3533_v9 = vld [vmem:[%s6665_s0 + $0x1e0] sm:$0xf]  ;;  %v4809_v11 = vld [vmem:[%s6665_s0 + $0x1ec] sm:$0xf0] }
  0xe9   :  { %v5567_v13 = vadd.f32 %v1592_v7, %v1424_v8  ;;  %v3534_v22 = vor.u32 %v4809_v11, %v3533_v9 }
  0xee   :  { %v1425_v23 = vpop.f32.mrf.mxu2  ;;  %v1090_v28 = vpop.f32.mrf.mxu0 }
  0xef   :  { %v1594_v24 = vpop.f32.mrf.mxu3  ;;  %v1426_v27 = vadd.f32 %v1425_v23, %v1257_v12  ;;  %v1259_v30 = vpop.f32.mrf.mxu1  ;;  %v4807_v12 = vld [vmem:[%s6665_s0 + $0x1e4] sm:$0xf] }
  0xf0   :  { %v1260_v33 = vadd.f32 %v1259_v30, %v1090_v28  ;;  %v3538_v23 = vor.u32 %v4807_v12, %v3535_v14  ;;  %v3546_v28 = vor.u32 %v4808_v18, %v3543_v19  ;;  %v4817_v18 = vld [vmem:[%s6665_s0 + $0x22c] sm:$0xf0] }
  0xf1   :  { %v5593_v34 = vadd.f32 %v1594_v24, %v1426_v27  ;;  %1129 = vmatmul.bf16.gmra.mxu0 %v3502_v25  ;;  %v3542_v27 = vor.u32 %v4810_v16, %v3541_v15  ;;  %v3565_v16 = vld [vmem:[%s6665_s0 + $0x220] sm:$0xf] }
  0xf2   :  { %1298 = vmatmul.bf16.gmra.mxu1 %v3506_v26 }
  0xf3   :  { %1467 = vmatmul.bf16.gmra.mxu2 %v3510_v31 }
  0xf4   :  { %1636 = vmatmul.bf16.gmra.mxu3 %v3514_v32 }
  0xf6   :  { %v1428_v35 = vpop.f32.mrf.mxu2  ;;  %v1092_v39 = vpop.f32.mrf.mxu0 }
  0xf7   :  { %v1597_v36 = vpop.f32.mrf.mxu3  ;;  %v1429_v38 = vadd.f32 %v1428_v35, %v1260_v33  ;;  %v1261_v40 = vpop.f32.mrf.mxu1 }
  0xf8   :  { %v1262_v41 = vadd.f32 %v1261_v40, %v1092_v39 }
  0xf9   :  { %v5595_v42 = vadd.f32 %v1597_v36, %v1429_v38 }
  0xfe   :  { %v1430_v53 = vpop.f32.mrf.mxu2  ;;  %v1095_v59 = vpop.f32.mrf.mxu0 }
  0xff   :  { %v1599_v54 = vpop.f32.mrf.mxu3  ;;  %v1431_v58 = vadd.f32 %v1430_v53, %v1262_v41  ;;  %v1264_v60 = vpop.f32.mrf.mxu1  ;;  %v3549_v41 = vld [vmem:[%s6665_s0 + $0x200] sm:$0xf] }
 0x100   :  { %v1265_v63 = vadd.f32 %v1264_v60, %v1095_v59 }
 0x101   :  { %v5621_v0 = vadd.f32 %v1599_v54, %v1431_v58  ;;  %1134 = vmatmul.bf16.gmra.mxu0 %v3518_v56  ;;  %v3550_v56 = vor.u32 %v4813_v43, %v3549_v41 }
 0x102   :  { %1303 = vmatmul.bf16.gmra.mxu1 %v3522_v57  ;;  %v3554_v57 = vor.u32 %v4811_v45, %v3551_v46 }
 0x103   :  { %1472 = vmatmul.bf16.gmra.mxu2 %v3526_v61  ;;  %v3558_v61 = vor.u32 %v4814_v50, %v3557_v47 }
 0x104   :  { %1641 = vmatmul.bf16.gmra.mxu3 %v3530_v62  ;;  %v3562_v62 = vor.u32 %v4812_v51, %v3559_v52 }
 0x106   :  { %v1433_v1 = vpop.f32.mrf.mxu2  ;;  %v1097_v5 = vpop.f32.mrf.mxu0 }
 0x107   :  { %v1602_v3 = vpop.f32.mrf.mxu3  ;;  %v1434_v4 = vadd.f32 %v1433_v1, %v1265_v63  ;;  %v1266_v6 = vpop.f32.mrf.mxu1 }
 0x108   :  { %v1267_v7 = vadd.f32 %v1266_v6, %v1097_v5  ;;  %v4911_v5 = vld [vmem:[%s6666_s3 + $0x20] sm:$0xff] }
 0x109   :  { %v5623_v8 = vadd.f32 %v1602_v3, %v1434_v4  ;;  %v4919_v3 = vld [vmem:[%s6666_s3 + $0x60] sm:$0xff]  ;;  %1993 = vmatpush.bf16.msrb.mxu1 %v4911_v5 }
 0x10a   :  { %v4935_v4 = vld [vmem:[%s6666_s3 + $0xe0] sm:$0xff]  ;;  %1932 = vmatpush.bf16.msrb.mxu0 %v4919_v3 }
 0x10b   :  { %2150 = vmatpush.bf16.msrb.mxu3 %v4935_v4 }
 0x10e   :  { %v1435_v20 = vpop.f32.mrf.mxu2  ;;  %v1100_v25 = vpop.f32.mrf.mxu0 }
 0x10f   :  { %v1604_v21 = vpop.f32.mrf.mxu3  ;;  %v1436_v24 = vadd.f32 %v1435_v20, %v1267_v7  ;;  %v1269_v26 = vpop.f32.mrf.mxu1  ;;  %v4815_v20 = vld [vmem:[%s6665_s0 + $0x224] sm:$0xf] }
 0x110   :  { %v1270_v30 = vadd.f32 %v1269_v26, %v1100_v25  ;;  %v3575_v25 = vld [vmem:[%s6665_s0 + $0x238] sm:$0xf0] }
 0x111   :  { %v5649_v31 = vadd.f32 %v1604_v21, %v1436_v24  ;;  %1139 = vmatmul.bf16.gmra.mxu0 %v3534_v22  ;;  %v3567_v21 = vld [vmem:[%s6665_s0 + $0x230] sm:$0xf0]  ;;  %v3573_v22 = vld [vmem:[%s6665_s0 + $0x228] sm:$0xf]  ;;  %v4816_v24 = vld [vmem:[%s6665_s0 + $0x22c] sm:$0xf] }
 0x112   :  { %1308 = vmatmul.bf16.gmra.mxu1 %v3538_v23  ;;  %v4818_v23 = vld [vmem:[%s6665_s0 + $0x234] sm:$0xf0] }
 0x113   :  { %6681 = vst [vmem:[#allocation2_spill] sm:$0xff] %v5649_v31  ;;  %1477 = vmatmul.bf16.gmra.mxu2 %v3542_v27 }
 0x114   :  { %1646 = vmatmul.bf16.gmra.mxu3 %v3546_v28  ;;  %v3566_v28 = vor.u32 %v4817_v18, %v3565_v16 }
 0x116   :  { %v1438_v32 = vpop.f32.mrf.mxu2  ;;  %v1102_v36 = vpop.f32.mrf.mxu0 }
 0x117   :  { %v1607_v33 = vpop.f32.mrf.mxu3  ;;  %v1439_v35 = vadd.f32 %v1438_v32, %v1270_v30  ;;  %v1271_v38 = vpop.f32.mrf.mxu1  ;;  %v3570_v30 = vor.u32 %v4815_v20, %v3567_v21 }
 0x118   :  { %v1272_v39 = vadd.f32 %v1271_v38, %v1102_v36  ;;  %v3574_v36 = vor.u32 %v4818_v23, %v3573_v22  ;;  %v3578_v38 = vor.u32 %v4816_v24, %v3575_v25 }
 0x119   :  { %v5651_v40 = vadd.f32 %v1607_v33, %v1439_v35 }
 0x11b   :  { %6682 = vst [vmem:[#allocation3_spill] sm:$0xff] %v5651_v40 }
 0x11e   :  { %v1440_v53 = vpop.f32.mrf.mxu2  ;;  %v1105_v59 = vpop.f32.mrf.mxu0 }
 0x11f   :  { %v1609_v54 = vpop.f32.mrf.mxu3  ;;  %v1441_v58 = vadd.f32 %v1440_v53, %v1272_v39  ;;  %v1274_v60 = vpop.f32.mrf.mxu1  ;;  %v3581_v53 = vld [vmem:[%s6665_s0 + $0x240] sm:$0xf] }
 0x120   :  { %v1275_v63 = vadd.f32 %v1274_v60, %v1105_v59  ;;  %v3589_v59 = vld [vmem:[%s6665_s0 + $0x248] sm:$0xf]  ;;  %v4822_v60 = vld [vmem:[%s6665_s0 + $0x254] sm:$0xf0] }
 0x121   :  { %v5680_v1 = vadd.f32 %v1609_v54, %v1441_v58  ;;  %1144 = vmatmul.bf16.gmra.mxu0 %v3550_v56  ;;  %v4821_v54 = vld [vmem:[%s6665_s0 + $0x24c] sm:$0xf0]  ;;  %v3583_v58 = vld [vmem:[%s6665_s0 + $0x250] sm:$0xf0] }
 0x122   :  { %1313 = vmatmul.bf16.gmra.mxu1 %v3554_v57  ;;  %v4819_v57 = vld [vmem:[%s6665_s0 + $0x244] sm:$0xf]  ;;  %v3582_v4 = vor.u32 %v4821_v54, %v3581_v53 }
 0x123   :  { %6683 = vst [vmem:[#allocation4_spill] sm:$0xff] %v5680_v1  ;;  %1482 = vmatmul.bf16.gmra.mxu2 %v3558_v61  ;;  %v4820_v61 = vld [vmem:[%s6665_s0 + $0x24c] sm:$0xf]  ;;  %v3586_v5 = vor.u32 %v4819_v57, %v3583_v58 }
 0x124   :  { %1651 = vmatmul.bf16.gmra.mxu3 %v3562_v62  ;;  %v3591_v62 = vld [vmem:[%s6665_s0 + $0x258] sm:$0xf0] }
 0x126   :  { %v1443_v6 = vpop.f32.mrf.mxu2  ;;  %v1107_v11 = vpop.f32.mrf.mxu0 }
 0x127   :  { %v1612_v7 = vpop.f32.mrf.mxu3  ;;  %v1444_v9 = vadd.f32 %v1443_v6, %v1275_v63  ;;  %v1276_v12 = vpop.f32.mrf.mxu1 }
 0x128   :  { %v1277_v14 = vadd.f32 %v1276_v12, %v1107_v11  ;;  %v3590_v11 = vor.u32 %v4822_v60, %v3589_v59  ;;  %v3594_v12 = vor.u32 %v4820_v61, %v3591_v62 }
 0x129   :  { %v5691_v15 = vadd.f32 %v1612_v7, %v1444_v9 }
 0x12e   :  { %v1445_v26 = vpop.f32.mrf.mxu2  ;;  %v1110_v33 = vpop.f32.mrf.mxu0 }
 0x12f   :  { %v1614_v27 = vpop.f32.mrf.mxu3  ;;  %v1446_v32 = vadd.f32 %v1445_v26, %v1277_v14  ;;  %v1279_v35 = vpop.f32.mrf.mxu1 }
 0x130   :  { %v1280_v39 = vadd.f32 %v1279_v35, %v1110_v33  ;;  %v3599_v33 = vld [vmem:[%s6665_s0 + $0x270] sm:$0xf0]  ;;  %v3605_v35 = vld [vmem:[%s6665_s0 + $0x268] sm:$0xf] }
 0x131   :  { %v5719_v41 = vadd.f32 %v1614_v27, %v1446_v32  ;;  %1149 = vmatmul.bf16.gmra.mxu0 %v3566_v28  ;;  %v3597_v27 = vld [vmem:[%s6665_s0 + $0x260] sm:$0xf]  ;;  %v4825_v28 = vld [vmem:[%s6665_s0 + $0x26c] sm:$0xf0]  ;;  %v4823_v32 = vld [vmem:[%s6665_s0 + $0x264] sm:$0xf] }
 0x132   :  { %1318 = vmatmul.bf16.gmra.mxu1 %v3570_v30 }
 0x133   :  { %1487 = vmatmul.bf16.gmra.mxu2 %v3574_v36  ;;  %v4826_v36 = vld [vmem:[%s6665_s0 + $0x274] sm:$0xf0] }
 0x134   :  { %1656 = vmatmul.bf16.gmra.mxu3 %v3578_v38  ;;  %v4824_v38 = vld [vmem:[%s6665_s0 + $0x26c] sm:$0xf]  ;;  %v3606_v54 = vor.u32 %v4826_v36, %v3605_v35 }
 0x136   :  { %v1448_v45 = vpop.f32.mrf.mxu2  ;;  %v1112_v49 = vpop.f32.mrf.mxu0 }
 0x137   :  { %v1617_v46 = vpop.f32.mrf.mxu3  ;;  %v1449_v47 = vadd.f32 %v1448_v45, %v1280_v39  ;;  %v1281_v50 = vpop.f32.mrf.mxu1  ;;  %v3607_v39 = vld [vmem:[%s6665_s0 + $0x278] sm:$0xf0] }
 0x138   :  { %v1282_v51 = vadd.f32 %v1281_v50, %v1112_v49  ;;  %v3602_v49 = vor.u32 %v4823_v32, %v3599_v33  ;;  %v3610_v57 = vor.u32 %v4824_v38, %v3607_v39 }
 0x139   :  { %v5723_v52 = vadd.f32 %v1617_v46, %v1449_v47  ;;  %v3598_v47 = vor.u32 %v4825_v28, %v3597_v27 }
 0x13e   :  { %v1450_v63 = vpop.f32.mrf.mxu2  ;;  %v1115_v7 = vpop.f32.mrf.mxu0 }
 0x13f   :  { %v1619_v3 = vpop.f32.mrf.mxu3  ;;  %v1451_v6 = vadd.f32 %v1450_v63, %v1282_v51  ;;  %v1284_v9 = vpop.f32.mrf.mxu1 }
 0x140   :  { %v1285_v14 = vadd.f32 %v1284_v9, %v1115_v7  ;;  %v3613_v7 = vld [vmem:[%s6665_s0 + $0x280] sm:$0xf]  ;;  %v4829_v9 = vld [vmem:[%s6665_s0 + $0x28c] sm:$0xf0] }
 0x141   :  { %v5751_v16 = vadd.f32 %v1619_v3, %v1451_v6  ;;  %1154 = vmatmul.bf16.gmra.mxu0 %v3582_v4  ;;  %v3614_v28 = vor.u32 %v4829_v9, %v3613_v7  ;;  %v4831_v7 = vld [vmem:[%s6665_s0 + $0x2a4] sm:$0xf]  ;;  %v3631_v9 = vld [vmem:[%s6665_s0 + $0x2b0] sm:$0xf0] }
 0x142   :  { %1323 = vmatmul.bf16.gmra.mxu1 %v3586_v5 }
 0x143   :  { %1492 = vmatmul.bf16.gmra.mxu2 %v3590_v11  ;;  %v4827_v11 = vld [vmem:[%s6665_s0 + $0x284] sm:$0xf] }
 0x144   :  { %1661 = vmatmul.bf16.gmra.mxu3 %v3594_v12 }
 0x146   :  { %v1453_v20 = vpop.f32.mrf.mxu2  ;;  %v1117_v23 = vpop.f32.mrf.mxu0 }
 0x147   :  { %v1622_v21 = vpop.f32.mrf.mxu3  ;;  %v1454_v22 = vadd.f32 %v1453_v20, %v1285_v14  ;;  %v1286_v24 = vpop.f32.mrf.mxu1  ;;  %v3615_v14 = vld [vmem:[%s6665_s0 + $0x290] sm:$0xf0]  ;;  %v3621_v20 = vld [vmem:[%s6665_s0 + $0x288] sm:$0xf] }
 0x148   :  { %v1287_v25 = vadd.f32 %v1286_v24, %v1117_v23  ;;  %v4828_v23 = vld [vmem:[%s6665_s0 + $0x28c] sm:$0xf]  ;;  %v3623_v24 = vld [vmem:[%s6665_s0 + $0x298] sm:$0xf0]  ;;  %v3618_v32 = vor.u32 %v4827_v11, %v3615_v14  ;;  %v3637_v11 = vld [vmem:[%s6665_s0 + $0x2a8] sm:$0xf] }
 0x149   :  { %v5755_v26 = vadd.f32 %v1622_v21, %v1454_v22  ;;  %v4926_v21 = vld [vmem:[%s6666_s3 + $0x98] sm:$0xff]  ;;  %v3626_v39 = vor.u32 %v4828_v23, %v3623_v24 }
 0x14a   :  { %v4830_v22 = vld [vmem:[%s6665_s0 + $0x294] sm:$0xf0]  ;;  %2072 = vmatpush.bf16.msrb.mxu2 %v4926_v21  ;;  %v3639_v21 = vld [vmem:[%s6665_s0 + $0x2b8] sm:$0xf0] }
 0x14b   :  { %v3622_v38 = vor.u32 %v4830_v22, %v3621_v20  ;;  %v4834_v14 = vld [vmem:[%s6665_s0 + $0x2b4] sm:$0xf0]  ;;  %v4832_v20 = vld [vmem:[%s6665_s0 + $0x2ac] sm:$0xf] }
 0x14e   :  { %v1455_v45 = vpop.f32.mrf.mxu2  ;;  %v1120_v51 = vpop.f32.mrf.mxu0 }
 0x14f   :  { %v1624_v46 = vpop.f32.mrf.mxu3  ;;  %v1456_v50 = vadd.f32 %v1455_v45, %v1287_v25  ;;  %v1289_v53 = vpop.f32.mrf.mxu1 }
 0x150   :  { %v1290_v58 = vadd.f32 %v1289_v53, %v1120_v51  ;;  %v4910_v51 = vld [vmem:[%s6666_s3 + $0x18] sm:$0xff] }
 0x151   :  { %v5783_v59 = vadd.f32 %v1624_v46, %v1456_v50  ;;  %1159 = vmatmul.bf16.gmra.mxu0 %v3598_v47  ;;  %v4934_v50 = vld [vmem:[%s6666_s3 + $0xd8] sm:$0xff]  ;;  %1994 = vmatpush.bf16.msrb.mxu1 %v4910_v51 }
 0x152   :  { %1328 = vmatmul.bf16.gmra.mxu1 %v3602_v49  ;;  %v4918_v49 = vld [vmem:[%s6666_s3 + $0x58] sm:$0xff]  ;;  %2151 = vmatpush.bf16.msrb.mxu3 %v4934_v50 }
 0x153   :  { %1497 = vmatmul.bf16.gmra.mxu2 %v3606_v54  ;;  %1933 = vmatpush.bf16.msrb.mxu0 %v4918_v49 }
 0x154   :  { %1666 = vmatmul.bf16.gmra.mxu3 %v3610_v57 }
 0x156   :  { %v1458_v61 = vpop.f32.mrf.mxu2  ;;  %v1122_v3 = vpop.f32.mrf.mxu0 }
 0x157   :  { %v1627_v62 = vpop.f32.mrf.mxu3  ;;  %v1459_v63 = vadd.f32 %v1458_v61, %v1290_v58  ;;  %v1291_v4 = vpop.f32.mrf.mxu1 }
 0x158   :  { %v1292_v5 = vadd.f32 %v1291_v4, %v1122_v3  ;;  %v3629_v3 = vld [vmem:[%s6665_s0 + $0x2a0] sm:$0xf]  ;;  %v4833_v4 = vld [vmem:[%s6665_s0 + $0x2ac] sm:$0xf0] }
 0x159   :  { %v5787_v6 = vadd.f32 %v1627_v62, %v1459_v63  ;;  %v3630_v24 = vor.u32 %v4833_v4, %v3629_v3  ;;  %v4835_v3 = vld [vmem:[%s6665_s0 + $0x2c4] sm:$0xf]  ;;  %v3647_v4 = vld [vmem:[%s6665_s0 + $0x2d0] sm:$0xf0] }
 0x15e   :  { %v1460_v25 = vpop.f32.mrf.mxu2  ;;  %v1125_v35 = vpop.f32.mrf.mxu0 }
 0x15f   :  { %v1629_v27 = vpop.f32.mrf.mxu3  ;;  %v1461_v33 = vadd.f32 %v1460_v25, %v1292_v5  ;;  %v1294_v36 = vpop.f32.mrf.mxu1  ;;  %v3634_v25 = vor.u32 %v4831_v7, %v3631_v9  ;;  %v3653_v7 = vld [vmem:[%s6665_s0 + $0x2c8] sm:$0xf]  ;;  %v4838_v9 = vld [vmem:[%s6665_s0 + $0x2d4] sm:$0xf0] }
 0x160   :  { %v1295_v45 = vadd.f32 %v1294_v36, %v1125_v35  ;;  %v3642_v35 = vor.u32 %v4832_v20, %v3639_v21 }
 0x161   :  { %v5818_v46 = vadd.f32 %v1629_v27, %v1461_v33  ;;  %1164 = vmatmul.bf16.gmra.mxu0 %v3614_v28  ;;  %v3638_v33 = vor.u32 %v4834_v14, %v3637_v11  ;;  %v4836_v11 = vld [vmem:[%s6665_s0 + $0x2cc] sm:$0xf]  ;;  %v3655_v14 = vld [vmem:[%s6665_s0 + $0x2d8] sm:$0xf0] }
 0x162   :  { %1333 = vmatmul.bf16.gmra.mxu1 %v3618_v32 }
 0x163   :  { %1502 = vmatmul.bf16.gmra.mxu2 %v3622_v38 }
 0x164   :  { %1671 = vmatmul.bf16.gmra.mxu3 %v3626_v39 }
 0x166   :  { %v1463_v53 = vpop.f32.mrf.mxu2  ;;  %v1127_v58 = vpop.f32.mrf.mxu0 }
 0x167   :  { %v1632_v54 = vpop.f32.mrf.mxu3  ;;  %v1464_v57 = vadd.f32 %v1463_v53, %v1295_v45  ;;  %v1296_v61 = vpop.f32.mrf.mxu1 }
 0x168   :  { %v1297_v62 = vadd.f32 %v1296_v61, %v1127_v58  ;;  %v3645_v58 = vld [vmem:[%s6665_s0 + $0x2c0] sm:$0xf]  ;;  %v4837_v61 = vld [vmem:[%s6665_s0 + $0x2cc] sm:$0xf0] }
 0x169   :  { %v5831_v63 = vadd.f32 %v1632_v54, %v1464_v57 }
 0x16e   :  { %v1465_v22 = vpop.f32.mrf.mxu2  ;;  %v1130_v28 = vpop.f32.mrf.mxu0 }
 0x16f   :  { %v1634_v23 = vpop.f32.mrf.mxu3  ;;  %v1466_v27 = vadd.f32 %v1465_v22, %v1297_v62  ;;  %v1299_v32 = vpop.f32.mrf.mxu1  ;;  %v3646_v22 = vor.u32 %v4837_v61, %v3645_v58  ;;  %v3661_v61 = vld [vmem:[%s6665_s0 + $0x2e0] sm:$0xf] }
 0x170   :  { %v1300_v36 = vadd.f32 %v1299_v32, %v1130_v28  ;;  %v3654_v28 = vor.u32 %v4838_v9, %v3653_v7  ;;  %v3658_v32 = vor.u32 %v4836_v11, %v3655_v14  ;;  %v4839_v7 = vld [vmem:[%s6665_s0 + $0x2e4] sm:$0xf]  ;;  %v3663_v9 = vld [vmem:[%s6665_s0 + $0x2f0] sm:$0xf0]  ;;  %v3669_v11 = vld [vmem:[%s6665_s0 + $0x2e8] sm:$0xf] }
 0x171   :  { %v5859_v38 = vadd.f32 %v1634_v23, %v1466_v27  ;;  %1169 = vmatmul.bf16.gmra.mxu0 %v3630_v24  ;;  %v3650_v23 = vor.u32 %v4835_v3, %v3647_v4  ;;  %v4841_v3 = vld [vmem:[%s6665_s0 + $0x2ec] sm:$0xf0]  ;;  %v4842_v14 = vld [vmem:[%s6665_s0 + $0x2f4] sm:$0xf0] }
 0x172   :  { %1338 = vmatmul.bf16.gmra.mxu1 %v3634_v25 }
 0x173   :  { %1507 = vmatmul.bf16.gmra.mxu2 %v3638_v33 }
 0x174   :  { %1676 = vmatmul.bf16.gmra.mxu3 %v3642_v35 }
 0x176   :  { %v1468_v45 = vpop.f32.mrf.mxu2  ;;  %v1132_v51 = vpop.f32.mrf.mxu0 }
 0x177   :  { %v1637_v49 = vpop.f32.mrf.mxu3  ;;  %v1469_v50 = vadd.f32 %v1468_v45, %v1300_v36  ;;  %v1301_v53 = vpop.f32.mrf.mxu1 }
 0x178   :  { %v1302_v54 = vadd.f32 %v1301_v53, %v1132_v51 }
 0x179   :  { %v5863_v57 = vadd.f32 %v1637_v49, %v1469_v50 }
 0x17e   :  { %v1470_v20 = vpop.f32.mrf.mxu2  ;;  %v1135_v25 = vpop.f32.mrf.mxu0 }
 0x17f   :  { %v1639_v21 = vpop.f32.mrf.mxu3  ;;  %v1471_v24 = vadd.f32 %v1470_v20, %v1302_v54  ;;  %v1304_v27 = vpop.f32.mrf.mxu1  ;;  %v4840_v20 = vld [vmem:[%s6665_s0 + $0x2ec] sm:$0xf] }
 0x180   :  { %v1305_v33 = vadd.f32 %v1304_v27, %v1135_v25  ;;  %v3666_v25 = vor.u32 %v4839_v7, %v3663_v9  ;;  %v4925_v9 = vld [vmem:[%s6666_s3 + $0x90] sm:$0xff] }
 0x181   :  { %v5891_v35 = vadd.f32 %v1639_v21, %v1471_v24  ;;  %1174 = vmatmul.bf16.gmra.mxu0 %v3646_v22  ;;  %v3671_v21 = vld [vmem:[%s6665_s0 + $0x2f8] sm:$0xf0]  ;;  %v3662_v24 = vor.u32 %v4841_v3, %v3661_v61  ;;  %2073 = vmatpush.bf16.msrb.mxu2 %v4925_v9 }
 0x182   :  { %1343 = vmatmul.bf16.gmra.mxu1 %v3650_v23 }
 0x183   :  { %1512 = vmatmul.bf16.gmra.mxu2 %v3654_v28 }
 0x184   :  { %1681 = vmatmul.bf16.gmra.mxu3 %v3658_v32 }
 0x186   :  { %v1473_v45 = vpop.f32.mrf.mxu2  ;;  %v1137_v51 = vpop.f32.mrf.mxu0 }
 0x187   :  { %v1642_v49 = vpop.f32.mrf.mxu3  ;;  %v1474_v50 = vadd.f32 %v1473_v45, %v1305_v33  ;;  %v1306_v53 = vpop.f32.mrf.mxu1  ;;  %v3670_v33 = vor.u32 %v4842_v14, %v3669_v11  ;;  %v3674_v45 = vor.u32 %v4840_v20, %v3671_v21  ;;  %v3677_v11 = vld [vmem:[%s6665_s0 + $0x300] sm:$0xf]  ;;  %v4845_v14 = vld [vmem:[%s6665_s0 + $0x30c] sm:$0xf0]  ;;  %v3685_v21 = vld [vmem:[%s6665_s0 + $0x308] sm:$0xf] }
 0x188   :  { %v1307_v54 = vadd.f32 %v1306_v53, %v1137_v51  ;;  %v4917_v20 = vld [vmem:[%s6666_s3 + $0x50] sm:$0xff] }
 0x189   :  { %v5895_v58 = vadd.f32 %v1642_v49, %v1474_v50  ;;  %v4933_v51 = vld [vmem:[%s6666_s3 + $0xd0] sm:$0xff]  ;;  %1934 = vmatpush.bf16.msrb.mxu0 %v4917_v20 }
 0x18a   :  { %2152 = vmatpush.bf16.msrb.mxu3 %v4933_v51  ;;  %v4847_v51 = vld [vmem:[%s6665_s0 + $0x324] sm:$0xf]  ;;  %v3695_v20 = vld [vmem:[%s6665_s0 + $0x330] sm:$0xf0] }
 0x18b   :  { %6684 = vst [vmem:[#allocation5_spill] sm:$0xff] %v5895_v58 }
 0x18e   :  { %v1475_v22 = vpop.f32.mrf.mxu2  ;;  %v1140_v28 = vpop.f32.mrf.mxu0 }
 0x18f   :  { %v1644_v23 = vpop.f32.mrf.mxu3  ;;  %v1476_v27 = vadd.f32 %v1475_v22, %v1307_v54  ;;  %v1309_v32 = vpop.f32.mrf.mxu1  ;;  %v4846_v22 = vld [vmem:[%s6665_s0 + $0x314] sm:$0xf0] }
 0x190   :  { %v1310_v49 = vadd.f32 %v1309_v32, %v1140_v28  ;;  %v3678_v28 = vor.u32 %v4845_v14, %v3677_v11  ;;  %v4909_v11 = vld [vmem:[%s6666_s3 + $0x10] sm:$0xff] }
 0x191   :  { %v5923_v50 = vadd.f32 %v1644_v23, %v1476_v27  ;;  %1179 = vmatmul.bf16.gmra.mxu0 %v3662_v24  ;;  %v4844_v23 = vld [vmem:[%s6665_s0 + $0x30c] sm:$0xf]  ;;  %v3687_v24 = vld [vmem:[%s6665_s0 + $0x318] sm:$0xf0]  ;;  %1995 = vmatpush.bf16.msrb.mxu1 %v4909_v11 }
 0x192   :  { %1348 = vmatmul.bf16.gmra.mxu1 %v3666_v25 }
 0x193   :  { %6685 = vst [vmem:[#allocation6_spill] sm:$0xff] %v5923_v50  ;;  %1517 = vmatmul.bf16.gmra.mxu2 %v3670_v33 }
 0x194   :  { %1686 = vmatmul.bf16.gmra.mxu3 %v3674_v45 }
 0x196   :  { %v1478_v53 = vpop.f32.mrf.mxu2  ;;  %v1142_v61 = vpop.f32.mrf.mxu0 }
 0x197   :  { %v1647_v4 = vpop.f32.mrf.mxu3  ;;  %v1479_v36 = vadd.f32 %v1478_v53, %v1310_v49  ;;  %v1311_v3 = vpop.f32.mrf.mxu1  ;;  %v3686_v53 = vor.u32 %v4846_v22, %v3685_v21 }
 0x198   :  { %v1312_v54 = vadd.f32 %v1311_v3, %v1142_v61  ;;  %v3690_v61 = vor.u32 %v4844_v23, %v3687_v24 }
 0x199   :  { %v5927_v7 = vadd.f32 %v1647_v4, %v1479_v36  ;;  %v4843_v36 = vld [vmem:[%s6665_s0 + $0x304] sm:$0xf]  ;;  %v3679_v4 = vld [vmem:[%s6665_s0 + $0x310] sm:$0xf0] }
 0x19a   :  { %v3682_v32 = vor.u32 %v4843_v36, %v3679_v4 }
 0x19b   :  { %6686 = vst [vmem:[#allocation7_spill] sm:$0xff] %v5927_v7 }
 0x19e   :  { %v1480_v25 = vpop.f32.mrf.mxu2  ;;  %v1145_v45 = vpop.f32.mrf.mxu0 }
 0x19f   :  { %v1649_v27 = vpop.f32.mrf.mxu3  ;;  %v1481_v33 = vadd.f32 %v1480_v25, %v1312_v54  ;;  %v1314_v49 = vpop.f32.mrf.mxu1  ;;  %v3693_v25 = vld [vmem:[%s6665_s0 + $0x320] sm:$0xf] }
 0x1a0   :  { %v1315_v3 = vadd.f32 %v1314_v49, %v1145_v45  ;;  %v3703_v45 = vld [vmem:[%s6665_s0 + $0x338] sm:$0xf0] }
 0x1a1   :  { %v5958_v9 = vadd.f32 %v1649_v27, %v1481_v33  ;;  %1184 = vmatmul.bf16.gmra.mxu0 %v3678_v28  ;;  %v4849_v27 = vld [vmem:[%s6665_s0 + $0x32c] sm:$0xf0]  ;;  %v3701_v28 = vld [vmem:[%s6665_s0 + $0x328] sm:$0xf]  ;;  %v4848_v33 = vld [vmem:[%s6665_s0 + $0x32c] sm:$0xf] }
 0x1a2   :  { %1353 = vmatmul.bf16.gmra.mxu1 %v3682_v32  ;;  %v4850_v32 = vld [vmem:[%s6665_s0 + $0x334] sm:$0xf0] }
 0x1a3   :  { %6687 = vst [vmem:[#allocation8_spill] sm:$0xff] %v5958_v9  ;;  %1522 = vmatmul.bf16.gmra.mxu2 %v3686_v53 }
 0x1a4   :  { %1691 = vmatmul.bf16.gmra.mxu3 %v3690_v61  ;;  %v3694_v61 = vor.u32 %v4849_v27, %v3693_v25  ;;  %v4853_v27 = vld [vmem:[%s6665_s0 + $0x34c] sm:$0xf0] }
 0x1a6   :  { %v1483_v14 = vpop.f32.mrf.mxu2  ;;  %v1147_v21 = vpop.f32.mrf.mxu0 }
 0x1a7   :  { %v1652_v36 = vpop.f32.mrf.mxu3  ;;  %v1484_v4 = vadd.f32 %v1483_v14, %v1315_v3  ;;  %v1316_v22 = vpop.f32.mrf.mxu1  ;;  %v3698_v3 = vor.u32 %v4847_v51, %v3695_v20  ;;  %v4851_v51 = vld [vmem:[%s6665_s0 + $0x344] sm:$0xf] }
 0x1a8   :  { %v1317_v23 = vadd.f32 %v1316_v22, %v1147_v21  ;;  %v3706_v21 = vor.u32 %v4848_v33, %v3703_v45 }
 0x1a9   :  { %v5971_v24 = vadd.f32 %v1652_v36, %v1484_v4  ;;  %v3702_v4 = vor.u32 %v4850_v32, %v3701_v28 }
 0x1ae   :  { %v1485_v49 = vpop.f32.mrf.mxu2  ;;  %v1150_v14 = vpop.f32.mrf.mxu0 }
 0x1af   :  { %v1654_v53 = vpop.f32.mrf.mxu3  ;;  %v1486_v11 = vadd.f32 %v1485_v49, %v1317_v23  ;;  %v1319_v36 = vpop.f32.mrf.mxu1  ;;  %v3709_v23 = vld [vmem:[%s6665_s0 + $0x340] sm:$0xf] }
 0x1b0   :  { %v1320_v22 = vadd.f32 %v1319_v36, %v1150_v14  ;;  %v3710_v32 = vor.u32 %v4853_v27, %v3709_v23  ;;  %v4857_v27 = vld [vmem:[%s6665_s0 + $0x36c] sm:$0xf0] }
 0x1b1   :  { %v5997_v54 = vadd.f32 %v1654_v53, %v1486_v11  ;;  %1189 = vmatmul.bf16.gmra.mxu0 %v3694_v61 }
 0x1b2   :  { %1358 = vmatmul.bf16.gmra.mxu1 %v3698_v3 }
 0x1b3   :  { %1527 = vmatmul.bf16.gmra.mxu2 %v3702_v4 }
 0x1b4   :  { %1696 = vmatmul.bf16.gmra.mxu3 %v3706_v21 }
 0x1b6   :  { %v1488_v62 = vpop.f32.mrf.mxu2  ;;  %v1152_v47 = vpop.f32.mrf.mxu0 }
 0x1b7   :  { %v1657_v39 = vpop.f32.mrf.mxu3  ;;  %v1489_v5 = vadd.f32 %v1488_v62, %v1320_v22  ;;  %v1321_v12 = vpop.f32.mrf.mxu1  ;;  %v3711_v62 = vld [vmem:[%s6665_s0 + $0x350] sm:$0xf0] }
 0x1b8   :  { %v1322_v60 = vadd.f32 %v1321_v12, %v1152_v47  ;;  %v3717_v12 = vld [vmem:[%s6665_s0 + $0x348] sm:$0xf]  ;;  %v4854_v47 = vld [vmem:[%s6665_s0 + $0x354] sm:$0xf0]  ;;  %v3714_v33 = vor.u32 %v4851_v51, %v3711_v62  ;;  %v4855_v51 = vld [vmem:[%s6665_s0 + $0x364] sm:$0xf] }
 0x1b9   :  { %v5999_v25 = vadd.f32 %v1657_v39, %v1489_v5  ;;  %v4852_v5 = vld [vmem:[%s6665_s0 + $0x34c] sm:$0xf]  ;;  %v3719_v39 = vld [vmem:[%s6665_s0 + $0x358] sm:$0xf0]  ;;  %v3718_v61 = vor.u32 %v4854_v47, %v3717_v12  ;;  %v3727_v62 = vld [vmem:[%s6665_s0 + $0x370] sm:$0xf0] }
 0x1ba   :  { %v3722_v3 = vor.u32 %v4852_v5, %v3719_v39  ;;  %v4858_v12 = vld [vmem:[%s6665_s0 + $0x374] sm:$0xf0]  ;;  %v4856_v47 = vld [vmem:[%s6665_s0 + $0x36c] sm:$0xf]  ;;  %v3735_v5 = vld [vmem:[%s6665_s0 + $0x378] sm:$0xf0] }
 0x1be   :  { %v1490_v20 = vpop.f32.mrf.mxu2  ;;  %v1155_v49 = vpop.f32.mrf.mxu0 }
 0x1bf   :  { %v1659_v28 = vpop.f32.mrf.mxu3  ;;  %v1491_v45 = vadd.f32 %v1490_v20, %v1322_v60  ;;  %v1324_v53 = vpop.f32.mrf.mxu1  ;;  %v3725_v60 = vld [vmem:[%s6665_s0 + $0x360] sm:$0xf] }
 0x1c0   :  { %v1325_v11 = vadd.f32 %v1324_v53, %v1155_v49 }
 0x1c1   :  { %v6025_v14 = vadd.f32 %v1659_v28, %v1491_v45  ;;  %1194 = vmatmul.bf16.gmra.mxu0 %v3710_v32  ;;  %v3726_v28 = vor.u32 %v4857_v27, %v3725_v60  ;;  %v3730_v32 = vor.u32 %v4855_v51, %v3727_v62  ;;  %v3741_v27 = vld [vmem:[%s6665_s0 + $0x380] sm:$0xf]  ;;  %v4861_v51 = vld [vmem:[%s6665_s0 + $0x38c] sm:$0xf0]  ;;  %v4859_v62 = vld [vmem:[%s6665_s0 + $0x384] sm:$0xf] }
 0x1c2   :  { %1363 = vmatmul.bf16.gmra.mxu1 %v3714_v33 }
 0x1c3   :  { %1532 = vmatmul.bf16.gmra.mxu2 %v3718_v61  ;;  %v3738_v61 = vor.u32 %v4856_v47, %v3735_v5  ;;  %v4860_v47 = vld [vmem:[%s6665_s0 + $0x38c] sm:$0xf]  ;;  %v3751_v5 = vld [vmem:[%s6665_s0 + $0x398] sm:$0xf0] }
 0x1c4   :  { %1701 = vmatmul.bf16.gmra.mxu3 %v3722_v3 }
 0x1c6   :  { %v1493_v36 = vpop.f32.mrf.mxu2  ;;  %v1157_v22 = vpop.f32.mrf.mxu0 }
 0x1c7   :  { %v1662_v4 = vpop.f32.mrf.mxu3  ;;  %v1494_v21 = vadd.f32 %v1493_v36, %v1325_v11  ;;  %v1326_v30 = vpop.f32.mrf.mxu1 }
 0x1c8   :  { %v1327_v18 = vadd.f32 %v1326_v30, %v1157_v22  ;;  %v3733_v30 = vld [vmem:[%s6665_s0 + $0x368] sm:$0xf] }
 0x1c9   :  { %v6027_v23 = vadd.f32 %v1662_v4, %v1494_v21  ;;  %v3734_v53 = vor.u32 %v4858_v12, %v3733_v30  ;;  %v3749_v30 = vld [vmem:[%s6665_s0 + $0x388] sm:$0xf]  ;;  %v4862_v12 = vld [vmem:[%s6665_s0 + $0x394] sm:$0xf0] }
 0x1ce   :  { %v1495_v39 = vpop.f32.mrf.mxu2  ;;  %v1160_v45 = vpop.f32.mrf.mxu0 }
 0x1cf   :  { %v1664_v20 = vpop.f32.mrf.mxu3  ;;  %v1496_v33 = vadd.f32 %v1495_v39, %v1327_v18  ;;  %v1329_v49 = vpop.f32.mrf.mxu1  ;;  %v4924_v18 = vld [vmem:[%s6666_s3 + $0x88] sm:$0xff] }
 0x1d0   :  { %v1330_v3 = vadd.f32 %v1329_v49, %v1160_v45  ;;  %2074 = vmatpush.bf16.msrb.mxu2 %v4924_v18 }
 0x1d1   :  { %v6053_v11 = vadd.f32 %v1664_v20, %v1496_v33  ;;  %1199 = vmatmul.bf16.gmra.mxu0 %v3726_v28  ;;  %v3742_v28 = vor.u32 %v4861_v51, %v3741_v27 }
 0x1d2   :  { %1368 = vmatmul.bf16.gmra.mxu1 %v3730_v32 }
 0x1d3   :  { %1537 = vmatmul.bf16.gmra.mxu2 %v3734_v53  ;;  %v3750_v53 = vor.u32 %v4862_v12, %v3749_v30  ;;  %v3757_v30 = vld [vmem:[%s6665_s0 + $0x3a0] sm:$0xf]  ;;  %v4865_v12 = vld [vmem:[%s6665_s0 + $0x3ac] sm:$0xf0] }
 0x1d4   :  { %1706 = vmatmul.bf16.gmra.mxu3 %v3738_v61  ;;  %v3754_v61 = vor.u32 %v4860_v47, %v3751_v5  ;;  %v4863_v47 = vld [vmem:[%s6665_s0 + $0x3a4] sm:$0xf]  ;;  %v3759_v5 = vld [vmem:[%s6665_s0 + $0x3b0] sm:$0xf0] }
 0x1d6   :  { %v1498_v36 = vpop.f32.mrf.mxu2  ;;  %v1162_v22 = vpop.f32.mrf.mxu0 }
 0x1d7   :  { %v1667_v4 = vpop.f32.mrf.mxu3  ;;  %v1499_v21 = vadd.f32 %v1498_v36, %v1330_v3  ;;  %v1331_v56 = vpop.f32.mrf.mxu1 }
 0x1d8   :  { %v1332_v43 = vadd.f32 %v1331_v56, %v1162_v22  ;;  %v3743_v56 = vld [vmem:[%s6665_s0 + $0x390] sm:$0xf0]  ;;  %v4908_v22 = vld [vmem:[%s6666_s3 + $0x8] sm:$0xff] }
 0x1d9   :  { %v6055_v60 = vadd.f32 %v1667_v4, %v1499_v21  ;;  %v3746_v32 = vor.u32 %v4859_v62, %v3743_v56  ;;  %v4916_v4 = vld [vmem:[%s6666_s3 + $0x48] sm:$0xff]  ;;  %1996 = vmatpush.bf16.msrb.mxu1 %v4908_v22 }
 0x1da   :  { %v4932_v21 = vld [vmem:[%s6666_s3 + $0xc8] sm:$0xff]  ;;  %1935 = vmatpush.bf16.msrb.mxu0 %v4916_v4 }
 0x1db   :  { %2153 = vmatpush.bf16.msrb.mxu3 %v4932_v21 }
 0x1de   :  { %v1500_v39 = vpop.f32.mrf.mxu2  ;;  %v1165_v45 = vpop.f32.mrf.mxu0 }
 0x1df   :  { %v1669_v20 = vpop.f32.mrf.mxu3  ;;  %v1501_v33 = vadd.f32 %v1500_v39, %v1332_v43  ;;  %v1334_v49 = vpop.f32.mrf.mxu1  ;;  %v3765_v39 = vld [vmem:[%s6665_s0 + $0x3a8] sm:$0xf] }
 0x1e0   :  { %v1335_v3 = vadd.f32 %v1334_v49, %v1165_v45  ;;  %v3758_v49 = vor.u32 %v4865_v12, %v3757_v30  ;;  %v3773_v30 = vld [vmem:[%s6665_s0 + $0x3c0] sm:$0xf]  ;;  %v4869_v12 = vld [vmem:[%s6665_s0 + $0x3cc] sm:$0xf0] }
 0x1e1   :  { %v6084_v36 = vadd.f32 %v1669_v20, %v1501_v33  ;;  %1204 = vmatmul.bf16.gmra.mxu0 %v3742_v28  ;;  %v4866_v20 = vld [vmem:[%s6665_s0 + $0x3b4] sm:$0xf0]  ;;  %v4864_v28 = vld [vmem:[%s6665_s0 + $0x3ac] sm:$0xf] }
 0x1e2   :  { %1373 = vmatmul.bf16.gmra.mxu1 %v3746_v32  ;;  %v3767_v32 = vld [vmem:[%s6665_s0 + $0x3b8] sm:$0xf0]  ;;  %v3766_v4 = vor.u32 %v4866_v20, %v3765_v39  ;;  %v3781_v39 = vld [vmem:[%s6665_s0 + $0x3c8] sm:$0xf]  ;;  %v4870_v20 = vld [vmem:[%s6665_s0 + $0x3d4] sm:$0xf0] }
 0x1e3   :  { %1542 = vmatmul.bf16.gmra.mxu2 %v3750_v53  ;;  %v3762_v53 = vor.u32 %v4863_v47, %v3759_v5  ;;  %v3770_v21 = vor.u32 %v4864_v28, %v3767_v32  ;;  %v4867_v47 = vld [vmem:[%s6665_s0 + $0x3c4] sm:$0xf]  ;;  %v3775_v5 = vld [vmem:[%s6665_s0 + $0x3d0] sm:$0xf0]  ;;  %v4868_v28 = vld [vmem:[%s6665_s0 + $0x3cc] sm:$0xf] }
 0x1e4   :  { %1711 = vmatmul.bf16.gmra.mxu3 %v3754_v61  ;;  %v3783_v32 = vld [vmem:[%s6665_s0 + $0x3d8] sm:$0xf0] }
 0x1e6   :  { %v1503_v43 = vpop.f32.mrf.mxu2  ;;  %v6095_v51 = vpop.f32.mrf.mxu0 }
 0x1e7   :  { %v1672_v18 = vpop.f32.mrf.mxu3  ;;  %v1504_v27 = vadd.f32 %v1503_v43, %v1335_v3  ;;  %v6097_v62 = vpop.f32.mrf.mxu1 }
 0x1e9   :  { %v6099_v56 = vadd.f32 %v1672_v18, %v1504_v27 }
 0x1ee   :  { %v6125_v33 = vpop.f32.mrf.mxu2  ;;  %v1170_v61 = vpop.f32.mrf.mxu0 }
 0x1ef   :  { %v6127_v45 = vpop.f32.mrf.mxu3  ;;  %v1339_v3 = vpop.f32.mrf.mxu1 }
 0x1f0   :  { %v1340_v22 = vadd.f32 %v1339_v3, %v1170_v61  ;;  %v3774_v61 = vor.u32 %v4869_v12, %v3773_v30  ;;  %v3778_v3 = vor.u32 %v4867_v47, %v3775_v5  ;;  %v3789_v30 = vld [vmem:[%s6665_s0 + $0x3e0] sm:$0xf]  ;;  %v4873_v12 = vld [vmem:[%s6665_s0 + $0x3ec] sm:$0xf0]  ;;  %v4871_v47 = vld [vmem:[%s6665_s0 + $0x3e4] sm:$0xf] }
 0x1f1   :  { %1209 = vmatmul.bf16.gmra.mxu0 %v3758_v49  ;;  %v3791_v5 = vld [vmem:[%s6665_s0 + $0x3f0] sm:$0xf0] }
 0x1f2   :  { %1378 = vmatmul.bf16.gmra.mxu1 %v3762_v53 }
 0x1f3   :  { %1547 = vmatmul.bf16.gmra.mxu2 %v3766_v4 }
 0x1f4   :  { %1716 = vmatmul.bf16.gmra.mxu3 %v3770_v21 }
 0x1f6   :  { %v1508_v43 = vpop.f32.mrf.mxu2  ;;  %v6129_v19 = vpop.f32.mrf.mxu0 }
 0x1f7   :  { %v1677_v18 = vpop.f32.mrf.mxu3  ;;  %v1509_v27 = vadd.f32 %v1508_v43, %v1340_v22  ;;  %v6131_v9 = vpop.f32.mrf.mxu1  ;;  %v3782_v22 = vor.u32 %v4870_v20, %v3781_v39  ;;  %v3786_v43 = vor.u32 %v4868_v28, %v3783_v32  ;;  %v4872_v39 = vld [vmem:[%s6665_s0 + $0x3ec] sm:$0xf]  ;;  %v3799_v20 = vld [vmem:[%s6665_s0 + $0x3f8] sm:$0xf0] }
 0x1f9   :  { %v6133_v1 = vadd.f32 %v1677_v18, %v1509_v27 }
 0x1fe   :  { %v6159_v49 = vpop.f32.mrf.mxu2  ;;  %v1175_v4 = vpop.f32.mrf.mxu0 }
 0x1ff   :  { %v6161_v53 = vpop.f32.mrf.mxu3  ;;  %v1344_v21 = vpop.f32.mrf.mxu1 }
 0x200   :  { %v1345_v18 = vadd.f32 %v1344_v21, %v1175_v4 }
 0x201   :  { %1214 = vmatmul.bf16.gmra.mxu0 %v3774_v61  ;;  %v3790_v61 = vor.u32 %v4873_v12, %v3789_v30 }
 0x202   :  { %1383 = vmatmul.bf16.gmra.mxu1 %v3778_v3  ;;  %v3794_v3 = vor.u32 %v4871_v47, %v3791_v5  ;;  %v4946_v47 = vld [vmem:[%s6666_s3 + $0x138] sm:$0xff] }
 0x203   :  { %1552 = vmatmul.bf16.gmra.mxu2 %v3782_v22 }
 0x204   :  { %1721 = vmatmul.bf16.gmra.mxu3 %v3786_v43  ;;  %v3802_v43 = vor.u32 %v4872_v39, %v3799_v20  ;;  %v4945_v20 = vld [vmem:[%s6666_s3 + $0x130] sm:$0xff] }
 0x206   :  { %v1513_v27 = vpop.f32.mrf.mxu2  ;;  %v6163_v50 = vpop.f32.mrf.mxu0 }
 0x207   :  { %v1682_v7 = vpop.f32.mrf.mxu3  ;;  %v1514_v40 = vadd.f32 %v1513_v27, %v1345_v18  ;;  %v6165_v31 = vpop.f32.mrf.mxu1  ;;  %v4907_v27 = vld [vmem:[%s6666_s3] sm:$0xff] }
 0x208   :  { %1997 = vmatpush.bf16.msrb.mxu1 %v4907_v27  ;;  %v4953_v27 = vld [vmem:[%s6666_s3 + $0x170] sm:$0xff] }
 0x209   :  { %v6167_v58 = vadd.f32 %v1682_v7, %v1514_v40  ;;  %v3797_v40 = vld [vmem:[%s6665_s0 + $0x3e8] sm:$0xf]  ;;  %v4874_v7 = vld [vmem:[%s6665_s0 + $0x3f4] sm:$0xf0] }
 0x20a   :  { %v3798_v22 = vor.u32 %v4874_v7, %v3797_v40 }
 0x20e   :  { %v6193_v28 = vpop.f32.mrf.mxu2  ;;  %v1180_v4 = vpop.f32.mrf.mxu0 }
 0x20f   :  { %v6195_v32 = vpop.f32.mrf.mxu3  ;;  %v1349_v21 = vpop.f32.mrf.mxu1 }
 0x210   :  { %6688 = vst [vmem:[#allocation9_spill] sm:$0xff] %v6195_v32  ;;  %v1350_v18 = vadd.f32 %v1349_v21, %v1180_v4  ;;  %v4915_v32 = vld [vmem:[%s6666_s3 + $0x40] sm:$0xff]  ;;  %v4944_v4 = vld [vmem:[%s6666_s3 + $0x128] sm:$0xff] }
 0x211   :  { %1219 = vmatmul.bf16.gmra.mxu0 %v3790_v61 }
 0x212   :  { %1388 = vmatmul.bf16.gmra.mxu1 %v3794_v3  ;;  %1936 = vmatpush.bf16.msrb.mxu0 %v4915_v32  ;;  %v4954_v32 = vld [vmem:[%s6666_s3 + $0x178] sm:$0xff] }
 0x213   :  { %1557 = vmatmul.bf16.gmra.mxu2 %v3798_v22  ;;  %2305 = vmatpush.bf16.msra.mxu1 %v4954_v32 }
 0x214   :  { %1726 = vmatmul.bf16.gmra.mxu3 %v3802_v43  ;;  %v4923_v43 = vld [vmem:[%s6666_s3 + $0x80] sm:$0xff] }
 0x215   :  { %2075 = vmatpush.bf16.msrb.mxu2 %v4923_v43  ;;  %v4931_v43 = vld [vmem:[%s6666_s3 + $0xc0] sm:$0xff] }
 0x216   :  { %v1518_v30 = vpop.f32.mrf.mxu2  ;;  %v6206_v40 = vpop.f32.mrf.mxu0  ;;  %2226 = vmatpush.bf16.msra.mxu0 %v4946_v47  ;;  %2154 = vmatpush.bf16.msrb.mxu3 %v4931_v43  ;;  %v4960_v43 = vld [vmem:[%s6666_s3 + $0x1a8] sm:$0xff] }
 0x217   :  { %v1687_v12 = vpop.f32.mrf.mxu3  ;;  %v1519_v5 = vadd.f32 %v1518_v30, %v1350_v18  ;;  %v6208_v7 = vpop.f32.mrf.mxu1  ;;  %v4943_v18 = vld [vmem:[%s6666_s3 + $0x120] sm:$0xff]  ;;  %2306 = vmatpush.bf16.msra.mxu1 %v4953_v27 }
 0x218   :  { %v4951_v27 = vld [vmem:[%s6666_s3 + $0x160] sm:$0xff] }
 0x219   :  { %v6210_v39 = vadd.f32 %v1687_v12, %v1519_v5  ;;  %v4942_v5 = vld [vmem:[%s6666_s3 + $0x118] sm:$0xff] }
 0x21a   :  { %2227 = vmatpush.bf16.msra.mxu0 %v4945_v20  ;;  %v4952_v20 = vld [vmem:[%s6666_s3 + $0x168] sm:$0xff] }
 0x21b   :  { %6689 = vst [vmem:[#allocation10_spill] sm:$0xff] %v6210_v39  ;;  %2307 = vmatpush.bf16.msra.mxu1 %v4952_v20 }
 0x21e   :  { %v6215_v61 = vpop.f32.mrf.mxu2  ;;  %v1185_v21 = vpop.f32.mrf.mxu0  ;;  %2228 = vmatpush.bf16.msra.mxu0 %v4944_v4  ;;  %v4962_v4 = vld [vmem:[%s6666_s3 + $0x1b8] sm:$0xff] }
 0x21f   :  { %6690 = vst [vmem:[#allocation11_spill] sm:$0xff] %v6215_v61  ;;  %v6217_v3 = vpop.f32.mrf.mxu3  ;;  %v1354_v22 = vpop.f32.mrf.mxu1  ;;  %2384 = vmatpush.bf16.msra.mxu2 %v4962_v4  ;;  %2308 = vmatpush.bf16.msra.mxu1 %v4951_v27 }
 0x220   :  { %6691 = vst [vmem:[#allocation12_spill] sm:$0xff] %v6217_v3  ;;  %v1355_v30 = vadd.f32 %v1354_v22, %v1185_v21 }
 0x222   :  { %2229 = vmatpush.bf16.msra.mxu0 %v4943_v18  ;;  %v4941_v18 = vld [vmem:[%s6666_s3 + $0x110] sm:$0xff] }
 0x226   :  { %v1523_v12 = vpop.f32.mrf.mxu2  ;;  %v1187_v3 = vpop.f32.mrf.mxu0  ;;  %2230 = vmatpush.bf16.msra.mxu0 %v4942_v5  ;;  %v6692_v5 = vmax.f32 %v5443_v29, %v5691_v15 }
 0x227   :  { %v1692_v47 = vpop.f32.mrf.mxu3  ;;  %v1524_v32 = vadd.f32 %v1523_v12, %v1355_v30  ;;  %v1356_v21 = vpop.f32.mrf.mxu1  ;;  %v4961_v30 = vld [vmem:[%s6666_s3 + $0x1b0] sm:$0xff] }
 0x228   :  { %v1357_v4 = vadd.f32 %v1356_v21, %v1187_v3  ;;  %2385 = vmatpush.bf16.msra.mxu2 %v4961_v30  ;;  %v4970_v21 = vld [vmem:[%s6666_s3 + $0x1f8] sm:$0xff] }
 0x229   :  { %v1693_v22 = vadd.f32 %v1692_v47, %v1524_v32  ;;  %v6259_v47 = vld [vmem:[%s6667_s2] ss:$0 sm:$0xff]  ;;  %2463 = vmatpush.bf16.msra.mxu3 %v4970_v21 }
 0x22a   :  { %2231 = vmatpush.bf16.msra.mxu0 %v4941_v18 }
 0x22b   :  { %v1748_v12 = vmax.f32 %v5971_v24, %v1693_v22  ;;  %v4940_v24 = vld [vmem:[%s6666_s3 + $0x108] sm:$0xff]  ;;  %v4950_v22 = vld [vmem:[%s6666_s3 + $0x158] sm:$0xff] }
 0x22c   :  { %2309 = vmatpush.bf16.msra.mxu1 %v4950_v22  ;;  %2386 = vmatpush.bf16.msra.mxu2 %v4960_v43  ;;  %v6693_v22 = vmax.f32 %v5469_v48, %v5719_v41 }
 0x22d   :  { %v1764_v20 = vmax.f32 %v6692_v5, %v1748_v12  ;;  %v4939_v12 = vld [vmem:[%s6666_s3 + $0x100] sm:$0xff]  ;;  %v4949_v5 = vld [vmem:[%s6666_s3 + $0x150] sm:$0xff] }
 0x22e   :  { %v1525_v32 = vpop.f32.mrf.mxu2  ;;  %v1190_v15 = vpop.f32.mrf.mxu0  ;;  %2232 = vmatpush.bf16.msra.mxu0 %v4940_v24 }
 0x22f   :  { %v1694_v61 = vpop.f32.mrf.mxu3  ;;  %v1784_v18 = vadd.f32 %v6259_v47, %v1764_v20  ;;  %v1526_v29 = vadd.f32 %v1525_v32, %v1357_v4  ;;  %v1359_v3 = vpop.f32.mrf.mxu1  ;;  %v4959_v20 = vld [vmem:[%s6666_s3 + $0x1a0] sm:$0xff] }
 0x230   :  { %v1360_v32 = vadd.f32 %v1359_v3, %v1190_v15  ;;  %2310 = vmatpush.bf16.msra.mxu1 %v4949_v5  ;;  %2387 = vmatpush.bf16.msra.mxu2 %v4959_v20  ;;  %v4968_v15 = vld [vmem:[%s6666_s3 + $0x1e8] sm:$0xff]  ;;  %v4947_v5 = vld [vmem:[%s6666_s3 + $0x140] sm:$0xff]  ;;  %v4957_v20 = vld [vmem:[%s6666_s3 + $0x190] sm:$0xff] }
 0x231   :  { %v1800_v27 = vmul.f32 0.01, %v1784_v18  ;;  %v1695_v30 = vadd.f32 %v1694_v61, %v1526_v29  ;;  %v4969_v61 = vld [vmem:[%s6666_s3 + $0x1f0] sm:$0xff] }
 0x232   :  { %2233 = vmatpush.bf16.msra.mxu0 %v4939_v12  ;;  %2464 = vmatpush.bf16.msra.mxu3 %v4969_v61  ;;  %v6694_v61 = vmax.f32 %v5471_v55, %v5723_v52 }
 0x233   :  { %v1749_v4 = vmax.f32 %v5997_v54, %v1695_v30  ;;  %v1816_v24 = vmax.f32 %v1784_v18, %v1800_v27  ;;  %v4948_v54 = vld [vmem:[%s6666_s3 + $0x148] sm:$0xff]  ;;  %v4958_v18 = vld [vmem:[%s6666_s3 + $0x198] sm:$0xff] }
 0x234   :  { %2311 = vmatpush.bf16.msra.mxu1 %v4948_v54  ;;  %2388 = vmatpush.bf16.msra.mxu2 %v4958_v18  ;;  %v4966_v18 = vld [vmem:[%s6666_s3 + $0x1d8] sm:$0xff] }
 0x235   :  { %v1765_v43 = vmax.f32 %v6693_v22, %v1749_v4  ;;  %v1832_v29 = vpack.c.bf16 %v1816_v24, %v1816_v24  ;;  %v4967_v4 = vld [vmem:[%s6666_s3 + $0x1e0] sm:$0xff] }
 0x236   :  { %v1528_v21 = vpop.f32.mrf.mxu2  ;;  %v1192_v3 = vpop.f32.mrf.mxu0  ;;  %2465 = vmatpush.bf16.msra.mxu3 %v4968_v15 }
 0x237   :  { %v1697_v39 = vpop.f32.mrf.mxu3  ;;  %v1785_v48 = vadd.f32 %v6259_v47, %v1765_v43  ;;  %v1529_v41 = vadd.f32 %v1528_v21, %v1360_v32  ;;  %1998 = vmatmul.bf16.vlgmr.msrb.gmra.mxu1 %v1832_v29  ;;  %v1361_v27 = vpop.f32.mrf.mxu1 }
 0x238   :  { %2312 = vmatpush.bf16.msra.mxu1 %v4947_v5  ;;  %v1362_v43 = vadd.f32 %v1361_v27, %v1192_v3  ;;  %2389 = vmatpush.bf16.msra.mxu2 %v4957_v20  ;;  %v4977_v3 = vld [vmem:[%s6666_s3 + $0x230] sm:$0xff] }
 0x239   :  { %v1801_v30 = vmul.f32 0.01, %v1785_v48  ;;  %v1698_v12 = vadd.f32 %v1697_v39, %v1529_v41  ;;  %v4978_v39 = vld [vmem:[%s6666_s3 + $0x238] sm:$0xff]  ;;  %v4965_v5 = vld [vmem:[%s6666_s3 + $0x1d0] sm:$0xff] }
 0x23a   :  { %2466 = vmatpush.bf16.msra.mxu3 %v4967_v4  ;;  %v4986_v41 = vld [vmem:[%s6666_s3 + $0x278] sm:$0xff] }
 0x23b   :  { %v1750_v32 = vmax.f32 %v5999_v25, %v1698_v12  ;;  %v1817_v24 = vmax.f32 %v1785_v48, %v1801_v30  ;;  %v4956_v25 = vld [vmem:[%s6666_s3 + $0x188] sm:$0xff]  ;;  %v4955_v12 = vld [vmem:[%s6666_s3 + $0x180] sm:$0xff] }
 0x23c   :  { %2390 = vmatpush.bf16.msra.mxu2 %v4956_v25  ;;  %2621 = vmatpush.bf16.msrb.mxu1 %v4986_v41  ;;  %v4963_v41 = vld [vmem:[%s6666_s3 + $0x1c0] sm:$0xff] }
 0x23d   :  { %v1766_v22 = vmax.f32 %v6694_v61, %v1750_v32  ;;  %v1833_v29 = vpack.c.bf16 %v1817_v24, %v1817_v24  ;;  %v4985_v24 = vld [vmem:[%s6666_s3 + $0x270] sm:$0xff]  ;;  %v6695_v61 = vmax.f32 %v5497_v10, %v5751_v16 }
 0x23e   :  { %v1530_v21 = vpop.f32.mrf.mxu2  ;;  %v1195_v55 = vpop.f32.mrf.mxu0  ;;  %2467 = vmatpush.bf16.msra.mxu3 %v4966_v18 }
 0x23f   :  { %v1699_v54 = vpop.f32.mrf.mxu3  ;;  %v1786_v15 = vadd.f32 %v6259_v47, %v1766_v22  ;;  %v1531_v48 = vadd.f32 %v1530_v21, %v1362_v43  ;;  %1937 = vmatmul.bf16.vlgmr.msrb.gmra.mxu0 %v1833_v29  ;;  %v1364_v52 = vpop.f32.mrf.mxu1  ;;  %v4964_v21 = vld [vmem:[%s6666_s3 + $0x1c8] sm:$0xff] }
 0x240   :  { %2542 = vmatpush.bf16.msrb.mxu0 %v4978_v39  ;;  %v1365_v4 = vadd.f32 %v1364_v52, %v1195_v55  ;;  %v4976_v39 = vld [vmem:[%s6666_s3 + $0x228] sm:$0xff]  ;;  %2391 = vmatpush.bf16.msra.mxu2 %v4955_v12  ;;  %v4993_v12 = vld [vmem:[%s6666_s3 + $0x2b0] sm:$0xff] }
 0x241   :  { %v1802_v27 = vmul.f32 0.01, %v1786_v15  ;;  %v1700_v30 = vadd.f32 %v1699_v54, %v1531_v48  ;;  %2622 = vmatpush.bf16.msrb.mxu1 %v4985_v24  ;;  %v4984_v54 = vld [vmem:[%s6666_s3 + $0x268] sm:$0xff]  ;;  %v4975_v48 = vld [vmem:[%s6666_s3 + $0x220] sm:$0xff] }
 0x242   :  { %2468 = vmatpush.bf16.msra.mxu3 %v4965_v5  ;;  %v4974_v5 = vld [vmem:[%s6666_s3 + $0x218] sm:$0xff] }
 0x243   :  { %v1751_v20 = vmax.f32 %v6025_v14, %v1700_v30  ;;  %v1818_v32 = vmax.f32 %v1786_v15, %v1802_v27  ;;  %v4994_v15 = vld [vmem:[%s6666_s3 + $0x2b8] sm:$0xff] }
 0x244   :  { %2543 = vmatpush.bf16.msrb.mxu0 %v4977_v3  ;;  %v4983_v3 = vld [vmem:[%s6666_s3 + $0x260] sm:$0xff] }
 0x245   :  { %v1767_v22 = vmax.f32 %v6695_v61, %v1751_v20  ;;  %v1834_v43 = vpack.c.bf16 %v1818_v32, %v1818_v32  ;;  %2623 = vmatpush.bf16.msrb.mxu1 %v4984_v54  ;;  %v6696_v20 = vmax.f32 %v5499_v17, %v5755_v26  ;;  %v4982_v61 = vld [vmem:[%s6666_s3 + $0x258] sm:$0xff] }
 0x246   :  { %v1533_v29 = vpop.f32.mrf.mxu2  ;;  %v1197_v10 = vpop.f32.mrf.mxu0  ;;  %2469 = vmatpush.bf16.msra.mxu3 %v4964_v21  ;;  %v4973_v21 = vld [vmem:[%s6666_s3 + $0x210] sm:$0xff] }
 0x247   :  { %v1702_v14 = vpop.f32.mrf.mxu3  ;;  %v1787_v25 = vadd.f32 %v6259_v47, %v1767_v22  ;;  %v1534_v18 = vadd.f32 %v1533_v29, %v1365_v4  ;;  %2076 = vmatmul.bf16.vlgmr.msrb.gmra.mxu2 %v1834_v43  ;;  %v1366_v16 = vpop.f32.mrf.mxu1  ;;  %v4992_v22 = vld [vmem:[%s6666_s3 + $0x2a8] sm:$0xff] }
 0x248   :  { %2544 = vmatpush.bf16.msrb.mxu0 %v4976_v39  ;;  %2700 = vmatpush.bf16.msrb.mxu2 %v4994_v15  ;;  %v1367_v32 = vadd.f32 %v1366_v16, %v1197_v10  ;;  %v4991_v10 = vld [vmem:[%s6666_s3 + $0x2a0] sm:$0xff] }
 0x249   :  { %v1803_v55 = vmul.f32 0.01, %v1787_v25  ;;  %v1703_v52 = vadd.f32 %v1702_v14, %v1534_v18  ;;  %2624 = vmatpush.bf16.msrb.mxu1 %v4983_v3  ;;  %v5002_v14 = vld [vmem:[%s6666_s3 + $0x2f8] sm:$0xff]  ;;  %v4981_v18 = vld [vmem:[%s6666_s3 + $0x250] sm:$0xff]  ;;  %v6697_v3 = vmax.f32 %v5525_v37, %v5783_v59 }
 0x24a   :  { %2470 = vmatpush.bf16.msra.mxu3 %v4963_v41 }
 0x24b   :  { %v1752_v27 = vmax.f32 %v6027_v23, %v1703_v52  ;;  %v1819_v30 = vmax.f32 %v1787_v25, %v1803_v55  ;;  %v5001_v55 = vld [vmem:[%s6666_s3 + $0x2f0] sm:$0xff]  ;;  %v4972_v52 = vld [vmem:[%s6666_s3 + $0x208] sm:$0xff] }
 0x24c   :  { %2545 = vmatpush.bf16.msrb.mxu0 %v4975_v48  ;;  %2701 = vmatpush.bf16.msrb.mxu2 %v4993_v12 }
 0x24d   :  { %v1768_v4 = vmax.f32 %v6696_v20, %v1752_v27  ;;  %v1835_v24 = vpack.c.bf16 %v1819_v30, %v1819_v30  ;;  %2625 = vmatpush.bf16.msrb.mxu1 %v4982_v61  ;;  %v5000_v20 = vld [vmem:[%s6666_s3 + $0x2e8] sm:$0xff]  ;;  %v5010_v61 = vld [vmem:[%s6666_s3 + $0x338] sm:$0xff] }
 0x24e   :  { %v1535_v39 = vpop.f32.mrf.mxu2  ;;  %v1200_v17 = vpop.f32.mrf.mxu0 }
 0x24f   :  { %v1704_v23 = vpop.f32.mrf.mxu3  ;;  %v1788_v43 = vadd.f32 %v6259_v47, %v1768_v4  ;;  %v1536_v29 = vadd.f32 %v1535_v39, %v1367_v32  ;;  %2155 = vmatmul.bf16.vlgmr.msrb.gmra.mxu3 %v1835_v24  ;;  %v1369_v26 = vpop.f32.mrf.mxu1  ;;  %v4971_v24 = vld [vmem:[%s6666_s3 + $0x200] sm:$0xff] }
 0x250   :  { %2546 = vmatpush.bf16.msrb.mxu0 %v4974_v5  ;;  %2702 = vmatpush.bf16.msrb.mxu2 %v4992_v22  ;;  %v1370_v48 = vadd.f32 %v1369_v26, %v1200_v17  ;;  %v4990_v5 = vld [vmem:[%s6666_s3 + $0x298] sm:$0xff]  ;;  %v4979_v22 = vld [vmem:[%s6666_s3 + $0x240] sm:$0xff] }
 0x251   :  { %v1804_v54 = vmul.f32 0.01, %v1788_v43  ;;  %v1705_v25 = vadd.f32 %v1704_v23, %v1536_v29  ;;  %2779 = vmatpush.bf16.msrb.mxu3 %v5002_v14  ;;  %2626 = vmatpush.bf16.msrb.mxu1 %v4981_v18  ;;  %v4999_v29 = vld [vmem:[%s6666_s3 + $0x2e0] sm:$0xff]  ;;  %v5009_v18 = vld [vmem:[%s6666_s3 + $0x330] sm:$0xff] }
 0x253   :  { %v1820_v16 = vmax.f32 %v1788_v43, %v1804_v54  ;;  %v1753_v15 = vmax.f32 %v6053_v11, %v1705_v25  ;;  %v4980_v11 = vld [vmem:[%s6666_s3 + $0x248] sm:$0xff]  ;;  %v4989_v43 = vld [vmem:[%s6666_s3 + $0x290] sm:$0xff] }
 0x254   :  { %2547 = vmatpush.bf16.msrb.mxu0 %v4973_v21  ;;  %2703 = vmatpush.bf16.msrb.mxu2 %v4991_v10  ;;  %v6698_v21 = vmax.f32 %v5527_v44, %v5787_v6  ;;  %v4998_v44 = vld [vmem:[%s6666_s3 + $0x2d8] sm:$0xff] }
 0x255   :  { %v1836_v41 = vpack.c.bf16 %v1820_v16, %v1820_v16  ;;  %v1769_v27 = vmax.f32 %v6697_v3, %v1753_v15  ;;  %2780 = vmatpush.bf16.msrb.mxu3 %v5001_v55  ;;  %2627 = vmatpush.bf16.msrb.mxu1 %v4980_v11 }
 0x256   :  { %v1538_v30 = vpop.f32.mrf.mxu2  ;;  %v1202_v4 = vpop.f32.mrf.mxu0 }
 0x257   :  { %v1707_v12 = vpop.f32.mrf.mxu3  ;;  %v1789_v37 = vadd.f32 %v6259_v47, %v1769_v27  ;;  %v1539_v59 = vadd.f32 %v1538_v30, %v1370_v48  ;;  %2234 = vmatmul.bf16.vlgmr.msra.gmra.mxu0 %v1836_v41  ;;  %v1371_v32 = vpop.f32.mrf.mxu1  ;;  %v5008_v27 = vld [vmem:[%s6666_s3 + $0x328] sm:$0xff]  ;;  %v4987_v30 = vld [vmem:[%s6666_s3 + $0x280] sm:$0xff] }
 0x258   :  { %2548 = vmatpush.bf16.msrb.mxu0 %v4972_v52  ;;  %2704 = vmatpush.bf16.msrb.mxu2 %v4990_v5  ;;  %v1372_v25 = vadd.f32 %v1371_v32, %v1202_v4  ;;  %v5018_v52 = vld [vmem:[%s6666_s3 + $0x378] sm:$0xff]  ;;  %v6699_v4 = vmax.f32 %v5556_v2, %v5818_v46 }
 0x259   :  { %v1805_v39 = vmul.f32 0.01, %v1789_v37  ;;  %v1708_v23 = vadd.f32 %v1707_v12, %v1539_v59  ;;  %2781 = vmatpush.bf16.msrb.mxu3 %v5000_v20  ;;  %2628 = vmatpush.bf16.msrb.mxu1 %v4979_v22  ;;  %v4997_v12 = vld [vmem:[%s6666_s3 + $0x2d0] sm:$0xff] }
 0x25b   :  { %v1821_v17 = vmax.f32 %v1789_v37, %v1805_v39  ;;  %v1754_v26 = vmax.f32 %v6055_v60, %v1708_v23  ;;  %v4988_v60 = vld [vmem:[%s6666_s3 + $0x288] sm:$0xff]  ;;  %v5017_v37 = vld [vmem:[%s6666_s3 + $0x370] sm:$0xff] }
 0x25c   :  { %2549 = vmatpush.bf16.msrb.mxu0 %v4971_v24  ;;  %2705 = vmatpush.bf16.msrb.mxu2 %v4989_v43  ;;  %v5007_v24 = vld [vmem:[%s6666_s3 + $0x320] sm:$0xff] }
 0x25d   :  { %v1837_v14 = vpack.c.bf16 %v1821_v17, %v1821_v17  ;;  %v1770_v54 = vmax.f32 %v6698_v21, %v1754_v26  ;;  %2782 = vmatpush.bf16.msrb.mxu3 %v4999_v29  ;;  %v5026_v29 = vld [vmem:[%s6666_s3 + $0x3b8] sm:$0xff]  ;;  %v1337_v21 = vadd.f32 %v6097_v62, %v6095_v51  ;;  %v6700_v62 = vmax.f32 %v5567_v13, %v5831_v63  ;;  %v5024_v13 = vld [vmem:[%s6666_s3 + $0x3a8] sm:$0xff] }
 0x25e   :  { %v1540_v10 = vpop.f32.mrf.mxu2  ;;  %v1205_v48 = vpop.f32.mrf.mxu0 }
 0x25f   :  { %v1709_v16 = vpop.f32.mrf.mxu3  ;;  %v1790_v6 = vadd.f32 %v6259_v47, %v1770_v54  ;;  %v1541_v15 = vadd.f32 %v1540_v10, %v1372_v25  ;;  %2313 = vmatmul.bf16.vlgmr.msra.gmra.mxu1 %v1837_v14  ;;  %v1374_v55 = vpop.f32.mrf.mxu1  ;;  %v5006_v14 = vld [vmem:[%s6666_s3 + $0x318] sm:$0xff]  ;;  %v4995_v54 = vld [vmem:[%s6666_s3 + $0x2c0] sm:$0xff] }
 0x260   :  { %2858 = vmatpush.bf16.msra.mxu0 %v5010_v61  ;;  %2706 = vmatpush.bf16.msrb.mxu2 %v4988_v60  ;;  %v1375_v20 = vadd.f32 %v1374_v55, %v1205_v48  ;;  %v5016_v61 = vld [vmem:[%s6666_s3 + $0x368] sm:$0xff]  ;;  %v5015_v25 = vld [vmem:[%s6666_s3 + $0x360] sm:$0xff]  ;;  %v1506_v60 = vadd.f32 %v6125_v33, %v1337_v21  ;;  %v5014_v33 = vld [vmem:[%s6666_s3 + $0x358] sm:$0xff] }
 0x261   :  { %v1806_v41 = vmul.f32 0.01, %v1790_v6  ;;  %v1710_v3 = vadd.f32 %v1709_v16, %v1541_v15  ;;  %2783 = vmatpush.bf16.msrb.mxu3 %v4998_v44  ;;  %2937 = vmatpush.bf16.msra.mxu1 %v5018_v52  ;;  %v5025_v16 = vld [vmem:[%s6666_s3 + $0x3b0] sm:$0xff] }
 0x262   :  { %v5005_v15 = vld [vmem:[%s6666_s3 + $0x310] sm:$0xff] }
 0x263   :  { %v1822_v11 = vmax.f32 %v1790_v6, %v1806_v41  ;;  %v1755_v5 = vmax.f32 %v6084_v36, %v1710_v3  ;;  %v4996_v36 = vld [vmem:[%s6666_s3 + $0x2c8] sm:$0xff]  ;;  %v5034_v3 = vld [vmem:[%s6666_s3 + $0x3f8] sm:$0xff]  ;;  %v5021_v21 = vld [vmem:[%s6666_s3 + $0x390] sm:$0xff] }
 0x264   :  { %2859 = vmatpush.bf16.msra.mxu0 %v5009_v18  ;;  %2707 = vmatpush.bf16.msrb.mxu2 %v4987_v30 }
 0x265   :  { %v1838_v59 = vpack.c.bf16 %v1822_v11, %v1822_v11  ;;  %v1771_v32 = vmax.f32 %v6699_v4, %v1755_v5  ;;  %2784 = vmatpush.bf16.msrb.mxu3 %v4997_v12  ;;  %2938 = vmatpush.bf16.msra.mxu1 %v5017_v37  ;;  %v5004_v11 = vld [vmem:[%s6666_s3 + $0x308] sm:$0xff]  ;;  %v5013_v5 = vld [vmem:[%s6666_s3 + $0x350] sm:$0xff] }
 0x266   :  { %v1543_v39 = vpop.f32.mrf.mxu2  ;;  %v1207_v22 = vpop.f32.mrf.mxu0  ;;  %v5033_v4 = vld [vmem:[%s6666_s3 + $0x3f0] sm:$0xff] }
 0x267   :  { %v1712_v23 = vpop.f32.mrf.mxu3  ;;  %v1791_v2 = vadd.f32 %v6259_v47, %v1771_v32  ;;  %v1544_v46 = vadd.f32 %v1543_v39, %v1375_v20  ;;  %2392 = vmatmul.bf16.vlgmr.msra.gmra.mxu2 %v1838_v59  ;;  %v1376_v43 = vpop.f32.mrf.mxu1  ;;  %v5023_v20 = vld [vmem:[%s6666_s3 + $0x3a0] sm:$0xff] }
 0x268   :  { %2860 = vmatpush.bf16.msra.mxu0 %v5008_v27  ;;  %3016 = vmatpush.bf16.msra.mxu2 %v5026_v29  ;;  %v1377_v6 = vadd.f32 %v1376_v43, %v1207_v22  ;;  %v1675_v27 = vadd.f32 %v6127_v45, %v1506_v60 }
 0x269   :  { %v1807_v17 = vmul.f32 0.01, %v1791_v2  ;;  %v1713_v26 = vadd.f32 %v1712_v23, %v1544_v46  ;;  %2785 = vmatpush.bf16.msrb.mxu3 %v4996_v36  ;;  %2939 = vmatpush.bf16.msra.mxu1 %v5016_v61  ;;  %v5003_v23 = vld [vmem:[%s6666_s3 + $0x300] sm:$0xff]  ;;  %v5022_v46 = vld [vmem:[%s6666_s3 + $0x398] sm:$0xff] }
 0x26b   :  { %v1823_v18 = vmax.f32 %v1791_v2, %v1807_v17  ;;  %v1756_v10 = vmax.f32 %v6099_v56, %v1713_v26  ;;  %v5012_v2 = vld [vmem:[%s6666_s3 + $0x348] sm:$0xff] }
 0x26c   :  { %2861 = vmatpush.bf16.msra.mxu0 %v5007_v24  ;;  %3017 = vmatpush.bf16.msra.mxu2 %v5025_v16  ;;  %v6701_v24 = vmax.f32 %v5593_v34, %v5859_v38  ;;  %v5032_v34 = vld [vmem:[%s6666_s3 + $0x3e8] sm:$0xff] }
 0x26d   :  { %v1839_v51 = vpack.c.bf16 %v1823_v18, %v1823_v18  ;;  %v1772_v44 = vmax.f32 %v6700_v62, %v1756_v10  ;;  %2786 = vmatpush.bf16.msrb.mxu3 %v4995_v54  ;;  %2940 = vmatpush.bf16.msra.mxu1 %v5015_v25  ;;  %v5031_v54 = vld [vmem:[%s6666_s3 + $0x3e0] sm:$0xff]  ;;  %v1342_v25 = vadd.f32 %v6131_v9, %v6129_v19  ;;  %v5020_v19 = vld [vmem:[%s6666_s3 + $0x388] sm:$0xff] }
 0x26e   :  { %v1545_v48 = vpop.f32.mrf.mxu2  ;;  %v1210_v52 = vpop.f32.mrf.mxu0 }
 0x26f   :  { %v1714_v56 = vpop.f32.mrf.mxu3  ;;  %v1792_v63 = vadd.f32 %v6259_v47, %v1772_v44  ;;  %v1546_v55 = vadd.f32 %v1545_v48, %v1377_v6  ;;  %2471 = vmatmul.bf16.vlgmr.msra.gmra.mxu3 %v1839_v51  ;;  %v1379_v41 = vpop.f32.mrf.mxu1  ;;  %v1511_v16 = vadd.f32 %v6159_v49, %v1342_v25  ;;  %v6702_v51 = vmax.f32 %v5595_v42, %v5863_v57  ;;  %v6708_v25 = vld [vmem:[#allocation6_spill] sm:$0xff] }
 0x270   :  { %2862 = vmatpush.bf16.msra.mxu0 %v5006_v14  ;;  %3018 = vmatpush.bf16.msra.mxu2 %v5024_v13  ;;  %v1380_v59 = vadd.f32 %v1379_v41, %v1210_v52  ;;  %v5011_v14 = vld [vmem:[%s6666_s3 + $0x340] sm:$0xff] }
 0x271   :  { %v1808_v30 = vmul.f32 0.01, %v1792_v63  ;;  %v1715_v12 = vadd.f32 %v1714_v56, %v1546_v55  ;;  %2941 = vmatpush.bf16.msra.mxu1 %v5014_v33  ;;  %3095 = vmatpush.bf16.msra.mxu3 %v5034_v3  ;;  %v1680_v48 = vadd.f32 %v6161_v53, %v1511_v16  ;;  %v5019_v13 = vld [vmem:[%s6666_s3 + $0x380] sm:$0xff] }
 0x273   :  { %v1824_v37 = vmax.f32 %v1792_v63, %v1808_v30  ;;  %v1757_v45 = vmax.f32 %v1675_v27, %v1715_v12  ;;  %v5029_v63 = vld [vmem:[%s6666_s3 + $0x3d0] sm:$0xff]  ;;  %v6703_v27 = vmax.f32 %v5621_v0, %v5891_v35  ;;  %v5027_v0 = vld [vmem:[%s6666_s3 + $0x3c0] sm:$0xff]  ;;  %v1347_v35 = vadd.f32 %v6165_v31, %v6163_v50  ;;  %v6706_v50 = vld [vmem:[#allocation9_spill] sm:$0xff] }
 0x274   :  { %2863 = vmatpush.bf16.msra.mxu0 %v5005_v15  ;;  %3019 = vmatpush.bf16.msra.mxu2 %v5023_v20 }
 0x275   :  { %v1840_v32 = vpack.c.bf16 %v1824_v37, %v1824_v37  ;;  %v1773_v39 = vmax.f32 %v6701_v24, %v1757_v45  ;;  %2942 = vmatpush.bf16.msra.mxu1 %v5013_v5  ;;  %3096 = vmatpush.bf16.msra.mxu3 %v5033_v4 }
 0x276   :  { %v1548_v36 = vpop.f32.mrf.mxu2  ;;  %v1212_v43 = vpop.f32.mrf.mxu0 }
 0x277   :  { %v1717_v61 = vpop.f32.mrf.mxu3  ;;  %v1793_v38 = vadd.f32 %v6259_v47, %v1773_v39  ;;  %v1549_v22 = vadd.f32 %v1548_v36, %v1380_v59  ;;  %2550 = vmatmul.bf16.vlgmr.msrb.gmra.mxu0 %v1840_v32  ;;  %v1381_v29 = vpop.f32.mrf.mxu1  ;;  %v1516_v39 = vadd.f32 %v6193_v28, %v1347_v35  ;;  %v6704_v36 = vld [vmem:[#allocation5_spill] sm:$0xff] }
 0x278   :  { %2864 = vmatpush.bf16.msra.mxu0 %v5004_v11  ;;  %3020 = vmatpush.bf16.msra.mxu2 %v5022_v46  ;;  %v1382_v44 = vadd.f32 %v1381_v29, %v1212_v43  ;;  %v5028_v11 = vld [vmem:[%s6666_s3 + $0x3c8] sm:$0xff] }
 0x279   :  { %v1809_v17 = vmul.f32 0.01, %v1793_v38  ;;  %v1718_v26 = vadd.f32 %v1717_v61, %v1549_v22  ;;  %2943 = vmatpush.bf16.msra.mxu1 %v5012_v2  ;;  %3097 = vmatpush.bf16.msra.mxu3 %v5032_v34  ;;  %v6705_v61 = vmax.f32 %v5623_v8, %v6704_v36  ;;  %v6707_v8 = vld [vmem:[#allocation2_spill] sm:$0xff] }
 0x27b   :  { %v1825_v18 = vmax.f32 %v1793_v38, %v1809_v17  ;;  %v1758_v10 = vmax.f32 %v6133_v1, %v1718_v26  ;;  %v5030_v1 = vld [vmem:[%s6666_s3 + $0x3d8] sm:$0xff]  ;;  %v1685_v17 = vadd.f32 %v6706_v50, %v1516_v39 }
 0x27c   :  { %2865 = vmatpush.bf16.msra.mxu0 %v5003_v23  ;;  %3021 = vmatpush.bf16.msra.mxu2 %v5021_v21 }
 0x27d   :  { %v1841_v60 = vpack.c.bf16 %v1825_v18, %v1825_v18  ;;  %v1774_v62 = vmax.f32 %v6702_v51, %v1758_v10  ;;  %2944 = vmatpush.bf16.msra.mxu1 %v5011_v14  ;;  %3098 = vmatpush.bf16.msra.mxu3 %v5031_v54  ;;  %v6709_v18 = vmax.f32 %v6707_v8, %v6708_v25 }
 0x27e   :  { %v1550_v6 = vpop.f32.mrf.mxu2  ;;  %v1215_v42 = vpop.f32.mrf.mxu0 }
 0x27f   :  { %v1719_v15 = vpop.f32.mrf.mxu3  ;;  %v1794_v9 = vadd.f32 %v6259_v47, %v1774_v62  ;;  %v1551_v49 = vadd.f32 %v1550_v6, %v1382_v44  ;;  %2629 = vmatmul.bf16.vlgmr.msrb.gmra.mxu1 %v1841_v60  ;;  %v1384_v57 = vpop.f32.mrf.mxu1 }
 0x280   :  { %3022 = vmatpush.bf16.msra.mxu2 %v5020_v19  ;;  %v1385_v41 = vadd.f32 %v1384_v57, %v1215_v42  ;;  %v6711_v57 = vld [vmem:[#allocation11_spill] sm:$0xff] }
 0x281   :  { %v1810_v56 = vmul.f32 0.01, %v1794_v9  ;;  %v1720_v33 = vadd.f32 %v1719_v15, %v1551_v49  ;;  %3099 = vmatpush.bf16.msra.mxu3 %v5030_v1  ;;  %v1352_v1 = vadd.f32 %v6208_v7, %v6206_v40  ;;  %v6710_v49 = vld [vmem:[#allocation10_spill] sm:$0xff] }
 0x283   :  { %v1826_v55 = vmax.f32 %v1794_v9, %v1810_v56  ;;  %v1759_v52 = vmax.f32 %v1680_v48, %v1720_v33  ;;  %v1521_v48 = vadd.f32 %v6711_v57, %v1352_v1  ;;  %v6712_v33 = vld [vmem:[#allocation3_spill] sm:$0xff] }
 0x284   :  { %3023 = vmatpush.bf16.msra.mxu2 %v5019_v13  ;;  %v6713_v13 = vld [vmem:[#allocation7_spill] sm:$0xff] }
 0x285   :  { %v1842_v3 = vpack.c.bf16 %v1826_v55, %v1826_v55  ;;  %v1775_v53 = vmax.f32 %v6703_v27, %v1759_v52  ;;  %3100 = vmatpush.bf16.msra.mxu3 %v5029_v63  ;;  %v6714_v63 = vmax.f32 %v6712_v33, %v6713_v13  ;;  %v5050_v13 = vld [vmem:[%s6671_s7 + $0x38] sm:$0xff] }
 0x286   :  { %v1553_v30 = vpop.f32.mrf.mxu2  ;;  %v1217_v37 = vpop.f32.mrf.mxu0  ;;  %3269 = vmatpush.bf16.msrb.mxu1 %v5050_v13 }
 0x287   :  { %v1722_v12 = vpop.f32.mrf.mxu3  ;;  %v1795_v5 = vadd.f32 %v6259_v47, %v1775_v53  ;;  %v1554_v20 = vadd.f32 %v1553_v30, %v1385_v41  ;;  %2708 = vmatmul.bf16.vlgmr.msrb.gmra.mxu2 %v1842_v3  ;;  %v1386_v45 = vpop.f32.mrf.mxu1  ;;  %v6715_v30 = vld [vmem:[#allocation12_spill] sm:$0xff] }
 0x288   :  { %v1387_v46 = vadd.f32 %v1386_v45, %v1217_v37  ;;  %v6716_v37 = vld [vmem:[#allocation4_spill] sm:$0xff] }
 0x289   :  { %v1811_v59 = vmul.f32 0.01, %v1795_v5  ;;  %v1723_v4 = vadd.f32 %v1722_v12, %v1554_v20  ;;  %3101 = vmatpush.bf16.msra.mxu3 %v5028_v11  ;;  %v1690_v12 = vadd.f32 %v6715_v30, %v1521_v48  ;;  %v6717_v45 = vld [vmem:[#allocation8_spill] sm:$0xff]  ;;  %v5047_v30 = vld [vmem:[%s6671_s7 + $0x20] sm:$0xff] }
 0x28b   :  { %v1827_v32 = vmax.f32 %v1795_v5, %v1811_v59  ;;  %v1760_v24 = vmax.f32 %v6167_v58, %v1723_v4  ;;  %v6718_v59 = vmax.f32 %v6716_v37, %v6717_v45  ;;  %v5052_v45 = vld [vmem:[%s6668_s4] ss:$0 sm:$0xff] }
 0x28d   :  { %v1843_v23 = vpack.c.bf16 %v1827_v32, %v1827_v32  ;;  %v1776_v2 = vmax.f32 %v6705_v61, %v1760_v24  ;;  %3102 = vmatpush.bf16.msra.mxu3 %v5027_v0 }
 0x28e   :  { %v1555_v34 = vpop.f32.mrf.mxu2  ;;  %v1220_v29 = vpop.f32.mrf.mxu0 }
 0x28f   :  { %v1724_v38 = vpop.f32.mrf.mxu3  ;;  %v1796_v22 = vadd.f32 %v6259_v47, %v1776_v2  ;;  %v1556_v43 = vadd.f32 %v1555_v34, %v1387_v46  ;;  %2787 = vmatmul.bf16.vlgmr.msrb.gmra.mxu3 %v1843_v23  ;;  %v1389_v31 = vpop.f32.mrf.mxu1 }
 0x290   :  { %v1390_v21 = vadd.f32 %v1389_v31, %v1220_v29 }
 0x291   :  { %v1812_v58 = vmul.f32 0.01, %v1796_v22  ;;  %v1725_v26 = vadd.f32 %v1724_v38, %v1556_v43 }
 0x293   :  { %v1828_v28 = vmax.f32 %v1796_v22, %v1812_v58  ;;  %v1761_v14 = vmax.f32 %v1685_v17, %v1725_v26 }
 0x295   :  { %v1844_v54 = vpack.c.bf16 %v1828_v28, %v1828_v28  ;;  %v1777_v10 = vmax.f32 %v6709_v18, %v1761_v14 }
 0x296   :  { %v1558_v16 = vpop.f32.mrf.mxu2  ;;  %v1222_v15 = vpop.f32.mrf.mxu0 }
 0x297   :  { %v1727_v60 = vpop.f32.mrf.mxu3  ;;  %v1797_v51 = vadd.f32 %v6259_v47, %v1777_v10  ;;  %v1559_v62 = vadd.f32 %v1558_v16, %v1390_v21  ;;  %2866 = vmatmul.bf16.vlgmr.msra.gmra.mxu0 %v1844_v54  ;;  %v1391_v19 = vpop.f32.mrf.mxu1  ;;  %v5042_v10 = vld [vmem:[%s6670_s5 + $0x38] sm:$0xff]  ;;  %v5041_v16 = vld [vmem:[%s6670_s5 + $0x30] sm:$0xff] }
 0x298   :  { %v1392_v52 = vadd.f32 %v1391_v19, %v1222_v15  ;;  %3185 = vmatpush.bf16.msrb.mxu0 %v5042_v10  ;;  %v5037_v15 = vld [vmem:[%s6670_s5 + $0x10] sm:$0xff] }
 0x299   :  { %v1813_v44 = vmul.f32 0.01, %v1797_v51  ;;  %v1728_v6 = vadd.f32 %v1727_v60, %v1559_v62  ;;  %v5039_v62 = vld [vmem:[%s6670_s5 + $0x20] sm:$0xff] }
 0x29b   :  { %v1829_v9 = vmax.f32 %v1797_v51, %v1813_v44  ;;  %v1762_v42 = vmax.f32 %v6710_v49, %v1728_v6  ;;  %v5040_v51 = vld [vmem:[%s6670_s5 + $0x28] sm:$0xff]  ;;  %v5038_v6 = vld [vmem:[%s6670_s5 + $0x18] sm:$0xff] }
 0x29c   :  { %3186 = vmatpush.bf16.msrb.mxu0 %v5041_v16  ;;  %v5036_v49 = vld [vmem:[%s6670_s5 + $0x8] sm:$0xff] }
 0x29d   :  { %v1845_v56 = vpack.c.bf16 %v1829_v9, %v1829_v9  ;;  %v1778_v55 = vmax.f32 %v6714_v63, %v1762_v42  ;;  %v5035_v42 = vld [vmem:[%s6670_s5] sm:$0xff] }
 0x29e   :  { %v1560_v41 = vpop.f32.mrf.mxu2 }
 0x29f   :  { %v1798_v3 = vadd.f32 %v6259_v47, %v1778_v55  ;;  %v1561_v27 = vadd.f32 %v1560_v41, %v1392_v52  ;;  %2945 = vmatmul.bf16.vlgmr.msra.gmra.mxu1 %v1845_v56  ;;  %v1729_v53 = vpop.f32.mrf.mxu3  ;;  %v5049_v55 = vld [vmem:[%s6671_s7 + $0x30] sm:$0xff]  ;;  %v5048_v41 = vld [vmem:[%s6671_s7 + $0x28] sm:$0xff] }
 0x2a0   :  { %3187 = vmatpush.bf16.msrb.mxu0 %v5040_v51  ;;  %3270 = vmatpush.bf16.msrb.mxu1 %v5049_v55 }
 0x2a1   :  { %v1814_v40 = vmul.f32 0.01, %v1798_v3  ;;  %v1730_v7 = vadd.f32 %v1729_v53, %v1561_v27 }
 0x2a3   :  { %v1830_v11 = vmax.f32 %v1798_v3, %v1814_v40  ;;  %v1763_v5 = vmax.f32 %v1690_v12, %v1730_v7  ;;  %v5046_v7 = vld [vmem:[%s6671_s7 + $0x18] sm:$0xff] }
 0x2a4   :  { %3188 = vmatpush.bf16.msrb.mxu0 %v5039_v62  ;;  %3271 = vmatpush.bf16.msrb.mxu1 %v5048_v41 }
 0x2a5   :  { %v1846_v20 = vpack.c.bf16 %v1830_v11, %v1830_v11  ;;  %v1779_v4 = vmax.f32 %v6718_v59, %v1763_v5 }
 0x2a7   :  { %v1799_v0 = vadd.f32 %v6259_v47, %v1779_v4  ;;  %3024 = vmatmul.bf16.vlgmr.msra.gmra.mxu2 %v1846_v20  ;;  %v5045_v20 = vld [vmem:[%s6671_s7 + $0x10] sm:$0xff] }
 0x2a8   :  { %3189 = vmatpush.bf16.msrb.mxu0 %v5038_v6  ;;  %3272 = vmatpush.bf16.msrb.mxu1 %v5047_v30 }
 0x2a9   :  { %v1815_v35 = vmul.f32 0.01, %v1799_v0 }
 0x2ab   :  { %v1831_v32 = vmax.f32 %v1799_v0, %v1815_v35 }
 0x2ac   :  { %3190 = vmatpush.bf16.msrb.mxu0 %v5037_v15  ;;  %3273 = vmatpush.bf16.msrb.mxu1 %v5046_v7 }
 0x2ad   :  { %v1847_v24 = vpack.c.bf16 %v1831_v32, %v1831_v32 }
 0x2af   :  { %3103 = vmatmul.bf16.vlgmr.msra.gmra.mxu3 %v1847_v24 }
 0x2b0   :  { %3191 = vmatpush.bf16.msrb.mxu0 %v5036_v49  ;;  %3274 = vmatpush.bf16.msrb.mxu1 %v5045_v20 }
 0x2b4   :  { %v1999_v39 = vpop.f32.mrf.mxu1  ;;  %3192 = vmatpush.bf16.msrb.mxu0 %v5035_v42 }
 0x2bc   :  { %v1938_v23 = vpop.f32.mrf.mxu0  ;;  %v2001_v36 = vpop.f32.mrf.mxu1 }
 0x2bd   :  { %v2000_v61 = vadd.f32 %v1999_v39, %v1938_v23  ;;  %v5044_v36 = vld [vmem:[%s6671_s7 + $0x8] sm:$0xff] }
 0x2be   :  { %3275 = vmatpush.bf16.msrb.mxu1 %v5044_v36 }
 0x2c4   :  { %v1940_v2 = vpop.f32.mrf.mxu0 }
 0x2c5   :  { %v5053_v2 = vld [vmem:[%s6669_s6] ss:$0 sm:$0xff] }
 0x2ca   :  { %v2077_v46 = vpop.f32.mrf.mxu2 }
 0x2cb   :  { %v2081_v34 = vadd.f32 %v2077_v46, %v2000_v61  ;;  %v5043_v61 = vld [vmem:[%s6671_s7] sm:$0xff] }
 0x2cc   :  { %3276 = vmatpush.bf16.msrb.mxu1 %v5043_v61 }
 0x2d2   :  { %v2079_v38 = vpop.f32.mrf.mxu2  ;;  %v2156_v22 = vpop.f32.mrf.mxu3 }
 0x2d3   :  { %v2160_v43 = vadd.f32 %v2156_v22, %v2081_v34 }
 0x2d4   :  { %v2235_v29 = vpop.f32.mrf.mxu0 }
 0x2d5   :  { %v2239_v31 = vadd.f32 %v2235_v29, %v2160_v43 }
 0x2da   :  { %v2158_v50 = vpop.f32.mrf.mxu3 }
 0x2dc   :  { %v2237_v17 = vpop.f32.mrf.mxu0  ;;  %v2314_v47 = vpop.f32.mrf.mxu1 }
 0x2dd   :  { %v2318_v58 = vadd.f32 %v2314_v47, %v2239_v31  ;;  %v5054_v31 = vld [vmem:[%s6672_s8] ss:$0 sm:$0xff] }
 0x2e4   :  { %v2316_v26 = vpop.f32.mrf.mxu1 }
 0x2ea   :  { %v2393_v28 = vpop.f32.mrf.mxu2 }
 0x2eb   :  { %v2397_v33 = vadd.f32 %v2393_v28, %v2318_v58 }
 0x2f2   :  { %v2395_v14 = vpop.f32.mrf.mxu2  ;;  %v2472_v21 = vpop.f32.mrf.mxu3 }
 0x2f3   :  { %v2476_v63 = vadd.f32 %v2472_v21, %v2397_v33 }
 0x2f4   :  { %v2551_v54 = vpop.f32.mrf.mxu0 }
 0x2f5   :  { %v2555_v52 = vadd.f32 %v2551_v54, %v2476_v63 }
 0x2fa   :  { %v2474_v8 = vpop.f32.mrf.mxu3 }
 0x2fc   :  { %v2553_v25 = vpop.f32.mrf.mxu0  ;;  %v2630_v18 = vpop.f32.mrf.mxu1 }
 0x2fd   :  { %v2634_v27 = vadd.f32 %v2630_v18, %v2555_v52 }
 0x304   :  { %v2632_v60 = vpop.f32.mrf.mxu1 }
 0x30a   :  { %v2709_v44 = vpop.f32.mrf.mxu2 }
 0x30b   :  { %v2713_v53 = vadd.f32 %v2709_v44, %v2634_v27 }
 0x312   :  { %v2711_v19 = vpop.f32.mrf.mxu2  ;;  %v2788_v1 = vpop.f32.mrf.mxu3 }
 0x313   :  { %v2792_v12 = vadd.f32 %v2788_v1, %v2713_v53 }
 0x314   :  { %v2867_v9 = vpop.f32.mrf.mxu0 }
 0x315   :  { %v2871_v11 = vadd.f32 %v2867_v9, %v2792_v12 }
 0x31a   :  { %v2790_v57 = vpop.f32.mrf.mxu3 }
 0x31c   :  { %v2869_v48 = vpop.f32.mrf.mxu0  ;;  %v2946_v56 = vpop.f32.mrf.mxu1 }
 0x31d   :  { %v2950_v5 = vadd.f32 %v2946_v56, %v2871_v11 }
 0x324   :  { %v2948_v3 = vpop.f32.mrf.mxu1 }
 0x32a   :  { %v3025_v40 = vpop.f32.mrf.mxu2 }
 0x32b   :  { %v3029_v37 = vadd.f32 %v3025_v40, %v2950_v5 }
 0x332   :  { %v3027_v59 = vpop.f32.mrf.mxu2  ;;  %v3104_v4 = vpop.f32.mrf.mxu3 }
 0x333   :  { %v3108_v0 = vadd.f32 %v3104_v4, %v3029_v37 }
 0x335   :  { %v3113_v35 = vadd.f32 %v5052_v45, %v3108_v0 }
 0x337   :  { %v3114_v32 = vmul.f32 0.01, %v3113_v35 }
 0x339   :  { %v3115_v24 = vmax.f32 %v3113_v35, %v3114_v32 }
 0x33a   :  { %v3106_v39 = vpop.f32.mrf.mxu3 }
 0x33b   :  { %v3116_v23 = vpack.c.bf16 %v3115_v24, %v3115_v24 }
 0x33d   :  { %3193 = vmatmul.bf16.vlgmr.msrb.gmra.mxu0 %v3116_v23 }
 0x3ba   :  { %v3194_v46 = vpop.f32.mrf.mxu0 }
 0x3bb   :  { %v3195_v34 = vadd.f32 %v5053_v2, %v3194_v46 }
 0x3bd   :  { %v3198_v38 = vmul.f32 0.01, %v3195_v34 }
 0x3bf   :  { %v3199_v22 = vmax.f32 %v3195_v34, %v3198_v38 }
 0x3c1   :  { %v3200_v43 = vpack.c.bf16 %v3199_v22, %v3199_v22 }
 0x3c2   :  { %v3196_v29 = vpop.f32.mrf.mxu0 }
 0x3c3   :  { %3277 = vmatmul.bf16.vlgmr.msrb.gmra.mxu1 %v3200_v43 }
 0x440   :  { %v3278_v50 = vpop.f32.mrf.mxu1 }
 0x441   :  { %v3279_v17 = vadd.f32 %v5054_v31, %v3278_v50 }
 0x443   :  { %v3282_v47 = vmul.f32 0.5, %v3279_v17 }
 0x445   :  { %5055 = vtanh.f32 %v3282_v47 }
 0x448   :  { %v3280_v58 = vpop.f32.mrf.mxu1 }
 0x44b   :  { %v5056_v26 = vpop.eup %5055 }
 0x44c   :  { %v3284_v28 = vmul.f32 0.5, %v5056_v26 }
 0x44e   :  { %v3285_v14 = vadd.f32 0.5, %v3284_v28 }
 0x450   :  { %3286 = vst [vmem:[%s6673_s9] sm:$0xff] %v3285_v14 }

</bundles_post_ra>
